<compile_context>
chip_gen: v7x
topology: tpu7x:2x2x1
jax: 0.10.0
libtpu: 0.0.40
codegen_flags: <defaults>
</compile_context>

<pallas_src>
import jax
import jax.numpy as jnp
from jax.experimental import pallas as pl
from jax.experimental.pallas import tpu as pltpu

# ----------------------------- model sizes (small, module-consistent) --------
VOCAB = 50          # synthetic vocab (pretrained table in original code)
EMBED = 128         # embedding dim
HIDDEN = 128        # hidden_size
NUM_LAYERS = 2
NUM_CLASSES = 2
BATCH = 4
SEQ = 8
FC_PAD = 128        # pad num_classes -> 128 lanes so the final store is lane-dense

_GATE_PERM = (0, 1, 3, 2)   # PyTorch [i, f, g, o] -> kernel [i, f, o, g]


# ----------------------------- fused whole-model kernel ----------------------
def _model_kernel(x_ref,                                   # (T*B, E) time-major slab
                  wih0_ref, b0_ref, whhf0_ref, whhb0_ref,  # layer 0
                  wih1_ref, b1_ref, whhf1_ref, whhb1_ref,  # layer 1
                  wfc_ref, bfc_ref,                        # FC (padded to 128 lanes)
                  out_ref,                                 # (B, FC_PAD)
                  gih_ref,                                 # (T*B, 8H) hoisted ih gates
                  seq0_ref, seq1_ref,                      # (T*B, 2H) per-layer outputs
                  hf_ref, cf_ref, hb_ref, cb_ref):         # (B, H) recurrent state
    B = hf_ref.shape[0]
    TB = x_ref.shape[0]
    T = TB // B
    H = HIDDEN
    H3 = 3 * H
    H4 = 4 * H

    def cell(gih, whh_ref, h_ref, c_ref):
        """One LSTM step: gih (precomputed x@W_ih^T + b) + h@W_hh^T, gates [i,f,o|g]."""
        g = gih + jnp.dot(h_ref[...], whh_ref[...],
                          preferred_element_type=jnp.float32)        # (B, 4H)
        sig = jax.nn.sigmoid(g[:, :H3])                               # i | f | o
        g_g = jnp.tanh(g[:, H3:])
        c_new = sig[:, H:2 * H] * c_ref[...] + sig[:, :H] * g_g
        h_new = sig[:, 2 * H:H3] * jnp.tanh(c_new)
        c_ref[...] = c_new
        h_ref[...] = h_new
        return h_new

    def run_layer(in_ref, wih_ref, b_ref, whhf_ref, whhb_ref, seq_ref):
        # Hoisted input-to-hidden matmul for BOTH directions: (T*B, D_in) @ (D_in, 8H)
        gih_ref[...] = (jnp.dot(in_ref[...], wih_ref[...],
                                preferred_element_type=jnp.float32)
                        + b_ref[...])

        hf_ref[...] = jnp.zeros_like(hf_ref)
        cf_ref[...] = jnp.zeros_like(cf_ref)
        hb_ref[...] = jnp.zeros_like(hb_ref)
        cb_ref[...] = jnp.zeros_like(cb_ref)

        def body(s, carry):
            row_f = pl.multiple_of(s * B, B)                # forward time s
            row_b = pl.multiple_of((T - 1 - s) * B, B)      # backward time T-1-s
            h_f = cell(gih_ref[pl.ds(row_f, B), :H4], whhf_ref, hf_ref, cf_ref)
            seq_ref[pl.ds(row_f, B), :H] = h_f
            h_b = cell(gih_ref[pl.ds(row_b, B), H4:], whhb_ref, hb_ref, cb_ref)
            seq_ref[pl.ds(row_b, B), H:] = h_b
            return carry

        jax.lax.fori_loop(0, T, body, 0, unroll=True)

    # layer 0: input is the embedded sequence slab
    run_layer(x_ref, wih0_ref, b0_ref, whhf0_ref, whhb0_ref, seq0_ref)
    # layer 1: input at time t is [h_fwd_l0(t), h_bwd_l0(t)] — already contiguous
    run_layer(seq0_ref, wih1_ref, b1_ref, whhf1_ref, whhb1_ref, seq1_ref)

    # out[:, -1, :] of the batch_first module == bidirectional output at time T-1
    last = seq1_ref[pl.ds((T - 1) * B, B), :]               # (B, 2H)
    out_ref[...] = (jnp.dot(last, wfc_ref[...], preferred_element_type=jnp.float32)
                    + bfc_ref[...])


def _fused_forward(x_slab, prep, b_pad):
    """x_slab: (T*B_pad, E) f32 time-major embedded input. Returns (B_pad, FC_PAD)."""
    TB = x_slab.shape[0]
    (wih0, b0, whhf0, whhb0), (wih1, b1, whhf1, whhb1) = prep["layers"]
    vmem = pl.BlockSpec(memory_space=pltpu.MemorySpace.VMEM)
    return pl.pallas_call(
        _model_kernel,
        out_shape=jax.ShapeDtypeStruct((b_pad, FC_PAD), jnp.float32),
        in_specs=[vmem] * 11,
        out_specs=vmem,
        scratch_shapes=[
            pltpu.VMEM((TB, 8 * HIDDEN), jnp.float32),      # hoisted ih gates (both dirs)
            pltpu.VMEM((TB, 2 * HIDDEN), jnp.float32),      # layer-0 outputs [fwd | bwd]
            pltpu.VMEM((TB, 2 * HIDDEN), jnp.float32),      # layer-1 outputs [fwd | bwd]
            pltpu.VMEM((b_pad, HIDDEN), jnp.float32),       # h fwd
            pltpu.VMEM((b_pad, HIDDEN), jnp.float32),       # c fwd
            pltpu.VMEM((b_pad, HIDDEN), jnp.float32),       # h bwd
            pltpu.VMEM((b_pad, HIDDEN), jnp.float32),       # c bwd
        ],
    )(x_slab, wih0, b0, whhf0, whhb0, wih1, b1, whhf1, whhb1,
      prep["fc_w"], prep["fc_b"])


# ----------------------------- params ----------------------------------------
def init_params(key):
    """PyTorch-layout parameters (as nn.LSTM / nn.Linear store them)."""
    params = {}
    k_emb, key = jax.random.split(key)
    params["embedding"] = jax.random.normal(k_emb, (VOCAB, EMBED), jnp.float32) * 0.1

    scale = 1.0 / jnp.sqrt(jnp.float32(HIDDEN))
    lstm = []
    for layer in range(NUM_LAYERS):
        d_in = EMBED if layer == 0 else 2 * HIDDEN
        dirs = []
        for _ in range(2):  # forward, backward
            ks = jax.random.split(key, 5)
            key = ks[0]
            dirs.append(dict(
                w_ih=jax.random.uniform(ks[1], (4 * HIDDEN, d_in), jnp.float32, -scale, scale),
                w_hh=jax.random.uniform(ks[2], (4 * HIDDEN, HIDDEN), jnp.float32, -scale, scale),
                b_ih=jax.random.uniform(ks[3], (4 * HIDDEN,), jnp.float32, -scale, scale),
                b_hh=jax.random.uniform(ks[4], (4 * HIDDEN,), jnp.float32, -scale, scale),
            ))
        lstm.append(dirs)
    params["lstm"] = lstm

    kf1, kf2, key = jax.random.split(key, 3)
    fscale = 1.0 / jnp.sqrt(jnp.float32(2 * HIDDEN))
    params["fc_w"] = jax.random.uniform(kf1, (NUM_CLASSES, 2 * HIDDEN), jnp.float32, -fscale, fscale)
    params["fc_b"] = jax.random.uniform(kf2, (NUM_CLASSES,), jnp.float32, -fscale, fscale)
    return params


def _perm_gate_cols(w_t):
    """(D_in, 4H) -> permute H-sized column blocks from [i,f,g,o] to [i,f,o,g]."""
    return jnp.concatenate([w_t[:, j * HIDDEN:(j + 1) * HIDDEN] for j in _GATE_PERM], axis=1)


def _perm_gate_vec(b):
    return jnp.concatenate([b[j * HIDDEN:(j + 1) * HIDDEN] for j in _GATE_PERM], axis=0)


def prepare_params(params):
    """One-time repack: per-layer (W_ih^T both dirs permuted, fused bias, per-dir W_hh^T)."""
    layers = []
    for d_f, d_b in params["lstm"]:
        wih = jnp.concatenate([_perm_gate_cols(d_f["w_ih"].T),
                               _perm_gate_cols(d_b["w_ih"].T)], axis=1)       # (D_in, 8H)
        b = jnp.concatenate([_perm_gate_vec(d_f["b_ih"] + d_f["b_hh"]),
                             _perm_gate_vec(d_b["b_ih"] + d_b["b_hh"])],
                            axis=0).reshape(1, 8 * HIDDEN)                    # (1, 8H)
        whh_f = _perm_gate_cols(d_f["w_hh"].T)                                # (H, 4H)
        whh_b = _perm_gate_cols(d_b["w_hh"].T)                                # (H, 4H)
        layers.append((wih, b, whh_f, whh_b))
    fc_w = jnp.zeros((2 * HIDDEN, FC_PAD), jnp.float32).at[:, :NUM_CLASSES].set(params["fc_w"].T)
    fc_b = jnp.zeros((1, FC_PAD), jnp.float32).at[0, :NUM_CLASSES].set(params["fc_b"])
    return {"embedding": params["embedding"], "layers": layers, "fc_w": fc_w, "fc_b": fc_b}


# ----------------------------- full model forward ----------------------------
@jax.jit
def model_forward(prep, tokens):
    B, T = tokens.shape
    b_pad = ((B + 7) // 8) * 8                               # full (8,128) sublane tiles
    emb = jnp.take(prep["embedding"], tokens, axis=0)        # (B, T, E) — gather = XLA glue
    emb = jnp.pad(emb, ((0, b_pad - B), (0, 0), (0, 0)))     # pad batch with zero rows
    x_slab = jnp.transpose(emb, (1, 0, 2)).reshape(T * b_pad, EMBED)   # time-major slab
    logits_pad = _fused_forward(x_slab, prep, b_pad)         # (b_pad, FC_PAD)
    return logits_pad[:B, :NUM_CLASSES]                      # (B, num_classes)


# ----------------------------- pure-JAX reference -----------------------------
def _ref_forward(params, tokens):
    """Reference built from the ORIGINAL PyTorch-layout params (gate order i,f,g,o)."""
    emb = jnp.take(params["embedding"], tokens, axis=0)
    seq = jnp.transpose(emb, (1, 0, 2))                      # (T, B, E)
    T, B, _ = seq.shape
    H = HIDDEN

    def cell(x, h, c, d):
        g = x @ d["w_ih"].T + h @ d["w_hh"].T + d["b_ih"] + d["b_hh"]
        i = jax.nn.sigmoid(g[:, :H]);          f = jax.nn.sigmoid(g[:, H:2 * H])
        gg = jnp.tanh(g[:, 2 * H:3 * H]);      o = jax.nn.sigmoid(g[:, 3 * H:])
        c_new = f * c + i * gg
        return o * jnp.tanh(c_new), c_new

    for d_f, d_b in params["lstm"]:
        h = jnp.zeros((B, H), jnp.float32); c = jnp.zeros((B, H), jnp.float32)
        outs_f = []
        for t in range(T):
            h, c = cell(seq[t], h, c, d_f)
            outs_f.append(h)
        h = jnp.zeros((B, H), jnp.float32); c = jnp.zeros((B, H), jnp.float32)
        outs_b = [None] * T
        for s in range(T):
            t = T - 1 - s
            h, c = cell(seq[t], h, c, d_b)
            outs_b[t] = h
        seq = jnp.stack([jnp.concatenate([outs_f[t], outs_b[t]], axis=-1) for t in range(T)], axis=0)
    last = seq[-1]
    return last @ params["fc_w"].T + params["fc_b"]


if __name__ == "__main__":
    key = jax.random.PRNGKey(0)
    k_params, k_tokens = jax.random.split(key)
    params = init_params(k_params)
    prep = prepare_params(params)
    tokens = jax.random.randint(k_tokens, (BATCH, SEQ), 0, VOCAB, dtype=jnp.int32)

    out = model_forward(prep, tokens)
    jax.block_until_ready(out)
    assert out.shape == (BATCH, NUM_CLASSES), out.shape

    ref = _ref_forward(params, tokens)
    assert jnp.allclose(out, ref, atol=5e-3, rtol=5e-3), jnp.max(jnp.abs(out - ref))
    print("KERNEL_OK")
</pallas_src>

<mosaic_0001>
module attributes {stable_mosaic.version = 11 : i64} {
  func.func @_model_kernel(%arg0: memref<64x128xf32, #tpu.memory_space<vmem>>, %arg1: memref<128x1024xf32, #tpu.memory_space<vmem>>, %arg2: memref<1x1024xf32, #tpu.memory_space<vmem>>, %arg3: memref<128x512xf32, #tpu.memory_space<vmem>>, %arg4: memref<128x512xf32, #tpu.memory_space<vmem>>, %arg5: memref<256x1024xf32, #tpu.memory_space<vmem>>, %arg6: memref<1x1024xf32, #tpu.memory_space<vmem>>, %arg7: memref<128x512xf32, #tpu.memory_space<vmem>>, %arg8: memref<128x512xf32, #tpu.memory_space<vmem>>, %arg9: memref<256x128xf32, #tpu.memory_space<vmem>>, %arg10: memref<1x128xf32, #tpu.memory_space<vmem>>, %arg11: memref<8x128xf32, #tpu.memory_space<vmem>>, %arg12: memref<64x1024xf32, #tpu.memory_space<vmem>>, %arg13: memref<64x256xf32, #tpu.memory_space<vmem>>, %arg14: memref<64x256xf32, #tpu.memory_space<vmem>>, %arg15: memref<8x128xf32, #tpu.memory_space<vmem>>, %arg16: memref<8x128xf32, #tpu.memory_space<vmem>>, %arg17: memref<8x128xf32, #tpu.memory_space<vmem>>, %arg18: memref<8x128xf32, #tpu.memory_space<vmem>>) attributes {dimension_semantics = [], scalar_prefetch = 0 : i64, scratch_operands = 7 : i64, tpu.core_type = #tpu.core_type<tc>} {
    %c0 = arith.constant 0 : index
    %c0_0 = arith.constant 0 : index
    %0 = vector.load %arg0[%c0, %c0_0] : memref<64x128xf32, #tpu.memory_space<vmem>>, vector<64x128xf32>
    %c0_1 = arith.constant 0 : index
    %c0_2 = arith.constant 0 : index
    %1 = vector.load %arg1[%c0_1, %c0_2] : memref<128x1024xf32, #tpu.memory_space<vmem>>, vector<128x1024xf32>
    %cst = arith.constant dense<0.000000e+00> : vector<64x1024xf32>
    %2 = tpu.matmul %0, %1, %cst {dimension_numbers = #tpu.dot_dimension_numbers<[1], [0], [0], [1], [0, 0, 1, 1], [], []>} : vector<64x128xf32>, vector<128x1024xf32>, vector<64x1024xf32> -> vector<64x1024xf32>
    %c0_3 = arith.constant 0 : index
    %c0_4 = arith.constant 0 : index
    %3 = vector.load %arg2[%c0_3, %c0_4] : memref<1x1024xf32, #tpu.memory_space<vmem>>, vector<1x1024xf32>
    %4 = vector.broadcast %3 : vector<1x1024xf32> to vector<64x1024xf32>
    %5 = arith.addf %2, %4 : vector<64x1024xf32>
    %c0_5 = arith.constant 0 : index
    %c0_6 = arith.constant 0 : index
    %6 = vector.load %arg12[%c0_5, %c0_6] : memref<64x1024xf32, #tpu.memory_space<vmem>>, vector<64x1024xf32>
    tpu.vector_store %arg12[%c0_5, %c0_6], %5 {strides = array<i32>} : memref<64x1024xf32, #tpu.memory_space<vmem>>, vector<64x1024xf32>,
    %cst_7 = arith.constant 0.000000e+00 : f32
    %7 = vector.broadcast %cst_7 : f32 to vector<8x128xf32>
    %c0_8 = arith.constant 0 : index
    %c0_9 = arith.constant 0 : index
    %8 = vector.load %arg15[%c0_8, %c0_9] : memref<8x128xf32, #tpu.memory_space<vmem>>, vector<8x128xf32>
    tpu.vector_store %arg15[%c0_8, %c0_9], %7 {strides = array<i32>} : memref<8x128xf32, #tpu.memory_space<vmem>>, vector<8x128xf32>,
    %cst_10 = arith.constant 0.000000e+00 : f32
    %9 = vector.broadcast %cst_10 : f32 to vector<8x128xf32>
    %c0_11 = arith.constant 0 : index
    %c0_12 = arith.constant 0 : index
    %10 = vector.load %arg16[%c0_11, %c0_12] : memref<8x128xf32, #tpu.memory_space<vmem>>, vector<8x128xf32>
    tpu.vector_store %arg16[%c0_11, %c0_12], %9 {strides = array<i32>} : memref<8x128xf32, #tpu.memory_space<vmem>>, vector<8x128xf32>,
    %cst_13 = arith.constant 0.000000e+00 : f32
    %11 = vector.broadcast %cst_13 : f32 to vector<8x128xf32>
    %c0_14 = arith.constant 0 : index
    %c0_15 = arith.constant 0 : index
    %12 = vector.load %arg17[%c0_14, %c0_15] : memref<8x128xf32, #tpu.memory_space<vmem>>, vector<8x128xf32>
    tpu.vector_store %arg17[%c0_14, %c0_15], %11 {strides = array<i32>} : memref<8x128xf32, #tpu.memory_space<vmem>>, vector<8x128xf32>,
    %cst_16 = arith.constant 0.000000e+00 : f32
    %13 = vector.broadcast %cst_16 : f32 to vector<8x128xf32>
    %c0_17 = arith.constant 0 : index
    %c0_18 = arith.constant 0 : index
    %14 = vector.load %arg18[%c0_17, %c0_18] : memref<8x128xf32, #tpu.memory_space<vmem>>, vector<8x128xf32>
    tpu.vector_store %arg18[%c0_17, %c0_18], %13 {strides = array<i32>} : memref<8x128xf32, #tpu.memory_space<vmem>>, vector<8x128xf32>,
    %c0_i32 = arith.constant 0 : i32
    %c8_i32 = arith.constant 8 : i32
    %15 = arith.muli %c0_i32, %c8_i32 : i32
    %16 = tpu.assume_multiple %15, 8 : i32
    %c7_i32 = arith.constant 7 : i32
    %17 = arith.subi %c7_i32, %c0_i32 : i32
    %c8_i32_19 = arith.constant 8 : i32
    %18 = arith.muli %17, %c8_i32_19 : i32
    %19 = tpu.assume_multiple %18, 8 : i32
    %20 = arith.index_cast %16 : i32 to index
    %c0_20 = arith.constant 0 : index
    %21 = vector.load %arg12[%20, %c0_20] : memref<64x1024xf32, #tpu.memory_space<vmem>>, vector<8x512xf32>
    %c0_21 = arith.constant 0 : index
    %c0_22 = arith.constant 0 : index
    %22 = vector.load %arg15[%c0_21, %c0_22] : memref<8x128xf32, #tpu.memory_space<vmem>>, vector<8x128xf32>
    %c0_23 = arith.constant 0 : index
    %c0_24 = arith.constant 0 : index
    %23 = vector.load %arg3[%c0_23, %c0_24] : memref<128x512xf32, #tpu.memory_space<vmem>>, vector<128x512xf32>
    %cst_25 = arith.constant dense<0.000000e+00> : vector<8x512xf32>
    %24 = tpu.matmul %22, %23, %cst_25 {dimension_numbers = #tpu.dot_dimension_numbers<[1], [0], [0], [1], [0, 0, 1, 1], [], []>} : vector<8x128xf32>, vector<128x512xf32>, vector<8x512xf32> -> vector<8x512xf32>
    %25 = arith.addf %21, %24 : vector<8x512xf32>
    %26 = vector.extract_strided_slice %25 {offsets = [0, 0], sizes = [8, 384], strides = [1, 1]} : vector<8x512xf32> to vector<8x384xf32>
    %27 = arith.negf %26 : vector<8x384xf32>
    %28 = math.exp %27 : vector<8x384xf32>
    %cst_26 = arith.constant 1.000000e+00 : f32
    %29 = vector.broadcast %cst_26 : f32 to vector<8x384xf32>
    %30 = arith.addf %29, %28 : vector<8x384xf32>
    %31 = arith.divf %29, %30 : vector<8x384xf32>
    %32 = vector.extract_strided_slice %25 {offsets = [0, 384], sizes = [8, 128], strides = [1, 1]} : vector<8x512xf32> to vector<8x128xf32>
    %33 = math.tanh %32 : vector<8x128xf32>
    %34 = vector.extract_strided_slice %31 {offsets = [0, 128], sizes = [8, 128], strides = [1, 1]} : vector<8x384xf32> to vector<8x128xf32>
    %c0_27 = arith.constant 0 : index
    %c0_28 = arith.constant 0 : index
    %35 = vector.load %arg16[%c0_27, %c0_28] : memref<8x128xf32, #tpu.memory_space<vmem>>, vector<8x128xf32>
    %36 = arith.mulf %34, %35 : vector<8x128xf32>
    %37 = vector.extract_strided_slice %31 {offsets = [0, 0], sizes = [8, 128], strides = [1, 1]} : vector<8x384xf32> to vector<8x128xf32>
    %38 = arith.mulf %37, %33 : vector<8x128xf32>
    %39 = arith.addf %36, %38 : vector<8x128xf32>
    %40 = vector.extract_strided_slice %31 {offsets = [0, 256], sizes = [8, 128], strides = [1, 1]} : vector<8x384xf32> to vector<8x128xf32>
    %41 = math.tanh %39 : vector<8x128xf32>
    %42 = arith.mulf %40, %41 : vector<8x128xf32>
    %c0_29 = arith.constant 0 : index
    %c0_30 = arith.constant 0 : index
    %43 = vector.load %arg16[%c0_29, %c0_30] : memref<8x128xf32, #tpu.memory_space<vmem>>, vector<8x128xf32>
    tpu.vector_store %arg16[%c0_29, %c0_30], %39 {strides = array<i32>} : memref<8x128xf32, #tpu.memory_space<vmem>>, vector<8x128xf32>,
    %c0_31 = arith.constant 0 : index
    %c0_32 = arith.constant 0 : index
    %44 = vector.load %arg15[%c0_31, %c0_32] : memref<8x128xf32, #tpu.memory_space<vmem>>, vector<8x128xf32>
    tpu.vector_store %arg15[%c0_31, %c0_32], %42 {strides = array<i32>} : memref<8x128xf32, #tpu.memory_space<vmem>>, vector<8x128xf32>,
    %45 = arith.index_cast %16 : i32 to index
    %c0_33 = arith.constant 0 : index
    %46 = vector.load %arg13[%45, %c0_33] : memref<64x256xf32, #tpu.memory_space<vmem>>, vector<8x128xf32>
    tpu.vector_store %arg13[%45, %c0_33], %42 {strides = array<i32>} : memref<64x256xf32, #tpu.memory_space<vmem>>, vector<8x128xf32>,
    %47 = arith.index_cast %19 : i32 to index
    %c512 = arith.constant 512 : index
    %48 = vector.load %arg12[%47, %c512] : memref<64x1024xf32, #tpu.memory_space<vmem>>, vector<8x512xf32>
    %c0_34 = arith.constant 0 : index
    %c0_35 = arith.constant 0 : index
    %49 = vector.load %arg17[%c0_34, %c0_35] : memref<8x128xf32, #tpu.memory_space<vmem>>, vector<8x128xf32>
    %c0_36 = arith.constant 0 : index
    %c0_37 = arith.constant 0 : index
    %50 = vector.load %arg4[%c0_36, %c0_37] : memref<128x512xf32, #tpu.memory_space<vmem>>, vector<128x512xf32>
    %cst_38 = arith.constant dense<0.000000e+00> : vector<8x512xf32>
    %51 = tpu.matmul %49, %50, %cst_38 {dimension_numbers = #tpu.dot_dimension_numbers<[1], [0], [0], [1], [0, 0, 1, 1], [], []>} : vector<8x128xf32>, vector<128x512xf32>, vector<8x512xf32> -> vector<8x512xf32>
    %52 = arith.addf %48, %51 : vector<8x512xf32>
    %53 = vector.extract_strided_slice %52 {offsets = [0, 0], sizes = [8, 384], strides = [1, 1]} : vector<8x512xf32> to vector<8x384xf32>
    %54 = arith.negf %53 : vector<8x384xf32>
    %55 = math.exp %54 : vector<8x384xf32>
    %cst_39 = arith.constant 1.000000e+00 : f32
    %56 = vector.broadcast %cst_39 : f32 to vector<8x384xf32>
    %57 = arith.addf %56, %55 : vector<8x384xf32>
    %58 = arith.divf %56, %57 : vector<8x384xf32>
    %59 = vector.extract_strided_slice %52 {offsets = [0, 384], sizes = [8, 128], strides = [1, 1]} : vector<8x512xf32> to vector<8x128xf32>
    %60 = math.tanh %59 : vector<8x128xf32>
    %61 = vector.extract_strided_slice %58 {offsets = [0, 128], sizes = [8, 128], strides = [1, 1]} : vector<8x384xf32> to vector<8x128xf32>
    %c0_40 = arith.constant 0 : index
    %c0_41 = arith.constant 0 : index
    %62 = vector.load %arg18[%c0_40, %c0_41] : memref<8x128xf32, #tpu.memory_space<vmem>>, vector<8x128xf32>
    %63 = arith.mulf %61, %62 : vector<8x128xf32>
    %64 = vector.extract_strided_slice %58 {offsets = [0, 0], sizes = [8, 128], strides = [1, 1]} : vector<8x384xf32> to vector<8x128xf32>
    %65 = arith.mulf %64, %60 : vector<8x128xf32>
    %66 = arith.addf %63, %65 : vector<8x128xf32>
    %67 = vector.extract_strided_slice %58 {offsets = [0, 256], sizes = [8, 128], strides = [1, 1]} : vector<8x384xf32> to vector<8x128xf32>
    %68 = math.tanh %66 : vector<8x128xf32>
    %69 = arith.mulf %67, %68 : vector<8x128xf32>
    %c0_42 = arith.constant 0 : index
    %c0_43 = arith.constant 0 : index
    %70 = vector.load %arg18[%c0_42, %c0_43] : memref<8x128xf32, #tpu.memory_space<vmem>>, vector<8x128xf32>
    tpu.vector_store %arg18[%c0_42, %c0_43], %66 {strides = array<i32>} : memref<8x128xf32, #tpu.memory_space<vmem>>, vector<8x128xf32>,
    %c0_44 = arith.constant 0 : index
    %c0_45 = arith.constant 0 : index
    %71 = vector.load %arg17[%c0_44, %c0_45] : memref<8x128xf32, #tpu.memory_space<vmem>>, vector<8x128xf32>
    tpu.vector_store %arg17[%c0_44, %c0_45], %69 {strides = array<i32>} : memref<8x128xf32, #tpu.memory_space<vmem>>, vector<8x128xf32>,
    %72 = arith.index_cast %19 : i32 to index
    %c128 = arith.constant 128 : index
    %73 = vector.load %arg13[%72, %c128] : memref<64x256xf32, #tpu.memory_space<vmem>>, vector<8x128xf32>
    tpu.vector_store %arg13[%72, %c128], %69 {strides = array<i32>} : memref<64x256xf32, #tpu.memory_space<vmem>>, vector<8x128xf32>,
    %c1_i32 = arith.constant 1 : i32
    %c8_i32_46 = arith.constant 8 : i32
    %74 = arith.muli %c1_i32, %c8_i32_46 : i32
    %75 = tpu.assume_multiple %74, 8 : i32
    %c7_i32_47 = arith.constant 7 : i32
    %76 = arith.subi %c7_i32_47, %c1_i32 : i32
    %c8_i32_48 = arith.constant 8 : i32
    %77 = arith.muli %76, %c8_i32_48 : i32
    %78 = tpu.assume_multiple %77, 8 : i32
    %79 = arith.index_cast %75 : i32 to index
    %c0_49 = arith.constant 0 : index
    %80 = vector.load %arg12[%79, %c0_49] : memref<64x1024xf32, #tpu.memory_space<vmem>>, vector<8x512xf32>
    %c0_50 = arith.constant 0 : index
    %c0_51 = arith.constant 0 : index
    %81 = vector.load %arg15[%c0_50, %c0_51] : memref<8x128xf32, #tpu.memory_space<vmem>>, vector<8x128xf32>
    %c0_52 = arith.constant 0 : index
    %c0_53 = arith.constant 0 : index
    %82 = vector.load %arg3[%c0_52, %c0_53] : memref<128x512xf32, #tpu.memory_space<vmem>>, vector<128x512xf32>
    %cst_54 = arith.constant dense<0.000000e+00> : vector<8x512xf32>
    %83 = tpu.matmul %81, %82, %cst_54 {dimension_numbers = #tpu.dot_dimension_numbers<[1], [0], [0], [1], [0, 0, 1, 1], [], []>} : vector<8x128xf32>, vector<128x512xf32>, vector<8x512xf32> -> vector<8x512xf32>
    %84 = arith.addf %80, %83 : vector<8x512xf32>
    %85 = vector.extract_strided_slice %84 {offsets = [0, 0], sizes = [8, 384], strides = [1, 1]} : vector<8x512xf32> to vector<8x384xf32>
    %86 = arith.negf %85 : vector<8x384xf32>
    %87 = math.exp %86 : vector<8x384xf32>
    %cst_55 = arith.constant 1.000000e+00 : f32
    %88 = vector.broadcast %cst_55 : f32 to vector<8x384xf32>
    %89 = arith.addf %88, %87 : vector<8x384xf32>
    %90 = arith.divf %88, %89 : vector<8x384xf32>
    %91 = vector.extract_strided_slice %84 {offsets = [0, 384], sizes = [8, 128], strides = [1, 1]} : vector<8x512xf32> to vector<8x128xf32>
    %92 = math.tanh %91 : vector<8x128xf32>
    %93 = vector.extract_strided_slice %90 {offsets = [0, 128], sizes = [8, 128], strides = [1, 1]} : vector<8x384xf32> to vector<8x128xf32>
    %c0_56 = arith.constant 0 : index
    %c0_57 = arith.constant 0 : index
    %94 = vector.load %arg16[%c0_56, %c0_57] : memref<8x128xf32, #tpu.memory_space<vmem>>, vector<8x128xf32>
    %95 = arith.mulf %93, %94 : vector<8x128xf32>
    %96 = vector.extract_strided_slice %90 {offsets = [0, 0], sizes = [8, 128], strides = [1, 1]} : vector<8x384xf32> to vector<8x128xf32>
    %97 = arith.mulf %96, %92 : vector<8x128xf32>
    %98 = arith.addf %95, %97 : vector<8x128xf32>
    %99 = vector.extract_strided_slice %90 {offsets = [0, 256], sizes = [8, 128], strides = [1, 1]} : vector<8x384xf32> to vector<8x128xf32>
    %100 = math.tanh %98 : vector<8x128xf32>
    %101 = arith.mulf %99, %100 : vector<8x128xf32>
    %c0_58 = arith.constant 0 : index
    %c0_59 = arith.constant 0 : index
    %102 = vector.load %arg16[%c0_58, %c0_59] : memref<8x128xf32, #tpu.memory_space<vmem>>, vector<8x128xf32>
    tpu.vector_store %arg16[%c0_58, %c0_59], %98 {strides = array<i32>} : memref<8x128xf32, #tpu.memory_space<vmem>>, vector<8x128xf32>,
    %c0_60 = arith.constant 0 : index
    %c0_61 = arith.constant 0 : index
    %103 = vector.load %arg15[%c0_60, %c0_61] : memref<8x128xf32, #tpu.memory_space<vmem>>, vector<8x128xf32>
    tpu.vector_store %arg15[%c0_60, %c0_61], %101 {strides = array<i32>} : memref<8x128xf32, #tpu.memory_space<vmem>>, vector<8x128xf32>,
    %104 = arith.index_cast %75 : i32 to index
    %c0_62 = arith.constant 0 : index
    %105 = vector.load %arg13[%104, %c0_62] : memref<64x256xf32, #tpu.memory_space<vmem>>, vector<8x128xf32>
    tpu.vector_store %arg13[%104, %c0_62], %101 {strides = array<i32>} : memref<64x256xf32, #tpu.memory_space<vmem>>, vector<8x128xf32>,
    %106 = arith.index_cast %78 : i32 to index
    %c512_63 = arith.constant 512 : index
    %107 = vector.load %arg12[%106, %c512_63] : memref<64x1024xf32, #tpu.memory_space<vmem>>, vector<8x512xf32>
    %c0_64 = arith.constant 0 : index
    %c0_65 = arith.constant 0 : index
    %108 = vector.load %arg17[%c0_64, %c0_65] : memref<8x128xf32, #tpu.memory_space<vmem>>, vector<8x128xf32>
    %c0_66 = arith.constant 0 : index
    %c0_67 = arith.constant 0 : index
    %109 = vector.load %arg4[%c0_66, %c0_67] : memref<128x512xf32, #tpu.memory_space<vmem>>, vector<128x512xf32>
    %cst_68 = arith.constant dense<0.000000e+00> : vector<8x512xf32>
    %110 = tpu.matmul %108, %109, %cst_68 {dimension_numbers = #tpu.dot_dimension_numbers<[1], [0], [0], [1], [0, 0, 1, 1], [], []>} : vector<8x128xf32>, vector<128x512xf32>, vector<8x512xf32> -> vector<8x512xf32>
    %111 = arith.addf %107, %110 : vector<8x512xf32>
    %112 = vector.extract_strided_slice %111 {offsets = [0, 0], sizes = [8, 384], strides = [1, 1]} : vector<8x512xf32> to vector<8x384xf32>
    %113 = arith.negf %112 : vector<8x384xf32>
    %114 = math.exp %113 : vector<8x384xf32>
    %cst_69 = arith.constant 1.000000e+00 : f32
    %115 = vector.broadcast %cst_69 : f32 to vector<8x384xf32>
    %116 = arith.addf %115, %114 : vector<8x384xf32>
    %117 = arith.divf %115, %116 : vector<8x384xf32>
    %118 = vector.extract_strided_slice %111 {offsets = [0, 384], sizes = [8, 128], strides = [1, 1]} : vector<8x512xf32> to vector<8x128xf32>
    %119 = math.tanh %118 : vector<8x128xf32>
    %120 = vector.extract_strided_slice %117 {offsets = [0, 128], sizes = [8, 128], strides = [1, 1]} : vector<8x384xf32> to vector<8x128xf32>
    %c0_70 = arith.constant 0 : index
    %c0_71 = arith.constant 0 : index
    %121 = vector.load %arg18[%c0_70, %c0_71] : memref<8x128xf32, #tpu.memory_space<vmem>>, vector<8x128xf32>
    %122 = arith.mulf %120, %121 : vector<8x128xf32>
    %123 = vector.extract_strided_slice %117 {offsets = [0, 0], sizes = [8, 128], strides = [1, 1]} : vector<8x384xf32> to vector<8x128xf32>
    %124 = arith.mulf %123, %119 : vector<8x128xf32>
    %125 = arith.addf %122, %124 : vector<8x128xf32>
    %126 = vector.extract_strided_slice %117 {offsets = [0, 256], sizes = [8, 128], strides = [1, 1]} : vector<8x384xf32> to vector<8x128xf32>
    %127 = math.tanh %125 : vector<8x128xf32>
    %128 = arith.mulf %126, %127 : vector<8x128xf32>
    %c0_72 = arith.constant 0 : index
    %c0_73 = arith.constant 0 : index
    %129 = vector.load %arg18[%c0_72, %c0_73] : memref<8x128xf32, #tpu.memory_space<vmem>>, vector<8x128xf32>
    tpu.vector_store %arg18[%c0_72, %c0_73], %125 {strides = array<i32>} : memref<8x128xf32, #tpu.memory_space<vmem>>, vector<8x128xf32>,
    %c0_74 = arith.constant 0 : index
    %c0_75 = arith.constant 0 : index
    %130 = vector.load %arg17[%c0_74, %c0_75] : memref<8x128xf32, #tpu.memory_space<vmem>>, vector<8x128xf32>
    tpu.vector_store %arg17[%c0_74, %c0_75], %128 {strides = array<i32>} : memref<8x128xf32, #tpu.memory_space<vmem>>, vector<8x128xf32>,
    %131 = arith.index_cast %78 : i32 to index
    %c128_76 = arith.constant 128 : index
    %132 = vector.load %arg13[%131, %c128_76] : memref<64x256xf32, #tpu.memory_space<vmem>>, vector<8x128xf32>
    tpu.vector_store %arg13[%131, %c128_76], %128 {strides = array<i32>} : memref<64x256xf32, #tpu.memory_space<vmem>>, vector<8x128xf32>,
    %c2_i32 = arith.constant 2 : i32
    %c8_i32_77 = arith.constant 8 : i32
    %133 = arith.muli %c2_i32, %c8_i32_77 : i32
    %134 = tpu.assume_multiple %133, 8 : i32
    %c7_i32_78 = arith.constant 7 : i32
    %135 = arith.subi %c7_i32_78, %c2_i32 : i32
    %c8_i32_79 = arith.constant 8 : i32
    %136 = arith.muli %135, %c8_i32_79 : i32
    %137 = tpu.assume_multiple %136, 8 : i32
    %138 = arith.index_cast %134 : i32 to index
    %c0_80 = arith.constant 0 : index
    %139 = vector.load %arg12[%138, %c0_80] : memref<64x1024xf32, #tpu.memory_space<vmem>>, vector<8x512xf32>
    %c0_81 = arith.constant 0 : index
    %c0_82 = arith.constant 0 : index
    %140 = vector.load %arg15[%c0_81, %c0_82] : memref<8x128xf32, #tpu.memory_space<vmem>>, vector<8x128xf32>
    %c0_83 = arith.constant 0 : index
    %c0_84 = arith.constant 0 : index
    %141 = vector.load %arg3[%c0_83, %c0_84] : memref<128x512xf32, #tpu.memory_space<vmem>>, vector<128x512xf32>
    %cst_85 = arith.constant dense<0.000000e+00> : vector<8x512xf32>
    %142 = tpu.matmul %140, %141, %cst_85 {dimension_numbers = #tpu.dot_dimension_numbers<[1], [0], [0], [1], [0, 0, 1, 1], [], []>} : vector<8x128xf32>, vector<128x512xf32>, vector<8x512xf32> -> vector<8x512xf32>
    %143 = arith.addf %139, %142 : vector<8x512xf32>
    %144 = vector.extract_strided_slice %143 {offsets = [0, 0], sizes = [8, 384], strides = [1, 1]} : vector<8x512xf32> to vector<8x384xf32>
    %145 = arith.negf %144 : vector<8x384xf32>
    %146 = math.exp %145 : vector<8x384xf32>
    %cst_86 = arith.constant 1.000000e+00 : f32
    %147 = vector.broadcast %cst_86 : f32 to vector<8x384xf32>
    %148 = arith.addf %147, %146 : vector<8x384xf32>
    %149 = arith.divf %147, %148 : vector<8x384xf32>
    %150 = vector.extract_strided_slice %143 {offsets = [0, 384], sizes = [8, 128], strides = [1, 1]} : vector<8x512xf32> to vector<8x128xf32>
    %151 = math.tanh %150 : vector<8x128xf32>
    %152 = vector.extract_strided_slice %149 {offsets = [0, 128], sizes = [8, 128], strides = [1, 1]} : vector<8x384xf32> to vector<8x128xf32>
    %c0_87 = arith.constant 0 : index
    %c0_88 = arith.constant 0 : index
    %153 = vector.load %arg16[%c0_87, %c0_88] : memref<8x128xf32, #tpu.memory_space<vmem>>, vector<8x128xf32>
    %154 = arith.mulf %152, %153 : vector<8x128xf32>
    %155 = vector.extract_strided_slice %149 {offsets = [0, 0], sizes = [8, 128], strides = [1, 1]} : vector<8x384xf32> to vector<8x128xf32>
    %156 = arith.mulf %155, %151 : vector<8x128xf32>
    %157 = arith.addf %154, %156 : vector<8x128xf32>
    %158 = vector.extract_strided_slice %149 {offsets = [0, 256], sizes = [8, 128], strides = [1, 1]} : vector<8x384xf32> to vector<8x128xf32>
    %159 = math.tanh %157 : vector<8x128xf32>
    %160 = arith.mulf %158, %159 : vector<8x128xf32>
    %c0_89 = arith.constant 0 : index
    %c0_90 = arith.constant 0 : index
    %161 = vector.load %arg16[%c0_89, %c0_90] : memref<8x128xf32, #tpu.memory_space<vmem>>, vector<8x128xf32>
    tpu.vector_store %arg16[%c0_89, %c0_90], %157 {strides = array<i32>} : memref<8x128xf32, #tpu.memory_space<vmem>>, vector<8x128xf32>,
    %c0_91 = arith.constant 0 : index
    %c0_92 = arith.constant 0 : index
    %162 = vector.load %arg15[%c0_91, %c0_92] : memref<8x128xf32, #tpu.memory_space<vmem>>, vector<8x128xf32>
    tpu.vector_store %arg15[%c0_91, %c0_92], %160 {strides = array<i32>} : memref<8x128xf32, #tpu.memory_space<vmem>>, vector<8x128xf32>,
    %163 = arith.index_cast %134 : i32 to index
    %c0_93 = arith.constant 0 : index
    %164 = vector.load %arg13[%163, %c0_93] : memref<64x256xf32, #tpu.memory_space<vmem>>, vector<8x128xf32>
    tpu.vector_store %arg13[%163, %c0_93], %160 {strides = array<i32>} : memref<64x256xf32, #tpu.memory_space<vmem>>, vector<8x128xf32>,
    %165 = arith.index_cast %137 : i32 to index
    %c512_94 = arith.constant 512 : index
    %166 = vector.load %arg12[%165, %c512_94] : memref<64x1024xf32, #tpu.memory_space<vmem>>, vector<8x512xf32>
    %c0_95 = arith.constant 0 : index
    %c0_96 = arith.constant 0 : index
    %167 = vector.load %arg17[%c0_95, %c0_96] : memref<8x128xf32, #tpu.memory_space<vmem>>, vector<8x128xf32>
    %c0_97 = arith.constant 0 : index
    %c0_98 = arith.constant 0 : index
    %168 = vector.load %arg4[%c0_97, %c0_98] : memref<128x512xf32, #tpu.memory_space<vmem>>, vector<128x512xf32>
    %cst_99 = arith.constant dense<0.000000e+00> : vector<8x512xf32>
    %169 = tpu.matmul %167, %168, %cst_99 {dimension_numbers = #tpu.dot_dimension_numbers<[1], [0], [0], [1], [0, 0, 1, 1], [], []>} : vector<8x128xf32>, vector<128x512xf32>, vector<8x512xf32> -> vector<8x512xf32>
    %170 = arith.addf %166, %169 : vector<8x512xf32>
    %171 = vector.extract_strided_slice %170 {offsets = [0, 0], sizes = [8, 384], strides = [1, 1]} : vector<8x512xf32> to vector<8x384xf32>
    %172 = arith.negf %171 : vector<8x384xf32>
    %173 = math.exp %172 : vector<8x384xf32>
    %cst_100 = arith.constant 1.000000e+00 : f32
    %174 = vector.broadcast %cst_100 : f32 to vector<8x384xf32>
    %175 = arith.addf %174, %173 : vector<8x384xf32>
    %176 = arith.divf %174, %175 : vector<8x384xf32>
    %177 = vector.extract_strided_slice %170 {offsets = [0, 384], sizes = [8, 128], strides = [1, 1]} : vector<8x512xf32> to vector<8x128xf32>
    %178 = math.tanh %177 : vector<8x128xf32>
    %179 = vector.extract_strided_slice %176 {offsets = [0, 128], sizes = [8, 128], strides = [1, 1]} : vector<8x384xf32> to vector<8x128xf32>
    %c0_101 = arith.constant 0 : index
    %c0_102 = arith.constant 0 : index
    %180 = vector.load %arg18[%c0_101, %c0_102] : memref<8x128xf32, #tpu.memory_space<vmem>>, vector<8x128xf32>
    %181 = arith.mulf %179, %180 : vector<8x128xf32>
    %182 = vector.extract_strided_slice %176 {offsets = [0, 0], sizes = [8, 128], strides = [1, 1]} : vector<8x384xf32> to vector<8x128xf32>
    %183 = arith.mulf %182, %178 : vector<8x128xf32>
    %184 = arith.addf %181, %183 : vector<8x128xf32>
    %185 = vector.extract_strided_slice %176 {offsets = [0, 256], sizes = [8, 128], strides = [1, 1]} : vector<8x384xf32> to vector<8x128xf32>
    %186 = math.tanh %184 : vector<8x128xf32>
    %187 = arith.mulf %185, %186 : vector<8x128xf32>
    %c0_103 = arith.constant 0 : index
    %c0_104 = arith.constant 0 : index
    %188 = vector.load %arg18[%c0_103, %c0_104] : memref<8x128xf32, #tpu.memory_space<vmem>>, vector<8x128xf32>
    tpu.vector_store %arg18[%c0_103, %c0_104], %184 {strides = array<i32>} : memref<8x128xf32, #tpu.memory_space<vmem>>, vector<8x128xf32>,
    %c0_105 = arith.constant 0 : index
    %c0_106 = arith.constant 0 : index
    %189 = vector.load %arg17[%c0_105, %c0_106] : memref<8x128xf32, #tpu.memory_space<vmem>>, vector<8x128xf32>
    tpu.vector_store %arg17[%c0_105, %c0_106], %187 {strides = array<i32>} : memref<8x128xf32, #tpu.memory_space<vmem>>, vector<8x128xf32>,
    %190 = arith.index_cast %137 : i32 to index
    %c128_107 = arith.constant 128 : index
    %191 = vector.load %arg13[%190, %c128_107] : memref<64x256xf32, #tpu.memory_space<vmem>>, vector<8x128xf32>
    tpu.vector_store %arg13[%190, %c128_107], %187 {strides = array<i32>} : memref<64x256xf32, #tpu.memory_space<vmem>>, vector<8x128xf32>,
    %c3_i32 = arith.constant 3 : i32
    %c8_i32_108 = arith.constant 8 : i32
    %192 = arith.muli %c3_i32, %c8_i32_108 : i32
    %193 = tpu.assume_multiple %192, 8 : i32
    %c7_i32_109 = arith.constant 7 : i32
    %194 = arith.subi %c7_i32_109, %c3_i32 : i32
    %c8_i32_110 = arith.constant 8 : i32
    %195 = arith.muli %194, %c8_i32_110 : i32
    %196 = tpu.assume_multiple %195, 8 : i32
    %197 = arith.index_cast %193 : i32 to index
    %c0_111 = arith.constant 0 : index
    %198 = vector.load %arg12[%197, %c0_111] : memref<64x1024xf32, #tpu.memory_space<vmem>>, vector<8x512xf32>
    %c0_112 = arith.constant 0 : index
    %c0_113 = arith.constant 0 : index
    %199 = vector.load %arg15[%c0_112, %c0_113] : memref<8x128xf32, #tpu.memory_space<vmem>>, vector<8x128xf32>
    %c0_114 = arith.constant 0 : index
    %c0_115 = arith.constant 0 : index
    %200 = vector.load %arg3[%c0_114, %c0_115] : memref<128x512xf32, #tpu.memory_space<vmem>>, vector<128x512xf32>
    %cst_116 = arith.constant dense<0.000000e+00> : vector<8x512xf32>
    %201 = tpu.matmul %199, %200, %cst_116 {dimension_numbers = #tpu.dot_dimension_numbers<[1], [0], [0], [1], [0, 0, 1, 1], [], []>} : vector<8x128xf32>, vector<128x512xf32>, vector<8x512xf32> -> vector<8x512xf32>
    %202 = arith.addf %198, %201 : vector<8x512xf32>
    %203 = vector.extract_strided_slice %202 {offsets = [0, 0], sizes = [8, 384], strides = [1, 1]} : vector<8x512xf32> to vector<8x384xf32>
    %204 = arith.negf %203 : vector<8x384xf32>
    %205 = math.exp %204 : vector<8x384xf32>
    %cst_117 = arith.constant 1.000000e+00 : f32
    %206 = vector.broadcast %cst_117 : f32 to vector<8x384xf32>
    %207 = arith.addf %206, %205 : vector<8x384xf32>
    %208 = arith.divf %206, %207 : vector<8x384xf32>
    %209 = vector.extract_strided_slice %202 {offsets = [0, 384], sizes = [8, 128], strides = [1, 1]} : vector<8x512xf32> to vector<8x128xf32>
    %210 = math.tanh %209 : vector<8x128xf32>
    %211 = vector.extract_strided_slice %208 {offsets = [0, 128], sizes = [8, 128], strides = [1, 1]} : vector<8x384xf32> to vector<8x128xf32>
    %c0_118 = arith.constant 0 : index
    %c0_119 = arith.constant 0 : index
    %212 = vector.load %arg16[%c0_118, %c0_119] : memref<8x128xf32, #tpu.memory_space<vmem>>, vector<8x128xf32>
    %213 = arith.mulf %211, %212 : vector<8x128xf32>
    %214 = vector.extract_strided_slice %208 {offsets = [0, 0], sizes = [8, 128], strides = [1, 1]} : vector<8x384xf32> to vector<8x128xf32>
    %215 = arith.mulf %214, %210 : vector<8x128xf32>
    %216 = arith.addf %213, %215 : vector<8x128xf32>
    %217 = vector.extract_strided_slice %208 {offsets = [0, 256], sizes = [8, 128], strides = [1, 1]} : vector<8x384xf32> to vector<8x128xf32>
    %218 = math.tanh %216 : vector<8x128xf32>
    %219 = arith.mulf %217, %218 : vector<8x128xf32>
    %c0_120 = arith.constant 0 : index
    %c0_121 = arith.constant 0 : index
    %220 = vector.load %arg16[%c0_120, %c0_121] : memref<8x128xf32, #tpu.memory_space<vmem>>, vector<8x128xf32>
    tpu.vector_store %arg16[%c0_120, %c0_121], %216 {strides = array<i32>} : memref<8x128xf32, #tpu.memory_space<vmem>>, vector<8x128xf32>,
    %c0_122 = arith.constant 0 : index
    %c0_123 = arith.constant 0 : index
    %221 = vector.load %arg15[%c0_122, %c0_123] : memref<8x128xf32, #tpu.memory_space<vmem>>, vector<8x128xf32>
    tpu.vector_store %arg15[%c0_122, %c0_123], %219 {strides = array<i32>} : memref<8x128xf32, #tpu.memory_space<vmem>>, vector<8x128xf32>,
    %222 = arith.index_cast %193 : i32 to index
    %c0_124 = arith.constant 0 : index
    %223 = vector.load %arg13[%222, %c0_124] : memref<64x256xf32, #tpu.memory_space<vmem>>, vector<8x128xf32>
    tpu.vector_store %arg13[%222, %c0_124], %219 {strides = array<i32>} : memref<64x256xf32, #tpu.memory_space<vmem>>, vector<8x128xf32>,
    %224 = arith.index_cast %196 : i32 to index
    %c512_125 = arith.constant 512 : index
    %225 = vector.load %arg12[%224, %c512_125] : memref<64x1024xf32, #tpu.memory_space<vmem>>, vector<8x512xf32>
    %c0_126 = arith.constant 0 : index
    %c0_127 = arith.constant 0 : index
    %226 = vector.load %arg17[%c0_126, %c0_127] : memref<8x128xf32, #tpu.memory_space<vmem>>, vector<8x128xf32>
    %c0_128 = arith.constant 0 : index
    %c0_129 = arith.constant 0 : index
    %227 = vector.load %arg4[%c0_128, %c0_129] : memref<128x512xf32, #tpu.memory_space<vmem>>, vector<128x512xf32>
    %cst_130 = arith.constant dense<0.000000e+00> : vector<8x512xf32>
    %228 = tpu.matmul %226, %227, %cst_130 {dimension_numbers = #tpu.dot_dimension_numbers<[1], [0], [0], [1], [0, 0, 1, 1], [], []>} : vector<8x128xf32>, vector<128x512xf32>, vector<8x512xf32> -> vector<8x512xf32>
    %229 = arith.addf %225, %228 : vector<8x512xf32>
    %230 = vector.extract_strided_slice %229 {offsets = [0, 0], sizes = [8, 384], strides = [1, 1]} : vector<8x512xf32> to vector<8x384xf32>
    %231 = arith.negf %230 : vector<8x384xf32>
    %232 = math.exp %231 : vector<8x384xf32>
    %cst_131 = arith.constant 1.000000e+00 : f32
    %233 = vector.broadcast %cst_131 : f32 to vector<8x384xf32>
    %234 = arith.addf %233, %232 : vector<8x384xf32>
    %235 = arith.divf %233, %234 : vector<8x384xf32>
    %236 = vector.extract_strided_slice %229 {offsets = [0, 384], sizes = [8, 128], strides = [1, 1]} : vector<8x512xf32> to vector<8x128xf32>
    %237 = math.tanh %236 : vector<8x128xf32>
    %238 = vector.extract_strided_slice %235 {offsets = [0, 128], sizes = [8, 128], strides = [1, 1]} : vector<8x384xf32> to vector<8x128xf32>
    %c0_132 = arith.constant 0 : index
    %c0_133 = arith.constant 0 : index
    %239 = vector.load %arg18[%c0_132, %c0_133] : memref<8x128xf32, #tpu.memory_space<vmem>>, vector<8x128xf32>
    %240 = arith.mulf %238, %239 : vector<8x128xf32>
    %241 = vector.extract_strided_slice %235 {offsets = [0, 0], sizes = [8, 128], strides = [1, 1]} : vector<8x384xf32> to vector<8x128xf32>
    %242 = arith.mulf %241, %237 : vector<8x128xf32>
    %243 = arith.addf %240, %242 : vector<8x128xf32>
    %244 = vector.extract_strided_slice %235 {offsets = [0, 256], sizes = [8, 128], strides = [1, 1]} : vector<8x384xf32> to vector<8x128xf32>
    %245 = math.tanh %243 : vector<8x128xf32>
    %246 = arith.mulf %244, %245 : vector<8x128xf32>
    %c0_134 = arith.constant 0 : index
    %c0_135 = arith.constant 0 : index
    %247 = vector.load %arg18[%c0_134, %c0_135] : memref<8x128xf32, #tpu.memory_space<vmem>>, vector<8x128xf32>
    tpu.vector_store %arg18[%c0_134, %c0_135], %243 {strides = array<i32>} : memref<8x128xf32, #tpu.memory_space<vmem>>, vector<8x128xf32>,
    %c0_136 = arith.constant 0 : index
    %c0_137 = arith.constant 0 : index
    %248 = vector.load %arg17[%c0_136, %c0_137] : memref<8x128xf32, #tpu.memory_space<vmem>>, vector<8x128xf32>
    tpu.vector_store %arg17[%c0_136, %c0_137], %246 {strides = array<i32>} : memref<8x128xf32, #tpu.memory_space<vmem>>, vector<8x128xf32>,
    %249 = arith.index_cast %196 : i32 to index
    %c128_138 = arith.constant 128 : index
    %250 = vector.load %arg13[%249, %c128_138] : memref<64x256xf32, #tpu.memory_space<vmem>>, vector<8x128xf32>
    tpu.vector_store %arg13[%249, %c128_138], %246 {strides = array<i32>} : memref<64x256xf32, #tpu.memory_space<vmem>>, vector<8x128xf32>,
    %c4_i32 = arith.constant 4 : i32
    %c8_i32_139 = arith.constant 8 : i32
    %251 = arith.muli %c4_i32, %c8_i32_139 : i32
    %252 = tpu.assume_multiple %251, 8 : i32
    %c7_i32_140 = arith.constant 7 : i32
    %253 = arith.subi %c7_i32_140, %c4_i32 : i32
    %c8_i32_141 = arith.constant 8 : i32
    %254 = arith.muli %253, %c8_i32_141 : i32
    %255 = tpu.assume_multiple %254, 8 : i32
    %256 = arith.index_cast %252 : i32 to index
    %c0_142 = arith.constant 0 : index
    %257 = vector.load %arg12[%256, %c0_142] : memref<64x1024xf32, #tpu.memory_space<vmem>>, vector<8x512xf32>
    %c0_143 = arith.constant 0 : index
    %c0_144 = arith.constant 0 : index
    %258 = vector.load %arg15[%c0_143, %c0_144] : memref<8x128xf32, #tpu.memory_space<vmem>>, vector<8x128xf32>
    %c0_145 = arith.constant 0 : index
    %c0_146 = arith.constant 0 : index
    %259 = vector.load %arg3[%c0_145, %c0_146] : memref<128x512xf32, #tpu.memory_space<vmem>>, vector<128x512xf32>
    %cst_147 = arith.constant dense<0.000000e+00> : vector<8x512xf32>
    %260 = tpu.matmul %258, %259, %cst_147 {dimension_numbers = #tpu.dot_dimension_numbers<[1], [0], [0], [1], [0, 0, 1, 1], [], []>} : vector<8x128xf32>, vector<128x512xf32>, vector<8x512xf32> -> vector<8x512xf32>
    %261 = arith.addf %257, %260 : vector<8x512xf32>
    %262 = vector.extract_strided_slice %261 {offsets = [0, 0], sizes = [8, 384], strides = [1, 1]} : vector<8x512xf32> to vector<8x384xf32>
    %263 = arith.negf %262 : vector<8x384xf32>
    %264 = math.exp %263 : vector<8x384xf32>
    %cst_148 = arith.constant 1.000000e+00 : f32
    %265 = vector.broadcast %cst_148 : f32 to vector<8x384xf32>
    %266 = arith.addf %265, %264 : vector<8x384xf32>
    %267 = arith.divf %265, %266 : vector<8x384xf32>
    %268 = vector.extract_strided_slice %261 {offsets = [0, 384], sizes = [8, 128], strides = [1, 1]} : vector<8x512xf32> to vector<8x128xf32>
    %269 = math.tanh %268 : vector<8x128xf32>
    %270 = vector.extract_strided_slice %267 {offsets = [0, 128], sizes = [8, 128], strides = [1, 1]} : vector<8x384xf32> to vector<8x128xf32>
    %c0_149 = arith.constant 0 : index
    %c0_150 = arith.constant 0 : index
    %271 = vector.load %arg16[%c0_149, %c0_150] : memref<8x128xf32, #tpu.memory_space<vmem>>, vector<8x128xf32>
    %272 = arith.mulf %270, %271 : vector<8x128xf32>
    %273 = vector.extract_strided_slice %267 {offsets = [0, 0], sizes = [8, 128], strides = [1, 1]} : vector<8x384xf32> to vector<8x128xf32>
    %274 = arith.mulf %273, %269 : vector<8x128xf32>
    %275 = arith.addf %272, %274 : vector<8x128xf32>
    %276 = vector.extract_strided_slice %267 {offsets = [0, 256], sizes = [8, 128], strides = [1, 1]} : vector<8x384xf32> to vector<8x128xf32>
    %277 = math.tanh %275 : vector<8x128xf32>
    %278 = arith.mulf %276, %277 : vector<8x128xf32>
    %c0_151 = arith.constant 0 : index
    %c0_152 = arith.constant 0 : index
    %279 = vector.load %arg16[%c0_151, %c0_152] : memref<8x128xf32, #tpu.memory_space<vmem>>, vector<8x128xf32>
    tpu.vector_store %arg16[%c0_151, %c0_152], %275 {strides = array<i32>} : memref<8x128xf32, #tpu.memory_space<vmem>>, vector<8x128xf32>,
    %c0_153 = arith.constant 0 : index
    %c0_154 = arith.constant 0 : index
    %280 = vector.load %arg15[%c0_153, %c0_154] : memref<8x128xf32, #tpu.memory_space<vmem>>, vector<8x128xf32>
    tpu.vector_store %arg15[%c0_153, %c0_154], %278 {strides = array<i32>} : memref<8x128xf32, #tpu.memory_space<vmem>>, vector<8x128xf32>,
    %281 = arith.index_cast %252 : i32 to index
    %c0_155 = arith.constant 0 : index
    %282 = vector.load %arg13[%281, %c0_155] : memref<64x256xf32, #tpu.memory_space<vmem>>, vector<8x128xf32>
    tpu.vector_store %arg13[%281, %c0_155], %278 {strides = array<i32>} : memref<64x256xf32, #tpu.memory_space<vmem>>, vector<8x128xf32>,
    %283 = arith.index_cast %255 : i32 to index
    %c512_156 = arith.constant 512 : index
    %284 = vector.load %arg12[%283, %c512_156] : memref<64x1024xf32, #tpu.memory_space<vmem>>, vector<8x512xf32>
    %c0_157 = arith.constant 0 : index
    %c0_158 = arith.constant 0 : index
    %285 = vector.load %arg17[%c0_157, %c0_158] : memref<8x128xf32, #tpu.memory_space<vmem>>, vector<8x128xf32>
    %c0_159 = arith.constant 0 : index
    %c0_160 = arith.constant 0 : index
    %286 = vector.load %arg4[%c0_159, %c0_160] : memref<128x512xf32, #tpu.memory_space<vmem>>, vector<128x512xf32>
    %cst_161 = arith.constant dense<0.000000e+00> : vector<8x512xf32>
    %287 = tpu.matmul %285, %286, %cst_161 {dimension_numbers = #tpu.dot_dimension_numbers<[1], [0], [0], [1], [0, 0, 1, 1], [], []>} : vector<8x128xf32>, vector<128x512xf32>, vector<8x512xf32> -> vector<8x512xf32>
    %288 = arith.addf %284, %287 : vector<8x512xf32>
    %289 = vector.extract_strided_slice %288 {offsets = [0, 0], sizes = [8, 384], strides = [1, 1]} : vector<8x512xf32> to vector<8x384xf32>
    %290 = arith.negf %289 : vector<8x384xf32>
    %291 = math.exp %290 : vector<8x384xf32>
    %cst_162 = arith.constant 1.000000e+00 : f32
    %292 = vector.broadcast %cst_162 : f32 to vector<8x384xf32>
    %293 = arith.addf %292, %291 : vector<8x384xf32>
    %294 = arith.divf %292, %293 : vector<8x384xf32>
    %295 = vector.extract_strided_slice %288 {offsets = [0, 384], sizes = [8, 128], strides = [1, 1]} : vector<8x512xf32> to vector<8x128xf32>
    %296 = math.tanh %295 : vector<8x128xf32>
    %297 = vector.extract_strided_slice %294 {offsets = [0, 128], sizes = [8, 128], strides = [1, 1]} : vector<8x384xf32> to vector<8x128xf32>
    %c0_163 = arith.constant 0 : index
    %c0_164 = arith.constant 0 : index
    %298 = vector.load %arg18[%c0_163, %c0_164] : memref<8x128xf32, #tpu.memory_space<vmem>>, vector<8x128xf32>
    %299 = arith.mulf %297, %298 : vector<8x128xf32>
    %300 = vector.extract_strided_slice %294 {offsets = [0, 0], sizes = [8, 128], strides = [1, 1]} : vector<8x384xf32> to vector<8x128xf32>
    %301 = arith.mulf %300, %296 : vector<8x128xf32>
    %302 = arith.addf %299, %301 : vector<8x128xf32>
    %303 = vector.extract_strided_slice %294 {offsets = [0, 256], sizes = [8, 128], strides = [1, 1]} : vector<8x384xf32> to vector<8x128xf32>
    %304 = math.tanh %302 : vector<8x128xf32>
    %305 = arith.mulf %303, %304 : vector<8x128xf32>
    %c0_165 = arith.constant 0 : index
    %c0_166 = arith.constant 0 : index
    %306 = vector.load %arg18[%c0_165, %c0_166] : memref<8x128xf32, #tpu.memory_space<vmem>>, vector<8x128xf32>
    tpu.vector_store %arg18[%c0_165, %c0_166], %302 {strides = array<i32>} : memref<8x128xf32, #tpu.memory_space<vmem>>, vector<8x128xf32>,
    %c0_167 = arith.constant 0 : index
    %c0_168 = arith.constant 0 : index
    %307 = vector.load %arg17[%c0_167, %c0_168] : memref<8x128xf32, #tpu.memory_space<vmem>>, vector<8x128xf32>
    tpu.vector_store %arg17[%c0_167, %c0_168], %305 {strides = array<i32>} : memref<8x128xf32, #tpu.memory_space<vmem>>, vector<8x128xf32>,
    %308 = arith.index_cast %255 : i32 to index
    %c128_169 = arith.constant 128 : index
    %309 = vector.load %arg13[%308, %c128_169] : memref<64x256xf32, #tpu.memory_space<vmem>>, vector<8x128xf32>
    tpu.vector_store %arg13[%308, %c128_169], %305 {strides = array<i32>} : memref<64x256xf32, #tpu.memory_space<vmem>>, vector<8x128xf32>,
    %c5_i32 = arith.constant 5 : i32
    %c8_i32_170 = arith.constant 8 : i32
    %310 = arith.muli %c5_i32, %c8_i32_170 : i32
    %311 = tpu.assume_multiple %310, 8 : i32
    %c7_i32_171 = arith.constant 7 : i32
    %312 = arith.subi %c7_i32_171, %c5_i32 : i32
    %c8_i32_172 = arith.constant 8 : i32
    %313 = arith.muli %312, %c8_i32_172 : i32
    %314 = tpu.assume_multiple %313, 8 : i32
    %315 = arith.index_cast %311 : i32 to index
    %c0_173 = arith.constant 0 : index
    %316 = vector.load %arg12[%315, %c0_173] : memref<64x1024xf32, #tpu.memory_space<vmem>>, vector<8x512xf32>
    %c0_174 = arith.constant 0 : index
    %c0_175 = arith.constant 0 : index
    %317 = vector.load %arg15[%c0_174, %c0_175] : memref<8x128xf32, #tpu.memory_space<vmem>>, vector<8x128xf32>
    %c0_176 = arith.constant 0 : index
    %c0_177 = arith.constant 0 : index
    %318 = vector.load %arg3[%c0_176, %c0_177] : memref<128x512xf32, #tpu.memory_space<vmem>>, vector<128x512xf32>
    %cst_178 = arith.constant dense<0.000000e+00> : vector<8x512xf32>
    %319 = tpu.matmul %317, %318, %cst_178 {dimension_numbers = #tpu.dot_dimension_numbers<[1], [0], [0], [1], [0, 0, 1, 1], [], []>} : vector<8x128xf32>, vector<128x512xf32>, vector<8x512xf32> -> vector<8x512xf32>
    %320 = arith.addf %316, %319 : vector<8x512xf32>
    %321 = vector.extract_strided_slice %320 {offsets = [0, 0], sizes = [8, 384], strides = [1, 1]} : vector<8x512xf32> to vector<8x384xf32>
    %322 = arith.negf %321 : vector<8x384xf32>
    %323 = math.exp %322 : vector<8x384xf32>
    %cst_179 = arith.constant 1.000000e+00 : f32
    %324 = vector.broadcast %cst_179 : f32 to vector<8x384xf32>
    %325 = arith.addf %324, %323 : vector<8x384xf32>
    %326 = arith.divf %324, %325 : vector<8x384xf32>
    %327 = vector.extract_strided_slice %320 {offsets = [0, 384], sizes = [8, 128], strides = [1, 1]} : vector<8x512xf32> to vector<8x128xf32>
    %328 = math.tanh %327 : vector<8x128xf32>
    %329 = vector.extract_strided_slice %326 {offsets = [0, 128], sizes = [8, 128], strides = [1, 1]} : vector<8x384xf32> to vector<8x128xf32>
    %c0_180 = arith.constant 0 : index
    %c0_181 = arith.constant 0 : index
    %330 = vector.load %arg16[%c0_180, %c0_181] : memref<8x128xf32, #tpu.memory_space<vmem>>, vector<8x128xf32>
    %331 = arith.mulf %329, %330 : vector<8x128xf32>
    %332 = vector.extract_strided_slice %326 {offsets = [0, 0], sizes = [8, 128], strides = [1, 1]} : vector<8x384xf32> to vector<8x128xf32>
    %333 = arith.mulf %332, %328 : vector<8x128xf32>
    %334 = arith.addf %331, %333 : vector<8x128xf32>
    %335 = vector.extract_strided_slice %326 {offsets = [0, 256], sizes = [8, 128], strides = [1, 1]} : vector<8x384xf32> to vector<8x128xf32>
    %336 = math.tanh %334 : vector<8x128xf32>
    %337 = arith.mulf %335, %336 : vector<8x128xf32>
    %c0_182 = arith.constant 0 : index
    %c0_183 = arith.constant 0 : index
    %338 = vector.load %arg16[%c0_182, %c0_183] : memref<8x128xf32, #tpu.memory_space<vmem>>, vector<8x128xf32>
    tpu.vector_store %arg16[%c0_182, %c0_183], %334 {strides = array<i32>} : memref<8x128xf32, #tpu.memory_space<vmem>>, vector<8x128xf32>,
    %c0_184 = arith.constant 0 : index
    %c0_185 = arith.constant 0 : index
    %339 = vector.load %arg15[%c0_184, %c0_185] : memref<8x128xf32, #tpu.memory_space<vmem>>, vector<8x128xf32>
    tpu.vector_store %arg15[%c0_184, %c0_185], %337 {strides = array<i32>} : memref<8x128xf32, #tpu.memory_space<vmem>>, vector<8x128xf32>,
    %340 = arith.index_cast %311 : i32 to index
    %c0_186 = arith.constant 0 : index
    %341 = vector.load %arg13[%340, %c0_186] : memref<64x256xf32, #tpu.memory_space<vmem>>, vector<8x128xf32>
    tpu.vector_store %arg13[%340, %c0_186], %337 {strides = array<i32>} : memref<64x256xf32, #tpu.memory_space<vmem>>, vector<8x128xf32>,
    %342 = arith.index_cast %314 : i32 to index
    %c512_187 = arith.constant 512 : index
    %343 = vector.load %arg12[%342, %c512_187] : memref<64x1024xf32, #tpu.memory_space<vmem>>, vector<8x512xf32>
    %c0_188 = arith.constant 0 : index
    %c0_189 = arith.constant 0 : index
    %344 = vector.load %arg17[%c0_188, %c0_189] : memref<8x128xf32, #tpu.memory_space<vmem>>, vector<8x128xf32>
    %c0_190 = arith.constant 0 : index
    %c0_191 = arith.constant 0 : index
    %345 = vector.load %arg4[%c0_190, %c0_191] : memref<128x512xf32, #tpu.memory_space<vmem>>, vector<128x512xf32>
    %cst_192 = arith.constant dense<0.000000e+00> : vector<8x512xf32>
    %346 = tpu.matmul %344, %345, %cst_192 {dimension_numbers = #tpu.dot_dimension_numbers<[1], [0], [0], [1], [0, 0, 1, 1], [], []>} : vector<8x128xf32>, vector<128x512xf32>, vector<8x512xf32> -> vector<8x512xf32>
    %347 = arith.addf %343, %346 : vector<8x512xf32>
    %348 = vector.extract_strided_slice %347 {offsets = [0, 0], sizes = [8, 384], strides = [1, 1]} : vector<8x512xf32> to vector<8x384xf32>
    %349 = arith.negf %348 : vector<8x384xf32>
    %350 = math.exp %349 : vector<8x384xf32>
    %cst_193 = arith.constant 1.000000e+00 : f32
    %351 = vector.broadcast %cst_193 : f32 to vector<8x384xf32>
    %352 = arith.addf %351, %350 : vector<8x384xf32>
    %353 = arith.divf %351, %352 : vector<8x384xf32>
    %354 = vector.extract_strided_slice %347 {offsets = [0, 384], sizes = [8, 128], strides = [1, 1]} : vector<8x512xf32> to vector<8x128xf32>
    %355 = math.tanh %354 : vector<8x128xf32>
    %356 = vector.extract_strided_slice %353 {offsets = [0, 128], sizes = [8, 128], strides = [1, 1]} : vector<8x384xf32> to vector<8x128xf32>
    %c0_194 = arith.constant 0 : index
    %c0_195 = arith.constant 0 : index
    %357 = vector.load %arg18[%c0_194, %c0_195] : memref<8x128xf32, #tpu.memory_space<vmem>>, vector<8x128xf32>
    %358 = arith.mulf %356, %357 : vector<8x128xf32>
    %359 = vector.extract_strided_slice %353 {offsets = [0, 0], sizes = [8, 128], strides = [1, 1]} : vector<8x384xf32> to vector<8x128xf32>
    %360 = arith.mulf %359, %355 : vector<8x128xf32>
    %361 = arith.addf %358, %360 : vector<8x128xf32>
    %362 = vector.extract_strided_slice %353 {offsets = [0, 256], sizes = [8, 128], strides = [1, 1]} : vector<8x384xf32> to vector<8x128xf32>
    %363 = math.tanh %361 : vector<8x128xf32>
    %364 = arith.mulf %362, %363 : vector<8x128xf32>
    %c0_196 = arith.constant 0 : index
    %c0_197 = arith.constant 0 : index
    %365 = vector.load %arg18[%c0_196, %c0_197] : memref<8x128xf32, #tpu.memory_space<vmem>>, vector<8x128xf32>
    tpu.vector_store %arg18[%c0_196, %c0_197], %361 {strides = array<i32>} : memref<8x128xf32, #tpu.memory_space<vmem>>, vector<8x128xf32>,
    %c0_198 = arith.constant 0 : index
    %c0_199 = arith.constant 0 : index
    %366 = vector.load %arg17[%c0_198, %c0_199] : memref<8x128xf32, #tpu.memory_space<vmem>>, vector<8x128xf32>
    tpu.vector_store %arg17[%c0_198, %c0_199], %364 {strides = array<i32>} : memref<8x128xf32, #tpu.memory_space<vmem>>, vector<8x128xf32>,
    %367 = arith.index_cast %314 : i32 to index
    %c128_200 = arith.constant 128 : index
    %368 = vector.load %arg13[%367, %c128_200] : memref<64x256xf32, #tpu.memory_space<vmem>>, vector<8x128xf32>
    tpu.vector_store %arg13[%367, %c128_200], %364 {strides = array<i32>} : memref<64x256xf32, #tpu.memory_space<vmem>>, vector<8x128xf32>,
    %c6_i32 = arith.constant 6 : i32
    %c8_i32_201 = arith.constant 8 : i32
    %369 = arith.muli %c6_i32, %c8_i32_201 : i32
    %370 = tpu.assume_multiple %369, 8 : i32
    %c7_i32_202 = arith.constant 7 : i32
    %371 = arith.subi %c7_i32_202, %c6_i32 : i32
    %c8_i32_203 = arith.constant 8 : i32
    %372 = arith.muli %371, %c8_i32_203 : i32
    %373 = tpu.assume_multiple %372, 8 : i32
    %374 = arith.index_cast %370 : i32 to index
    %c0_204 = arith.constant 0 : index
    %375 = vector.load %arg12[%374, %c0_204] : memref<64x1024xf32, #tpu.memory_space<vmem>>, vector<8x512xf32>
    %c0_205 = arith.constant 0 : index
    %c0_206 = arith.constant 0 : index
    %376 = vector.load %arg15[%c0_205, %c0_206] : memref<8x128xf32, #tpu.memory_space<vmem>>, vector<8x128xf32>
    %c0_207 = arith.constant 0 : index
    %c0_208 = arith.constant 0 : index
    %377 = vector.load %arg3[%c0_207, %c0_208] : memref<128x512xf32, #tpu.memory_space<vmem>>, vector<128x512xf32>
    %cst_209 = arith.constant dense<0.000000e+00> : vector<8x512xf32>
    %378 = tpu.matmul %376, %377, %cst_209 {dimension_numbers = #tpu.dot_dimension_numbers<[1], [0], [0], [1], [0, 0, 1, 1], [], []>} : vector<8x128xf32>, vector<128x512xf32>, vector<8x512xf32> -> vector<8x512xf32>
    %379 = arith.addf %375, %378 : vector<8x512xf32>
    %380 = vector.extract_strided_slice %379 {offsets = [0, 0], sizes = [8, 384], strides = [1, 1]} : vector<8x512xf32> to vector<8x384xf32>
    %381 = arith.negf %380 : vector<8x384xf32>
    %382 = math.exp %381 : vector<8x384xf32>
    %cst_210 = arith.constant 1.000000e+00 : f32
    %383 = vector.broadcast %cst_210 : f32 to vector<8x384xf32>
    %384 = arith.addf %383, %382 : vector<8x384xf32>
    %385 = arith.divf %383, %384 : vector<8x384xf32>
    %386 = vector.extract_strided_slice %379 {offsets = [0, 384], sizes = [8, 128], strides = [1, 1]} : vector<8x512xf32> to vector<8x128xf32>
    %387 = math.tanh %386 : vector<8x128xf32>
    %388 = vector.extract_strided_slice %385 {offsets = [0, 128], sizes = [8, 128], strides = [1, 1]} : vector<8x384xf32> to vector<8x128xf32>
    %c0_211 = arith.constant 0 : index
    %c0_212 = arith.constant 0 : index
    %389 = vector.load %arg16[%c0_211, %c0_212] : memref<8x128xf32, #tpu.memory_space<vmem>>, vector<8x128xf32>
    %390 = arith.mulf %388, %389 : vector<8x128xf32>
    %391 = vector.extract_strided_slice %385 {offsets = [0, 0], sizes = [8, 128], strides = [1, 1]} : vector<8x384xf32> to vector<8x128xf32>
    %392 = arith.mulf %391, %387 : vector<8x128xf32>
    %393 = arith.addf %390, %392 : vector<8x128xf32>
    %394 = vector.extract_strided_slice %385 {offsets = [0, 256], sizes = [8, 128], strides = [1, 1]} : vector<8x384xf32> to vector<8x128xf32>
    %395 = math.tanh %393 : vector<8x128xf32>
    %396 = arith.mulf %394, %395 : vector<8x128xf32>
    %c0_213 = arith.constant 0 : index
    %c0_214 = arith.constant 0 : index
    %397 = vector.load %arg16[%c0_213, %c0_214] : memref<8x128xf32, #tpu.memory_space<vmem>>, vector<8x128xf32>
    tpu.vector_store %arg16[%c0_213, %c0_214], %393 {strides = array<i32>} : memref<8x128xf32, #tpu.memory_space<vmem>>, vector<8x128xf32>,
    %c0_215 = arith.constant 0 : index
    %c0_216 = arith.constant 0 : index
    %398 = vector.load %arg15[%c0_215, %c0_216] : memref<8x128xf32, #tpu.memory_space<vmem>>, vector<8x128xf32>
    tpu.vector_store %arg15[%c0_215, %c0_216], %396 {strides = array<i32>} : memref<8x128xf32, #tpu.memory_space<vmem>>, vector<8x128xf32>,
    %399 = arith.index_cast %370 : i32 to index
    %c0_217 = arith.constant 0 : index
    %400 = vector.load %arg13[%399, %c0_217] : memref<64x256xf32, #tpu.memory_space<vmem>>, vector<8x128xf32>
    tpu.vector_store %arg13[%399, %c0_217], %396 {strides = array<i32>} : memref<64x256xf32, #tpu.memory_space<vmem>>, vector<8x128xf32>,
    %401 = arith.index_cast %373 : i32 to index
    %c512_218 = arith.constant 512 : index
    %402 = vector.load %arg12[%401, %c512_218] : memref<64x1024xf32, #tpu.memory_space<vmem>>, vector<8x512xf32>
    %c0_219 = arith.constant 0 : index
    %c0_220 = arith.constant 0 : index
    %403 = vector.load %arg17[%c0_219, %c0_220] : memref<8x128xf32, #tpu.memory_space<vmem>>, vector<8x128xf32>
    %c0_221 = arith.constant 0 : index
    %c0_222 = arith.constant 0 : index
    %404 = vector.load %arg4[%c0_221, %c0_222] : memref<128x512xf32, #tpu.memory_space<vmem>>, vector<128x512xf32>
    %cst_223 = arith.constant dense<0.000000e+00> : vector<8x512xf32>
    %405 = tpu.matmul %403, %404, %cst_223 {dimension_numbers = #tpu.dot_dimension_numbers<[1], [0], [0], [1], [0, 0, 1, 1], [], []>} : vector<8x128xf32>, vector<128x512xf32>, vector<8x512xf32> -> vector<8x512xf32>
    %406 = arith.addf %402, %405 : vector<8x512xf32>
    %407 = vector.extract_strided_slice %406 {offsets = [0, 0], sizes = [8, 384], strides = [1, 1]} : vector<8x512xf32> to vector<8x384xf32>
    %408 = arith.negf %407 : vector<8x384xf32>
    %409 = math.exp %408 : vector<8x384xf32>
    %cst_224 = arith.constant 1.000000e+00 : f32
    %410 = vector.broadcast %cst_224 : f32 to vector<8x384xf32>
    %411 = arith.addf %410, %409 : vector<8x384xf32>
    %412 = arith.divf %410, %411 : vector<8x384xf32>
    %413 = vector.extract_strided_slice %406 {offsets = [0, 384], sizes = [8, 128], strides = [1, 1]} : vector<8x512xf32> to vector<8x128xf32>
    %414 = math.tanh %413 : vector<8x128xf32>
    %415 = vector.extract_strided_slice %412 {offsets = [0, 128], sizes = [8, 128], strides = [1, 1]} : vector<8x384xf32> to vector<8x128xf32>
    %c0_225 = arith.constant 0 : index
    %c0_226 = arith.constant 0 : index
    %416 = vector.load %arg18[%c0_225, %c0_226] : memref<8x128xf32, #tpu.memory_space<vmem>>, vector<8x128xf32>
    %417 = arith.mulf %415, %416 : vector<8x128xf32>
    %418 = vector.extract_strided_slice %412 {offsets = [0, 0], sizes = [8, 128], strides = [1, 1]} : vector<8x384xf32> to vector<8x128xf32>
    %419 = arith.mulf %418, %414 : vector<8x128xf32>
    %420 = arith.addf %417, %419 : vector<8x128xf32>
    %421 = vector.extract_strided_slice %412 {offsets = [0, 256], sizes = [8, 128], strides = [1, 1]} : vector<8x384xf32> to vector<8x128xf32>
    %422 = math.tanh %420 : vector<8x128xf32>
    %423 = arith.mulf %421, %422 : vector<8x128xf32>
    %c0_227 = arith.constant 0 : index
    %c0_228 = arith.constant 0 : index
    %424 = vector.load %arg18[%c0_227, %c0_228] : memref<8x128xf32, #tpu.memory_space<vmem>>, vector<8x128xf32>
    tpu.vector_store %arg18[%c0_227, %c0_228], %420 {strides = array<i32>} : memref<8x128xf32, #tpu.memory_space<vmem>>, vector<8x128xf32>,
    %c0_229 = arith.constant 0 : index
    %c0_230 = arith.constant 0 : index
    %425 = vector.load %arg17[%c0_229, %c0_230] : memref<8x128xf32, #tpu.memory_space<vmem>>, vector<8x128xf32>
    tpu.vector_store %arg17[%c0_229, %c0_230], %423 {strides = array<i32>} : memref<8x128xf32, #tpu.memory_space<vmem>>, vector<8x128xf32>,
    %426 = arith.index_cast %373 : i32 to index
    %c128_231 = arith.constant 128 : index
    %427 = vector.load %arg13[%426, %c128_231] : memref<64x256xf32, #tpu.memory_space<vmem>>, vector<8x128xf32>
    tpu.vector_store %arg13[%426, %c128_231], %423 {strides = array<i32>} : memref<64x256xf32, #tpu.memory_space<vmem>>, vector<8x128xf32>,
    %c7_i32_232 = arith.constant 7 : i32
    %c8_i32_233 = arith.constant 8 : i32
    %428 = arith.muli %c7_i32_232, %c8_i32_233 : i32
    %429 = tpu.assume_multiple %428, 8 : i32
    %c7_i32_234 = arith.constant 7 : i32
    %430 = arith.subi %c7_i32_234, %c7_i32_232 : i32
    %c8_i32_235 = arith.constant 8 : i32
    %431 = arith.muli %430, %c8_i32_235 : i32
    %432 = tpu.assume_multiple %431, 8 : i32
    %433 = arith.index_cast %429 : i32 to index
    %c0_236 = arith.constant 0 : index
    %434 = vector.load %arg12[%433, %c0_236] : memref<64x1024xf32, #tpu.memory_space<vmem>>, vector<8x512xf32>
    %c0_237 = arith.constant 0 : index
    %c0_238 = arith.constant 0 : index
    %435 = vector.load %arg15[%c0_237, %c0_238] : memref<8x128xf32, #tpu.memory_space<vmem>>, vector<8x128xf32>
    %c0_239 = arith.constant 0 : index
    %c0_240 = arith.constant 0 : index
    %436 = vector.load %arg3[%c0_239, %c0_240] : memref<128x512xf32, #tpu.memory_space<vmem>>, vector<128x512xf32>
    %cst_241 = arith.constant dense<0.000000e+00> : vector<8x512xf32>
    %437 = tpu.matmul %435, %436, %cst_241 {dimension_numbers = #tpu.dot_dimension_numbers<[1], [0], [0], [1], [0, 0, 1, 1], [], []>} : vector<8x128xf32>, vector<128x512xf32>, vector<8x512xf32> -> vector<8x512xf32>
    %438 = arith.addf %434, %437 : vector<8x512xf32>
    %439 = vector.extract_strided_slice %438 {offsets = [0, 0], sizes = [8, 384], strides = [1, 1]} : vector<8x512xf32> to vector<8x384xf32>
    %440 = arith.negf %439 : vector<8x384xf32>
    %441 = math.exp %440 : vector<8x384xf32>
    %cst_242 = arith.constant 1.000000e+00 : f32
    %442 = vector.broadcast %cst_242 : f32 to vector<8x384xf32>
    %443 = arith.addf %442, %441 : vector<8x384xf32>
    %444 = arith.divf %442, %443 : vector<8x384xf32>
    %445 = vector.extract_strided_slice %438 {offsets = [0, 384], sizes = [8, 128], strides = [1, 1]} : vector<8x512xf32> to vector<8x128xf32>
    %446 = math.tanh %445 : vector<8x128xf32>
    %447 = vector.extract_strided_slice %444 {offsets = [0, 128], sizes = [8, 128], strides = [1, 1]} : vector<8x384xf32> to vector<8x128xf32>
    %c0_243 = arith.constant 0 : index
    %c0_244 = arith.constant 0 : index
    %448 = vector.load %arg16[%c0_243, %c0_244] : memref<8x128xf32, #tpu.memory_space<vmem>>, vector<8x128xf32>
    %449 = arith.mulf %447, %448 : vector<8x128xf32>
    %450 = vector.extract_strided_slice %444 {offsets = [0, 0], sizes = [8, 128], strides = [1, 1]} : vector<8x384xf32> to vector<8x128xf32>
    %451 = arith.mulf %450, %446 : vector<8x128xf32>
    %452 = arith.addf %449, %451 : vector<8x128xf32>
    %453 = vector.extract_strided_slice %444 {offsets = [0, 256], sizes = [8, 128], strides = [1, 1]} : vector<8x384xf32> to vector<8x128xf32>
    %454 = math.tanh %452 : vector<8x128xf32>
    %455 = arith.mulf %453, %454 : vector<8x128xf32>
    %c0_245 = arith.constant 0 : index
    %c0_246 = arith.constant 0 : index
    %456 = vector.load %arg16[%c0_245, %c0_246] : memref<8x128xf32, #tpu.memory_space<vmem>>, vector<8x128xf32>
    tpu.vector_store %arg16[%c0_245, %c0_246], %452 {strides = array<i32>} : memref<8x128xf32, #tpu.memory_space<vmem>>, vector<8x128xf32>,
    %c0_247 = arith.constant 0 : index
    %c0_248 = arith.constant 0 : index
    %457 = vector.load %arg15[%c0_247, %c0_248] : memref<8x128xf32, #tpu.memory_space<vmem>>, vector<8x128xf32>
    tpu.vector_store %arg15[%c0_247, %c0_248], %455 {strides = array<i32>} : memref<8x128xf32, #tpu.memory_space<vmem>>, vector<8x128xf32>,
    %458 = arith.index_cast %429 : i32 to index
    %c0_249 = arith.constant 0 : index
    %459 = vector.load %arg13[%458, %c0_249] : memref<64x256xf32, #tpu.memory_space<vmem>>, vector<8x128xf32>
    tpu.vector_store %arg13[%458, %c0_249], %455 {strides = array<i32>} : memref<64x256xf32, #tpu.memory_space<vmem>>, vector<8x128xf32>,
    %460 = arith.index_cast %432 : i32 to index
    %c512_250 = arith.constant 512 : index
    %461 = vector.load %arg12[%460, %c512_250] : memref<64x1024xf32, #tpu.memory_space<vmem>>, vector<8x512xf32>
    %c0_251 = arith.constant 0 : index
    %c0_252 = arith.constant 0 : index
    %462 = vector.load %arg17[%c0_251, %c0_252] : memref<8x128xf32, #tpu.memory_space<vmem>>, vector<8x128xf32>
    %c0_253 = arith.constant 0 : index
    %c0_254 = arith.constant 0 : index
    %463 = vector.load %arg4[%c0_253, %c0_254] : memref<128x512xf32, #tpu.memory_space<vmem>>, vector<128x512xf32>
    %cst_255 = arith.constant dense<0.000000e+00> : vector<8x512xf32>
    %464 = tpu.matmul %462, %463, %cst_255 {dimension_numbers = #tpu.dot_dimension_numbers<[1], [0], [0], [1], [0, 0, 1, 1], [], []>} : vector<8x128xf32>, vector<128x512xf32>, vector<8x512xf32> -> vector<8x512xf32>
    %465 = arith.addf %461, %464 : vector<8x512xf32>
    %466 = vector.extract_strided_slice %465 {offsets = [0, 0], sizes = [8, 384], strides = [1, 1]} : vector<8x512xf32> to vector<8x384xf32>
    %467 = arith.negf %466 : vector<8x384xf32>
    %468 = math.exp %467 : vector<8x384xf32>
    %cst_256 = arith.constant 1.000000e+00 : f32
    %469 = vector.broadcast %cst_256 : f32 to vector<8x384xf32>
    %470 = arith.addf %469, %468 : vector<8x384xf32>
    %471 = arith.divf %469, %470 : vector<8x384xf32>
    %472 = vector.extract_strided_slice %465 {offsets = [0, 384], sizes = [8, 128], strides = [1, 1]} : vector<8x512xf32> to vector<8x128xf32>
    %473 = math.tanh %472 : vector<8x128xf32>
    %474 = vector.extract_strided_slice %471 {offsets = [0, 128], sizes = [8, 128], strides = [1, 1]} : vector<8x384xf32> to vector<8x128xf32>
    %c0_257 = arith.constant 0 : index
    %c0_258 = arith.constant 0 : index
    %475 = vector.load %arg18[%c0_257, %c0_258] : memref<8x128xf32, #tpu.memory_space<vmem>>, vector<8x128xf32>
    %476 = arith.mulf %474, %475 : vector<8x128xf32>
    %477 = vector.extract_strided_slice %471 {offsets = [0, 0], sizes = [8, 128], strides = [1, 1]} : vector<8x384xf32> to vector<8x128xf32>
    %478 = arith.mulf %477, %473 : vector<8x128xf32>
    %479 = arith.addf %476, %478 : vector<8x128xf32>
    %480 = vector.extract_strided_slice %471 {offsets = [0, 256], sizes = [8, 128], strides = [1, 1]} : vector<8x384xf32> to vector<8x128xf32>
    %481 = math.tanh %479 : vector<8x128xf32>
    %482 = arith.mulf %480, %481 : vector<8x128xf32>
    %c0_259 = arith.constant 0 : index
    %c0_260 = arith.constant 0 : index
    %483 = vector.load %arg18[%c0_259, %c0_260] : memref<8x128xf32, #tpu.memory_space<vmem>>, vector<8x128xf32>
    tpu.vector_store %arg18[%c0_259, %c0_260], %479 {strides = array<i32>} : memref<8x128xf32, #tpu.memory_space<vmem>>, vector<8x128xf32>,
    %c0_261 = arith.constant 0 : index
    %c0_262 = arith.constant 0 : index
    %484 = vector.load %arg17[%c0_261, %c0_262] : memref<8x128xf32, #tpu.memory_space<vmem>>, vector<8x128xf32>
    tpu.vector_store %arg17[%c0_261, %c0_262], %482 {strides = array<i32>} : memref<8x128xf32, #tpu.memory_space<vmem>>, vector<8x128xf32>,
    %485 = arith.index_cast %432 : i32 to index
    %c128_263 = arith.constant 128 : index
    %486 = vector.load %arg13[%485, %c128_263] : memref<64x256xf32, #tpu.memory_space<vmem>>, vector<8x128xf32>
    tpu.vector_store %arg13[%485, %c128_263], %482 {strides = array<i32>} : memref<64x256xf32, #tpu.memory_space<vmem>>, vector<8x128xf32>,
    %c8_i32_264 = arith.constant 8 : i32
    %c0_265 = arith.constant 0 : index
    %c0_266 = arith.constant 0 : index
    %487 = vector.load %arg13[%c0_265, %c0_266] : memref<64x256xf32, #tpu.memory_space<vmem>>, vector<64x256xf32>
    %c0_267 = arith.constant 0 : index
    %c0_268 = arith.constant 0 : index
    %488 = vector.load %arg5[%c0_267, %c0_268] : memref<256x1024xf32, #tpu.memory_space<vmem>>, vector<256x1024xf32>
    %cst_269 = arith.constant dense<0.000000e+00> : vector<64x1024xf32>
    %489 = tpu.matmul %487, %488, %cst_269 {dimension_numbers = #tpu.dot_dimension_numbers<[1], [0], [0], [1], [0, 0, 1, 1], [], []>} : vector<64x256xf32>, vector<256x1024xf32>, vector<64x1024xf32> -> vector<64x1024xf32>
    %c0_270 = arith.constant 0 : index
    %c0_271 = arith.constant 0 : index
    %490 = vector.load %arg6[%c0_270, %c0_271] : memref<1x1024xf32, #tpu.memory_space<vmem>>, vector<1x1024xf32>
    %491 = vector.broadcast %490 : vector<1x1024xf32> to vector<64x1024xf32>
    %492 = arith.addf %489, %491 : vector<64x1024xf32>
    %c0_272 = arith.constant 0 : index
    %c0_273 = arith.constant 0 : index
    %493 = vector.load %arg12[%c0_272, %c0_273] : memref<64x1024xf32, #tpu.memory_space<vmem>>, vector<64x1024xf32>
    tpu.vector_store %arg12[%c0_272, %c0_273], %492 {strides = array<i32>} : memref<64x1024xf32, #tpu.memory_space<vmem>>, vector<64x1024xf32>,
    %cst_274 = arith.constant 0.000000e+00 : f32
    %494 = vector.broadcast %cst_274 : f32 to vector<8x128xf32>
    %c0_275 = arith.constant 0 : index
    %c0_276 = arith.constant 0 : index
    %495 = vector.load %arg15[%c0_275, %c0_276] : memref<8x128xf32, #tpu.memory_space<vmem>>, vector<8x128xf32>
    tpu.vector_store %arg15[%c0_275, %c0_276], %494 {strides = array<i32>} : memref<8x128xf32, #tpu.memory_space<vmem>>, vector<8x128xf32>,
    %cst_277 = arith.constant 0.000000e+00 : f32
    %496 = vector.broadcast %cst_277 : f32 to vector<8x128xf32>
    %c0_278 = arith.constant 0 : index
    %c0_279 = arith.constant 0 : index
    %497 = vector.load %arg16[%c0_278, %c0_279] : memref<8x128xf32, #tpu.memory_space<vmem>>, vector<8x128xf32>
    tpu.vector_store %arg16[%c0_278, %c0_279], %496 {strides = array<i32>} : memref<8x128xf32, #tpu.memory_space<vmem>>, vector<8x128xf32>,
    %cst_280 = arith.constant 0.000000e+00 : f32
    %498 = vector.broadcast %cst_280 : f32 to vector<8x128xf32>
    %c0_281 = arith.constant 0 : index
    %c0_282 = arith.constant 0 : index
    %499 = vector.load %arg17[%c0_281, %c0_282] : memref<8x128xf32, #tpu.memory_space<vmem>>, vector<8x128xf32>
    tpu.vector_store %arg17[%c0_281, %c0_282], %498 {strides = array<i32>} : memref<8x128xf32, #tpu.memory_space<vmem>>, vector<8x128xf32>,
    %cst_283 = arith.constant 0.000000e+00 : f32
    %500 = vector.broadcast %cst_283 : f32 to vector<8x128xf32>
    %c0_284 = arith.constant 0 : index
    %c0_285 = arith.constant 0 : index
    %501 = vector.load %arg18[%c0_284, %c0_285] : memref<8x128xf32, #tpu.memory_space<vmem>>, vector<8x128xf32>
    tpu.vector_store %arg18[%c0_284, %c0_285], %500 {strides = array<i32>} : memref<8x128xf32, #tpu.memory_space<vmem>>, vector<8x128xf32>,
    %c0_i32_286 = arith.constant 0 : i32
    %c8_i32_287 = arith.constant 8 : i32
    %502 = arith.muli %c0_i32_286, %c8_i32_287 : i32
    %503 = tpu.assume_multiple %502, 8 : i32
    %c7_i32_288 = arith.constant 7 : i32
    %504 = arith.subi %c7_i32_288, %c0_i32_286 : i32
    %c8_i32_289 = arith.constant 8 : i32
    %505 = arith.muli %504, %c8_i32_289 : i32
    %506 = tpu.assume_multiple %505, 8 : i32
    %507 = arith.index_cast %503 : i32 to index
    %c0_290 = arith.constant 0 : index
    %508 = vector.load %arg12[%507, %c0_290] : memref<64x1024xf32, #tpu.memory_space<vmem>>, vector<8x512xf32>
    %c0_291 = arith.constant 0 : index
    %c0_292 = arith.constant 0 : index
    %509 = vector.load %arg15[%c0_291, %c0_292] : memref<8x128xf32, #tpu.memory_space<vmem>>, vector<8x128xf32>
    %c0_293 = arith.constant 0 : index
    %c0_294 = arith.constant 0 : index
    %510 = vector.load %arg7[%c0_293, %c0_294] : memref<128x512xf32, #tpu.memory_space<vmem>>, vector<128x512xf32>
    %cst_295 = arith.constant dense<0.000000e+00> : vector<8x512xf32>
    %511 = tpu.matmul %509, %510, %cst_295 {dimension_numbers = #tpu.dot_dimension_numbers<[1], [0], [0], [1], [0, 0, 1, 1], [], []>} : vector<8x128xf32>, vector<128x512xf32>, vector<8x512xf32> -> vector<8x512xf32>
    %512 = arith.addf %508, %511 : vector<8x512xf32>
    %513 = vector.extract_strided_slice %512 {offsets = [0, 0], sizes = [8, 384], strides = [1, 1]} : vector<8x512xf32> to vector<8x384xf32>
    %514 = arith.negf %513 : vector<8x384xf32>
    %515 = math.exp %514 : vector<8x384xf32>
    %cst_296 = arith.constant 1.000000e+00 : f32
    %516 = vector.broadcast %cst_296 : f32 to vector<8x384xf32>
    %517 = arith.addf %516, %515 : vector<8x384xf32>
    %518 = arith.divf %516, %517 : vector<8x384xf32>
    %519 = vector.extract_strided_slice %512 {offsets = [0, 384], sizes = [8, 128], strides = [1, 1]} : vector<8x512xf32> to vector<8x128xf32>
    %520 = math.tanh %519 : vector<8x128xf32>
    %521 = vector.extract_strided_slice %518 {offsets = [0, 128], sizes = [8, 128], strides = [1, 1]} : vector<8x384xf32> to vector<8x128xf32>
    %c0_297 = arith.constant 0 : index
    %c0_298 = arith.constant 0 : index
    %522 = vector.load %arg16[%c0_297, %c0_298] : memref<8x128xf32, #tpu.memory_space<vmem>>, vector<8x128xf32>
    %523 = arith.mulf %521, %522 : vector<8x128xf32>
    %524 = vector.extract_strided_slice %518 {offsets = [0, 0], sizes = [8, 128], strides = [1, 1]} : vector<8x384xf32> to vector<8x128xf32>
    %525 = arith.mulf %524, %520 : vector<8x128xf32>
    %526 = arith.addf %523, %525 : vector<8x128xf32>
    %527 = vector.extract_strided_slice %518 {offsets = [0, 256], sizes = [8, 128], strides = [1, 1]} : vector<8x384xf32> to vector<8x128xf32>
    %528 = math.tanh %526 : vector<8x128xf32>
    %529 = arith.mulf %527, %528 : vector<8x128xf32>
    %c0_299 = arith.constant 0 : index
    %c0_300 = arith.constant 0 : index
    %530 = vector.load %arg16[%c0_299, %c0_300] : memref<8x128xf32, #tpu.memory_space<vmem>>, vector<8x128xf32>
    tpu.vector_store %arg16[%c0_299, %c0_300], %526 {strides = array<i32>} : memref<8x128xf32, #tpu.memory_space<vmem>>, vector<8x128xf32>,
    %c0_301 = arith.constant 0 : index
    %c0_302 = arith.constant 0 : index
    %531 = vector.load %arg15[%c0_301, %c0_302] : memref<8x128xf32, #tpu.memory_space<vmem>>, vector<8x128xf32>
    tpu.vector_store %arg15[%c0_301, %c0_302], %529 {strides = array<i32>} : memref<8x128xf32, #tpu.memory_space<vmem>>, vector<8x128xf32>,
    %532 = arith.index_cast %503 : i32 to index
    %c0_303 = arith.constant 0 : index
    %533 = vector.load %arg14[%532, %c0_303] : memref<64x256xf32, #tpu.memory_space<vmem>>, vector<8x128xf32>
    tpu.vector_store %arg14[%532, %c0_303], %529 {strides = array<i32>} : memref<64x256xf32, #tpu.memory_space<vmem>>, vector<8x128xf32>,
    %534 = arith.index_cast %506 : i32 to index
    %c512_304 = arith.constant 512 : index
    %535 = vector.load %arg12[%534, %c512_304] : memref<64x1024xf32, #tpu.memory_space<vmem>>, vector<8x512xf32>
    %c0_305 = arith.constant 0 : index
    %c0_306 = arith.constant 0 : index
    %536 = vector.load %arg17[%c0_305, %c0_306] : memref<8x128xf32, #tpu.memory_space<vmem>>, vector<8x128xf32>
    %c0_307 = arith.constant 0 : index
    %c0_308 = arith.constant 0 : index
    %537 = vector.load %arg8[%c0_307, %c0_308] : memref<128x512xf32, #tpu.memory_space<vmem>>, vector<128x512xf32>
    %cst_309 = arith.constant dense<0.000000e+00> : vector<8x512xf32>
    %538 = tpu.matmul %536, %537, %cst_309 {dimension_numbers = #tpu.dot_dimension_numbers<[1], [0], [0], [1], [0, 0, 1, 1], [], []>} : vector<8x128xf32>, vector<128x512xf32>, vector<8x512xf32> -> vector<8x512xf32>
    %539 = arith.addf %535, %538 : vector<8x512xf32>
    %540 = vector.extract_strided_slice %539 {offsets = [0, 0], sizes = [8, 384], strides = [1, 1]} : vector<8x512xf32> to vector<8x384xf32>
    %541 = arith.negf %540 : vector<8x384xf32>
    %542 = math.exp %541 : vector<8x384xf32>
    %cst_310 = arith.constant 1.000000e+00 : f32
    %543 = vector.broadcast %cst_310 : f32 to vector<8x384xf32>
    %544 = arith.addf %543, %542 : vector<8x384xf32>
    %545 = arith.divf %543, %544 : vector<8x384xf32>
    %546 = vector.extract_strided_slice %539 {offsets = [0, 384], sizes = [8, 128], strides = [1, 1]} : vector<8x512xf32> to vector<8x128xf32>
    %547 = math.tanh %546 : vector<8x128xf32>
    %548 = vector.extract_strided_slice %545 {offsets = [0, 128], sizes = [8, 128], strides = [1, 1]} : vector<8x384xf32> to vector<8x128xf32>
    %c0_311 = arith.constant 0 : index
    %c0_312 = arith.constant 0 : index
    %549 = vector.load %arg18[%c0_311, %c0_312] : memref<8x128xf32, #tpu.memory_space<vmem>>, vector<8x128xf32>
    %550 = arith.mulf %548, %549 : vector<8x128xf32>
    %551 = vector.extract_strided_slice %545 {offsets = [0, 0], sizes = [8, 128], strides = [1, 1]} : vector<8x384xf32> to vector<8x128xf32>
    %552 = arith.mulf %551, %547 : vector<8x128xf32>
    %553 = arith.addf %550, %552 : vector<8x128xf32>
    %554 = vector.extract_strided_slice %545 {offsets = [0, 256], sizes = [8, 128], strides = [1, 1]} : vector<8x384xf32> to vector<8x128xf32>
    %555 = math.tanh %553 : vector<8x128xf32>
    %556 = arith.mulf %554, %555 : vector<8x128xf32>
    %c0_313 = arith.constant 0 : index
    %c0_314 = arith.constant 0 : index
    %557 = vector.load %arg18[%c0_313, %c0_314] : memref<8x128xf32, #tpu.memory_space<vmem>>, vector<8x128xf32>
    tpu.vector_store %arg18[%c0_313, %c0_314], %553 {strides = array<i32>} : memref<8x128xf32, #tpu.memory_space<vmem>>, vector<8x128xf32>,
    %c0_315 = arith.constant 0 : index
    %c0_316 = arith.constant 0 : index
    %558 = vector.load %arg17[%c0_315, %c0_316] : memref<8x128xf32, #tpu.memory_space<vmem>>, vector<8x128xf32>
    tpu.vector_store %arg17[%c0_315, %c0_316], %556 {strides = array<i32>} : memref<8x128xf32, #tpu.memory_space<vmem>>, vector<8x128xf32>,
    %559 = arith.index_cast %506 : i32 to index
    %c128_317 = arith.constant 128 : index
    %560 = vector.load %arg14[%559, %c128_317] : memref<64x256xf32, #tpu.memory_space<vmem>>, vector<8x128xf32>
    tpu.vector_store %arg14[%559, %c128_317], %556 {strides = array<i32>} : memref<64x256xf32, #tpu.memory_space<vmem>>, vector<8x128xf32>,
    %c1_i32_318 = arith.constant 1 : i32
    %c8_i32_319 = arith.constant 8 : i32
    %561 = arith.muli %c1_i32_318, %c8_i32_319 : i32
    %562 = tpu.assume_multiple %561, 8 : i32
    %c7_i32_320 = arith.constant 7 : i32
    %563 = arith.subi %c7_i32_320, %c1_i32_318 : i32
    %c8_i32_321 = arith.constant 8 : i32
    %564 = arith.muli %563, %c8_i32_321 : i32
    %565 = tpu.assume_multiple %564, 8 : i32
    %566 = arith.index_cast %562 : i32 to index
    %c0_322 = arith.constant 0 : index
    %567 = vector.load %arg12[%566, %c0_322] : memref<64x1024xf32, #tpu.memory_space<vmem>>, vector<8x512xf32>
    %c0_323 = arith.constant 0 : index
    %c0_324 = arith.constant 0 : index
    %568 = vector.load %arg15[%c0_323, %c0_324] : memref<8x128xf32, #tpu.memory_space<vmem>>, vector<8x128xf32>
    %c0_325 = arith.constant 0 : index
    %c0_326 = arith.constant 0 : index
    %569 = vector.load %arg7[%c0_325, %c0_326] : memref<128x512xf32, #tpu.memory_space<vmem>>, vector<128x512xf32>
    %cst_327 = arith.constant dense<0.000000e+00> : vector<8x512xf32>
    %570 = tpu.matmul %568, %569, %cst_327 {dimension_numbers = #tpu.dot_dimension_numbers<[1], [0], [0], [1], [0, 0, 1, 1], [], []>} : vector<8x128xf32>, vector<128x512xf32>, vector<8x512xf32> -> vector<8x512xf32>
    %571 = arith.addf %567, %570 : vector<8x512xf32>
    %572 = vector.extract_strided_slice %571 {offsets = [0, 0], sizes = [8, 384], strides = [1, 1]} : vector<8x512xf32> to vector<8x384xf32>
    %573 = arith.negf %572 : vector<8x384xf32>
    %574 = math.exp %573 : vector<8x384xf32>
    %cst_328 = arith.constant 1.000000e+00 : f32
    %575 = vector.broadcast %cst_328 : f32 to vector<8x384xf32>
    %576 = arith.addf %575, %574 : vector<8x384xf32>
    %577 = arith.divf %575, %576 : vector<8x384xf32>
    %578 = vector.extract_strided_slice %571 {offsets = [0, 384], sizes = [8, 128], strides = [1, 1]} : vector<8x512xf32> to vector<8x128xf32>
    %579 = math.tanh %578 : vector<8x128xf32>
    %580 = vector.extract_strided_slice %577 {offsets = [0, 128], sizes = [8, 128], strides = [1, 1]} : vector<8x384xf32> to vector<8x128xf32>
    %c0_329 = arith.constant 0 : index
    %c0_330 = arith.constant 0 : index
    %581 = vector.load %arg16[%c0_329, %c0_330] : memref<8x128xf32, #tpu.memory_space<vmem>>, vector<8x128xf32>
    %582 = arith.mulf %580, %581 : vector<8x128xf32>
    %583 = vector.extract_strided_slice %577 {offsets = [0, 0], sizes = [8, 128], strides = [1, 1]} : vector<8x384xf32> to vector<8x128xf32>
    %584 = arith.mulf %583, %579 : vector<8x128xf32>
    %585 = arith.addf %582, %584 : vector<8x128xf32>
    %586 = vector.extract_strided_slice %577 {offsets = [0, 256], sizes = [8, 128], strides = [1, 1]} : vector<8x384xf32> to vector<8x128xf32>
    %587 = math.tanh %585 : vector<8x128xf32>
    %588 = arith.mulf %586, %587 : vector<8x128xf32>
    %c0_331 = arith.constant 0 : index
    %c0_332 = arith.constant 0 : index
    %589 = vector.load %arg16[%c0_331, %c0_332] : memref<8x128xf32, #tpu.memory_space<vmem>>, vector<8x128xf32>
    tpu.vector_store %arg16[%c0_331, %c0_332], %585 {strides = array<i32>} : memref<8x128xf32, #tpu.memory_space<vmem>>, vector<8x128xf32>,
    %c0_333 = arith.constant 0 : index
    %c0_334 = arith.constant 0 : index
    %590 = vector.load %arg15[%c0_333, %c0_334] : memref<8x128xf32, #tpu.memory_space<vmem>>, vector<8x128xf32>
    tpu.vector_store %arg15[%c0_333, %c0_334], %588 {strides = array<i32>} : memref<8x128xf32, #tpu.memory_space<vmem>>, vector<8x128xf32>,
    %591 = arith.index_cast %562 : i32 to index
    %c0_335 = arith.constant 0 : index
    %592 = vector.load %arg14[%591, %c0_335] : memref<64x256xf32, #tpu.memory_space<vmem>>, vector<8x128xf32>
    tpu.vector_store %arg14[%591, %c0_335], %588 {strides = array<i32>} : memref<64x256xf32, #tpu.memory_space<vmem>>, vector<8x128xf32>,
    %593 = arith.index_cast %565 : i32 to index
    %c512_336 = arith.constant 512 : index
    %594 = vector.load %arg12[%593, %c512_336] : memref<64x1024xf32, #tpu.memory_space<vmem>>, vector<8x512xf32>
    %c0_337 = arith.constant 0 : index
    %c0_338 = arith.constant 0 : index
    %595 = vector.load %arg17[%c0_337, %c0_338] : memref<8x128xf32, #tpu.memory_space<vmem>>, vector<8x128xf32>
    %c0_339 = arith.constant 0 : index
    %c0_340 = arith.constant 0 : index
    %596 = vector.load %arg8[%c0_339, %c0_340] : memref<128x512xf32, #tpu.memory_space<vmem>>, vector<128x512xf32>
    %cst_341 = arith.constant dense<0.000000e+00> : vector<8x512xf32>
    %597 = tpu.matmul %595, %596, %cst_341 {dimension_numbers = #tpu.dot_dimension_numbers<[1], [0], [0], [1], [0, 0, 1, 1], [], []>} : vector<8x128xf32>, vector<128x512xf32>, vector<8x512xf32> -> vector<8x512xf32>
    %598 = arith.addf %594, %597 : vector<8x512xf32>
    %599 = vector.extract_strided_slice %598 {offsets = [0, 0], sizes = [8, 384], strides = [1, 1]} : vector<8x512xf32> to vector<8x384xf32>
    %600 = arith.negf %599 : vector<8x384xf32>
    %601 = math.exp %600 : vector<8x384xf32>
    %cst_342 = arith.constant 1.000000e+00 : f32
    %602 = vector.broadcast %cst_342 : f32 to vector<8x384xf32>
    %603 = arith.addf %602, %601 : vector<8x384xf32>
    %604 = arith.divf %602, %603 : vector<8x384xf32>
    %605 = vector.extract_strided_slice %598 {offsets = [0, 384], sizes = [8, 128], strides = [1, 1]} : vector<8x512xf32> to vector<8x128xf32>
    %606 = math.tanh %605 : vector<8x128xf32>
    %607 = vector.extract_strided_slice %604 {offsets = [0, 128], sizes = [8, 128], strides = [1, 1]} : vector<8x384xf32> to vector<8x128xf32>
    %c0_343 = arith.constant 0 : index
    %c0_344 = arith.constant 0 : index
    %608 = vector.load %arg18[%c0_343, %c0_344] : memref<8x128xf32, #tpu.memory_space<vmem>>, vector<8x128xf32>
    %609 = arith.mulf %607, %608 : vector<8x128xf32>
    %610 = vector.extract_strided_slice %604 {offsets = [0, 0], sizes = [8, 128], strides = [1, 1]} : vector<8x384xf32> to vector<8x128xf32>
    %611 = arith.mulf %610, %606 : vector<8x128xf32>
    %612 = arith.addf %609, %611 : vector<8x128xf32>
    %613 = vector.extract_strided_slice %604 {offsets = [0, 256], sizes = [8, 128], strides = [1, 1]} : vector<8x384xf32> to vector<8x128xf32>
    %614 = math.tanh %612 : vector<8x128xf32>
    %615 = arith.mulf %613, %614 : vector<8x128xf32>
    %c0_345 = arith.constant 0 : index
    %c0_346 = arith.constant 0 : index
    %616 = vector.load %arg18[%c0_345, %c0_346] : memref<8x128xf32, #tpu.memory_space<vmem>>, vector<8x128xf32>
    tpu.vector_store %arg18[%c0_345, %c0_346], %612 {strides = array<i32>} : memref<8x128xf32, #tpu.memory_space<vmem>>, vector<8x128xf32>,
    %c0_347 = arith.constant 0 : index
    %c0_348 = arith.constant 0 : index
    %617 = vector.load %arg17[%c0_347, %c0_348] : memref<8x128xf32, #tpu.memory_space<vmem>>, vector<8x128xf32>
    tpu.vector_store %arg17[%c0_347, %c0_348], %615 {strides = array<i32>} : memref<8x128xf32, #tpu.memory_space<vmem>>, vector<8x128xf32>,
    %618 = arith.index_cast %565 : i32 to index
    %c128_349 = arith.constant 128 : index
    %619 = vector.load %arg14[%618, %c128_349] : memref<64x256xf32, #tpu.memory_space<vmem>>, vector<8x128xf32>
    tpu.vector_store %arg14[%618, %c128_349], %615 {strides = array<i32>} : memref<64x256xf32, #tpu.memory_space<vmem>>, vector<8x128xf32>,
    %c2_i32_350 = arith.constant 2 : i32
    %c8_i32_351 = arith.constant 8 : i32
    %620 = arith.muli %c2_i32_350, %c8_i32_351 : i32
    %621 = tpu.assume_multiple %620, 8 : i32
    %c7_i32_352 = arith.constant 7 : i32
    %622 = arith.subi %c7_i32_352, %c2_i32_350 : i32
    %c8_i32_353 = arith.constant 8 : i32
    %623 = arith.muli %622, %c8_i32_353 : i32
    %624 = tpu.assume_multiple %623, 8 : i32
    %625 = arith.index_cast %621 : i32 to index
    %c0_354 = arith.constant 0 : index
    %626 = vector.load %arg12[%625, %c0_354] : memref<64x1024xf32, #tpu.memory_space<vmem>>, vector<8x512xf32>
    %c0_355 = arith.constant 0 : index
    %c0_356 = arith.constant 0 : index
    %627 = vector.load %arg15[%c0_355, %c0_356] : memref<8x128xf32, #tpu.memory_space<vmem>>, vector<8x128xf32>
    %c0_357 = arith.constant 0 : index
    %c0_358 = arith.constant 0 : index
    %628 = vector.load %arg7[%c0_357, %c0_358] : memref<128x512xf32, #tpu.memory_space<vmem>>, vector<128x512xf32>
    %cst_359 = arith.constant dense<0.000000e+00> : vector<8x512xf32>
    %629 = tpu.matmul %627, %628, %cst_359 {dimension_numbers = #tpu.dot_dimension_numbers<[1], [0], [0], [1], [0, 0, 1, 1], [], []>} : vector<8x128xf32>, vector<128x512xf32>, vector<8x512xf32> -> vector<8x512xf32>
    %630 = arith.addf %626, %629 : vector<8x512xf32>
    %631 = vector.extract_strided_slice %630 {offsets = [0, 0], sizes = [8, 384], strides = [1, 1]} : vector<8x512xf32> to vector<8x384xf32>
    %632 = arith.negf %631 : vector<8x384xf32>
    %633 = math.exp %632 : vector<8x384xf32>
    %cst_360 = arith.constant 1.000000e+00 : f32
    %634 = vector.broadcast %cst_360 : f32 to vector<8x384xf32>
    %635 = arith.addf %634, %633 : vector<8x384xf32>
    %636 = arith.divf %634, %635 : vector<8x384xf32>
    %637 = vector.extract_strided_slice %630 {offsets = [0, 384], sizes = [8, 128], strides = [1, 1]} : vector<8x512xf32> to vector<8x128xf32>
    %638 = math.tanh %637 : vector<8x128xf32>
    %639 = vector.extract_strided_slice %636 {offsets = [0, 128], sizes = [8, 128], strides = [1, 1]} : vector<8x384xf32> to vector<8x128xf32>
    %c0_361 = arith.constant 0 : index
    %c0_362 = arith.constant 0 : index
    %640 = vector.load %arg16[%c0_361, %c0_362] : memref<8x128xf32, #tpu.memory_space<vmem>>, vector<8x128xf32>
    %641 = arith.mulf %639, %640 : vector<8x128xf32>
    %642 = vector.extract_strided_slice %636 {offsets = [0, 0], sizes = [8, 128], strides = [1, 1]} : vector<8x384xf32> to vector<8x128xf32>
    %643 = arith.mulf %642, %638 : vector<8x128xf32>
    %644 = arith.addf %641, %643 : vector<8x128xf32>
    %645 = vector.extract_strided_slice %636 {offsets = [0, 256], sizes = [8, 128], strides = [1, 1]} : vector<8x384xf32> to vector<8x128xf32>
    %646 = math.tanh %644 : vector<8x128xf32>
    %647 = arith.mulf %645, %646 : vector<8x128xf32>
    %c0_363 = arith.constant 0 : index
    %c0_364 = arith.constant 0 : index
    %648 = vector.load %arg16[%c0_363, %c0_364] : memref<8x128xf32, #tpu.memory_space<vmem>>, vector<8x128xf32>
    tpu.vector_store %arg16[%c0_363, %c0_364], %644 {strides = array<i32>} : memref<8x128xf32, #tpu.memory_space<vmem>>, vector<8x128xf32>,
    %c0_365 = arith.constant 0 : index
    %c0_366 = arith.constant 0 : index
    %649 = vector.load %arg15[%c0_365, %c0_366] : memref<8x128xf32, #tpu.memory_space<vmem>>, vector<8x128xf32>
    tpu.vector_store %arg15[%c0_365, %c0_366], %647 {strides = array<i32>} : memref<8x128xf32, #tpu.memory_space<vmem>>, vector<8x128xf32>,
    %650 = arith.index_cast %621 : i32 to index
    %c0_367 = arith.constant 0 : index
    %651 = vector.load %arg14[%650, %c0_367] : memref<64x256xf32, #tpu.memory_space<vmem>>, vector<8x128xf32>
    tpu.vector_store %arg14[%650, %c0_367], %647 {strides = array<i32>} : memref<64x256xf32, #tpu.memory_space<vmem>>, vector<8x128xf32>,
    %652 = arith.index_cast %624 : i32 to index
    %c512_368 = arith.constant 512 : index
    %653 = vector.load %arg12[%652, %c512_368] : memref<64x1024xf32, #tpu.memory_space<vmem>>, vector<8x512xf32>
    %c0_369 = arith.constant 0 : index
    %c0_370 = arith.constant 0 : index
    %654 = vector.load %arg17[%c0_369, %c0_370] : memref<8x128xf32, #tpu.memory_space<vmem>>, vector<8x128xf32>
    %c0_371 = arith.constant 0 : index
    %c0_372 = arith.constant 0 : index
    %655 = vector.load %arg8[%c0_371, %c0_372] : memref<128x512xf32, #tpu.memory_space<vmem>>, vector<128x512xf32>
    %cst_373 = arith.constant dense<0.000000e+00> : vector<8x512xf32>
    %656 = tpu.matmul %654, %655, %cst_373 {dimension_numbers = #tpu.dot_dimension_numbers<[1], [0], [0], [1], [0, 0, 1, 1], [], []>} : vector<8x128xf32>, vector<128x512xf32>, vector<8x512xf32> -> vector<8x512xf32>
    %657 = arith.addf %653, %656 : vector<8x512xf32>
    %658 = vector.extract_strided_slice %657 {offsets = [0, 0], sizes = [8, 384], strides = [1, 1]} : vector<8x512xf32> to vector<8x384xf32>
    %659 = arith.negf %658 : vector<8x384xf32>
    %660 = math.exp %659 : vector<8x384xf32>
    %cst_374 = arith.constant 1.000000e+00 : f32
    %661 = vector.broadcast %cst_374 : f32 to vector<8x384xf32>
    %662 = arith.addf %661, %660 : vector<8x384xf32>
    %663 = arith.divf %661, %662 : vector<8x384xf32>
    %664 = vector.extract_strided_slice %657 {offsets = [0, 384], sizes = [8, 128], strides = [1, 1]} : vector<8x512xf32> to vector<8x128xf32>
    %665 = math.tanh %664 : vector<8x128xf32>
    %666 = vector.extract_strided_slice %663 {offsets = [0, 128], sizes = [8, 128], strides = [1, 1]} : vector<8x384xf32> to vector<8x128xf32>
    %c0_375 = arith.constant 0 : index
    %c0_376 = arith.constant 0 : index
    %667 = vector.load %arg18[%c0_375, %c0_376] : memref<8x128xf32, #tpu.memory_space<vmem>>, vector<8x128xf32>
    %668 = arith.mulf %666, %667 : vector<8x128xf32>
    %669 = vector.extract_strided_slice %663 {offsets = [0, 0], sizes = [8, 128], strides = [1, 1]} : vector<8x384xf32> to vector<8x128xf32>
    %670 = arith.mulf %669, %665 : vector<8x128xf32>
    %671 = arith.addf %668, %670 : vector<8x128xf32>
    %672 = vector.extract_strided_slice %663 {offsets = [0, 256], sizes = [8, 128], strides = [1, 1]} : vector<8x384xf32> to vector<8x128xf32>
    %673 = math.tanh %671 : vector<8x128xf32>
    %674 = arith.mulf %672, %673 : vector<8x128xf32>
    %c0_377 = arith.constant 0 : index
    %c0_378 = arith.constant 0 : index
    %675 = vector.load %arg18[%c0_377, %c0_378] : memref<8x128xf32, #tpu.memory_space<vmem>>, vector<8x128xf32>
    tpu.vector_store %arg18[%c0_377, %c0_378], %671 {strides = array<i32>} : memref<8x128xf32, #tpu.memory_space<vmem>>, vector<8x128xf32>,
    %c0_379 = arith.constant 0 : index
    %c0_380 = arith.constant 0 : index
    %676 = vector.load %arg17[%c0_379, %c0_380] : memref<8x128xf32, #tpu.memory_space<vmem>>, vector<8x128xf32>
    tpu.vector_store %arg17[%c0_379, %c0_380], %674 {strides = array<i32>} : memref<8x128xf32, #tpu.memory_space<vmem>>, vector<8x128xf32>,
    %677 = arith.index_cast %624 : i32 to index
    %c128_381 = arith.constant 128 : index
    %678 = vector.load %arg14[%677, %c128_381] : memref<64x256xf32, #tpu.memory_space<vmem>>, vector<8x128xf32>
    tpu.vector_store %arg14[%677, %c128_381], %674 {strides = array<i32>} : memref<64x256xf32, #tpu.memory_space<vmem>>, vector<8x128xf32>,
    %c3_i32_382 = arith.constant 3 : i32
    %c8_i32_383 = arith.constant 8 : i32
    %679 = arith.muli %c3_i32_382, %c8_i32_383 : i32
    %680 = tpu.assume_multiple %679, 8 : i32
    %c7_i32_384 = arith.constant 7 : i32
    %681 = arith.subi %c7_i32_384, %c3_i32_382 : i32
    %c8_i32_385 = arith.constant 8 : i32
    %682 = arith.muli %681, %c8_i32_385 : i32
    %683 = tpu.assume_multiple %682, 8 : i32
    %684 = arith.index_cast %680 : i32 to index
    %c0_386 = arith.constant 0 : index
    %685 = vector.load %arg12[%684, %c0_386] : memref<64x1024xf32, #tpu.memory_space<vmem>>, vector<8x512xf32>
    %c0_387 = arith.constant 0 : index
    %c0_388 = arith.constant 0 : index
    %686 = vector.load %arg15[%c0_387, %c0_388] : memref<8x128xf32, #tpu.memory_space<vmem>>, vector<8x128xf32>
    %c0_389 = arith.constant 0 : index
    %c0_390 = arith.constant 0 : index
    %687 = vector.load %arg7[%c0_389, %c0_390] : memref<128x512xf32, #tpu.memory_space<vmem>>, vector<128x512xf32>
    %cst_391 = arith.constant dense<0.000000e+00> : vector<8x512xf32>
    %688 = tpu.matmul %686, %687, %cst_391 {dimension_numbers = #tpu.dot_dimension_numbers<[1], [0], [0], [1], [0, 0, 1, 1], [], []>} : vector<8x128xf32>, vector<128x512xf32>, vector<8x512xf32> -> vector<8x512xf32>
    %689 = arith.addf %685, %688 : vector<8x512xf32>
    %690 = vector.extract_strided_slice %689 {offsets = [0, 0], sizes = [8, 384], strides = [1, 1]} : vector<8x512xf32> to vector<8x384xf32>
    %691 = arith.negf %690 : vector<8x384xf32>
    %692 = math.exp %691 : vector<8x384xf32>
    %cst_392 = arith.constant 1.000000e+00 : f32
    %693 = vector.broadcast %cst_392 : f32 to vector<8x384xf32>
    %694 = arith.addf %693, %692 : vector<8x384xf32>
    %695 = arith.divf %693, %694 : vector<8x384xf32>
    %696 = vector.extract_strided_slice %689 {offsets = [0, 384], sizes = [8, 128], strides = [1, 1]} : vector<8x512xf32> to vector<8x128xf32>
    %697 = math.tanh %696 : vector<8x128xf32>
    %698 = vector.extract_strided_slice %695 {offsets = [0, 128], sizes = [8, 128], strides = [1, 1]} : vector<8x384xf32> to vector<8x128xf32>
    %c0_393 = arith.constant 0 : index
    %c0_394 = arith.constant 0 : index
    %699 = vector.load %arg16[%c0_393, %c0_394] : memref<8x128xf32, #tpu.memory_space<vmem>>, vector<8x128xf32>
    %700 = arith.mulf %698, %699 : vector<8x128xf32>
    %701 = vector.extract_strided_slice %695 {offsets = [0, 0], sizes = [8, 128], strides = [1, 1]} : vector<8x384xf32> to vector<8x128xf32>
    %702 = arith.mulf %701, %697 : vector<8x128xf32>
    %703 = arith.addf %700, %702 : vector<8x128xf32>
    %704 = vector.extract_strided_slice %695 {offsets = [0, 256], sizes = [8, 128], strides = [1, 1]} : vector<8x384xf32> to vector<8x128xf32>
    %705 = math.tanh %703 : vector<8x128xf32>
    %706 = arith.mulf %704, %705 : vector<8x128xf32>
    %c0_395 = arith.constant 0 : index
    %c0_396 = arith.constant 0 : index
    %707 = vector.load %arg16[%c0_395, %c0_396] : memref<8x128xf32, #tpu.memory_space<vmem>>, vector<8x128xf32>
    tpu.vector_store %arg16[%c0_395, %c0_396], %703 {strides = array<i32>} : memref<8x128xf32, #tpu.memory_space<vmem>>, vector<8x128xf32>,
    %c0_397 = arith.constant 0 : index
    %c0_398 = arith.constant 0 : index
    %708 = vector.load %arg15[%c0_397, %c0_398] : memref<8x128xf32, #tpu.memory_space<vmem>>, vector<8x128xf32>
    tpu.vector_store %arg15[%c0_397, %c0_398], %706 {strides = array<i32>} : memref<8x128xf32, #tpu.memory_space<vmem>>, vector<8x128xf32>,
    %709 = arith.index_cast %680 : i32 to index
    %c0_399 = arith.constant 0 : index
    %710 = vector.load %arg14[%709, %c0_399] : memref<64x256xf32, #tpu.memory_space<vmem>>, vector<8x128xf32>
    tpu.vector_store %arg14[%709, %c0_399], %706 {strides = array<i32>} : memref<64x256xf32, #tpu.memory_space<vmem>>, vector<8x128xf32>,
    %711 = arith.index_cast %683 : i32 to index
    %c512_400 = arith.constant 512 : index
    %712 = vector.load %arg12[%711, %c512_400] : memref<64x1024xf32, #tpu.memory_space<vmem>>, vector<8x512xf32>
    %c0_401 = arith.constant 0 : index
    %c0_402 = arith.constant 0 : index
    %713 = vector.load %arg17[%c0_401, %c0_402] : memref<8x128xf32, #tpu.memory_space<vmem>>, vector<8x128xf32>
    %c0_403 = arith.constant 0 : index
    %c0_404 = arith.constant 0 : index
    %714 = vector.load %arg8[%c0_403, %c0_404] : memref<128x512xf32, #tpu.memory_space<vmem>>, vector<128x512xf32>
    %cst_405 = arith.constant dense<0.000000e+00> : vector<8x512xf32>
    %715 = tpu.matmul %713, %714, %cst_405 {dimension_numbers = #tpu.dot_dimension_numbers<[1], [0], [0], [1], [0, 0, 1, 1], [], []>} : vector<8x128xf32>, vector<128x512xf32>, vector<8x512xf32> -> vector<8x512xf32>
    %716 = arith.addf %712, %715 : vector<8x512xf32>
    %717 = vector.extract_strided_slice %716 {offsets = [0, 0], sizes = [8, 384], strides = [1, 1]} : vector<8x512xf32> to vector<8x384xf32>
    %718 = arith.negf %717 : vector<8x384xf32>
    %719 = math.exp %718 : vector<8x384xf32>
    %cst_406 = arith.constant 1.000000e+00 : f32
    %720 = vector.broadcast %cst_406 : f32 to vector<8x384xf32>
    %721 = arith.addf %720, %719 : vector<8x384xf32>
    %722 = arith.divf %720, %721 : vector<8x384xf32>
    %723 = vector.extract_strided_slice %716 {offsets = [0, 384], sizes = [8, 128], strides = [1, 1]} : vector<8x512xf32> to vector<8x128xf32>
    %724 = math.tanh %723 : vector<8x128xf32>
    %725 = vector.extract_strided_slice %722 {offsets = [0, 128], sizes = [8, 128], strides = [1, 1]} : vector<8x384xf32> to vector<8x128xf32>
    %c0_407 = arith.constant 0 : index
    %c0_408 = arith.constant 0 : index
    %726 = vector.load %arg18[%c0_407, %c0_408] : memref<8x128xf32, #tpu.memory_space<vmem>>, vector<8x128xf32>
    %727 = arith.mulf %725, %726 : vector<8x128xf32>
    %728 = vector.extract_strided_slice %722 {offsets = [0, 0], sizes = [8, 128], strides = [1, 1]} : vector<8x384xf32> to vector<8x128xf32>
    %729 = arith.mulf %728, %724 : vector<8x128xf32>
    %730 = arith.addf %727, %729 : vector<8x128xf32>
    %731 = vector.extract_strided_slice %722 {offsets = [0, 256], sizes = [8, 128], strides = [1, 1]} : vector<8x384xf32> to vector<8x128xf32>
    %732 = math.tanh %730 : vector<8x128xf32>
    %733 = arith.mulf %731, %732 : vector<8x128xf32>
    %c0_409 = arith.constant 0 : index
    %c0_410 = arith.constant 0 : index
    %734 = vector.load %arg18[%c0_409, %c0_410] : memref<8x128xf32, #tpu.memory_space<vmem>>, vector<8x128xf32>
    tpu.vector_store %arg18[%c0_409, %c0_410], %730 {strides = array<i32>} : memref<8x128xf32, #tpu.memory_space<vmem>>, vector<8x128xf32>,
    %c0_411 = arith.constant 0 : index
    %c0_412 = arith.constant 0 : index
    %735 = vector.load %arg17[%c0_411, %c0_412] : memref<8x128xf32, #tpu.memory_space<vmem>>, vector<8x128xf32>
    tpu.vector_store %arg17[%c0_411, %c0_412], %733 {strides = array<i32>} : memref<8x128xf32, #tpu.memory_space<vmem>>, vector<8x128xf32>,
    %736 = arith.index_cast %683 : i32 to index
    %c128_413 = arith.constant 128 : index
    %737 = vector.load %arg14[%736, %c128_413] : memref<64x256xf32, #tpu.memory_space<vmem>>, vector<8x128xf32>
    tpu.vector_store %arg14[%736, %c128_413], %733 {strides = array<i32>} : memref<64x256xf32, #tpu.memory_space<vmem>>, vector<8x128xf32>,
    %c4_i32_414 = arith.constant 4 : i32
    %c8_i32_415 = arith.constant 8 : i32
    %738 = arith.muli %c4_i32_414, %c8_i32_415 : i32
    %739 = tpu.assume_multiple %738, 8 : i32
    %c7_i32_416 = arith.constant 7 : i32
    %740 = arith.subi %c7_i32_416, %c4_i32_414 : i32
    %c8_i32_417 = arith.constant 8 : i32
    %741 = arith.muli %740, %c8_i32_417 : i32
    %742 = tpu.assume_multiple %741, 8 : i32
    %743 = arith.index_cast %739 : i32 to index
    %c0_418 = arith.constant 0 : index
    %744 = vector.load %arg12[%743, %c0_418] : memref<64x1024xf32, #tpu.memory_space<vmem>>, vector<8x512xf32>
    %c0_419 = arith.constant 0 : index
    %c0_420 = arith.constant 0 : index
    %745 = vector.load %arg15[%c0_419, %c0_420] : memref<8x128xf32, #tpu.memory_space<vmem>>, vector<8x128xf32>
    %c0_421 = arith.constant 0 : index
    %c0_422 = arith.constant 0 : index
    %746 = vector.load %arg7[%c0_421, %c0_422] : memref<128x512xf32, #tpu.memory_space<vmem>>, vector<128x512xf32>
    %cst_423 = arith.constant dense<0.000000e+00> : vector<8x512xf32>
    %747 = tpu.matmul %745, %746, %cst_423 {dimension_numbers = #tpu.dot_dimension_numbers<[1], [0], [0], [1], [0, 0, 1, 1], [], []>} : vector<8x128xf32>, vector<128x512xf32>, vector<8x512xf32> -> vector<8x512xf32>
    %748 = arith.addf %744, %747 : vector<8x512xf32>
    %749 = vector.extract_strided_slice %748 {offsets = [0, 0], sizes = [8, 384], strides = [1, 1]} : vector<8x512xf32> to vector<8x384xf32>
    %750 = arith.negf %749 : vector<8x384xf32>
    %751 = math.exp %750 : vector<8x384xf32>
    %cst_424 = arith.constant 1.000000e+00 : f32
    %752 = vector.broadcast %cst_424 : f32 to vector<8x384xf32>
    %753 = arith.addf %752, %751 : vector<8x384xf32>
    %754 = arith.divf %752, %753 : vector<8x384xf32>
    %755 = vector.extract_strided_slice %748 {offsets = [0, 384], sizes = [8, 128], strides = [1, 1]} : vector<8x512xf32> to vector<8x128xf32>
    %756 = math.tanh %755 : vector<8x128xf32>
    %757 = vector.extract_strided_slice %754 {offsets = [0, 128], sizes = [8, 128], strides = [1, 1]} : vector<8x384xf32> to vector<8x128xf32>
    %c0_425 = arith.constant 0 : index
    %c0_426 = arith.constant 0 : index
    %758 = vector.load %arg16[%c0_425, %c0_426] : memref<8x128xf32, #tpu.memory_space<vmem>>, vector<8x128xf32>
    %759 = arith.mulf %757, %758 : vector<8x128xf32>
    %760 = vector.extract_strided_slice %754 {offsets = [0, 0], sizes = [8, 128], strides = [1, 1]} : vector<8x384xf32> to vector<8x128xf32>
    %761 = arith.mulf %760, %756 : vector<8x128xf32>
    %762 = arith.addf %759, %761 : vector<8x128xf32>
    %763 = vector.extract_strided_slice %754 {offsets = [0, 256], sizes = [8, 128], strides = [1, 1]} : vector<8x384xf32> to vector<8x128xf32>
    %764 = math.tanh %762 : vector<8x128xf32>
    %765 = arith.mulf %763, %764 : vector<8x128xf32>
    %c0_427 = arith.constant 0 : index
    %c0_428 = arith.constant 0 : index
    %766 = vector.load %arg16[%c0_427, %c0_428] : memref<8x128xf32, #tpu.memory_space<vmem>>, vector<8x128xf32>
    tpu.vector_store %arg16[%c0_427, %c0_428], %762 {strides = array<i32>} : memref<8x128xf32, #tpu.memory_space<vmem>>, vector<8x128xf32>,
    %c0_429 = arith.constant 0 : index
    %c0_430 = arith.constant 0 : index
    %767 = vector.load %arg15[%c0_429, %c0_430] : memref<8x128xf32, #tpu.memory_space<vmem>>, vector<8x128xf32>
    tpu.vector_store %arg15[%c0_429, %c0_430], %765 {strides = array<i32>} : memref<8x128xf32, #tpu.memory_space<vmem>>, vector<8x128xf32>,
    %768 = arith.index_cast %739 : i32 to index
    %c0_431 = arith.constant 0 : index
    %769 = vector.load %arg14[%768, %c0_431] : memref<64x256xf32, #tpu.memory_space<vmem>>, vector<8x128xf32>
    tpu.vector_store %arg14[%768, %c0_431], %765 {strides = array<i32>} : memref<64x256xf32, #tpu.memory_space<vmem>>, vector<8x128xf32>,
    %770 = arith.index_cast %742 : i32 to index
    %c512_432 = arith.constant 512 : index
    %771 = vector.load %arg12[%770, %c512_432] : memref<64x1024xf32, #tpu.memory_space<vmem>>, vector<8x512xf32>
    %c0_433 = arith.constant 0 : index
    %c0_434 = arith.constant 0 : index
    %772 = vector.load %arg17[%c0_433, %c0_434] : memref<8x128xf32, #tpu.memory_space<vmem>>, vector<8x128xf32>
    %c0_435 = arith.constant 0 : index
    %c0_436 = arith.constant 0 : index
    %773 = vector.load %arg8[%c0_435, %c0_436] : memref<128x512xf32, #tpu.memory_space<vmem>>, vector<128x512xf32>
    %cst_437 = arith.constant dense<0.000000e+00> : vector<8x512xf32>
    %774 = tpu.matmul %772, %773, %cst_437 {dimension_numbers = #tpu.dot_dimension_numbers<[1], [0], [0], [1], [0, 0, 1, 1], [], []>} : vector<8x128xf32>, vector<128x512xf32>, vector<8x512xf32> -> vector<8x512xf32>
    %775 = arith.addf %771, %774 : vector<8x512xf32>
    %776 = vector.extract_strided_slice %775 {offsets = [0, 0], sizes = [8, 384], strides = [1, 1]} : vector<8x512xf32> to vector<8x384xf32>
    %777 = arith.negf %776 : vector<8x384xf32>
    %778 = math.exp %777 : vector<8x384xf32>
    %cst_438 = arith.constant 1.000000e+00 : f32
    %779 = vector.broadcast %cst_438 : f32 to vector<8x384xf32>
    %780 = arith.addf %779, %778 : vector<8x384xf32>
    %781 = arith.divf %779, %780 : vector<8x384xf32>
    %782 = vector.extract_strided_slice %775 {offsets = [0, 384], sizes = [8, 128], strides = [1, 1]} : vector<8x512xf32> to vector<8x128xf32>
    %783 = math.tanh %782 : vector<8x128xf32>
    %784 = vector.extract_strided_slice %781 {offsets = [0, 128], sizes = [8, 128], strides = [1, 1]} : vector<8x384xf32> to vector<8x128xf32>
    %c0_439 = arith.constant 0 : index
    %c0_440 = arith.constant 0 : index
    %785 = vector.load %arg18[%c0_439, %c0_440] : memref<8x128xf32, #tpu.memory_space<vmem>>, vector<8x128xf32>
    %786 = arith.mulf %784, %785 : vector<8x128xf32>
    %787 = vector.extract_strided_slice %781 {offsets = [0, 0], sizes = [8, 128], strides = [1, 1]} : vector<8x384xf32> to vector<8x128xf32>
    %788 = arith.mulf %787, %783 : vector<8x128xf32>
    %789 = arith.addf %786, %788 : vector<8x128xf32>
    %790 = vector.extract_strided_slice %781 {offsets = [0, 256], sizes = [8, 128], strides = [1, 1]} : vector<8x384xf32> to vector<8x128xf32>
    %791 = math.tanh %789 : vector<8x128xf32>
    %792 = arith.mulf %790, %791 : vector<8x128xf32>
    %c0_441 = arith.constant 0 : index
    %c0_442 = arith.constant 0 : index
    %793 = vector.load %arg18[%c0_441, %c0_442] : memref<8x128xf32, #tpu.memory_space<vmem>>, vector<8x128xf32>
    tpu.vector_store %arg18[%c0_441, %c0_442], %789 {strides = array<i32>} : memref<8x128xf32, #tpu.memory_space<vmem>>, vector<8x128xf32>,
    %c0_443 = arith.constant 0 : index
    %c0_444 = arith.constant 0 : index
    %794 = vector.load %arg17[%c0_443, %c0_444] : memref<8x128xf32, #tpu.memory_space<vmem>>, vector<8x128xf32>
    tpu.vector_store %arg17[%c0_443, %c0_444], %792 {strides = array<i32>} : memref<8x128xf32, #tpu.memory_space<vmem>>, vector<8x128xf32>,
    %795 = arith.index_cast %742 : i32 to index
    %c128_445 = arith.constant 128 : index
    %796 = vector.load %arg14[%795, %c128_445] : memref<64x256xf32, #tpu.memory_space<vmem>>, vector<8x128xf32>
    tpu.vector_store %arg14[%795, %c128_445], %792 {strides = array<i32>} : memref<64x256xf32, #tpu.memory_space<vmem>>, vector<8x128xf32>,
    %c5_i32_446 = arith.constant 5 : i32
    %c8_i32_447 = arith.constant 8 : i32
    %797 = arith.muli %c5_i32_446, %c8_i32_447 : i32
    %798 = tpu.assume_multiple %797, 8 : i32
    %c7_i32_448 = arith.constant 7 : i32
    %799 = arith.subi %c7_i32_448, %c5_i32_446 : i32
    %c8_i32_449 = arith.constant 8 : i32
    %800 = arith.muli %799, %c8_i32_449 : i32
    %801 = tpu.assume_multiple %800, 8 : i32
    %802 = arith.index_cast %798 : i32 to index
    %c0_450 = arith.constant 0 : index
    %803 = vector.load %arg12[%802, %c0_450] : memref<64x1024xf32, #tpu.memory_space<vmem>>, vector<8x512xf32>
    %c0_451 = arith.constant 0 : index
    %c0_452 = arith.constant 0 : index
    %804 = vector.load %arg15[%c0_451, %c0_452] : memref<8x128xf32, #tpu.memory_space<vmem>>, vector<8x128xf32>
    %c0_453 = arith.constant 0 : index
    %c0_454 = arith.constant 0 : index
    %805 = vector.load %arg7[%c0_453, %c0_454] : memref<128x512xf32, #tpu.memory_space<vmem>>, vector<128x512xf32>
    %cst_455 = arith.constant dense<0.000000e+00> : vector<8x512xf32>
    %806 = tpu.matmul %804, %805, %cst_455 {dimension_numbers = #tpu.dot_dimension_numbers<[1], [0], [0], [1], [0, 0, 1, 1], [], []>} : vector<8x128xf32>, vector<128x512xf32>, vector<8x512xf32> -> vector<8x512xf32>
    %807 = arith.addf %803, %806 : vector<8x512xf32>
    %808 = vector.extract_strided_slice %807 {offsets = [0, 0], sizes = [8, 384], strides = [1, 1]} : vector<8x512xf32> to vector<8x384xf32>
    %809 = arith.negf %808 : vector<8x384xf32>
    %810 = math.exp %809 : vector<8x384xf32>
    %cst_456 = arith.constant 1.000000e+00 : f32
    %811 = vector.broadcast %cst_456 : f32 to vector<8x384xf32>
    %812 = arith.addf %811, %810 : vector<8x384xf32>
    %813 = arith.divf %811, %812 : vector<8x384xf32>
    %814 = vector.extract_strided_slice %807 {offsets = [0, 384], sizes = [8, 128], strides = [1, 1]} : vector<8x512xf32> to vector<8x128xf32>
    %815 = math.tanh %814 : vector<8x128xf32>
    %816 = vector.extract_strided_slice %813 {offsets = [0, 128], sizes = [8, 128], strides = [1, 1]} : vector<8x384xf32> to vector<8x128xf32>
    %c0_457 = arith.constant 0 : index
    %c0_458 = arith.constant 0 : index
    %817 = vector.load %arg16[%c0_457, %c0_458] : memref<8x128xf32, #tpu.memory_space<vmem>>, vector<8x128xf32>
    %818 = arith.mulf %816, %817 : vector<8x128xf32>
    %819 = vector.extract_strided_slice %813 {offsets = [0, 0], sizes = [8, 128], strides = [1, 1]} : vector<8x384xf32> to vector<8x128xf32>
    %820 = arith.mulf %819, %815 : vector<8x128xf32>
    %821 = arith.addf %818, %820 : vector<8x128xf32>
    %822 = vector.extract_strided_slice %813 {offsets = [0, 256], sizes = [8, 128], strides = [1, 1]} : vector<8x384xf32> to vector<8x128xf32>
    %823 = math.tanh %821 : vector<8x128xf32>
    %824 = arith.mulf %822, %823 : vector<8x128xf32>
    %c0_459 = arith.constant 0 : index
    %c0_460 = arith.constant 0 : index
    %825 = vector.load %arg16[%c0_459, %c0_460] : memref<8x128xf32, #tpu.memory_space<vmem>>, vector<8x128xf32>
    tpu.vector_store %arg16[%c0_459, %c0_460], %821 {strides = array<i32>} : memref<8x128xf32, #tpu.memory_space<vmem>>, vector<8x128xf32>,
    %c0_461 = arith.constant 0 : index
    %c0_462 = arith.constant 0 : index
    %826 = vector.load %arg15[%c0_461, %c0_462] : memref<8x128xf32, #tpu.memory_space<vmem>>, vector<8x128xf32>
    tpu.vector_store %arg15[%c0_461, %c0_462], %824 {strides = array<i32>} : memref<8x128xf32, #tpu.memory_space<vmem>>, vector<8x128xf32>,
    %827 = arith.index_cast %798 : i32 to index
    %c0_463 = arith.constant 0 : index
    %828 = vector.load %arg14[%827, %c0_463] : memref<64x256xf32, #tpu.memory_space<vmem>>, vector<8x128xf32>
    tpu.vector_store %arg14[%827, %c0_463], %824 {strides = array<i32>} : memref<64x256xf32, #tpu.memory_space<vmem>>, vector<8x128xf32>,
    %829 = arith.index_cast %801 : i32 to index
    %c512_464 = arith.constant 512 : index
    %830 = vector.load %arg12[%829, %c512_464] : memref<64x1024xf32, #tpu.memory_space<vmem>>, vector<8x512xf32>
    %c0_465 = arith.constant 0 : index
    %c0_466 = arith.constant 0 : index
    %831 = vector.load %arg17[%c0_465, %c0_466] : memref<8x128xf32, #tpu.memory_space<vmem>>, vector<8x128xf32>
    %c0_467 = arith.constant 0 : index
    %c0_468 = arith.constant 0 : index
    %832 = vector.load %arg8[%c0_467, %c0_468] : memref<128x512xf32, #tpu.memory_space<vmem>>, vector<128x512xf32>
    %cst_469 = arith.constant dense<0.000000e+00> : vector<8x512xf32>
    %833 = tpu.matmul %831, %832, %cst_469 {dimension_numbers = #tpu.dot_dimension_numbers<[1], [0], [0], [1], [0, 0, 1, 1], [], []>} : vector<8x128xf32>, vector<128x512xf32>, vector<8x512xf32> -> vector<8x512xf32>
    %834 = arith.addf %830, %833 : vector<8x512xf32>
    %835 = vector.extract_strided_slice %834 {offsets = [0, 0], sizes = [8, 384], strides = [1, 1]} : vector<8x512xf32> to vector<8x384xf32>
    %836 = arith.negf %835 : vector<8x384xf32>
    %837 = math.exp %836 : vector<8x384xf32>
    %cst_470 = arith.constant 1.000000e+00 : f32
    %838 = vector.broadcast %cst_470 : f32 to vector<8x384xf32>
    %839 = arith.addf %838, %837 : vector<8x384xf32>
    %840 = arith.divf %838, %839 : vector<8x384xf32>
    %841 = vector.extract_strided_slice %834 {offsets = [0, 384], sizes = [8, 128], strides = [1, 1]} : vector<8x512xf32> to vector<8x128xf32>
    %842 = math.tanh %841 : vector<8x128xf32>
    %843 = vector.extract_strided_slice %840 {offsets = [0, 128], sizes = [8, 128], strides = [1, 1]} : vector<8x384xf32> to vector<8x128xf32>
    %c0_471 = arith.constant 0 : index
    %c0_472 = arith.constant 0 : index
    %844 = vector.load %arg18[%c0_471, %c0_472] : memref<8x128xf32, #tpu.memory_space<vmem>>, vector<8x128xf32>
    %845 = arith.mulf %843, %844 : vector<8x128xf32>
    %846 = vector.extract_strided_slice %840 {offsets = [0, 0], sizes = [8, 128], strides = [1, 1]} : vector<8x384xf32> to vector<8x128xf32>
    %847 = arith.mulf %846, %842 : vector<8x128xf32>
    %848 = arith.addf %845, %847 : vector<8x128xf32>
    %849 = vector.extract_strided_slice %840 {offsets = [0, 256], sizes = [8, 128], strides = [1, 1]} : vector<8x384xf32> to vector<8x128xf32>
    %850 = math.tanh %848 : vector<8x128xf32>
    %851 = arith.mulf %849, %850 : vector<8x128xf32>
    %c0_473 = arith.constant 0 : index
    %c0_474 = arith.constant 0 : index
    %852 = vector.load %arg18[%c0_473, %c0_474] : memref<8x128xf32, #tpu.memory_space<vmem>>, vector<8x128xf32>
    tpu.vector_store %arg18[%c0_473, %c0_474], %848 {strides = array<i32>} : memref<8x128xf32, #tpu.memory_space<vmem>>, vector<8x128xf32>,
    %c0_475 = arith.constant 0 : index
    %c0_476 = arith.constant 0 : index
    %853 = vector.load %arg17[%c0_475, %c0_476] : memref<8x128xf32, #tpu.memory_space<vmem>>, vector<8x128xf32>
    tpu.vector_store %arg17[%c0_475, %c0_476], %851 {strides = array<i32>} : memref<8x128xf32, #tpu.memory_space<vmem>>, vector<8x128xf32>,
    %854 = arith.index_cast %801 : i32 to index
    %c128_477 = arith.constant 128 : index
    %855 = vector.load %arg14[%854, %c128_477] : memref<64x256xf32, #tpu.memory_space<vmem>>, vector<8x128xf32>
    tpu.vector_store %arg14[%854, %c128_477], %851 {strides = array<i32>} : memref<64x256xf32, #tpu.memory_space<vmem>>, vector<8x128xf32>,
    %c6_i32_478 = arith.constant 6 : i32
    %c8_i32_479 = arith.constant 8 : i32
    %856 = arith.muli %c6_i32_478, %c8_i32_479 : i32
    %857 = tpu.assume_multiple %856, 8 : i32
    %c7_i32_480 = arith.constant 7 : i32
    %858 = arith.subi %c7_i32_480, %c6_i32_478 : i32
    %c8_i32_481 = arith.constant 8 : i32
    %859 = arith.muli %858, %c8_i32_481 : i32
    %860 = tpu.assume_multiple %859, 8 : i32
    %861 = arith.index_cast %857 : i32 to index
    %c0_482 = arith.constant 0 : index
    %862 = vector.load %arg12[%861, %c0_482] : memref<64x1024xf32, #tpu.memory_space<vmem>>, vector<8x512xf32>
    %c0_483 = arith.constant 0 : index
    %c0_484 = arith.constant 0 : index
    %863 = vector.load %arg15[%c0_483, %c0_484] : memref<8x128xf32, #tpu.memory_space<vmem>>, vector<8x128xf32>
    %c0_485 = arith.constant 0 : index
    %c0_486 = arith.constant 0 : index
    %864 = vector.load %arg7[%c0_485, %c0_486] : memref<128x512xf32, #tpu.memory_space<vmem>>, vector<128x512xf32>
    %cst_487 = arith.constant dense<0.000000e+00> : vector<8x512xf32>
    %865 = tpu.matmul %863, %864, %cst_487 {dimension_numbers = #tpu.dot_dimension_numbers<[1], [0], [0], [1], [0, 0, 1, 1], [], []>} : vector<8x128xf32>, vector<128x512xf32>, vector<8x512xf32> -> vector<8x512xf32>
    %866 = arith.addf %862, %865 : vector<8x512xf32>
    %867 = vector.extract_strided_slice %866 {offsets = [0, 0], sizes = [8, 384], strides = [1, 1]} : vector<8x512xf32> to vector<8x384xf32>
    %868 = arith.negf %867 : vector<8x384xf32>
    %869 = math.exp %868 : vector<8x384xf32>
    %cst_488 = arith.constant 1.000000e+00 : f32
    %870 = vector.broadcast %cst_488 : f32 to vector<8x384xf32>
    %871 = arith.addf %870, %869 : vector<8x384xf32>
    %872 = arith.divf %870, %871 : vector<8x384xf32>
    %873 = vector.extract_strided_slice %866 {offsets = [0, 384], sizes = [8, 128], strides = [1, 1]} : vector<8x512xf32> to vector<8x128xf32>
    %874 = math.tanh %873 : vector<8x128xf32>
    %875 = vector.extract_strided_slice %872 {offsets = [0, 128], sizes = [8, 128], strides = [1, 1]} : vector<8x384xf32> to vector<8x128xf32>
    %c0_489 = arith.constant 0 : index
    %c0_490 = arith.constant 0 : index
    %876 = vector.load %arg16[%c0_489, %c0_490] : memref<8x128xf32, #tpu.memory_space<vmem>>, vector<8x128xf32>
    %877 = arith.mulf %875, %876 : vector<8x128xf32>
    %878 = vector.extract_strided_slice %872 {offsets = [0, 0], sizes = [8, 128], strides = [1, 1]} : vector<8x384xf32> to vector<8x128xf32>
    %879 = arith.mulf %878, %874 : vector<8x128xf32>
    %880 = arith.addf %877, %879 : vector<8x128xf32>
    %881 = vector.extract_strided_slice %872 {offsets = [0, 256], sizes = [8, 128], strides = [1, 1]} : vector<8x384xf32> to vector<8x128xf32>
    %882 = math.tanh %880 : vector<8x128xf32>
    %883 = arith.mulf %881, %882 : vector<8x128xf32>
    %c0_491 = arith.constant 0 : index
    %c0_492 = arith.constant 0 : index
    %884 = vector.load %arg16[%c0_491, %c0_492] : memref<8x128xf32, #tpu.memory_space<vmem>>, vector<8x128xf32>
    tpu.vector_store %arg16[%c0_491, %c0_492], %880 {strides = array<i32>} : memref<8x128xf32, #tpu.memory_space<vmem>>, vector<8x128xf32>,
    %c0_493 = arith.constant 0 : index
    %c0_494 = arith.constant 0 : index
    %885 = vector.load %arg15[%c0_493, %c0_494] : memref<8x128xf32, #tpu.memory_space<vmem>>, vector<8x128xf32>
    tpu.vector_store %arg15[%c0_493, %c0_494], %883 {strides = array<i32>} : memref<8x128xf32, #tpu.memory_space<vmem>>, vector<8x128xf32>,
    %886 = arith.index_cast %857 : i32 to index
    %c0_495 = arith.constant 0 : index
    %887 = vector.load %arg14[%886, %c0_495] : memref<64x256xf32, #tpu.memory_space<vmem>>, vector<8x128xf32>
    tpu.vector_store %arg14[%886, %c0_495], %883 {strides = array<i32>} : memref<64x256xf32, #tpu.memory_space<vmem>>, vector<8x128xf32>,
    %888 = arith.index_cast %860 : i32 to index
    %c512_496 = arith.constant 512 : index
    %889 = vector.load %arg12[%888, %c512_496] : memref<64x1024xf32, #tpu.memory_space<vmem>>, vector<8x512xf32>
    %c0_497 = arith.constant 0 : index
    %c0_498 = arith.constant 0 : index
    %890 = vector.load %arg17[%c0_497, %c0_498] : memref<8x128xf32, #tpu.memory_space<vmem>>, vector<8x128xf32>
    %c0_499 = arith.constant 0 : index
    %c0_500 = arith.constant 0 : index
    %891 = vector.load %arg8[%c0_499, %c0_500] : memref<128x512xf32, #tpu.memory_space<vmem>>, vector<128x512xf32>
    %cst_501 = arith.constant dense<0.000000e+00> : vector<8x512xf32>
    %892 = tpu.matmul %890, %891, %cst_501 {dimension_numbers = #tpu.dot_dimension_numbers<[1], [0], [0], [1], [0, 0, 1, 1], [], []>} : vector<8x128xf32>, vector<128x512xf32>, vector<8x512xf32> -> vector<8x512xf32>
    %893 = arith.addf %889, %892 : vector<8x512xf32>
    %894 = vector.extract_strided_slice %893 {offsets = [0, 0], sizes = [8, 384], strides = [1, 1]} : vector<8x512xf32> to vector<8x384xf32>
    %895 = arith.negf %894 : vector<8x384xf32>
    %896 = math.exp %895 : vector<8x384xf32>
    %cst_502 = arith.constant 1.000000e+00 : f32
    %897 = vector.broadcast %cst_502 : f32 to vector<8x384xf32>
    %898 = arith.addf %897, %896 : vector<8x384xf32>
    %899 = arith.divf %897, %898 : vector<8x384xf32>
    %900 = vector.extract_strided_slice %893 {offsets = [0, 384], sizes = [8, 128], strides = [1, 1]} : vector<8x512xf32> to vector<8x128xf32>
    %901 = math.tanh %900 : vector<8x128xf32>
    %902 = vector.extract_strided_slice %899 {offsets = [0, 128], sizes = [8, 128], strides = [1, 1]} : vector<8x384xf32> to vector<8x128xf32>
    %c0_503 = arith.constant 0 : index
    %c0_504 = arith.constant 0 : index
    %903 = vector.load %arg18[%c0_503, %c0_504] : memref<8x128xf32, #tpu.memory_space<vmem>>, vector<8x128xf32>
    %904 = arith.mulf %902, %903 : vector<8x128xf32>
    %905 = vector.extract_strided_slice %899 {offsets = [0, 0], sizes = [8, 128], strides = [1, 1]} : vector<8x384xf32> to vector<8x128xf32>
    %906 = arith.mulf %905, %901 : vector<8x128xf32>
    %907 = arith.addf %904, %906 : vector<8x128xf32>
    %908 = vector.extract_strided_slice %899 {offsets = [0, 256], sizes = [8, 128], strides = [1, 1]} : vector<8x384xf32> to vector<8x128xf32>
    %909 = math.tanh %907 : vector<8x128xf32>
    %910 = arith.mulf %908, %909 : vector<8x128xf32>
    %c0_505 = arith.constant 0 : index
    %c0_506 = arith.constant 0 : index
    %911 = vector.load %arg18[%c0_505, %c0_506] : memref<8x128xf32, #tpu.memory_space<vmem>>, vector<8x128xf32>
    tpu.vector_store %arg18[%c0_505, %c0_506], %907 {strides = array<i32>} : memref<8x128xf32, #tpu.memory_space<vmem>>, vector<8x128xf32>,
    %c0_507 = arith.constant 0 : index
    %c0_508 = arith.constant 0 : index
    %912 = vector.load %arg17[%c0_507, %c0_508] : memref<8x128xf32, #tpu.memory_space<vmem>>, vector<8x128xf32>
    tpu.vector_store %arg17[%c0_507, %c0_508], %910 {strides = array<i32>} : memref<8x128xf32, #tpu.memory_space<vmem>>, vector<8x128xf32>,
    %913 = arith.index_cast %860 : i32 to index
    %c128_509 = arith.constant 128 : index
    %914 = vector.load %arg14[%913, %c128_509] : memref<64x256xf32, #tpu.memory_space<vmem>>, vector<8x128xf32>
    tpu.vector_store %arg14[%913, %c128_509], %910 {strides = array<i32>} : memref<64x256xf32, #tpu.memory_space<vmem>>, vector<8x128xf32>,
    %c7_i32_510 = arith.constant 7 : i32
    %c8_i32_511 = arith.constant 8 : i32
    %915 = arith.muli %c7_i32_510, %c8_i32_511 : i32
    %916 = tpu.assume_multiple %915, 8 : i32
    %c7_i32_512 = arith.constant 7 : i32
    %917 = arith.subi %c7_i32_512, %c7_i32_510 : i32
    %c8_i32_513 = arith.constant 8 : i32
    %918 = arith.muli %917, %c8_i32_513 : i32
    %919 = tpu.assume_multiple %918, 8 : i32
    %920 = arith.index_cast %916 : i32 to index
    %c0_514 = arith.constant 0 : index
    %921 = vector.load %arg12[%920, %c0_514] : memref<64x1024xf32, #tpu.memory_space<vmem>>, vector<8x512xf32>
    %c0_515 = arith.constant 0 : index
    %c0_516 = arith.constant 0 : index
    %922 = vector.load %arg15[%c0_515, %c0_516] : memref<8x128xf32, #tpu.memory_space<vmem>>, vector<8x128xf32>
    %c0_517 = arith.constant 0 : index
    %c0_518 = arith.constant 0 : index
    %923 = vector.load %arg7[%c0_517, %c0_518] : memref<128x512xf32, #tpu.memory_space<vmem>>, vector<128x512xf32>
    %cst_519 = arith.constant dense<0.000000e+00> : vector<8x512xf32>
    %924 = tpu.matmul %922, %923, %cst_519 {dimension_numbers = #tpu.dot_dimension_numbers<[1], [0], [0], [1], [0, 0, 1, 1], [], []>} : vector<8x128xf32>, vector<128x512xf32>, vector<8x512xf32> -> vector<8x512xf32>
    %925 = arith.addf %921, %924 : vector<8x512xf32>
    %926 = vector.extract_strided_slice %925 {offsets = [0, 0], sizes = [8, 384], strides = [1, 1]} : vector<8x512xf32> to vector<8x384xf32>
    %927 = arith.negf %926 : vector<8x384xf32>
    %928 = math.exp %927 : vector<8x384xf32>
    %cst_520 = arith.constant 1.000000e+00 : f32
    %929 = vector.broadcast %cst_520 : f32 to vector<8x384xf32>
    %930 = arith.addf %929, %928 : vector<8x384xf32>
    %931 = arith.divf %929, %930 : vector<8x384xf32>
    %932 = vector.extract_strided_slice %925 {offsets = [0, 384], sizes = [8, 128], strides = [1, 1]} : vector<8x512xf32> to vector<8x128xf32>
    %933 = math.tanh %932 : vector<8x128xf32>
    %934 = vector.extract_strided_slice %931 {offsets = [0, 128], sizes = [8, 128], strides = [1, 1]} : vector<8x384xf32> to vector<8x128xf32>
    %c0_521 = arith.constant 0 : index
    %c0_522 = arith.constant 0 : index
    %935 = vector.load %arg16[%c0_521, %c0_522] : memref<8x128xf32, #tpu.memory_space<vmem>>, vector<8x128xf32>
    %936 = arith.mulf %934, %935 : vector<8x128xf32>
    %937 = vector.extract_strided_slice %931 {offsets = [0, 0], sizes = [8, 128], strides = [1, 1]} : vector<8x384xf32> to vector<8x128xf32>
    %938 = arith.mulf %937, %933 : vector<8x128xf32>
    %939 = arith.addf %936, %938 : vector<8x128xf32>
    %940 = vector.extract_strided_slice %931 {offsets = [0, 256], sizes = [8, 128], strides = [1, 1]} : vector<8x384xf32> to vector<8x128xf32>
    %941 = math.tanh %939 : vector<8x128xf32>
    %942 = arith.mulf %940, %941 : vector<8x128xf32>
    %c0_523 = arith.constant 0 : index
    %c0_524 = arith.constant 0 : index
    %943 = vector.load %arg16[%c0_523, %c0_524] : memref<8x128xf32, #tpu.memory_space<vmem>>, vector<8x128xf32>
    tpu.vector_store %arg16[%c0_523, %c0_524], %939 {strides = array<i32>} : memref<8x128xf32, #tpu.memory_space<vmem>>, vector<8x128xf32>,
    %c0_525 = arith.constant 0 : index
    %c0_526 = arith.constant 0 : index
    %944 = vector.load %arg15[%c0_525, %c0_526] : memref<8x128xf32, #tpu.memory_space<vmem>>, vector<8x128xf32>
    tpu.vector_store %arg15[%c0_525, %c0_526], %942 {strides = array<i32>} : memref<8x128xf32, #tpu.memory_space<vmem>>, vector<8x128xf32>,
    %945 = arith.index_cast %916 : i32 to index
    %c0_527 = arith.constant 0 : index
    %946 = vector.load %arg14[%945, %c0_527] : memref<64x256xf32, #tpu.memory_space<vmem>>, vector<8x128xf32>
    tpu.vector_store %arg14[%945, %c0_527], %942 {strides = array<i32>} : memref<64x256xf32, #tpu.memory_space<vmem>>, vector<8x128xf32>,
    %947 = arith.index_cast %919 : i32 to index
    %c512_528 = arith.constant 512 : index
    %948 = vector.load %arg12[%947, %c512_528] : memref<64x1024xf32, #tpu.memory_space<vmem>>, vector<8x512xf32>
    %c0_529 = arith.constant 0 : index
    %c0_530 = arith.constant 0 : index
    %949 = vector.load %arg17[%c0_529, %c0_530] : memref<8x128xf32, #tpu.memory_space<vmem>>, vector<8x128xf32>
    %c0_531 = arith.constant 0 : index
    %c0_532 = arith.constant 0 : index
    %950 = vector.load %arg8[%c0_531, %c0_532] : memref<128x512xf32, #tpu.memory_space<vmem>>, vector<128x512xf32>
    %cst_533 = arith.constant dense<0.000000e+00> : vector<8x512xf32>
    %951 = tpu.matmul %949, %950, %cst_533 {dimension_numbers = #tpu.dot_dimension_numbers<[1], [0], [0], [1], [0, 0, 1, 1], [], []>} : vector<8x128xf32>, vector<128x512xf32>, vector<8x512xf32> -> vector<8x512xf32>
    %952 = arith.addf %948, %951 : vector<8x512xf32>
    %953 = vector.extract_strided_slice %952 {offsets = [0, 0], sizes = [8, 384], strides = [1, 1]} : vector<8x512xf32> to vector<8x384xf32>
    %954 = arith.negf %953 : vector<8x384xf32>
    %955 = math.exp %954 : vector<8x384xf32>
    %cst_534 = arith.constant 1.000000e+00 : f32
    %956 = vector.broadcast %cst_534 : f32 to vector<8x384xf32>
    %957 = arith.addf %956, %955 : vector<8x384xf32>
    %958 = arith.divf %956, %957 : vector<8x384xf32>
    %959 = vector.extract_strided_slice %952 {offsets = [0, 384], sizes = [8, 128], strides = [1, 1]} : vector<8x512xf32> to vector<8x128xf32>
    %960 = math.tanh %959 : vector<8x128xf32>
    %961 = vector.extract_strided_slice %958 {offsets = [0, 128], sizes = [8, 128], strides = [1, 1]} : vector<8x384xf32> to vector<8x128xf32>
    %c0_535 = arith.constant 0 : index
    %c0_536 = arith.constant 0 : index
    %962 = vector.load %arg18[%c0_535, %c0_536] : memref<8x128xf32, #tpu.memory_space<vmem>>, vector<8x128xf32>
    %963 = arith.mulf %961, %962 : vector<8x128xf32>
    %964 = vector.extract_strided_slice %958 {offsets = [0, 0], sizes = [8, 128], strides = [1, 1]} : vector<8x384xf32> to vector<8x128xf32>
    %965 = arith.mulf %964, %960 : vector<8x128xf32>
    %966 = arith.addf %963, %965 : vector<8x128xf32>
    %967 = vector.extract_strided_slice %958 {offsets = [0, 256], sizes = [8, 128], strides = [1, 1]} : vector<8x384xf32> to vector<8x128xf32>
    %968 = math.tanh %966 : vector<8x128xf32>
    %969 = arith.mulf %967, %968 : vector<8x128xf32>
    %c0_537 = arith.constant 0 : index
    %c0_538 = arith.constant 0 : index
    %970 = vector.load %arg18[%c0_537, %c0_538] : memref<8x128xf32, #tpu.memory_space<vmem>>, vector<8x128xf32>
    tpu.vector_store %arg18[%c0_537, %c0_538], %966 {strides = array<i32>} : memref<8x128xf32, #tpu.memory_space<vmem>>, vector<8x128xf32>,
    %c0_539 = arith.constant 0 : index
    %c0_540 = arith.constant 0 : index
    %971 = vector.load %arg17[%c0_539, %c0_540] : memref<8x128xf32, #tpu.memory_space<vmem>>, vector<8x128xf32>
    tpu.vector_store %arg17[%c0_539, %c0_540], %969 {strides = array<i32>} : memref<8x128xf32, #tpu.memory_space<vmem>>, vector<8x128xf32>,
    %972 = arith.index_cast %919 : i32 to index
    %c128_541 = arith.constant 128 : index
    %973 = vector.load %arg14[%972, %c128_541] : memref<64x256xf32, #tpu.memory_space<vmem>>, vector<8x128xf32>
    tpu.vector_store %arg14[%972, %c128_541], %969 {strides = array<i32>} : memref<64x256xf32, #tpu.memory_space<vmem>>, vector<8x128xf32>,
    %c8_i32_542 = arith.constant 8 : i32
    %c56 = arith.constant 56 : index
    %c0_543 = arith.constant 0 : index
    %974 = vector.load %arg14[%c56, %c0_543] : memref<64x256xf32, #tpu.memory_space<vmem>>, vector<8x256xf32>
    %c0_544 = arith.constant 0 : index
    %c0_545 = arith.constant 0 : index
    %975 = vector.load %arg9[%c0_544, %c0_545] : memref<256x128xf32, #tpu.memory_space<vmem>>, vector<256x128xf32>
    %cst_546 = arith.constant dense<0.000000e+00> : vector<8x128xf32>
    %976 = tpu.matmul %974, %975, %cst_546 {dimension_numbers = #tpu.dot_dimension_numbers<[1], [0], [0], [1], [0, 0, 1, 1], [], []>} : vector<8x256xf32>, vector<256x128xf32>, vector<8x128xf32> -> vector<8x128xf32>
    %c0_547 = arith.constant 0 : index
    %c0_548 = arith.constant 0 : index
    %977 = vector.load %arg10[%c0_547, %c0_548] : memref<1x128xf32, #tpu.memory_space<vmem>>, vector<1x128xf32>
    %978 = vector.broadcast %977 : vector<1x128xf32> to vector<8x128xf32>
    %979 = arith.addf %976, %978 : vector<8x128xf32>
    %c0_549 = arith.constant 0 : index
    %c0_550 = arith.constant 0 : index
    %980 = vector.load %arg11[%c0_549, %c0_550] : memref<8x128xf32, #tpu.memory_space<vmem>>, vector<8x128xf32>
    tpu.vector_store %arg11[%c0_549, %c0_550], %979 {strides = array<i32>} : memref<8x128xf32, #tpu.memory_space<vmem>>, vector<8x128xf32>,
    return
  }
}

</mosaic_0001>

<bundles_post_ra>
// kernel: model_forward.1
= control target key start
LH: loop header
LB: loop body
LE: loop exit
PB: predicated region body
PF: predicated region fallthrough
CT: control target
= control target key end

     0   :  { %16 = vsyncpa [#allocation10], 0  ;;  %s16769_s0 = inlined_call_operand.vmem [shape: f32[64,128], index: 0, kind: input, shape index: {}]   ;;  %s16770_s1 = inlined_call_operand.hbm [shape: f32[128,1024], index: 1, kind: input, shape index: {}]   ;;  %s16771_s2 = inlined_call_operand.vmem [shape: f32[1,1024], index: 2, kind: input, shape index: {}]   ;;  %s16772_s3 = inlined_call_operand.hbm [shape: f32[128,512], index: 3, kind: input, shape index: {}]   ;;  %s16773_s4 = inlined_call_operand.hbm [shape: f32[128,512], index: 4, kind: input, shape index: {}]   ;;  %s16774_s5 = inlined_call_operand.hbm [shape: f32[256,1024], index: 5, kind: input, shape index: {}]   ;;  %s16775_s6 = inlined_call_operand.hbm [shape: f32[1,1024], index: 6, kind: input, shape index: {}]   ;;  %s16776_s7 = inlined_call_operand.vmem [shape: f32[128,512], index: 7, kind: input, shape index: {}]   ;;  %s16777_s8 = inlined_call_operand.hbm [shape: f32[128,512], index: 8, kind: input, shape index: {}]   ;;  %s16778_s9 = inlined_call_operand.hbm [shape: f32[256,128], index: 9, kind: input, shape index: {}]   ;;  %s16779_s10 = inlined_call_operand.vmem [shape: f32[1,128], index: 10, kind: input, shape index: {}]   ;;  %s16780_s11 = inlined_call_operand.vmem [shape: f32[8,128], index: 11, kind: output, shape index: {}]  }
   0x1   :  { %17 = vsyncpa [#allocation12], 0 }
   0x2   :  { %18 = vsyncpa [#allocation15], 0 }
   0x3   :  { %19 = vsyncpa [#allocation18], 0  ;;  %s13160_s17 = smov [#allocation11]   ;;  %s12998_s21 = scalar_lea.hbm %s16772_s3, 8192 }
   0x4   :  { %s41_s18 = sshll.u32 %s13160_s17, 4  ;;  %p12999_p0 = scmp.ne.s32.totalorder %s16772_s3, %s12998_s21  ;;  %s42_s18 = int_to_ptr.vmem [resolvable:$true] %s41_s18 }
   0x5   :  { %p13002_p1 = scmp.lt.u32.totalorder %s12998_s21, %s16772_s3 }
   0x7   :  { %p13004_p2 = pnand %p13002_p1, %p12999_p0 }
   0x9   :  { %13007 = shalt.err (!%p13004_p2)
}
   0xa   :  { %s13008_s26 = scalar_lea.vmem %s42_s18, 8192  ;;  %p13013_p4 = scmp.lt.s32.totalorder %s42_s18, %s42_s18 }
   0xb   :  { %p13009_p3 = scmp.ne.s32.totalorder %s42_s18, %s13008_s26  ;;  %p13014_p5 = scmp.lt.s32.totalorder %s13008_s26, %s13008_s26 }
   0xd   :  { %p13015_p6 = por %p13014_p5, %p13013_p4 }
   0xf   :  { %p13016_p7 = pnand %p13015_p6, %p13009_p3 }
  0x11   :  { %13019 = shalt.err (!%p13016_p7)
}
  0x12   :  { %s13161_s27 = smov 512   ;;  %s13162_s28 = smov 32  }
  0x13   :  { %47 = dma.hbm_to_vmem [thread:$0]  %s16772_s3, 8192, %s42_s18, [#allocation12], %s13161_s27, %s13161_s27, %s13162_s28  }
  0x14   :  { %s13163_s12 = smov [#allocation14]   ;;  %s13164_s14 = smov [#allocation17]  }
  0x15   :  { %s65_s13 = sshll.u32 %s13163_s12, 4  ;;  %s89_s15 = sshll.u32 %s13164_s14, 4  ;;  %s66_s13 = int_to_ptr.vmem [resolvable:$true] %s65_s13  ;;  %s90_s15 = int_to_ptr.vmem [resolvable:$true] %s89_s15 }
  0x16   :  { %s13020_s19 = scalar_lea.hbm %s16774_s5, 32768 }
  0x17   :  { %p13021_p8 = scmp.ne.s32.totalorder %s16774_s5, %s13020_s19  ;;  %p13024_p9 = scmp.lt.u32.totalorder %s13020_s19, %s16774_s5 }
  0x19   :  { %p13026_p10 = pnand %p13024_p9, %p13021_p8 }
  0x1b   :  { %13029 = shalt.err (!%p13026_p10)
}
  0x1c   :  { %s13030_s3 = scalar_lea.vmem %s66_s13, 32768  ;;  %p13035_p12 = scmp.lt.s32.totalorder %s66_s13, %s66_s13 }
  0x1d   :  { %p13031_p11 = scmp.ne.s32.totalorder %s66_s13, %s13030_s3  ;;  %p13036_p13 = scmp.lt.s32.totalorder %s13030_s3, %s13030_s3 }
  0x1f   :  { %p13037_p0 = por %p13036_p13, %p13035_p12 }
  0x21   :  { %p13038_p1 = pnand %p13037_p0, %p13031_p11 }
  0x23   :  { %13041 = shalt.err (!%p13038_p1)
}
  0x24   :  { %s13165_s18 = smov 1024   ;;  %s13166_s24 = smov 64  }
  0x25   :  { %71 = dma.hbm_to_vmem [thread:$0]  %s16774_s5, 32768, %s66_s13, [#allocation15], %s13165_s18, %s13165_s18, %s13166_s24  }
  0x26   :  { %s13042_s12 = scalar_lea.hbm %s16777_s8, 8192 }
  0x27   :  { %p13043_p2 = scmp.ne.s32.totalorder %s16777_s8, %s13042_s12  ;;  %p13046_p3 = scmp.lt.u32.totalorder %s13042_s12, %s16777_s8 }
  0x29   :  { %p13048_p4 = pnand %p13046_p3, %p13043_p2 }
  0x2b   :  { %13051 = shalt.err (!%p13048_p4)
}
  0x2c   :  { %s13052_s20 = scalar_lea.vmem %s90_s15, 8192  ;;  %p13057_p6 = scmp.lt.s32.totalorder %s90_s15, %s90_s15 }
  0x2d   :  { %p13053_p5 = scmp.ne.s32.totalorder %s90_s15, %s13052_s20  ;;  %p13058_p7 = scmp.lt.s32.totalorder %s13052_s20, %s13052_s20 }
  0x2f   :  { %p13059_p8 = por %p13058_p7, %p13057_p6 }
  0x31   :  { %p13060_p9 = pnand %p13059_p8, %p13053_p5 }
  0x33   :  { %13063 = shalt.err (!%p13060_p9)
}
  0x34   :  { %95 = dma.hbm_to_vmem [thread:$0]  %s16777_s8, 8192, %s90_s15, [#allocation18], %s13161_s27, %s13161_s27, %s13162_s28  }
  0x35   :  { %s13167_s21 = smov [#allocation9]   ;;  %s13168_s23 = smov [#allocation13]  }
  0x36   :  { %s27_s22 = sshll.u32 %s13167_s21, 4  ;;  %s53_s3 = sshll.u32 %s13168_s23, 4  ;;  %s28_s22 = int_to_ptr.vmem [resolvable:$true] %s27_s22  ;;  %s54_s3 = int_to_ptr.vmem [resolvable:$true] %s53_s3 }
  0x37   :  { %s13064_s29 = scalar_lea.hbm %s16770_s1, 16384 }
  0x38   :  { %p13065_p10 = scmp.ne.s32.totalorder %s16770_s1, %s13064_s29  ;;  %p13068_p11 = scmp.lt.u32.totalorder %s13064_s29, %s16770_s1 }
  0x3a   :  { %p13070_p12 = pnand %p13068_p11, %p13065_p10 }
  0x3c   :  { %13073 = shalt.err (!%p13070_p12)
}
  0x3d   :  { %s13074_s8 = scalar_lea.vmem %s28_s22, 16384  ;;  %p13079_p0 = scmp.lt.s32.totalorder %s28_s22, %s28_s22 }
  0x3e   :  { %p13075_p13 = scmp.ne.s32.totalorder %s28_s22, %s13074_s8  ;;  %p13080_p1 = scmp.lt.s32.totalorder %s13074_s8, %s13074_s8 }
  0x40   :  { %p13081_p2 = por %p13080_p1, %p13079_p0 }
  0x42   :  { %p13082_p3 = pnand %p13081_p2, %p13075_p13 }
  0x44   :  { %13085 = shalt.err (!%p13082_p3)
}
  0x45   :  { %33 = dma.hbm_to_vmem [thread:$0]  %s16770_s1, 16384, %s28_s22, [#allocation10], %s13165_s18, %s13165_s18, %s13166_s24  }
  0x46   :  { %s13086_s5 = scalar_lea.hbm %s16773_s4, 8192 }
  0x47   :  { %p13087_p4 = scmp.ne.s32.totalorder %s16773_s4, %s13086_s5  ;;  %p13090_p5 = scmp.lt.u32.totalorder %s13086_s5, %s16773_s4 }
  0x49   :  { %p13092_p6 = pnand %p13090_p5, %p13087_p4 }
  0x4b   :  { %13095 = shalt.err (!%p13092_p6)
}
  0x4c   :  { %s13096_s26 = scalar_lea.vmem %s54_s3, 8192  ;;  %p13101_p8 = scmp.lt.s32.totalorder %s54_s3, %s54_s3 }
  0x4d   :  { %p13097_p7 = scmp.ne.s32.totalorder %s54_s3, %s13096_s26  ;;  %p13102_p9 = scmp.lt.s32.totalorder %s13096_s26, %s13096_s26 }
  0x4f   :  { %p13103_p10 = por %p13102_p9, %p13101_p8 }
  0x51   :  { %p13104_p11 = pnand %p13103_p10, %p13097_p7 }
  0x53   :  { %13107 = shalt.err (!%p13104_p11)
}
  0x54   :  { %59 = dma.hbm_to_vmem [thread:$0]  %s16773_s4, 8192, %s54_s3, [#allocation12], %s13161_s27, %s13161_s27, %s13162_s28  }
  0x55   :  { %s13169_s24 = smov [#allocation16]   ;;  %s13170_s29 = smov [#allocation19]  }
  0x56   :  { %s78_s22 = sshll.u32 %s13169_s24, 4  ;;  %s101_s30 = sshll.u32 %s13170_s29, 4  ;;  %s79_s22 = int_to_ptr.vmem [resolvable:$true] %s78_s22  ;;  %s102_s30 = int_to_ptr.vmem [resolvable:$true] %s101_s30 }
  0x57   :  { %s13108_s16 = scalar_lea.hbm %s16775_s6, 128 }
  0x58   :  { %p13109_p12 = scmp.ne.s32.totalorder %s16775_s6, %s13108_s16  ;;  %p13112_p13 = scmp.lt.u32.totalorder %s13108_s16, %s16775_s6 }
  0x5a   :  { %p13114_p0 = pnand %p13112_p13, %p13109_p12 }
  0x5c   :  { %13117 = shalt.err (!%p13114_p0)
}
  0x5d   :  { %s13118_s4 = scalar_lea.vmem %s79_s22, 128  ;;  %p13123_p2 = scmp.lt.s32.totalorder %s79_s22, %s79_s22 }
  0x5e   :  { %p13119_p1 = scmp.ne.s32.totalorder %s79_s22, %s13118_s4  ;;  %p13124_p3 = scmp.lt.s32.totalorder %s13118_s4, %s13118_s4 }
  0x60   :  { %p13125_p4 = por %p13124_p3, %p13123_p2 }
  0x62   :  { %p13126_p5 = pnand %p13125_p4, %p13119_p1 }
  0x64   :  { %13129 = shalt.err (!%p13126_p5)
}
  0x65   :  { %81 = dma.hbm_to_vmem [thread:$0]  %s16775_s6, 128, %s79_s22, [#allocation15]  }
  0x66   :  { %s13130_s5 = scalar_lea.hbm %s16778_s9, 4096 }
  0x67   :  { %p13131_p6 = scmp.ne.s32.totalorder %s16778_s9, %s13130_s5  ;;  %p13134_p7 = scmp.lt.u32.totalorder %s13130_s5, %s16778_s9 }
  0x69   :  { %p13136_p8 = pnand %p13134_p7, %p13131_p6 }
  0x6b   :  { %13139 = shalt.err (!%p13136_p8)
}
  0x6c   :  { %s13140_s26 = scalar_lea.vmem %s102_s30, 4096  ;;  %p13145_p10 = scmp.lt.s32.totalorder %s102_s30, %s102_s30 }
  0x6d   :  { %p13141_p9 = scmp.ne.s32.totalorder %s102_s30, %s13140_s26  ;;  %p13146_p11 = scmp.lt.s32.totalorder %s13140_s26, %s13140_s26 }
  0x6f   :  { %p13147_p12 = por %p13146_p11, %p13145_p10 }
  0x71   :  { %p13148_p13 = pnand %p13147_p12, %p13141_p9 }
  0x73   :  { %13151 = shalt.err (!%p13148_p13)
}
  0x74   :  { %s13171_s6 = smov 128   ;;  %s13172_s1 = smov 8  }
  0x75   :  { %107 = dma.hbm_to_vmem [thread:$0]  %s16778_s9, 4096, %s102_s30, [#allocation18], %s13171_s6, %s13171_s6, %s13172_s1  }
  0x76   :  { %13152 = dma.done.wait [#allocation10], 16384  }
  0x77   :  { %13153 = vsyncadd [#allocation10], 4294950912 }
  0x78   :  { %13154 = dma.done.wait [#allocation12], 16384  }
  0x79   :  { %13155 = vsyncadd [#allocation12], 4294950912 }
  0x7a   :  { %13156 = dma.done.wait [#allocation15], 32896  }
  0x7b   :  { %13157 = vsyncadd [#allocation15], 4294934400 }
  0x7c   :  { %13158 = dma.done.wait [#allocation18], 12288  }
  0x7d   :  { %13159 = vsyncadd [#allocation18], 4294955008  ;;  %v16781_v0 = vmov 0.0   ;;  %v140_v1 = vld [vmem:[#allocation9 + $0x8] sm:$0xff]  ;;  %v142_v3 = vld [vmem:[#allocation9 + $0x18] sm:$0xff] }
  0x7e   :  { %373 = vmatprep.mubr.f32.mxu0 %v16781_v0  ;;  %486 = vmatprep.mubr.f32.mxu1 %v16781_v0  ;;  %v148_v2 = vld [vmem:[#allocation9 + $0x48] sm:$0xff]  ;;  %v150_v5 = vld [vmem:[#allocation9 + $0x58] sm:$0xff]  ;;  %v139_v6 = vld [vmem:[#allocation9] sm:$0xff] }
  0x7f   :  { %v9776_v4 = vpack.c.bf16 %v148_v2, %v140_v1  ;;  %v147_v7 = vld [vmem:[#allocation9 + $0x40] sm:$0xff]  ;;  %v9808_v8 = vpack.c.bf16 %v150_v5, %v142_v3  ;;  %v141_v10 = vld [vmem:[#allocation9 + $0x10] sm:$0xff]  ;;  %v156_v12 = vld [vmem:[#allocation9 + $0x88] sm:$0xff] }
  0x80   :  { %v9778_v9 = vpack.c.bf16 %v147_v7, %v139_v6  ;;  %v149_v11 = vld [vmem:[#allocation9 + $0x50] sm:$0xff]  ;;  %v164_v14 = vld [vmem:[#allocation9 + $0xc8] sm:$0xff]  ;;  %v158_v15 = vld [vmem:[#allocation9 + $0x98] sm:$0xff] }
  0x81   :  { %9777 = vmatprep.subr.bf16.mxu0 %v9776_v4  ;;  %v9810_v13 = vpack.c.bf16 %v149_v11, %v141_v10  ;;  %v166_v16 = vld [vmem:[#allocation9 + $0xd8] sm:$0xff]  ;;  %9809 = vmatprep.subr.bf16.mxu1 %v9808_v8  ;;  %v9780_v17 = vpack.c.bf16 %v164_v14, %v156_v12  ;;  %v155_v19 = vld [vmem:[#allocation9 + $0x80] sm:$0xff]  ;;  %v157_v21 = vld [vmem:[#allocation9 + $0x90] sm:$0xff] }
  0x82   :  { %9779 = vmatpush1.bf16.msra.mxu0 %v9778_v9  ;;  %v9812_v18 = vpack.c.bf16 %v166_v16, %v158_v15  ;;  %v163_v20 = vld [vmem:[#allocation9 + $0xc0] sm:$0xff]  ;;  %v165_v23 = vld [vmem:[#allocation9 + $0xd0] sm:$0xff]  ;;  %v172_v24 = vld [vmem:[#allocation9 + $0x108] sm:$0xff] }
  0x83   :  { %9811 = vmatpush1.bf16.msra.mxu1 %v9810_v13  ;;  %v9782_v22 = vpack.c.bf16 %v163_v20, %v155_v19  ;;  %v180_v25 = vld [vmem:[#allocation9 + $0x148] sm:$0xff]  ;;  %9781 = vmatprep.subr.bf16.mxu0 %v9780_v17  ;;  %v9814_v26 = vpack.c.bf16 %v165_v23, %v157_v21  ;;  %v174_v28 = vld [vmem:[#allocation9 + $0x118] sm:$0xff]  ;;  %v171_v30 = vld [vmem:[#allocation9 + $0x100] sm:$0xff] }
  0x84   :  { %9813 = vmatprep.subr.bf16.mxu1 %v9812_v18  ;;  %v9784_v27 = vpack.c.bf16 %v180_v25, %v172_v24  ;;  %v182_v29 = vld [vmem:[#allocation9 + $0x158] sm:$0xff]  ;;  %v179_v32 = vld [vmem:[#allocation9 + $0x140] sm:$0xff]  ;;  %v173_v33 = vld [vmem:[#allocation9 + $0x110] sm:$0xff] }
  0x85   :  { %v9816_v31 = vpack.c.bf16 %v182_v29, %v174_v28  ;;  %v181_v34 = vld [vmem:[#allocation9 + $0x150] sm:$0xff]  ;;  %v9786_v35 = vpack.c.bf16 %v179_v32, %v171_v30  ;;  %v188_v36 = vld [vmem:[#allocation9 + $0x188] sm:$0xff]  ;;  %v190_v38 = vld [vmem:[#allocation9 + $0x198] sm:$0xff] }
  0x86   :  { %9783 = vmatpush1.bf16.msra.mxu0 %v9782_v22  ;;  %v196_v37 = vld [vmem:[#allocation9 + $0x1c8] sm:$0xff]  ;;  %v9818_v39 = vpack.c.bf16 %v181_v34, %v173_v33  ;;  %v198_v41 = vld [vmem:[#allocation9 + $0x1d8] sm:$0xff]  ;;  %v187_v42 = vld [vmem:[#allocation9 + $0x180] sm:$0xff] }
  0x87   :  { %9815 = vmatpush1.bf16.msra.mxu1 %v9814_v26  ;;  %9785 = vmatprep.subr.bf16.mxu0 %v9784_v27  ;;  %v9788_v40 = vpack.c.bf16 %v196_v37, %v188_v36  ;;  %v195_v43 = vld [vmem:[#allocation9 + $0x1c0] sm:$0xff]  ;;  %v9820_v44 = vpack.c.bf16 %v198_v41, %v190_v38  ;;  %v189_v45 = vld [vmem:[#allocation9 + $0x190] sm:$0xff]  ;;  %v204_v47 = vld [vmem:[#allocation9 + $0x208] sm:$0xff] }
  0x88   :  { %9817 = vmatprep.subr.bf16.mxu1 %v9816_v31  ;;  %v197_v46 = vld [vmem:[#allocation9 + $0x1d0] sm:$0xff]  ;;  %v212_v48 = vld [vmem:[#allocation9 + $0x248] sm:$0xff]  ;;  %v206_v49 = vld [vmem:[#allocation9 + $0x218] sm:$0xff]  ;;  %v9790_v51 = vpack.c.bf16 %v195_v43, %v187_v42 }
  0x89   :  { %v214_v50 = vld [vmem:[#allocation9 + $0x258] sm:$0xff]  ;;  %v9822_v52 = vpack.c.bf16 %v197_v46, %v189_v45  ;;  %v9792_v53 = vpack.c.bf16 %v212_v48, %v204_v47  ;;  %v203_v54 = vld [vmem:[#allocation9 + $0x200] sm:$0xff]  ;;  %v205_v56 = vld [vmem:[#allocation9 + $0x210] sm:$0xff] }
  0x8a   :  { %9787 = vmatpush1.bf16.msra.mxu0 %v9786_v35  ;;  %v211_v55 = vld [vmem:[#allocation9 + $0x240] sm:$0xff]  ;;  %v9824_v57 = vpack.c.bf16 %v214_v50, %v206_v49  ;;  %v213_v58 = vld [vmem:[#allocation9 + $0x250] sm:$0xff]  ;;  %v220_v59 = vld [vmem:[#allocation9 + $0x288] sm:$0xff] }
  0x8b   :  { %9819 = vmatpush1.bf16.msra.mxu1 %v9818_v39  ;;  %9789 = vmatprep.subr.bf16.mxu0 %v9788_v40  ;;  %v228_v60 = vld [vmem:[#allocation9 + $0x2c8] sm:$0xff]  ;;  %v222_v61 = vld [vmem:[#allocation9 + $0x298] sm:$0xff]  ;;  %v9794_v63 = vpack.c.bf16 %v211_v55, %v203_v54  ;;  %v9826_v1 = vpack.c.bf16 %v213_v58, %v205_v56  ;;  %v219_v3 = vld [vmem:[#allocation9 + $0x280] sm:$0xff] }
  0x8c   :  { %9821 = vmatprep.subr.bf16.mxu1 %v9820_v44  ;;  %v230_v62 = vld [vmem:[#allocation9 + $0x2d8] sm:$0xff]  ;;  %v9796_v2 = vpack.c.bf16 %v228_v60, %v220_v59  ;;  %v227_v4 = vld [vmem:[#allocation9 + $0x2c0] sm:$0xff]  ;;  %v221_v5 = vld [vmem:[#allocation9 + $0x290] sm:$0xff] }
  0x8d   :  { %v9828_v6 = vpack.c.bf16 %v230_v62, %v222_v61  ;;  %v229_v7 = vld [vmem:[#allocation9 + $0x2d0] sm:$0xff]  ;;  %v236_v8 = vld [vmem:[#allocation9 + $0x308] sm:$0xff]  ;;  %v238_v10 = vld [vmem:[#allocation9 + $0x318] sm:$0xff]  ;;  %v9798_v12 = vpack.c.bf16 %v227_v4, %v219_v3 }
  0x8e   :  { %9791 = vmatpush1.bf16.msra.mxu0 %v9790_v51  ;;  %v244_v9 = vld [vmem:[#allocation9 + $0x348] sm:$0xff]  ;;  %v246_v11 = vld [vmem:[#allocation9 + $0x358] sm:$0xff]  ;;  %v9830_v13 = vpack.c.bf16 %v229_v7, %v221_v5  ;;  %v235_v15 = vld [vmem:[#allocation9 + $0x300] sm:$0xff] }
  0x8f   :  { %9823 = vmatpush1.bf16.msra.mxu1 %v9822_v52  ;;  %9793 = vmatprep.subr.bf16.mxu0 %v9792_v53  ;;  %v9800_v14 = vpack.c.bf16 %v244_v9, %v236_v8  ;;  %v243_v16 = vld [vmem:[#allocation9 + $0x340] sm:$0xff]  ;;  %v237_v17 = vld [vmem:[#allocation9 + $0x310] sm:$0xff]  ;;  %v9832_v18 = vpack.c.bf16 %v246_v11, %v238_v10  ;;  %v252_v20 = vld [vmem:[#allocation9 + $0x388] sm:$0xff] }
  0x90   :  { %9825 = vmatprep.subr.bf16.mxu1 %v9824_v57  ;;  %v245_v19 = vld [vmem:[#allocation9 + $0x350] sm:$0xff]  ;;  %v260_v21 = vld [vmem:[#allocation9 + $0x3c8] sm:$0xff]  ;;  %v254_v22 = vld [vmem:[#allocation9 + $0x398] sm:$0xff]  ;;  %v9802_v24 = vpack.c.bf16 %v243_v16, %v235_v15 }
  0x91   :  { %v262_v23 = vld [vmem:[#allocation9 + $0x3d8] sm:$0xff]  ;;  %v9834_v25 = vpack.c.bf16 %v245_v19, %v237_v17  ;;  %v9804_v26 = vpack.c.bf16 %v260_v21, %v252_v20  ;;  %v251_v27 = vld [vmem:[#allocation9 + $0x380] sm:$0xff]  ;;  %v253_v29 = vld [vmem:[#allocation9 + $0x390] sm:$0xff] }
  0x92   :  { %9795 = vmatpush1.bf16.msra.mxu0 %v9794_v63  ;;  %v259_v28 = vld [vmem:[#allocation9 + $0x3c0] sm:$0xff]  ;;  %v9836_v30 = vpack.c.bf16 %v262_v23, %v254_v22  ;;  %v261_v31 = vld [vmem:[#allocation9 + $0x3d0] sm:$0xff]  ;;  %v144_v32 = vld [vmem:[#allocation9 + $0x28] sm:$0xff] }
  0x93   :  { %9827 = vmatpush1.bf16.msra.mxu1 %v9826_v1  ;;  %9797 = vmatprep.subr.bf16.mxu0 %v9796_v2  ;;  %v152_v33 = vld [vmem:[#allocation9 + $0x68] sm:$0xff]  ;;  %v146_v34 = vld [vmem:[#allocation9 + $0x38] sm:$0xff]  ;;  %v9806_v36 = vpack.c.bf16 %v259_v28, %v251_v27  ;;  %v9838_v37 = vpack.c.bf16 %v261_v31, %v253_v29  ;;  %v143_v39 = vld [vmem:[#allocation9 + $0x20] sm:$0xff] }
  0x94   :  { %9829 = vmatprep.subr.bf16.mxu1 %v9828_v6  ;;  %v154_v35 = vld [vmem:[#allocation9 + $0x78] sm:$0xff]  ;;  %v9840_v38 = vpack.c.bf16 %v152_v33, %v144_v32  ;;  %v151_v40 = vld [vmem:[#allocation9 + $0x60] sm:$0xff]  ;;  %v145_v42 = vld [vmem:[#allocation9 + $0x30] sm:$0xff] }
  0x95   :  { %v9872_v41 = vpack.c.bf16 %v154_v35, %v146_v34  ;;  %v153_v43 = vld [vmem:[#allocation9 + $0x70] sm:$0xff]  ;;  %v160_v44 = vld [vmem:[#allocation9 + $0xa8] sm:$0xff]  ;;  %v13338_v46 = vld [vmem:[%s16769_s0] sm:$0xff]  ;;  %v9842_v47 = vpack.c.bf16 %v151_v40, %v143_v39 }
  0x96   :  { %9799 = vmatpush1.bf16.msra.mxu0 %v9798_v12  ;;  %v168_v45 = vld [vmem:[#allocation9 + $0xe8] sm:$0xff]  ;;  %v162_v48 = vld [vmem:[#allocation9 + $0xb8] sm:$0xff]  ;;  %v9874_v50 = vpack.c.bf16 %v153_v43, %v145_v42  ;;  %v159_v51 = vld [vmem:[#allocation9 + $0xa0] sm:$0xff] }
  0x97   :  { %9831 = vmatpush1.bf16.msra.mxu1 %v9830_v13  ;;  %9801 = vmatprep.subr.bf16.mxu0 %v9800_v14  ;;  %v170_v49 = vld [vmem:[#allocation9 + $0xf8] sm:$0xff]  ;;  %v167_v52 = vld [vmem:[#allocation9 + $0xe0] sm:$0xff]  ;;  %v9844_v53 = vpack.c.bf16 %v168_v45, %v160_v44  ;;  %v161_v54 = vld [vmem:[#allocation9 + $0xb0] sm:$0xff] }
  0x98   :  { %9833 = vmatprep.subr.bf16.mxu1 %v9832_v18  ;;  %v169_v55 = vld [vmem:[#allocation9 + $0xf0] sm:$0xff]  ;;  %v9876_v56 = vpack.c.bf16 %v170_v49, %v162_v48  ;;  %v176_v57 = vld [vmem:[#allocation9 + $0x128] sm:$0xff]  ;;  %v9846_v60 = vpack.c.bf16 %v167_v52, %v159_v51  ;;  %v178_v61 = vld [vmem:[#allocation9 + $0x138] sm:$0xff] }
  0x99   :  { %v184_v58 = vld [vmem:[#allocation9 + $0x168] sm:$0xff]  ;;  %v186_v62 = vld [vmem:[#allocation9 + $0x178] sm:$0xff]  ;;  %v9878_v63 = vpack.c.bf16 %v169_v55, %v161_v54  ;;  %v175_v1 = vld [vmem:[#allocation9 + $0x120] sm:$0xff] }
  0x9a   :  { %9803 = vmatpush1.bf16.msra.mxu0 %v9802_v24  ;;  %v13345_v59 = vld [vmem:[%s16769_s0 + $0x8] sm:$0xff]  ;;  %v183_v2 = vld [vmem:[#allocation9 + $0x160] sm:$0xff]  ;;  %v9848_v3 = vpack.c.bf16 %v184_v58, %v176_v57  ;;  %v177_v4 = vld [vmem:[#allocation9 + $0x130] sm:$0xff]  ;;  %v9880_v6 = vpack.c.bf16 %v186_v62, %v178_v61 }
  0x9b   :  { %9835 = vmatpush1.bf16.msra.mxu1 %v9834_v25  ;;  %9805 = vmatprep.subr.bf16.mxu0 %v9804_v26  ;;  %v185_v5 = vld [vmem:[#allocation9 + $0x170] sm:$0xff]  ;;  %v192_v7 = vld [vmem:[#allocation9 + $0x1a8] sm:$0xff]  ;;  %v9850_v10 = vpack.c.bf16 %v183_v2, %v175_v1  ;;  %v194_v11 = vld [vmem:[#allocation9 + $0x1b8] sm:$0xff] }
  0x9c   :  { %9837 = vmatprep.subr.bf16.mxu1 %v9836_v30  ;;  %v200_v8 = vld [vmem:[#allocation9 + $0x1e8] sm:$0xff]  ;;  %v13354_v9 = vld [vmem:[%s16769_s0 + $0x10] sm:$0xff]  ;;  %v202_v12 = vld [vmem:[#allocation9 + $0x1f8] sm:$0xff]  ;;  %v9882_v13 = vpack.c.bf16 %v185_v5, %v177_v4 }
  0x9d   :  { %v191_v14 = vld [vmem:[#allocation9 + $0x1a0] sm:$0xff]  ;;  %v9852_v16 = vpack.c.bf16 %v200_v8, %v192_v7  ;;  %v193_v17 = vld [vmem:[#allocation9 + $0x1b0] sm:$0xff]  ;;  %v9884_v19 = vpack.c.bf16 %v202_v12, %v194_v11  ;;  %v208_v20 = vld [vmem:[#allocation9 + $0x228] sm:$0xff] }
  0x9e   :  { %9807 = vmatpush1.bf16.msra.mxu0 %v9806_v36  ;;  %v199_v15 = vld [vmem:[#allocation9 + $0x1e0] sm:$0xff]  ;;  %v201_v18 = vld [vmem:[#allocation9 + $0x1f0] sm:$0xff]  ;;  %v216_v21 = vld [vmem:[#allocation9 + $0x268] sm:$0xff] }
  0x9f   :  { %9839 = vmatpush1.bf16.msra.mxu1 %v9838_v37  ;;  %9841 = vmatprep.subr.bf16.mxu0 %v9840_v38  ;;  %v13363_v22 = vld [vmem:[%s16769_s0 + $0x18] sm:$0xff]  ;;  %v9854_v23 = vpack.c.bf16 %v199_v15, %v191_v14  ;;  %v9886_v26 = vpack.c.bf16 %v201_v18, %v193_v17  ;;  %v207_v27 = vld [vmem:[#allocation9 + $0x220] sm:$0xff]  ;;  %v9856_v29 = vpack.c.bf16 %v216_v21, %v208_v20  ;;  %v209_v30 = vld [vmem:[#allocation9 + $0x230] sm:$0xff] }
  0xa0   :  { %9873 = vmatprep.subr.bf16.mxu1 %v9872_v41  ;;  %v210_v24 = vld [vmem:[#allocation9 + $0x238] sm:$0xff]  ;;  %v215_v28 = vld [vmem:[#allocation9 + $0x260] sm:$0xff]  ;;  %v217_v31 = vld [vmem:[#allocation9 + $0x270] sm:$0xff] }
  0xa1   :  { %374 = vmatmul.mubr.f32.vlgmr.msra.gmra.mrb[0].mxu0 %v13338_v46  ;;  %v218_v25 = vld [vmem:[#allocation9 + $0x278] sm:$0xff]  ;;  %v224_v33 = vld [vmem:[#allocation9 + $0x2a8] sm:$0xff]  ;;  %v13372_v35 = vld [vmem:[%s16769_s0 + $0x20] sm:$0xff]  ;;  %v9858_v36 = vpack.c.bf16 %v215_v28, %v207_v27  ;;  %v9890_v39 = vpack.c.bf16 %v217_v31, %v209_v30 }
  0xa2   :  { %487 = vmatmul.mubr.f32.vlgmr.msra.gmra.mrb[0].mxu1 %v13338_v46  ;;  %9843 = vmatpush1.bf16.msra.mxu0 %v9842_v47  ;;  %v9888_v32 = vpack.c.bf16 %v218_v25, %v210_v24  ;;  %v232_v34 = vld [vmem:[#allocation9 + $0x2e8] sm:$0xff]  ;;  %v226_v37 = vld [vmem:[#allocation9 + $0x2b8] sm:$0xff]  ;;  %v223_v40 = vld [vmem:[#allocation9 + $0x2a0] sm:$0xff] }
  0xa3   :  { %9875 = vmatpush1.bf16.msra.mxu1 %v9874_v50  ;;  %379 = vmatprep.mubr.f32.mxu0 %v16781_v0  ;;  %v234_v38 = vld [vmem:[#allocation9 + $0x2f8] sm:$0xff]  ;;  %v231_v41 = vld [vmem:[#allocation9 + $0x2e0] sm:$0xff]  ;;  %v9860_v42 = vpack.c.bf16 %v232_v34, %v224_v33  ;;  %v225_v43 = vld [vmem:[#allocation9 + $0x2b0] sm:$0xff] }
  0xa4   :  { %492 = vmatprep.mubr.f32.mxu1 %v16781_v0  ;;  %9845 = vmatprep.subr.bf16.mxu0 %v9844_v53  ;;  %v233_v44 = vld [vmem:[#allocation9 + $0x2f0] sm:$0xff]  ;;  %v9892_v45 = vpack.c.bf16 %v234_v38, %v226_v37  ;;  %v240_v47 = vld [vmem:[#allocation9 + $0x328] sm:$0xff]  ;;  %v9862_v50 = vpack.c.bf16 %v231_v41, %v223_v40  ;;  %v242_v51 = vld [vmem:[#allocation9 + $0x338] sm:$0xff] }
  0xa5   :  { %380 = vmatmul.mubr.f32.gmra.mrb[2].mxu0 %v13345_v59  ;;  %9877 = vmatprep.subr.bf16.mxu1 %v9876_v56  ;;  %v248_v48 = vld [vmem:[#allocation9 + $0x368] sm:$0xff]  ;;  %v250_v52 = vld [vmem:[#allocation9 + $0x378] sm:$0xff]  ;;  %v9894_v53 = vpack.c.bf16 %v233_v44, %v225_v43  ;;  %v239_v54 = vld [vmem:[#allocation9 + $0x320] sm:$0xff] }
  0xa6   :  { %493 = vmatmul.mubr.f32.gmra.mrb[2].mxu1 %v13345_v59  ;;  %9847 = vmatpush1.bf16.msra.mxu0 %v9846_v60  ;;  %v13381_v49 = vld [vmem:[%s16769_s0 + $0x28] sm:$0xff]  ;;  %v247_v55 = vld [vmem:[#allocation9 + $0x360] sm:$0xff]  ;;  %v9864_v56 = vpack.c.bf16 %v248_v48, %v240_v47  ;;  %v241_v57 = vld [vmem:[#allocation9 + $0x330] sm:$0xff]  ;;  %v9896_v60 = vpack.c.bf16 %v250_v52, %v242_v51 }
  0xa7   :  { %9879 = vmatpush1.bf16.msra.mxu1 %v9878_v63  ;;  %385 = vmatprep.mubr.f32.mxu0 %v16781_v0  ;;  %v249_v58 = vld [vmem:[#allocation9 + $0x370] sm:$0xff]  ;;  %v256_v61 = vld [vmem:[#allocation9 + $0x3a8] sm:$0xff]  ;;  %v9866_v1 = vpack.c.bf16 %v247_v55, %v239_v54  ;;  %v258_v2 = vld [vmem:[#allocation9 + $0x3b8] sm:$0xff] }
  0xa8   :  { %498 = vmatprep.mubr.f32.mxu1 %v16781_v0  ;;  %9849 = vmatprep.subr.bf16.mxu0 %v9848_v3  ;;  %v264_v62 = vld [vmem:[#allocation9 + $0x3e8] sm:$0xff]  ;;  %v13390_v63 = vld [vmem:[%s16769_s0 + $0x30] sm:$0xff]  ;;  %v266_v3 = vld [vmem:[#allocation9 + $0x3f8] sm:$0xff]  ;;  %v9898_v4 = vpack.c.bf16 %v249_v58, %v241_v57 }
  0xa9   :  { %386 = vmatmul.mubr.f32.gmra.mrb[4].mxu0 %v13354_v9  ;;  %9881 = vmatprep.subr.bf16.mxu1 %v9880_v6  ;;  %v255_v5 = vld [vmem:[#allocation9 + $0x3a0] sm:$0xff]  ;;  %v9868_v7 = vpack.c.bf16 %v264_v62, %v256_v61  ;;  %v257_v8 = vld [vmem:[#allocation9 + $0x3b0] sm:$0xff]  ;;  %v9900_v11 = vpack.c.bf16 %v266_v3, %v258_v2  ;;  %v838_v12 = vld [vmem:[#allocation11 + $0x8] sm:$0xff] }
  0xaa   :  { %499 = vmatmul.mubr.f32.gmra.mrb[4].mxu1 %v13354_v9  ;;  %9851 = vmatpush1.bf16.msra.mxu0 %v9850_v10  ;;  %v263_v6 = vld [vmem:[#allocation9 + $0x3e0] sm:$0xff]  ;;  %v265_v10 = vld [vmem:[#allocation9 + $0x3f0] sm:$0xff]  ;;  %v13399_v14 = vld [vmem:[%s16769_s0 + $0x38] sm:$0xff] }
  0xab   :  { %9883 = vmatpush1.bf16.msra.mxu1 %v9882_v13  ;;  %391 = vmatprep.mubr.f32.mxu0 %v16781_v0  ;;  %v842_v13 = vld [vmem:[#allocation11 + $0x28] sm:$0xff]  ;;  %v9870_v15 = vpack.c.bf16 %v263_v6, %v255_v5  ;;  %v844_v17 = vld [vmem:[#allocation11 + $0x38] sm:$0xff]  ;;  %v9902_v18 = vpack.c.bf16 %v265_v10, %v257_v8  ;;  %v841_v20 = vld [vmem:[#allocation11 + $0x20] sm:$0xff] }
  0xac   :  { %504 = vmatprep.mubr.f32.mxu1 %v16781_v0  ;;  %9853 = vmatprep.subr.bf16.mxu0 %v9852_v16  ;;  %v840_v16 = vld [vmem:[#allocation11 + $0x18] sm:$0xff]  ;;  %v13403_v21 = vpack.c.bf16 %v842_v13, %v838_v12  ;;  %v843_v24 = vld [vmem:[#allocation11 + $0x30] sm:$0xff]  ;;  %v850_v27 = vld [vmem:[#allocation11 + $0x68] sm:$0xff] }
  0xad   :  { %392 = vmatmul.mubr.f32.gmra.mrb[6].mxu0 %v13363_v22  ;;  %9885 = vmatprep.subr.bf16.mxu1 %v9884_v19  ;;  %v837_v19 = vld [vmem:[#allocation11] sm:$0xff]  ;;  %v13406_v25 = vpack.c.bf16 %v844_v17, %v840_v16  ;;  %v852_v30 = vld [vmem:[#allocation11 + $0x78] sm:$0xff]  ;;  %v851_v37 = vld [vmem:[#allocation11 + $0x70] sm:$0xff] }
  0xae   :  { %505 = vmatmul.mubr.f32.gmra.mrb[6].mxu1 %v13363_v22  ;;  %9855 = vmatpush1.bf16.msra.mxu0 %v9854_v23  ;;  %v839_v23 = vld [vmem:[#allocation11 + $0x10] sm:$0xff]  ;;  %v13409_v28 = vpack.c.bf16 %v841_v20, %v837_v19  ;;  %v849_v33 = vld [vmem:[#allocation11 + $0x60] sm:$0xff]  ;;  %v858_v40 = vld [vmem:[#allocation11 + $0xa8] sm:$0xff] }
  0xaf   :  { %9887 = vmatpush1.bf16.msra.mxu1 %v9886_v26  ;;  %397 = vmatprep.mubr.f32.mxu0 %v16781_v0  ;;  %v846_v26 = vld [vmem:[#allocation11 + $0x48] sm:$0xff]  ;;  %v13412_v31 = vpack.c.bf16 %v843_v24, %v839_v23  ;;  %v860_v43 = vld [vmem:[#allocation11 + $0xb8] sm:$0xff]  ;;  %v857_v47 = vld [vmem:[#allocation11 + $0xa0] sm:$0xff] }
  0xb0   :  { %510 = vmatprep.mubr.f32.mxu1 %v16781_v0  ;;  %9857 = vmatprep.subr.bf16.mxu0 %v9856_v29  ;;  %v848_v29 = vld [vmem:[#allocation11 + $0x58] sm:$0xff]  ;;  %v13416_v34 = vpack.c.bf16 %v850_v27, %v846_v26  ;;  %v862_v52 = vld [vmem:[#allocation11 + $0xc8] sm:$0xff]  ;;  %v861_v58 = vld [vmem:[#allocation11 + $0xc0] sm:$0xff] }
  0xb1   :  { %398 = vmatmul.mubr.f32.gmra.mrb[8].mxu0 %v13372_v35  ;;  %9889 = vmatprep.subr.bf16.mxu1 %v9888_v32  ;;  %v845_v32 = vld [vmem:[#allocation11 + $0x40] sm:$0xff]  ;;  %v13420_v38 = vpack.c.bf16 %v852_v30, %v848_v29  ;;  %v864_v55 = vld [vmem:[#allocation11 + $0xd8] sm:$0xff]  ;;  %v867_v62 = vld [vmem:[#allocation11 + $0xf0] sm:$0xff] }
  0xb2   :  { %511 = vmatmul.mubr.f32.gmra.mrb[8].mxu1 %v13372_v35  ;;  %9859 = vmatpush1.bf16.msra.mxu0 %v9858_v36  ;;  %v847_v36 = vld [vmem:[#allocation11 + $0x50] sm:$0xff]  ;;  %v13424_v41 = vpack.c.bf16 %v849_v33, %v845_v32  ;;  %v870_v2 = vld [vmem:[#allocation11 + $0x108] sm:$0xff]  ;;  %v872_v5 = vld [vmem:[#allocation11 + $0x118] sm:$0xff] }
  0xb3   :  { %9891 = vmatpush1.bf16.msra.mxu1 %v9890_v39  ;;  %403 = vmatprep.mubr.f32.mxu0 %v16781_v0  ;;  %v854_v39 = vld [vmem:[#allocation11 + $0x88] sm:$0xff]  ;;  %v13428_v44 = vpack.c.bf16 %v851_v37, %v847_v36  ;;  %v876_v6 = vld [vmem:[#allocation11 + $0x138] sm:$0xff]  ;;  %v869_v8 = vld [vmem:[#allocation11 + $0x100] sm:$0xff] }
  0xb4   :  { %516 = vmatprep.mubr.f32.mxu1 %v16781_v0  ;;  %9861 = vmatprep.subr.bf16.mxu0 %v9860_v42  ;;  %v856_v42 = vld [vmem:[#allocation11 + $0x98] sm:$0xff]  ;;  %v13432_v48 = vpack.c.bf16 %v858_v40, %v854_v39  ;;  %v874_v3 = vld [vmem:[#allocation11 + $0x128] sm:$0xff]  ;;  %v873_v10 = vld [vmem:[#allocation11 + $0x120] sm:$0xff]  ;;  %v13468_v13 = vpack.c.bf16 %v876_v6, %v872_v5 }
  0xb5   :  { %404 = vmatmul.mubr.f32.gmra.mrb[10].mxu0 %v13381_v49  ;;  %9893 = vmatprep.subr.bf16.mxu1 %v9892_v45  ;;  %v853_v45 = vld [vmem:[#allocation11 + $0x80] sm:$0xff]  ;;  %v13436_v51 = vpack.c.bf16 %v860_v43, %v856_v42  ;;  %v875_v12 = vld [vmem:[#allocation11 + $0x130] sm:$0xff]  ;;  %v882_v16 = vld [vmem:[#allocation11 + $0x168] sm:$0xff]  ;;  %v13472_v17 = vpack.c.bf16 %v873_v10, %v869_v8 }
  0xb6   :  { %517 = vmatmul.mubr.f32.gmra.mrb[10].mxu1 %v13381_v49  ;;  %9863 = vmatpush1.bf16.msra.mxu0 %v9862_v50  ;;  %v859_v50 = vld [vmem:[#allocation11 + $0xb0] sm:$0xff]  ;;  %v13440_v54 = vpack.c.bf16 %v857_v47, %v853_v45  ;;  %v884_v19 = vld [vmem:[#allocation11 + $0x178] sm:$0xff]  ;;  %v877_v23 = vld [vmem:[#allocation11 + $0x140] sm:$0xff] }
  0xb7   :  { %9895 = vmatpush1.bf16.msra.mxu1 %v9894_v53  ;;  %409 = vmatprep.mubr.f32.mxu0 %v16781_v0  ;;  %v866_v53 = vld [vmem:[#allocation11 + $0xe8] sm:$0xff]  ;;  %v881_v24 = vld [vmem:[#allocation11 + $0x160] sm:$0xff]  ;;  %v883_v27 = vld [vmem:[#allocation11 + $0x170] sm:$0xff] }
  0xb8   :  { %522 = vmatprep.mubr.f32.mxu1 %v16781_v0  ;;  %9865 = vmatprep.subr.bf16.mxu0 %v9864_v56  ;;  %v868_v56 = vld [vmem:[#allocation11 + $0xf8] sm:$0xff]  ;;  %v13448_v61 = vpack.c.bf16 %v866_v53, %v862_v52  ;;  %v886_v30 = vld [vmem:[#allocation11 + $0x188] sm:$0xff]  ;;  %v13488_v33 = vpack.c.bf16 %v881_v24, %v877_v23  ;;  %v885_v40 = vld [vmem:[#allocation11 + $0x180] sm:$0xff] }
  0xb9   :  { %410 = vmatmul.mubr.f32.gmra.mrb[12].mxu0 %v13390_v63  ;;  %9897 = vmatprep.subr.bf16.mxu1 %v9896_v60  ;;  %v865_v60 = vld [vmem:[#allocation11 + $0xe0] sm:$0xff]  ;;  %v890_v32 = vld [vmem:[#allocation11 + $0x1a8] sm:$0xff]  ;;  %v888_v36 = vld [vmem:[#allocation11 + $0x198] sm:$0xff] }
  0xba   :  { %523 = vmatmul.mubr.f32.gmra.mrb[12].mxu1 %v13390_v63  ;;  %9867 = vmatpush1.bf16.msra.mxu0 %v9866_v1  ;;  %v13452_v1 = vpack.c.bf16 %v868_v56, %v864_v55  ;;  %v892_v37 = vld [vmem:[#allocation11 + $0x1b8] sm:$0xff]  ;;  %v889_v42 = vld [vmem:[#allocation11 + $0x1a0] sm:$0xff]  ;;  %v13496_v43 = vpack.c.bf16 %v890_v32, %v886_v30  ;;  %v891_v45 = vld [vmem:[#allocation11 + $0x1b0] sm:$0xff] }
  0xbb   :  { %9899 = vmatpush1.bf16.msra.mxu1 %v9898_v4  ;;  %415 = vmatprep.mubr.f32.mxu0 %v16781_v0  ;;  %v13456_v4 = vpack.c.bf16 %v865_v60, %v861_v58  ;;  %v13500_v47 = vpack.c.bf16 %v892_v37, %v888_v36  ;;  %v13504_v52 = vpack.c.bf16 %v889_v42, %v885_v40  ;;  %v896_v53 = vld [vmem:[#allocation11 + $0x1d8] sm:$0xff]  ;;  %v893_v58 = vld [vmem:[#allocation11 + $0x1c0] sm:$0xff]  ;;  %v1091_v5 = vld [vmem:[#allocation13 + $0x28] sm:$0xff] }
  0xbc   :  { %528 = vmatprep.mubr.f32.mxu1 %v16781_v0  ;;  %9869 = vmatprep.subr.bf16.mxu0 %v9868_v7  ;;  %v900_v55 = vld [vmem:[#allocation11 + $0x1f8] sm:$0xff]  ;;  %v897_v60 = vld [vmem:[#allocation11 + $0x1e0] sm:$0xff]  ;;  %v1099_v23 = vld [vmem:[#allocation13 + $0x68] sm:$0xff] }
  0xbd   :  { %416 = vmatmul.mubr.f32.gmra.mrb[14].mxu0 %v13399_v14  ;;  %9901 = vmatprep.subr.bf16.mxu1 %v9900_v11  ;;  %v13464_v11 = vpack.c.bf16 %v874_v3, %v870_v2  ;;  %v13516_v2 = vpack.c.bf16 %v900_v55, %v896_v53  ;;  %v1087_v3 = vld [vmem:[#allocation13 + $0x8] sm:$0xff]  ;;  %v13520_v6 = vpack.c.bf16 %v897_v60, %v893_v58  ;;  %v1089_v8 = vld [vmem:[#allocation13 + $0x18] sm:$0xff]  ;;  %v1094_v37 = vld [vmem:[#allocation13 + $0x40] sm:$0xff] }
  0xbe   :  { %529 = vmatmul.mubr.f32.gmra.mrb[14].mxu1 %v13399_v14  ;;  %9871 = vmatpush1.bf16.msra.mxu0 %v9870_v15  ;;  %v878_v15 = vld [vmem:[#allocation11 + $0x148] sm:$0xff]  ;;  %v1093_v10 = vld [vmem:[#allocation13 + $0x38] sm:$0xff]  ;;  %v1098_v40 = vld [vmem:[#allocation13 + $0x60] sm:$0xff] }
  0xbf   :  { %9903 = vmatpush1.bf16.msra.mxu1 %v9902_v18  ;;  %599 = vmatprep.mubr.f32.mxu0 %v16781_v0  ;;  %v880_v18 = vld [vmem:[#allocation11 + $0x158] sm:$0xff]  ;;  %v13480_v26 = vpack.c.bf16 %v882_v16, %v878_v15  ;;  %v1090_v15 = vld [vmem:[#allocation13 + $0x20] sm:$0xff]  ;;  %v1088_v16 = vld [vmem:[#allocation13 + $0x10] sm:$0xff]  ;;  %v13532_v24 = vpack.c.bf16 %v1093_v10, %v1089_v8  ;;  %v13552_v55 = vpack.c.bf16 %v1098_v40, %v1094_v37 }
  0xc0   :  { %712 = vmatprep.mubr.f32.mxu1 %v16781_v0  ;;  %9905 = vmatprep.subr.bf16.mxu0 %v13403_v21  ;;  %v13484_v29 = vpack.c.bf16 %v884_v19, %v880_v18  ;;  %v1092_v18 = vld [vmem:[#allocation13 + $0x30] sm:$0xff]  ;;  %v1095_v19 = vld [vmem:[#allocation13 + $0x48] sm:$0xff]  ;;  %v1109_v53 = vld [vmem:[#allocation13 + $0xb8] sm:$0xff] }
  0xc1   :  { %600 = vmatmul.mubr.f32.vlgmr.msra.gmra.mrb[16].mxu0 %v13338_v46  ;;  %9937 = vmatprep.subr.bf16.mxu1 %v13406_v25  ;;  %v13540_v32 = vpack.c.bf16 %v1092_v18, %v1088_v16  ;;  %v13542_v36 = vpack.c.bf16 %v1099_v23, %v1095_v19  ;;  %v1096_v42 = vld [vmem:[#allocation13 + $0x50] sm:$0xff]  ;;  %v1111_v10 = vld [vmem:[#allocation13 + $0xc8] sm:$0xff]  ;;  %v1117_v16 = vld [vmem:[#allocation13 + $0xf8] sm:$0xff] }
  0xc2   :  { %713 = vmatmul.mubr.f32.vlgmr.msra.gmra.mrb[16].mxu1 %v13338_v46  ;;  %9907 = vmatpush1.bf16.msra.mxu0 %v13409_v28  ;;  %v855_v46 = vld [vmem:[#allocation11 + $0x90] sm:$0xff] }
  0xc3   :  { %9939 = vmatpush1.bf16.msra.mxu1 %v13412_v31  ;;  %605 = vmatprep.mubr.f32.mxu0 %v16781_v0  ;;  %v13444_v57 = vpack.c.bf16 %v859_v50, %v855_v46  ;;  %v894_v46 = vld [vmem:[#allocation11 + $0x1c8] sm:$0xff]  ;;  %v1108_v8 = vld [vmem:[#allocation13 + $0xb0] sm:$0xff] }
  0xc4   :  { %718 = vmatprep.mubr.f32.mxu1 %v16781_v0  ;;  %9909 = vmatprep.subr.bf16.mxu0 %v13416_v34  ;;  %v898_v50 = vld [vmem:[#allocation11 + $0x1e8] sm:$0xff]  ;;  %v1112_v37 = vld [vmem:[#allocation13 + $0xd0] sm:$0xff] }
  0xc5   :  { %606 = vmatmul.mubr.f32.gmra.mrb[18].mxu0 %v13345_v59  ;;  %9941 = vmatprep.subr.bf16.mxu1 %v13420_v38 }
  0xc6   :  { %719 = vmatmul.mubr.f32.gmra.mrb[18].mxu1 %v13345_v59  ;;  %9911 = vmatpush1.bf16.msra.mxu0 %v13424_v41  ;;  %v863_v59 = vld [vmem:[#allocation11 + $0xd0] sm:$0xff] }
  0xc7   :  { %9943 = vmatpush1.bf16.msra.mxu1 %v13428_v44  ;;  %611 = vmatprep.mubr.f32.mxu0 %v16781_v0  ;;  %v13460_v7 = vpack.c.bf16 %v867_v62, %v863_v59  ;;  %v13512_v59 = vpack.c.bf16 %v898_v50, %v894_v46  ;;  %v899_v62 = vld [vmem:[#allocation11 + $0x1f0] sm:$0xff]  ;;  %v1107_v46 = vld [vmem:[#allocation13 + $0xa8] sm:$0xff]  ;;  %v1105_v50 = vld [vmem:[#allocation13 + $0x98] sm:$0xff] }
  0xc8   :  { %724 = vmatprep.mubr.f32.mxu1 %v16781_v0  ;;  %9913 = vmatprep.subr.bf16.mxu0 %v13432_v48 }
  0xc9   :  { %612 = vmatmul.mubr.f32.gmra.mrb[20].mxu0 %v13354_v9  ;;  %9945 = vmatprep.subr.bf16.mxu1 %v13436_v51 }
  0xca   :  { %725 = vmatmul.mubr.f32.gmra.mrb[20].mxu1 %v13354_v9  ;;  %9915 = vmatpush1.bf16.msra.mxu0 %v13440_v54  ;;  %v871_v9 = vld [vmem:[#allocation11 + $0x110] sm:$0xff] }
  0xcb   :  { %9947 = vmatpush1.bf16.msra.mxu1 %v13444_v57  ;;  %617 = vmatprep.mubr.f32.mxu0 %v16781_v0  ;;  %v13476_v20 = vpack.c.bf16 %v875_v12, %v871_v9  ;;  %v1086_v12 = vld [vmem:[#allocation13] sm:$0xff] }
  0xcc   :  { %730 = vmatprep.mubr.f32.mxu1 %v16781_v0  ;;  %9917 = vmatprep.subr.bf16.mxu0 %v13448_v61  ;;  %v13536_v30 = vpack.c.bf16 %v1090_v15, %v1086_v12  ;;  %v1115_v12 = vld [vmem:[#allocation13 + $0xe8] sm:$0xff]  ;;  %v1113_v15 = vld [vmem:[#allocation13 + $0xd8] sm:$0xff] }
  0xcd   :  { %618 = vmatmul.mubr.f32.gmra.mrb[22].mxu0 %v13363_v22  ;;  %9949 = vmatprep.subr.bf16.mxu1 %v13452_v1  ;;  %v13572_v23 = vpack.c.bf16 %v1115_v12, %v1111_v10  ;;  %v13575_v40 = vpack.c.bf16 %v1117_v16, %v1113_v15  ;;  %v1120_v10 = vld [vmem:[#allocation13 + $0x110] sm:$0xff]  ;;  %v1127_v16 = vld [vmem:[#allocation13 + $0x148] sm:$0xff] }
  0xce   :  { %731 = vmatmul.mubr.f32.gmra.mrb[22].mxu1 %v13363_v22  ;;  %9919 = vmatpush1.bf16.msra.mxu0 %v13456_v4  ;;  %v879_v22 = vld [vmem:[#allocation11 + $0x150] sm:$0xff] }
  0xcf   :  { %9951 = vmatpush1.bf16.msra.mxu1 %v13460_v7  ;;  %623 = vmatprep.mubr.f32.mxu0 %v16781_v0  ;;  %v13492_v39 = vpack.c.bf16 %v883_v27, %v879_v22  ;;  %v1097_v22 = vld [vmem:[#allocation13 + $0x58] sm:$0xff]  ;;  %16979 = vst [vmem:[#allocation25_spill] sm:$0xff] %v13572_v23  ;;  %16980 = vst [vmem:[#allocation26_spill] sm:$0xff] %v13575_v40  ;;  %v1124_v15 = vld [vmem:[#allocation13 + $0x130] sm:$0xff] }
  0xd0   :  { %736 = vmatprep.mubr.f32.mxu1 %v16781_v0  ;;  %9921 = vmatprep.subr.bf16.mxu0 %v13464_v11  ;;  %v1101_v27 = vld [vmem:[#allocation13 + $0x78] sm:$0xff] }
  0xd1   :  { %624 = vmatmul.mubr.f32.gmra.mrb[24].mxu0 %v13372_v35  ;;  %9953 = vmatprep.subr.bf16.mxu1 %v13468_v13 }
  0xd2   :  { %737 = vmatmul.mubr.f32.gmra.mrb[24].mxu1 %v13372_v35  ;;  %9923 = vmatpush1.bf16.msra.mxu0 %v13472_v17  ;;  %v887_v35 = vld [vmem:[#allocation11 + $0x190] sm:$0xff] }
  0xd3   :  { %9955 = vmatpush1.bf16.msra.mxu1 %v13476_v20  ;;  %629 = vmatprep.mubr.f32.mxu0 %v16781_v0  ;;  %v13508_v56 = vpack.c.bf16 %v891_v45, %v887_v35  ;;  %v1100_v35 = vld [vmem:[#allocation13 + $0x70] sm:$0xff]  ;;  %v1103_v45 = vld [vmem:[#allocation13 + $0x88] sm:$0xff] }
  0xd4   :  { %742 = vmatprep.mubr.f32.mxu1 %v16781_v0  ;;  %9925 = vmatprep.subr.bf16.mxu0 %v13480_v26  ;;  %v13556_v58 = vpack.c.bf16 %v1100_v35, %v1096_v42  ;;  %v13558_v60 = vpack.c.bf16 %v1107_v46, %v1103_v45  ;;  %v1116_v42 = vld [vmem:[#allocation13 + $0xf0] sm:$0xff]  ;;  %v1119_v35 = vld [vmem:[#allocation13 + $0x108] sm:$0xff]  ;;  %v1121_v46 = vld [vmem:[#allocation13 + $0x118] sm:$0xff] }
  0xd5   :  { %630 = vmatmul.mubr.f32.gmra.mrb[26].mxu0 %v13381_v49  ;;  %9957 = vmatprep.subr.bf16.mxu1 %v13484_v29  ;;  %v1123_v45 = vld [vmem:[#allocation13 + $0x128] sm:$0xff] }
  0xd6   :  { %743 = vmatmul.mubr.f32.gmra.mrb[26].mxu1 %v13381_v49  ;;  %9927 = vmatpush1.bf16.msra.mxu0 %v13488_v33  ;;  %v895_v49 = vld [vmem:[#allocation11 + $0x1d0] sm:$0xff] }
  0xd7   :  { %9959 = vmatpush1.bf16.msra.mxu1 %v13492_v39  ;;  %635 = vmatprep.mubr.f32.mxu0 %v16781_v0  ;;  %v13524_v9 = vpack.c.bf16 %v899_v62, %v895_v49  ;;  %v1102_v49 = vld [vmem:[#allocation13 + $0x80] sm:$0xff] }
  0xd8   :  { %748 = vmatprep.mubr.f32.mxu1 %v16781_v0  ;;  %9929 = vmatprep.subr.bf16.mxu0 %v13496_v43  ;;  %v1106_v62 = vld [vmem:[#allocation13 + $0xa0] sm:$0xff] }
  0xd9   :  { %636 = vmatmul.mubr.f32.gmra.mrb[28].mxu0 %v13390_v63  ;;  %9961 = vmatprep.subr.bf16.mxu1 %v13500_v47  ;;  %v13566_v18 = vpack.c.bf16 %v1106_v62, %v1102_v49  ;;  %v13582_v49 = vpack.c.bf16 %v1116_v42, %v1112_v37  ;;  %v13584_v62 = vpack.c.bf16 %v1123_v45, %v1119_v35  ;;  %v1126_v35 = vld [vmem:[#allocation13 + $0x140] sm:$0xff] }
  0xda   :  { %749 = vmatmul.mubr.f32.gmra.mrb[28].mxu1 %v13390_v63  ;;  %9931 = vmatpush1.bf16.msra.mxu0 %v13504_v52  ;;  %v13528_v63 = vpack.c.bf16 %v1091_v5, %v1087_v3  ;;  %v1104_v3 = vld [vmem:[#allocation13 + $0x90] sm:$0xff]  ;;  %v13561_v5 = vpack.c.bf16 %v1109_v53, %v1105_v50  ;;  %v1125_v50 = vld [vmem:[#allocation13 + $0x138] sm:$0xff]  ;;  %v13594_v37 = vpack.c.bf16 %v1124_v15, %v1120_v10  ;;  %v1130_v45 = vld [vmem:[#allocation13 + $0x160] sm:$0xff] }
  0xdb   :  { %9963 = vmatpush1.bf16.msra.mxu1 %v13508_v56  ;;  %641 = vmatprep.mubr.f32.mxu0 %v16781_v0  ;;  %v13570_v19 = vpack.c.bf16 %v1108_v8, %v1104_v3  ;;  %16982 = vst [vmem:[#allocation28_spill] sm:$0xff] %v13582_v49  ;;  %16983 = vst [vmem:[#allocation29_spill] sm:$0xff] %v13584_v62  ;;  %v1118_v3 = vld [vmem:[#allocation13 + $0x100] sm:$0xff]  ;;  %v13587_v12 = vpack.c.bf16 %v1125_v50, %v1121_v46  ;;  %v1128_v46 = vld [vmem:[#allocation13 + $0x150] sm:$0xff] }
  0xdc   :  { %754 = vmatprep.mubr.f32.mxu1 %v16781_v0  ;;  %9933 = vmatprep.subr.bf16.mxu0 %v13512_v59  ;;  %v1122_v8 = vld [vmem:[#allocation13 + $0x120] sm:$0xff]  ;;  %16986 = vst [vmem:[#allocation32_spill] sm:$0xff] %v13594_v37 }
  0xdd   :  { %642 = vmatmul.mubr.f32.gmra.mrb[30].mxu0 %v13399_v14  ;;  %9965 = vmatprep.subr.bf16.mxu1 %v13516_v2  ;;  %16978 = vst [vmem:[#allocation24_spill] sm:$0xff] %v13570_v19  ;;  %16984 = vst [vmem:[#allocation30_spill] sm:$0xff] %v13587_v12  ;;  %v1134_v15 = vld [vmem:[#allocation13 + $0x180] sm:$0xff] }
  0xde   :  { %755 = vmatmul.mubr.f32.gmra.mrb[30].mxu1 %v13399_v14  ;;  %9935 = vmatpush1.bf16.msra.mxu0 %v13520_v6  ;;  %v13546_v14 = vpack.c.bf16 %v1101_v27, %v1097_v22  ;;  %v1110_v22 = vld [vmem:[#allocation13 + $0xc0] sm:$0xff] }
  0xdf   :  { %9967 = vmatpush1.bf16.msra.mxu1 %v13524_v9  ;;  %965 = vmatprep.mubr.f32.mxu0 %v16781_v0  ;;  %v1114_v27 = vld [vmem:[#allocation13 + $0xe0] sm:$0xff] }
  0xe0   :  { %1036 = vmatprep.mubr.f32.mxu1 %v16781_v0  ;;  %9969 = vmatprep.subr.bf16.mxu0 %v13528_v63  ;;  %v13578_v53 = vpack.c.bf16 %v1114_v27, %v1110_v22  ;;  %v1129_v22 = vld [vmem:[#allocation13 + $0x158] sm:$0xff] }
  0xe1   :  { %966 = vmatmul.mubr.f32.vlgmr.msra.gmra.mrb[0].mxu0 %v16781_v0  ;;  %10001 = vmatprep.subr.bf16.mxu1 %v13532_v24  ;;  %v1133_v27 = vld [vmem:[#allocation13 + $0x178] sm:$0xff] }
  0xe2   :  { %1037 = vmatmul.mubr.f32.vlgmr.msra.gmra.mrb[0].mxu1 %v16781_v0  ;;  %9971 = vmatpush1.bf16.msra.mxu0 %v13536_v30  ;;  %16981 = vst [vmem:[#allocation27_spill] sm:$0xff] %v13578_v53  ;;  %v13599_v50 = vpack.c.bf16 %v1133_v27, %v1129_v22  ;;  %v1136_v22 = vld [vmem:[#allocation13 + $0x190] sm:$0xff] }
  0xe3   :  { %10003 = vmatpush1.bf16.msra.mxu1 %v13540_v32  ;;  %9973 = vmatprep.subr.bf16.mxu0 %v13542_v36 }
  0xe4   :  { %10005 = vmatprep.subr.bf16.mxu1 %v13546_v14  ;;  %1214 = vmatprep.mubr.f32.mxu0 %v16781_v0  ;;  %16987 = vst [vmem:[#allocation33_spill] sm:$0xff] %v13599_v50 }
  0xe5   :  { %1285 = vmatprep.mubr.f32.mxu1 %v16781_v0  ;;  %v1131_v0 = vld [vmem:[#allocation13 + $0x168] sm:$0xff] }
  0xe6   :  { %9975 = vmatpush1.bf16.msra.mxu0 %v13552_v55  ;;  %v13596_v42 = vpack.c.bf16 %v1131_v0, %v1127_v16  ;;  %v1138_v16 = vld [vmem:[#allocation13 + $0x1a0] sm:$0xff] }
  0xe7   :  { %10007 = vmatpush1.bf16.msra.mxu1 %v13556_v58  ;;  %9977 = vmatprep.subr.bf16.mxu0 %v13558_v60 }
  0xe8   :  { %10009 = vmatprep.subr.bf16.mxu1 %v13561_v5 }
  0xea   :  { %9979 = vmatpush1.bf16.msra.mxu0 %v13566_v18 }
  0xeb   :  { %10011 = vmatpush1.bf16.msra.mxu1 %v13570_v19  ;;  %9981 = vmatprep.subr.bf16.mxu0 %v13572_v23  ;;  %v13590_v19 = vpack.c.bf16 %v1122_v8, %v1118_v3  ;;  %v1135_v23 = vld [vmem:[#allocation13 + $0x188] sm:$0xff]  ;;  %v1137_v3 = vld [vmem:[#allocation13 + $0x198] sm:$0xff] }
  0xec   :  { %10013 = vmatprep.subr.bf16.mxu1 %v13575_v40  ;;  %v1132_v40 = vld [vmem:[#allocation13 + $0x170] sm:$0xff]  ;;  %v1141_v8 = vld [vmem:[#allocation13 + $0x1b8] sm:$0xff] }
  0xed   :  { %16985 = vst [vmem:[#allocation31_spill] sm:$0xff] %v13590_v19  ;;  %v13606_v0 = vpack.c.bf16 %v1132_v40, %v1128_v46  ;;  %v13611_v27 = vpack.c.bf16 %v1141_v8, %v1137_v3  ;;  %v1146_v46 = vld [vmem:[#allocation13 + $0x1e0] sm:$0xff]  ;;  %v1144_v8 = vld [vmem:[#allocation13 + $0x1d0] sm:$0xff] }
  0xee   :  { %9983 = vmatpush1.bf16.msra.mxu0 %v13578_v53  ;;  %v1139_v53 = vld [vmem:[#allocation13 + $0x1a8] sm:$0xff] }
  0xef   :  { %10015 = vmatpush1.bf16.msra.mxu1 %v13582_v49  ;;  %9985 = vmatprep.subr.bf16.mxu0 %v13584_v62  ;;  %v13602_v49 = vpack.c.bf16 %v1130_v45, %v1126_v35  ;;  %v13608_v10 = vpack.c.bf16 %v1139_v53, %v1135_v23  ;;  %v1143_v62 = vld [vmem:[#allocation13 + $0x1c8] sm:$0xff]  ;;  %v1145_v35 = vld [vmem:[#allocation13 + $0x1d8] sm:$0xff]  ;;  %v1142_v53 = vld [vmem:[#allocation13 + $0x1c0] sm:$0xff] }
  0xf0   :  { %10017 = vmatprep.subr.bf16.mxu1 %v13587_v12  ;;  %v1140_v12 = vld [vmem:[#allocation13 + $0x1b0] sm:$0xff]  ;;  %v1149_v45 = vld [vmem:[#allocation13 + $0x1f8] sm:$0xff] }
  0xf1   :  { %v13618_v23 = vpack.c.bf16 %v1140_v12, %v1136_v22  ;;  %v13623_v3 = vpack.c.bf16 %v1149_v45, %v1145_v35 }
  0xf2   :  { %9987 = vmatpush1.bf16.msra.mxu0 %v13590_v19  ;;  %v1147_v19 = vld [vmem:[#allocation13 + $0x1e8] sm:$0xff] }
  0xf3   :  { %10019 = vmatpush1.bf16.msra.mxu1 %v13594_v37  ;;  %9989 = vmatprep.subr.bf16.mxu0 %v13596_v42  ;;  %v13614_v37 = vpack.c.bf16 %v1138_v16, %v1134_v15  ;;  %v13620_v40 = vpack.c.bf16 %v1147_v19, %v1143_v62  ;;  %v13626_v15 = vpack.c.bf16 %v1146_v46, %v1142_v53  ;;  %v16988_v19 = vmov 0.0  }
  0xf4   :  { %10021 = vmatprep.subr.bf16.mxu1 %v13599_v50  ;;  %v1148_v50 = vld [vmem:[#allocation13 + $0x1f0] sm:$0xff] }
  0xf5   :  { %v13630_v12 = vpack.c.bf16 %v1148_v50, %v1144_v8 }
  0xf6   :  { %9991 = vmatpush1.bf16.msra.mxu0 %v13602_v49 }
  0xf7   :  { %10023 = vmatpush1.bf16.msra.mxu1 %v13606_v0  ;;  %9993 = vmatprep.subr.bf16.mxu0 %v13608_v10 }
  0xf8   :  { %10025 = vmatprep.subr.bf16.mxu1 %v13611_v27 }
  0xfa   :  { %9995 = vmatpush1.bf16.msra.mxu0 %v13614_v37 }
  0xfb   :  { %10027 = vmatpush1.bf16.msra.mxu1 %v13618_v23  ;;  %9997 = vmatprep.subr.bf16.mxu0 %v13620_v40 }
  0xfc   :  { %10029 = vmatprep.subr.bf16.mxu1 %v13623_v3 }
  0xfe   :  { %9999 = vmatpush1.bf16.msra.mxu0 %v13626_v15 }
  0xff   :  { %10031 = vmatpush1.bf16.msra.mxu1 %v13630_v12  ;;  %10033 = vmatprep.subr.bf16.mxu0 %v13403_v21  ;;  %v269_v21 = vlaneseq }
 0x100   :  { %10065 = vmatprep.subr.bf16.mxu1 %v13406_v25 }
 0x101   :  { %1215 = vmatmul.mubr.f32.vlgmr.msra.gmra.mrb[30].mxu0 %v16988_v19  ;;  %v13673_v25 = vshrl.u32 %v269_v21, 7 }
 0x102   :  { %1286 = vmatmul.mubr.f32.vlgmr.msra.gmra.mrb[30].mxu1 %v16988_v19  ;;  %10035 = vmatpush1.bf16.msra.mxu0 %v13409_v28 }
 0x103   :  { %10067 = vmatpush1.bf16.msra.mxu1 %v13412_v31  ;;  %10037 = vmatprep.subr.bf16.mxu0 %v13416_v34  ;;  %16989 = vst [vmem:[#allocation34_spill] sm:$0xff] %v13673_v25  ;;  %v16800_v28 = vsub.s32 0, %v13673_v25  ;;  %v267_v31 = vld [vmem:[%s16771_s2] sm:$0xff]  ;;  %v16799_v34 = vsub.s32 1, %v13673_v25  ;;  %v16794_v35 = vsub.s32 6, %v13673_v25 }
 0x104   :  { %10069 = vmatprep.subr.bf16.mxu1 %v13420_v38  ;;  %1463 = vmatprep.mubr.f32.mxu0 %v16988_v19 }
 0x105   :  { %1534 = vmatprep.mubr.f32.mxu1 %v16988_v19  ;;  %v13682_v38 = vrot.slane %v267_v31, %v16800_v28 }
 0x106   :  { %10039 = vmatpush1.bf16.msra.mxu0 %v13424_v41  ;;  %v13686_v41 = vrot.slane %v267_v31, %v16799_v34 }
 0x107   :  { %10071 = vmatpush1.bf16.msra.mxu1 %v13428_v44  ;;  %10041 = vmatprep.subr.bf16.mxu0 %v13432_v48  ;;  %v16798_v48 = vsub.s32 2, %v13673_v25 }
 0x108   :  { %10073 = vmatprep.subr.bf16.mxu1 %v13436_v51  ;;  %16990 = vst [vmem:[#allocation35_spill] sm:$0xff] %v13686_v41 }
 0x10a   :  { %10043 = vmatpush1.bf16.msra.mxu0 %v13440_v54 }
 0x10b   :  { %10075 = vmatpush1.bf16.msra.mxu1 %v13444_v57  ;;  %10045 = vmatprep.subr.bf16.mxu0 %v13448_v61 }
 0x10c   :  { %10077 = vmatprep.subr.bf16.mxu1 %v13452_v1 }
 0x10e   :  { %10047 = vmatpush1.bf16.msra.mxu0 %v13456_v4 }
 0x10f   :  { %10079 = vmatpush1.bf16.msra.mxu1 %v13460_v7  ;;  %10049 = vmatprep.subr.bf16.mxu0 %v13464_v11  ;;  %v13693_v7 = vrot.slane %v267_v31, %v16798_v48 }
 0x110   :  { %10081 = vmatprep.subr.bf16.mxu1 %v13468_v13  ;;  %v16797_v13 = vsub.s32 3, %v13673_v25 }
 0x111   :  { %16991 = vst [vmem:[#allocation36_spill] sm:$0xff] %v13693_v7 }
 0x112   :  { %10051 = vmatpush1.bf16.msra.mxu0 %v13472_v17 }
 0x113   :  { %10083 = vmatpush1.bf16.msra.mxu1 %v13476_v20  ;;  %10053 = vmatprep.subr.bf16.mxu0 %v13480_v26  ;;  %v13699_v20 = vrot.slane %v267_v31, %v16797_v13 }
 0x114   :  { %10085 = vmatprep.subr.bf16.mxu1 %v13484_v29 }
 0x115   :  { %16992 = vst [vmem:[#allocation37_spill] sm:$0xff] %v13699_v20 }
 0x116   :  { %10055 = vmatpush1.bf16.msra.mxu0 %v13488_v33 }
 0x117   :  { %10087 = vmatpush1.bf16.msra.mxu1 %v13492_v39  ;;  %10057 = vmatprep.subr.bf16.mxu0 %v13496_v43 }
 0x118   :  { %10089 = vmatprep.subr.bf16.mxu1 %v13500_v47 }
 0x11a   :  { %10059 = vmatpush1.bf16.msra.mxu0 %v13504_v52  ;;  %v16796_v52 = vsub.s32 4, %v13673_v25 }
 0x11b   :  { %10091 = vmatpush1.bf16.msra.mxu1 %v13508_v56  ;;  %10061 = vmatprep.subr.bf16.mxu0 %v13512_v59  ;;  %v16795_v59 = vsub.s32 5, %v13673_v25 }
 0x11c   :  { %10093 = vmatprep.subr.bf16.mxu1 %v13516_v2 }
 0x11d   :  { %v13710_v50 = vrot.slane %v267_v31, %v16795_v59 }
 0x11e   :  { %10063 = vmatpush1.bf16.msra.mxu0 %v13520_v6 }
 0x11f   :  { %10095 = vmatpush1.bf16.msra.mxu1 %v13524_v9  ;;  %10097 = vmatprep.subr.bf16.mxu0 %v13528_v63  ;;  %v13706_v63 = vrot.slane %v267_v31, %v16796_v52  ;;  %16994 = vst [vmem:[#allocation39_spill] sm:$0xff] %v13710_v50 }
 0x120   :  { %10129 = vmatprep.subr.bf16.mxu1 %v13532_v24 }
 0x121   :  { %16993 = vst [vmem:[#allocation38_spill] sm:$0xff] %v13706_v63 }
 0x1b4   :  { %v967_v44 = vpop.f32.mrb[0].mxu0 }
 0x1b5   :  { %v12240_v51 = vadd.f32 %v967_v44, %v13682_v38  ;;  %v1038_v54 = vpop.f32.mrb[0].mxu1  ;;  %v969_v57 = vpop.f32.mrb[1].mxu0 }
 0x1b6   :  { %v12241_v61 = vadd.f32 %v969_v57, %v13686_v41  ;;  %v1040_v1 = vpop.f32.mrb[1].mxu1  ;;  %v12256_v17 = vadd.f32 %v1038_v54, %v13693_v7  ;;  %v13720_v54 = vrot.slane %v267_v31, %v16794_v35 }
 0x1b7   :  { %v9644_v4 = vmul.f32 -1.442695, %v12240_v51  ;;  %v12257_v29 = vadd.f32 %v1040_v1, %v13699_v20 }
 0x1b8   :  { %v9645_v11 = vmul.f32 -1.442695, %v12241_v61  ;;  %v9646_v26 = vmul.f32 -1.442695, %v12256_v17  ;;  %16995 = vst [vmem:[#allocation40_spill] sm:$0xff] %v13720_v54  ;;  %v16793_v61 = vsub.s32 7, %v13673_v25 }
 0x1b9   :  { %12502 = vpow2.f32 %v9644_v4 }
 0x1ba   :  { %12504 = vpow2.f32 %v9645_v11  ;;  %v13726_v4 = vrot.slane %v267_v31, %v16793_v61 }
 0x1bb   :  { %12506 = vpow2.f32 %v9646_v26 }
 0x1bc   :  { %12508 = vtanh.f32 %v12257_v29  ;;  %16996 = vst [vmem:[#allocation41_spill] sm:$0xff] %v13726_v4 }
 0x1c3   :  { %v12503_v33 = vpop.eup %12502 }
 0x1c4   :  { %v1056_v39 = vadd.f32 1.0, %v12503_v33  ;;  %v12505_v43 = vpop.eup %12504 }
 0x1c5   :  { %v1057_v47 = vadd.f32 1.0, %v12505_v43  ;;  %v12507_v56 = vpop.eup %12506 }
 0x1c6   :  { %12510 = vrcp.f32 %v1056_v39  ;;  %v12509_v2 = vpop.eup %12508  ;;  %v1058_v62 = vadd.f32 1.0, %v12507_v56 }
 0x1c7   :  { %12512 = vrcp.f32 %v1057_v47 }
 0x1c8   :  { %12514 = vrcp.f32 %v1058_v62 }
 0x1d0   :  { %v12511_v6 = vpop.eup %12510 }
 0x1d1   :  { %v1068_v9 = vmul.f32 %v12511_v6, %v12509_v2  ;;  %v12513_v24 = vpop.eup %12512 }
 0x1d2   :  { %v1067_v16 = vmul.f32 0.0, %v12513_v24  ;;  %v12515_v11 = vpop.eup %12514  ;;  %v17003_v24 = vld [vmem:[#allocation29_spill] sm:$0xff] }
 0x1d4   :  { %v1216_v22 = vpop.f32.mrb[30].mxu0  ;;  %v13713_v45 = vadd.f32 %v1068_v9, %v1067_v16  ;;  %v17001_v9 = vld [vmem:[#allocation27_spill] sm:$0xff] }
 0x1d5   :  { %v12286_v53 = vadd.f32 %v1216_v22, %v13706_v63  ;;  %v1287_v46 = vpop.f32.mrb[30].mxu1  ;;  %v1218_v8 = vpop.f32.mrb[31].mxu0  ;;  %v17005_v16 = vld [vmem:[#allocation31_spill] sm:$0xff]  ;;  %v17006_v22 = vld [vmem:[#allocation32_spill] sm:$0xff] }
 0x1d6   :  { %v12287_v21 = vadd.f32 %v1218_v8, %v13710_v50  ;;  %v1289_v44 = vpop.f32.mrb[31].mxu1  ;;  %12516 = vtanh.f32 %v13713_v45  ;;  %v12302_v1 = vadd.f32 %v1287_v46, %v13720_v54  ;;  %v1835_v8 = vld [vmem:[#allocation11 + $0x10] sm:$0xff] }
 0x1d7   :  { %v9647_v51 = vmul.f32 -1.442695, %v12286_v53  ;;  %v12303_v29 = vadd.f32 %v1289_v44, %v13726_v4  ;;  %v17007_v53 = vld [vmem:[#allocation33_spill] sm:$0xff] }
 0x1d8   :  { %v9648_v57 = vmul.f32 -1.442695, %v12287_v21  ;;  %v9649_v17 = vmul.f32 -1.442695, %v12302_v1  ;;  %v1839_v21 = vld [vmem:[#allocation11 + $0x30] sm:$0xff]  ;;  %v1844_v1 = vld [vmem:[#allocation11 + $0x58] sm:$0xff] }
 0x1d9   :  { %12518 = vpow2.f32 %v9647_v51  ;;  %v13781_v44 = vpack.c.bf16 %v1839_v21, %v1835_v8  ;;  %v1842_v51 = vld [vmem:[#allocation11 + $0x48] sm:$0xff] }
 0x1da   :  { %12520 = vpow2.f32 %v9648_v57  ;;  %v1846_v57 = vld [vmem:[#allocation11 + $0x68] sm:$0xff] }
 0x1db   :  { %12522 = vpow2.f32 %v9649_v17  ;;  %v1848_v17 = vld [vmem:[#allocation11 + $0x78] sm:$0xff]  ;;  %v1866_v8 = vld [vmem:[#allocation11 + $0x108] sm:$0xff] }
 0x1dc   :  { %12524 = vtanh.f32 %v12303_v29  ;;  %v1845_v29 = vld [vmem:[#allocation11 + $0x60] sm:$0xff]  ;;  %v1870_v21 = vld [vmem:[#allocation11 + $0x128] sm:$0xff] }
 0x1e0   :  { %v12517_v26 = vpop.eup %12516 }
 0x1e1   :  { %v13729_v33 = vmul.f32 %v12517_v26, %v12515_v11  ;;  %v13786_v11 = vpack.c.bf16 %v1846_v57, %v1842_v51  ;;  %v1841_v26 = vld [vmem:[#allocation11 + $0x40] sm:$0xff]  ;;  %v1868_v51 = vld [vmem:[#allocation11 + $0x118] sm:$0xff]  ;;  %v13822_v57 = vpack.c.bf16 %v1870_v21, %v1866_v8 }
 0x1e2   :  { %v1884_v8 = vld [vmem:[#allocation11 + $0x198] sm:$0xff] }
 0x1e3   :  { %16997 = vst [vmem:[#allocation42_spill] sm:$0xff] %v13729_v33  ;;  %v12519_v39 = vpop.eup %12518  ;;  %1464 = vmatmul.mubr.f32.vlgmr.msra.gmra.mrb[2].mxu0 %v13729_v33  ;;  %1535 = vmatmul.mubr.f32.vlgmr.msra.gmra.mrb[2].mxu1 %v13729_v33 }
 0x1e4   :  { %v1305_v43 = vadd.f32 1.0, %v12519_v39  ;;  %v12521_v47 = vpop.eup %12520  ;;  %10099 = vmatpush1.bf16.msra.mxu0 %v13536_v30  ;;  %10131 = vmatpush1.bf16.msra.mxu1 %v13540_v32  ;;  %v16998_v30 = vld [vmem:[#allocation24_spill] sm:$0xff]  ;;  %v13788_v39 = vpack.c.bf16 %v1848_v17, %v1844_v1  ;;  %v1872_v1 = vld [vmem:[#allocation11 + $0x138] sm:$0xff]  ;;  %v1865_v17 = vld [vmem:[#allocation11 + $0x100] sm:$0xff] }
 0x1e5   :  { %v1306_v31 = vadd.f32 1.0, %v12521_v47  ;;  %10101 = vmatprep.subr.bf16.mxu0 %v13542_v36  ;;  %10133 = vmatprep.subr.bf16.mxu1 %v13546_v14  ;;  %v12523_v32 = vpop.eup %12522  ;;  %v16999_v36 = vld [vmem:[#allocation25_spill] sm:$0xff]  ;;  %v17000_v14 = vld [vmem:[#allocation26_spill] sm:$0xff] }
 0x1e6   :  { %12526 = vrcp.f32 %v1305_v43  ;;  %1712 = vmatprep.mubr.f32.mxu0 %v16988_v19  ;;  %1783 = vmatprep.mubr.f32.mxu1 %v16988_v19  ;;  %v12525_v56 = vpop.eup %12524  ;;  %v13790_v43 = vpack.c.bf16 %v1845_v29, %v1841_v26  ;;  %v1843_v47 = vld [vmem:[#allocation11 + $0x50] sm:$0xff]  ;;  %v1869_v26 = vld [vmem:[#allocation11 + $0x120] sm:$0xff]  ;;  %v13824_v29 = vpack.c.bf16 %v1872_v1, %v1868_v51  ;;  %v1888_v51 = vld [vmem:[#allocation11 + $0x1b8] sm:$0xff] }
 0x1e7   :  { %12528 = vrcp.f32 %v1306_v31  ;;  %v1847_v31 = vld [vmem:[#allocation11 + $0x70] sm:$0xff]  ;;  %v1881_v1 = vld [vmem:[#allocation11 + $0x180] sm:$0xff] }
 0x1e8   :  { %10103 = vmatpush1.bf16.msra.mxu0 %v13552_v55  ;;  %10135 = vmatpush1.bf16.msra.mxu1 %v13556_v58  ;;  %v17002_v55 = vld [vmem:[#allocation28_spill] sm:$0xff] }
 0x1e9   :  { %10105 = vmatprep.subr.bf16.mxu0 %v13558_v60  ;;  %10137 = vmatprep.subr.bf16.mxu1 %v13561_v5  ;;  %v1307_v60 = vadd.f32 1.0, %v12523_v32  ;;  %v17004_v5 = vld [vmem:[#allocation30_spill] sm:$0xff]  ;;  %v1850_v32 = vld [vmem:[#allocation11 + $0x88] sm:$0xff] }
 0x1eb   :  { %12530 = vrcp.f32 %v1307_v60  ;;  %v1851_v60 = vld [vmem:[#allocation11 + $0x90] sm:$0xff] }
 0x1ec   :  { %10107 = vmatpush1.bf16.msra.mxu0 %v13566_v18  ;;  %10139 = vmatpush1.bf16.msra.mxu1 %v16998_v30  ;;  %v13793_v30 = vpack.c.bf16 %v1847_v31, %v1843_v47  ;;  %v13826_v47 = vpack.c.bf16 %v1869_v26, %v1865_v17  ;;  %v1867_v31 = vld [vmem:[#allocation11 + $0x110] sm:$0xff]  ;;  %v1885_v17 = vld [vmem:[#allocation11 + $0x1a0] sm:$0xff]  ;;  %v13848_v26 = vpack.c.bf16 %v1888_v51, %v1884_v8 }
 0x1ed   :  { %10109 = vmatprep.subr.bf16.mxu0 %v16999_v36  ;;  %10141 = vmatprep.subr.bf16.mxu1 %v17000_v14  ;;  %v1854_v36 = vld [vmem:[#allocation11 + $0xa8] sm:$0xff]  ;;  %v1852_v14 = vld [vmem:[#allocation11 + $0x98] sm:$0xff]  ;;  %v1891_v51 = vld [vmem:[#allocation11 + $0x1d0] sm:$0xff] }
 0x1f0   :  { %v12527_v2 = vpop.eup %12526  ;;  %10111 = vmatpush1.bf16.msra.mxu0 %v17001_v9  ;;  %10143 = vmatpush1.bf16.msra.mxu1 %v17002_v55  ;;  %v1853_v9 = vld [vmem:[#allocation11 + $0xa0] sm:$0xff] }
 0x1f1   :  { %v1317_v6 = vmul.f32 %v12527_v2, %v12525_v56  ;;  %v12529_v58 = vpop.eup %12528  ;;  %10113 = vmatprep.subr.bf16.mxu0 %v17003_v24  ;;  %10145 = vmatprep.subr.bf16.mxu1 %v17004_v5  ;;  %v13798_v56 = vpack.c.bf16 %v1854_v36, %v1850_v32  ;;  %v1856_v2 = vld [vmem:[#allocation11 + $0xb8] sm:$0xff]  ;;  %v1855_v24 = vld [vmem:[#allocation11 + $0xb0] sm:$0xff] }
 0x1f2   :  { %v1316_v18 = vmul.f32 0.0, %v12529_v58  ;;  %v13800_v55 = vpack.c.bf16 %v1856_v2, %v1852_v14  ;;  %v13805_v5 = vpack.c.bf16 %v1855_v24, %v1851_v60  ;;  %v1871_v32 = vld [vmem:[#allocation11 + $0x130] sm:$0xff]  ;;  %v1874_v14 = vld [vmem:[#allocation11 + $0x148] sm:$0xff]  ;;  %v1880_v60 = vld [vmem:[#allocation11 + $0x178] sm:$0xff] }
 0x1f3   :  { %v13829_v36 = vpack.c.bf16 %v1871_v32, %v1867_v31  ;;  %v1878_v2 = vld [vmem:[#allocation11 + $0x168] sm:$0xff]  ;;  %v1873_v24 = vld [vmem:[#allocation11 + $0x140] sm:$0xff]  ;;  %v13850_v31 = vpack.c.bf16 %v1885_v17, %v1881_v1  ;;  %v1883_v32 = vld [vmem:[#allocation11 + $0x190] sm:$0xff] }
 0x1f4   :  { %v13751_v62 = vadd.f32 %v1317_v6, %v1316_v18  ;;  %10115 = vmatpush1.bf16.msra.mxu0 %v17005_v16  ;;  %10147 = vmatpush1.bf16.msra.mxu1 %v17006_v22  ;;  %v1849_v6 = vld [vmem:[#allocation11 + $0x80] sm:$0xff]  ;;  %v1858_v18 = vld [vmem:[#allocation11 + $0xc8] sm:$0xff]  ;;  %v1860_v22 = vld [vmem:[#allocation11 + $0xd8] sm:$0xff] }
 0x1f5   :  { %10117 = vmatprep.subr.bf16.mxu0 %v13596_v42  ;;  %10149 = vmatprep.subr.bf16.mxu1 %v17007_v53  ;;  %v12531_v42 = vpop.eup %12530  ;;  %v13802_v58 = vpack.c.bf16 %v1853_v9, %v1849_v6  ;;  %v1862_v16 = vld [vmem:[#allocation11 + $0xe8] sm:$0xff]  ;;  %v1876_v6 = vld [vmem:[#allocation11 + $0x158] sm:$0xff]  ;;  %v13834_v9 = vpack.c.bf16 %v1878_v2, %v1874_v14  ;;  %v1887_v14 = vld [vmem:[#allocation11 + $0x1b0] sm:$0xff] }
 0x1f6   :  { %12532 = vtanh.f32 %v13751_v62  ;;  %v13810_v53 = vpack.c.bf16 %v1862_v16, %v1858_v18  ;;  %v1877_v18 = vld [vmem:[#allocation11 + $0x160] sm:$0xff]  ;;  %v13836_v16 = vpack.c.bf16 %v1880_v60, %v1876_v6  ;;  %v13853_v2 = vpack.c.bf16 %v1887_v14, %v1883_v32  ;;  %v1890_v6 = vld [vmem:[#allocation11 + $0x1c8] sm:$0xff]  ;;  %v1895_v1 = vld [vmem:[#allocation11 + $0x1f0] sm:$0xff] }
 0x1f7   :  { %v1894_v60 = vld [vmem:[#allocation11 + $0x1e8] sm:$0xff]  ;;  %v13865_v17 = vpack.c.bf16 %v1895_v1, %v1891_v51 }
 0x1f8   :  { %10119 = vmatpush1.bf16.msra.mxu0 %v13602_v49  ;;  %10151 = vmatpush1.bf16.msra.mxu1 %v13606_v0  ;;  %v1838_v0 = vld [vmem:[#allocation11 + $0x28] sm:$0xff] }
 0x1f9   :  { %10121 = vmatprep.subr.bf16.mxu0 %v13608_v10  ;;  %10153 = vmatprep.subr.bf16.mxu1 %v13611_v27  ;;  %v1836_v10 = vld [vmem:[#allocation11 + $0x18] sm:$0xff]  ;;  %v2083_v32 = vld [vmem:[#allocation13 + $0x8] sm:$0xff] }
 0x1fa   :  { %v2087_v14 = vld [vmem:[#allocation13 + $0x28] sm:$0xff] }
 0x1fc   :  { %10123 = vmatpush1.bf16.msra.mxu0 %v13614_v37  ;;  %10155 = vmatpush1.bf16.msra.mxu1 %v13618_v23  ;;  %v1834_v37 = vld [vmem:[#allocation11 + $0x8] sm:$0xff]  ;;  %v1840_v23 = vld [vmem:[#allocation11 + $0x38] sm:$0xff] }
 0x1fd   :  { %10125 = vmatprep.subr.bf16.mxu0 %v13620_v40  ;;  %10157 = vmatprep.subr.bf16.mxu1 %v13623_v3  ;;  %v13774_v27 = vpack.c.bf16 %v1838_v0, %v1834_v37  ;;  %v1833_v40 = vld [vmem:[#allocation11] sm:$0xff] }
 0x1fe   :  { %v1837_v3 = vld [vmem:[#allocation11 + $0x20] sm:$0xff] }
 0x1ff   :  { %v1861_v37 = vld [vmem:[#allocation11 + $0xe0] sm:$0xff] }
 0x200   :  { %v12533_v46 = vpop.eup %12532  ;;  %10127 = vmatpush1.bf16.msra.mxu0 %v13626_v15  ;;  %10159 = vmatpush1.bf16.msra.mxu1 %v13630_v12  ;;  %v13776_v15 = vpack.c.bf16 %v1840_v23, %v1836_v10  ;;  %v13778_v12 = vpack.c.bf16 %v1837_v3, %v1833_v40  ;;  %v1859_v23 = vld [vmem:[#allocation11 + $0xd0] sm:$0xff] }
 0x201   :  { %v13768_v49 = vmul.f32 %v12533_v46, %v12531_v42  ;;  %10161 = vmatprep.subr.bf16.mxu0 %v13774_v27  ;;  %v1864_v42 = vld [vmem:[#allocation11 + $0xf8] sm:$0xff]  ;;  %v1857_v46 = vld [vmem:[#allocation11 + $0xc0] sm:$0xff]  ;;  %v1863_v40 = vld [vmem:[#allocation11 + $0xf0] sm:$0xff] }
 0x202   :  { %10193 = vmatprep.subr.bf16.mxu1 %v13776_v15  ;;  %v13812_v0 = vpack.c.bf16 %v1864_v42, %v1860_v22  ;;  %v13814_v10 = vpack.c.bf16 %v1861_v37, %v1857_v46  ;;  %v13817_v3 = vpack.c.bf16 %v1863_v40, %v1859_v23  ;;  %v13838_v22 = vpack.c.bf16 %v1877_v18, %v1873_v24  ;;  %v1875_v42 = vld [vmem:[#allocation11 + $0x150] sm:$0xff]  ;;  %v1882_v23 = vld [vmem:[#allocation11 + $0x188] sm:$0xff]  ;;  %v1892_v24 = vld [vmem:[#allocation11 + $0x1d8] sm:$0xff] }
 0x203   :  { %17008 = vst [vmem:[#allocation24_spill] sm:$0xff] %v13768_v49  ;;  %1713 = vmatmul.mubr.f32.vlgmr.msra.gmra.mrb[28].mxu0 %v13768_v49  ;;  %1784 = vmatmul.mubr.f32.vlgmr.msra.gmra.mrb[28].mxu1 %v13768_v49  ;;  %v1879_v46 = vld [vmem:[#allocation11 + $0x170] sm:$0xff]  ;;  %v1886_v40 = vld [vmem:[#allocation11 + $0x1a8] sm:$0xff]  ;;  %v13858_v18 = vpack.c.bf16 %v1894_v60, %v1890_v6  ;;  %v2085_v6 = vld [vmem:[#allocation13 + $0x18] sm:$0xff]  ;;  %v13870_v60 = vpack.c.bf16 %v2087_v14, %v2083_v32 }
 0x204   :  { %1961 = vmatprep.mubr.f32.mxu0 %v16988_v19  ;;  %2032 = vmatprep.mubr.f32.mxu1 %v16988_v19  ;;  %v13841_v37 = vpack.c.bf16 %v1879_v46, %v1875_v42  ;;  %v13846_v21 = vpack.c.bf16 %v1886_v40, %v1882_v23  ;;  %v1896_v42 = vld [vmem:[#allocation11 + $0x1f8] sm:$0xff]  ;;  %v1889_v46 = vld [vmem:[#allocation11 + $0x1c0] sm:$0xff] }
 0x205   :  { %10163 = vmatpush1.bf16.msra.mxu0 %v13778_v12  ;;  %10195 = vmatpush1.bf16.msra.mxu1 %v13781_v44  ;;  %v1893_v23 = vld [vmem:[#allocation11 + $0x1e0] sm:$0xff]  ;;  %v13860_v40 = vpack.c.bf16 %v1896_v42, %v1892_v24  ;;  %v2089_v24 = vld [vmem:[#allocation13 + $0x38] sm:$0xff] }
 0x206   :  { %10165 = vmatprep.subr.bf16.mxu0 %v13786_v11  ;;  %10197 = vmatprep.subr.bf16.mxu1 %v13788_v39  ;;  %v13862_v8 = vpack.c.bf16 %v1893_v23, %v1889_v46  ;;  %v13872_v42 = vpack.c.bf16 %v2089_v24, %v2085_v6 }
 0x209   :  { %10167 = vmatpush1.bf16.msra.mxu0 %v13790_v43  ;;  %10199 = vmatpush1.bf16.msra.mxu1 %v13793_v30 }
 0x20a   :  { %10169 = vmatprep.subr.bf16.mxu0 %v13798_v56  ;;  %10201 = vmatprep.subr.bf16.mxu1 %v13800_v55 }
 0x20d   :  { %10171 = vmatpush1.bf16.msra.mxu0 %v13802_v58  ;;  %10203 = vmatpush1.bf16.msra.mxu1 %v13805_v5 }
 0x20e   :  { %10173 = vmatprep.subr.bf16.mxu0 %v13810_v53  ;;  %10205 = vmatprep.subr.bf16.mxu1 %v13812_v0 }
 0x211   :  { %10175 = vmatpush1.bf16.msra.mxu0 %v13814_v10  ;;  %10207 = vmatpush1.bf16.msra.mxu1 %v13817_v3 }
 0x212   :  { %10177 = vmatprep.subr.bf16.mxu0 %v13822_v57  ;;  %10209 = vmatprep.subr.bf16.mxu1 %v13824_v29 }
 0x215   :  { %10179 = vmatpush1.bf16.msra.mxu0 %v13826_v47  ;;  %10211 = vmatpush1.bf16.msra.mxu1 %v13829_v36 }
 0x216   :  { %10181 = vmatprep.subr.bf16.mxu0 %v13834_v9  ;;  %10213 = vmatprep.subr.bf16.mxu1 %v13836_v16 }
 0x219   :  { %10183 = vmatpush1.bf16.msra.mxu0 %v13838_v22  ;;  %10215 = vmatpush1.bf16.msra.mxu1 %v13841_v37 }
 0x21a   :  { %10185 = vmatprep.subr.bf16.mxu0 %v13846_v21  ;;  %10217 = vmatprep.subr.bf16.mxu1 %v13848_v26 }
 0x21d   :  { %10187 = vmatpush1.bf16.msra.mxu0 %v13850_v31  ;;  %10219 = vmatpush1.bf16.msra.mxu1 %v13853_v2 }
 0x21e   :  { %10189 = vmatprep.subr.bf16.mxu0 %v13858_v18  ;;  %10221 = vmatprep.subr.bf16.mxu1 %v13860_v40 }
 0x221   :  { %10191 = vmatpush1.bf16.msra.mxu0 %v13862_v8  ;;  %10223 = vmatpush1.bf16.msra.mxu1 %v13865_v17 }
 0x222   :  { %10225 = vmatprep.subr.bf16.mxu0 %v13870_v60  ;;  %10257 = vmatprep.subr.bf16.mxu1 %v13872_v42 }
 0x2b6   :  { %v1465_v46 = vpop.f32.mrb[2].mxu0  ;;  %v1536_v23 = vpop.f32.mrb[2].mxu1 }
 0x2b7   :  { %v12242_v51 = vadd.f32 %v1465_v46, %v13682_v38  ;;  %v1467_v1 = vpop.f32.mrb[3].mxu0  ;;  %v1538_v61 = vpop.f32.mrb[3].mxu1  ;;  %v12258_v32 = vadd.f32 %v1536_v23, %v13693_v7 }
 0x2b8   :  { %v12243_v35 = vadd.f32 %v1467_v1, %v13686_v41  ;;  %v12259_v14 = vadd.f32 %v1538_v61, %v13699_v20  ;;  %v2099_v20 = vld [vmem:[#allocation13 + $0x88] sm:$0xff] }
 0x2b9   :  { %v9650_v59 = vmul.f32 -1.442695, %v12242_v51  ;;  %v9652_v6 = vmul.f32 -1.442695, %v12258_v32  ;;  %v2103_v41 = vld [vmem:[#allocation13 + $0xa8] sm:$0xff] }
 0x2ba   :  { %v9651_v52 = vmul.f32 -1.442695, %v12243_v35 }
 0x2bb   :  { %12534 = vpow2.f32 %v9650_v59 }
 0x2bc   :  { %12536 = vpow2.f32 %v9651_v52 }
 0x2bd   :  { %12538 = vtanh.f32 %v12259_v14 }
 0x2be   :  { %12540 = vpow2.f32 %v9652_v6 }
 0x2c5   :  { %v12535_v24 = vpop.eup %12534 }
 0x2c6   :  { %v1554_v13 = vadd.f32 1.0, %v12535_v24  ;;  %v12537_v48 = vpop.eup %12536 }
 0x2c7   :  { %v1555_v46 = vadd.f32 1.0, %v12537_v48  ;;  %v12539_v34 = vpop.eup %12538 }
 0x2c8   :  { %12542 = vrcp.f32 %v1554_v13  ;;  %v12541_v28 = vpop.eup %12540 }
 0x2c9   :  { %12544 = vrcp.f32 %v1555_v46  ;;  %v1556_v59 = vadd.f32 1.0, %v12541_v28  ;;  %v2084_v46 = vld [vmem:[#allocation13 + $0x10] sm:$0xff] }
 0x2cb   :  { %12546 = vrcp.f32 %v1556_v59 }
 0x2d2   :  { %v12543_v1 = vpop.eup %12542 }
 0x2d3   :  { %v1566_v51 = vmul.f32 %v12543_v1, %v12539_v34  ;;  %v12545_v35 = vpop.eup %12544  ;;  %v2082_v34 = vld [vmem:[#allocation13] sm:$0xff]  ;;  %v2088_v1 = vld [vmem:[#allocation13 + $0x30] sm:$0xff] }
 0x2d4   :  { %v1565_v52 = vmul.f32 %v12545_v35, %v13713_v45  ;;  %v2086_v45 = vld [vmem:[#allocation13 + $0x20] sm:$0xff]  ;;  %v2095_v35 = vld [vmem:[#allocation13 + $0x68] sm:$0xff] }
 0x2d5   :  { %v12547_v49 = vpop.eup %12546 }
 0x2d6   :  { %v1714_v23 = vpop.f32.mrb[28].mxu0  ;;  %v1785_v25 = vpop.f32.mrb[28].mxu1  ;;  %v13881_v61 = vadd.f32 %v1566_v51, %v1565_v52  ;;  %v2091_v51 = vld [vmem:[#allocation13 + $0x48] sm:$0xff]  ;;  %v2093_v52 = vld [vmem:[#allocation13 + $0x58] sm:$0xff] }
 0x2d7   :  { %v12284_v32 = vadd.f32 %v1714_v23, %v13706_v63  ;;  %v1716_v14 = vpop.f32.mrb[29].mxu0  ;;  %v1787_v24 = vpop.f32.mrb[29].mxu1  ;;  %v12300_v28 = vadd.f32 %v1785_v25, %v13720_v54  ;;  %v2097_v23 = vld [vmem:[#allocation13 + $0x78] sm:$0xff]  ;;  %v2092_v63 = vld [vmem:[#allocation13 + $0x50] sm:$0xff] }
 0x2d8   :  { %17009 = vst [vmem:[#allocation25_spill] sm:$0xff] %v13881_v61  ;;  %v12285_v48 = vadd.f32 %v1716_v14, %v13710_v50  ;;  %12548 = vtanh.f32 %v13881_v61  ;;  %v12301_v59 = vadd.f32 %v1787_v24, %v13726_v4  ;;  %v13888_v50 = vpack.c.bf16 %v2086_v45, %v2082_v34  ;;  %v2096_v61 = vld [vmem:[#allocation13 + $0x70] sm:$0xff]  ;;  %v2101_v24 = vld [vmem:[#allocation13 + $0x98] sm:$0xff] }
 0x2d9   :  { %v9653_v13 = vmul.f32 -1.442695, %v12284_v32  ;;  %v9655_v33 = vmul.f32 -1.442695, %v12300_v28  ;;  %v13890_v32 = vpack.c.bf16 %v2088_v1, %v2084_v46  ;;  %v13896_v54 = vpack.c.bf16 %v2097_v23, %v2093_v52  ;;  %v2105_v4 = vld [vmem:[#allocation13 + $0xb8] sm:$0xff]  ;;  %v2098_v46 = vld [vmem:[#allocation13 + $0x80] sm:$0xff] }
 0x2da   :  { %v9654_v6 = vmul.f32 -1.442695, %v12285_v48  ;;  %v2090_v48 = vld [vmem:[#allocation13 + $0x40] sm:$0xff]  ;;  %v13904_v45 = vpack.c.bf16 %v2096_v61, %v2092_v63  ;;  %v2104_v52 = vld [vmem:[#allocation13 + $0xb0] sm:$0xff]  ;;  %v2107_v23 = vld [vmem:[#allocation13 + $0xc8] sm:$0xff] }
 0x2db   :  { %12550 = vpow2.f32 %v9653_v13  ;;  %v2094_v13 = vld [vmem:[#allocation13 + $0x60] sm:$0xff]  ;;  %17011 = vst [vmem:[#allocation27_spill] sm:$0xff] %v13896_v54 }
 0x2dc   :  { %12552 = vpow2.f32 %v9654_v6  ;;  %v13894_v6 = vpack.c.bf16 %v2095_v35, %v2091_v51  ;;  %17013 = vst [vmem:[#allocation29_spill] sm:$0xff] %v13904_v45  ;;  %v2102_v1 = vld [vmem:[#allocation13 + $0xa0] sm:$0xff]  ;;  %v13910_v35 = vpack.c.bf16 %v2105_v4, %v2101_v24  ;;  %v2108_v24 = vld [vmem:[#allocation13 + $0xd0] sm:$0xff] }
 0x2dd   :  { %12554 = vtanh.f32 %v12301_v59  ;;  %v2111_v59 = vld [vmem:[#allocation13 + $0xe8] sm:$0xff]  ;;  %v13916_v63 = vpack.c.bf16 %v2102_v1, %v2098_v46  ;;  %v2110_v4 = vld [vmem:[#allocation13 + $0xe0] sm:$0xff] }
 0x2de   :  { %12556 = vpow2.f32 %v9655_v33  ;;  %17015 = vst [vmem:[#allocation31_spill] sm:$0xff] %v13910_v35  ;;  %v2100_v33 = vld [vmem:[#allocation13 + $0x90] sm:$0xff]  ;;  %v13922_v61 = vpack.c.bf16 %v2111_v59, %v2107_v23 }
 0x2df   :  { %17016 = vst [vmem:[#allocation32_spill] sm:$0xff] %v13916_v63 }
 0x2e0   :  { %17018 = vst [vmem:[#allocation43_spill] sm:$0xff] %v13922_v61 }
 0x2e2   :  { %v12549_v14 = vpop.eup %12548 }
 0x2e3   :  { %v13892_v25 = vmul.f32 %v12549_v14, %v12547_v49  ;;  %v13902_v49 = vpack.c.bf16 %v2094_v13, %v2090_v48  ;;  %v2109_v14 = vld [vmem:[#allocation13 + $0xd8] sm:$0xff] }
 0x2e4   :  { %v2113_v48 = vld [vmem:[#allocation13 + $0xf8] sm:$0xff] }
 0x2e5   :  { %17010 = vst [vmem:[#allocation26_spill] sm:$0xff] %v13892_v25  ;;  %v12551_v7 = vpop.eup %12550  ;;  %1962 = vmatmul.mubr.f32.vlgmr.msra.gmra.mrb[4].mxu0 %v13892_v25  ;;  %2033 = vmatmul.mubr.f32.vlgmr.msra.gmra.mrb[4].mxu1 %v13892_v25  ;;  %17012 = vst [vmem:[#allocation28_spill] sm:$0xff] %v13902_v49  ;;  %v13924_v13 = vpack.c.bf16 %v2113_v48, %v2109_v14  ;;  %v2117_v25 = vld [vmem:[#allocation13 + $0x118] sm:$0xff]  ;;  %v2116_v48 = vld [vmem:[#allocation13 + $0x110] sm:$0xff] }
 0x2e6   :  { %v1803_v28 = vadd.f32 1.0, %v12551_v7  ;;  %v12553_v34 = vpop.eup %12552  ;;  %10227 = vmatpush1.bf16.msra.mxu0 %v13888_v50  ;;  %10259 = vmatpush1.bf16.msra.mxu1 %v13890_v32  ;;  %v13908_v7 = vpack.c.bf16 %v2103_v41, %v2099_v20  ;;  %v13918_v41 = vpack.c.bf16 %v2104_v52, %v2100_v33  ;;  %v2106_v20 = vld [vmem:[#allocation13 + $0xc0] sm:$0xff] }
 0x2e7   :  { %v1804_v51 = vadd.f32 1.0, %v12553_v34  ;;  %10229 = vmatprep.subr.bf16.mxu0 %v13894_v6  ;;  %10261 = vmatprep.subr.bf16.mxu1 %v13896_v54  ;;  %17019 = vst [vmem:[#allocation44_spill] sm:$0xff] %v13924_v13  ;;  %v2115_v34 = vld [vmem:[#allocation13 + $0x108] sm:$0xff]  ;;  %v13928_v46 = vpack.c.bf16 %v2110_v4, %v2106_v20  ;;  %v2114_v33 = vld [vmem:[#allocation13 + $0x100] sm:$0xff]  ;;  %v12555_v23 = vpop.eup %12554  ;;  %v2125_v20 = vld [vmem:[#allocation13 + $0x158] sm:$0xff] }
 0x2e8   :  { %12558 = vrcp.f32 %v1803_v28  ;;  %17014 = vst [vmem:[#allocation30_spill] sm:$0xff] %v13908_v7  ;;  %2210 = vmatprep.mubr.f32.mxu0 %v16988_v19  ;;  %2281 = vmatprep.mubr.f32.mxu1 %v16988_v19  ;;  %17017 = vst [vmem:[#allocation33_spill] sm:$0xff] %v13918_v41  ;;  %v2112_v28 = vld [vmem:[#allocation13 + $0xf0] sm:$0xff]  ;;  %v2118_v52 = vld [vmem:[#allocation13 + $0x120] sm:$0xff] }
 0x2e9   :  { %12560 = vrcp.f32 %v1804_v51  ;;  %v2119_v51 = vld [vmem:[#allocation13 + $0x128] sm:$0xff]  ;;  %17020 = vst [vmem:[#allocation45_spill] sm:$0xff] %v13928_v46  ;;  %v13930_v1 = vpack.c.bf16 %v2112_v28, %v2108_v24  ;;  %v2129_v4 = vld [vmem:[#allocation13 + $0x178] sm:$0xff] }
 0x2ea   :  { %10231 = vmatpush1.bf16.msra.mxu0 %v13902_v49  ;;  %10263 = vmatpush1.bf16.msra.mxu1 %v13904_v45  ;;  %v2121_v45 = vld [vmem:[#allocation13 + $0x138] sm:$0xff]  ;;  %v13934_v59 = vpack.c.bf16 %v2119_v51, %v2115_v34  ;;  %v2122_v34 = vld [vmem:[#allocation13 + $0x140] sm:$0xff]  ;;  %v13948_v54 = vpack.c.bf16 %v2129_v4, %v2125_v20 }
 0x2eb   :  { %10233 = vmatprep.subr.bf16.mxu0 %v13908_v7  ;;  %10265 = vmatprep.subr.bf16.mxu1 %v13910_v35  ;;  %17021 = vst [vmem:[#allocation46_spill] sm:$0xff] %v13930_v1  ;;  %v13936_v14 = vpack.c.bf16 %v2121_v45, %v2117_v25  ;;  %v2120_v35 = vld [vmem:[#allocation13 + $0x130] sm:$0xff]  ;;  %v12557_v7 = vpop.eup %12556  ;;  %v2126_v25 = vld [vmem:[#allocation13 + $0x160] sm:$0xff] }
 0x2ec   :  { %v1805_v51 = vadd.f32 1.0, %v12557_v7  ;;  %17023 = vst [vmem:[#allocation48_spill] sm:$0xff] %v13948_v54  ;;  %v13955_v7 = vpack.c.bf16 %v2126_v25, %v2122_v34  ;;  %v2134_v20 = vld [vmem:[#allocation13 + $0x1a0] sm:$0xff]  ;;  %v2143_v34 = vld [vmem:[#allocation13 + $0x1e8] sm:$0xff]  ;;  %v2141_v25 = vld [vmem:[#allocation13 + $0x1d8] sm:$0xff] }
 0x2ee   :  { %10235 = vmatpush1.bf16.msra.mxu0 %v13916_v63  ;;  %10267 = vmatpush1.bf16.msra.mxu1 %v13918_v41  ;;  %v2123_v63 = vld [vmem:[#allocation13 + $0x148] sm:$0xff]  ;;  %12562 = vrcp.f32 %v1805_v51 }
 0x2ef   :  { %10237 = vmatprep.subr.bf16.mxu0 %v13922_v61  ;;  %10269 = vmatprep.subr.bf16.mxu1 %v13924_v13  ;;  %v2127_v41 = vld [vmem:[#allocation13 + $0x168] sm:$0xff]  ;;  %v13940_v61 = vpack.c.bf16 %v2118_v52, %v2114_v33  ;;  %v13942_v13 = vpack.c.bf16 %v2120_v35, %v2116_v48  ;;  %v2133_v35 = vld [vmem:[#allocation13 + $0x198] sm:$0xff] }
 0x2f0   :  { %v13946_v49 = vpack.c.bf16 %v2127_v41, %v2123_v63  ;;  %v2135_v52 = vld [vmem:[#allocation13 + $0x1a8] sm:$0xff]  ;;  %v2137_v48 = vld [vmem:[#allocation13 + $0x1b8] sm:$0xff]  ;;  %v2130_v41 = vld [vmem:[#allocation13 + $0x180] sm:$0xff] }
 0x2f1   :  { %v13963_v4 = vpack.c.bf16 %v2137_v48, %v2133_v35  ;;  %v13968_v51 = vpack.c.bf16 %v2134_v20, %v2130_v41  ;;  %v2142_v48 = vld [vmem:[#allocation13 + $0x1e0] sm:$0xff] }
 0x2f2   :  { %v12559_v24 = vpop.eup %12558  ;;  %10239 = vmatpush1.bf16.msra.mxu0 %v13928_v46  ;;  %10271 = vmatpush1.bf16.msra.mxu1 %v13930_v1  ;;  %17022 = vst [vmem:[#allocation47_spill] sm:$0xff] %v13946_v49  ;;  %v2131_v46 = vld [vmem:[#allocation13 + $0x188] sm:$0xff] }
 0x2f3   :  { %v1815_v28 = vmul.f32 %v12559_v24, %v12555_v23  ;;  %v12561_v45 = vpop.eup %12560  ;;  %10241 = vmatprep.subr.bf16.mxu0 %v13934_v59  ;;  %10273 = vmatprep.subr.bf16.mxu1 %v13936_v14  ;;  %v2124_v23 = vld [vmem:[#allocation13 + $0x150] sm:$0xff] }
 0x2f4   :  { %v2128_v24 = vld [vmem:[#allocation13 + $0x170] sm:$0xff]  ;;  %v1814_v33 = vmul.f32 %v12561_v45, %v13751_v62  ;;  %v13961_v62 = vpack.c.bf16 %v2135_v52, %v2131_v46  ;;  %v2138_v46 = vld [vmem:[#allocation13 + $0x1c0] sm:$0xff] }
 0x2f5   :  { %v13957_v63 = vpack.c.bf16 %v2128_v24, %v2124_v23  ;;  %v2136_v45 = vld [vmem:[#allocation13 + $0x1b0] sm:$0xff]  ;;  %v2145_v23 = vld [vmem:[#allocation13 + $0x1f8] sm:$0xff]  ;;  %v13980_v41 = vpack.c.bf16 %v2142_v48, %v2138_v46 }
 0x2f6   :  { %v13951_v1 = vadd.f32 %v1815_v28, %v1814_v33  ;;  %10243 = vmatpush1.bf16.msra.mxu0 %v13940_v61  ;;  %10275 = vmatpush1.bf16.msra.mxu1 %v13942_v13  ;;  %v2132_v28 = vld [vmem:[#allocation13 + $0x190] sm:$0xff]  ;;  %v2139_v33 = vld [vmem:[#allocation13 + $0x1c8] sm:$0xff]  ;;  %v13976_v35 = vpack.c.bf16 %v2145_v23, %v2141_v25 }
 0x2f7   :  { %10245 = vmatprep.subr.bf16.mxu0 %v13946_v49  ;;  %10277 = vmatprep.subr.bf16.mxu1 %v13948_v54  ;;  %v13970_v24 = vpack.c.bf16 %v2136_v45, %v2132_v28  ;;  %v13974_v52 = vpack.c.bf16 %v2143_v34, %v2139_v33  ;;  %v2140_v54 = vld [vmem:[#allocation13 + $0x1d0] sm:$0xff]  ;;  %v17031_v25 = vld [vmem:[#allocation40_spill] sm:$0xff] }
 0x2f8   :  { %12564 = vtanh.f32 %v13951_v1  ;;  %v2144_v49 = vld [vmem:[#allocation13 + $0x1f0] sm:$0xff]  ;;  %v12563_v28 = vpop.eup %12562 }
 0x2f9   :  { %v13982_v20 = vpack.c.bf16 %v2144_v49, %v2140_v54  ;;  %v17032_v48 = vld [vmem:[#allocation41_spill] sm:$0xff] }
 0x2fa   :  { %10247 = vmatpush1.bf16.msra.mxu0 %v13955_v7  ;;  %10279 = vmatpush1.bf16.msra.mxu1 %v13957_v63 }
 0x2fb   :  { %10249 = vmatprep.subr.bf16.mxu0 %v13961_v62  ;;  %10281 = vmatprep.subr.bf16.mxu1 %v13963_v4 }
 0x2fe   :  { %10251 = vmatpush1.bf16.msra.mxu0 %v13968_v51  ;;  %10283 = vmatpush1.bf16.msra.mxu1 %v13970_v24 }
 0x2ff   :  { %10253 = vmatprep.subr.bf16.mxu0 %v13974_v52  ;;  %10285 = vmatprep.subr.bf16.mxu1 %v13976_v35 }
 0x302   :  { %v12565_v45 = vpop.eup %12564  ;;  %10255 = vmatpush1.bf16.msra.mxu0 %v13980_v41  ;;  %10287 = vmatpush1.bf16.msra.mxu1 %v13982_v20 }
 0x303   :  { %v13988_v33 = vmul.f32 %v12565_v45, %v12563_v28  ;;  %10289 = vmatprep.subr.bf16.mxu0 %v13774_v27  ;;  %10321 = vmatprep.subr.bf16.mxu1 %v13776_v15 }
 0x305   :  { %17024 = vst [vmem:[#allocation49_spill] sm:$0xff] %v13988_v33  ;;  %2211 = vmatmul.mubr.f32.vlgmr.msra.gmra.mrb[26].mxu0 %v13988_v33  ;;  %2282 = vmatmul.mubr.f32.vlgmr.msra.gmra.mrb[26].mxu1 %v13988_v33 }
 0x306   :  { %10291 = vmatpush1.bf16.msra.mxu0 %v13778_v12  ;;  %10323 = vmatpush1.bf16.msra.mxu1 %v13781_v44 }
 0x307   :  { %10293 = vmatprep.subr.bf16.mxu0 %v13786_v11  ;;  %10325 = vmatprep.subr.bf16.mxu1 %v13788_v39  ;;  %v17025_v11 = vld [vmem:[#allocation35_spill] sm:$0xff] }
 0x308   :  { %2459 = vmatprep.mubr.f32.mxu0 %v16988_v19  ;;  %2530 = vmatprep.mubr.f32.mxu1 %v16988_v19 }
 0x30a   :  { %10295 = vmatpush1.bf16.msra.mxu0 %v13790_v43  ;;  %10327 = vmatpush1.bf16.msra.mxu1 %v13793_v30 }
 0x30b   :  { %10297 = vmatprep.subr.bf16.mxu0 %v13798_v56  ;;  %10329 = vmatprep.subr.bf16.mxu1 %v13800_v55  ;;  %v17026_v56 = vld [vmem:[#allocation36_spill] sm:$0xff] }
 0x30e   :  { %10299 = vmatpush1.bf16.msra.mxu0 %v13802_v58  ;;  %10331 = vmatpush1.bf16.msra.mxu1 %v13805_v5  ;;  %v17027_v58 = vld [vmem:[#allocation37_spill] sm:$0xff] }
 0x30f   :  { %10301 = vmatprep.subr.bf16.mxu0 %v13810_v53  ;;  %10333 = vmatprep.subr.bf16.mxu1 %v13812_v0 }
 0x312   :  { %10303 = vmatpush1.bf16.msra.mxu0 %v13814_v10  ;;  %10335 = vmatpush1.bf16.msra.mxu1 %v13817_v3 }
 0x313   :  { %10305 = vmatprep.subr.bf16.mxu0 %v13822_v57  ;;  %10337 = vmatprep.subr.bf16.mxu1 %v13824_v29 }
 0x316   :  { %10307 = vmatpush1.bf16.msra.mxu0 %v13826_v47  ;;  %10339 = vmatpush1.bf16.msra.mxu1 %v13829_v36 }
 0x317   :  { %10309 = vmatprep.subr.bf16.mxu0 %v13834_v9  ;;  %10341 = vmatprep.subr.bf16.mxu1 %v13836_v16 }
 0x31a   :  { %10311 = vmatpush1.bf16.msra.mxu0 %v13838_v22  ;;  %10343 = vmatpush1.bf16.msra.mxu1 %v13841_v37  ;;  %v17028_v37 = vld [vmem:[#allocation25_spill] sm:$0xff] }
 0x31b   :  { %10313 = vmatprep.subr.bf16.mxu0 %v13846_v21  ;;  %10345 = vmatprep.subr.bf16.mxu1 %v13848_v26 }
 0x31e   :  { %10315 = vmatpush1.bf16.msra.mxu0 %v13850_v31  ;;  %10347 = vmatpush1.bf16.msra.mxu1 %v13853_v2 }
 0x31f   :  { %10317 = vmatprep.subr.bf16.mxu0 %v13858_v18  ;;  %10349 = vmatprep.subr.bf16.mxu1 %v13860_v40  ;;  %v17029_v18 = vld [vmem:[#allocation38_spill] sm:$0xff] }
 0x322   :  { %10319 = vmatpush1.bf16.msra.mxu0 %v13862_v8  ;;  %10351 = vmatpush1.bf16.msra.mxu1 %v13865_v17 }
 0x323   :  { %10353 = vmatprep.subr.bf16.mxu0 %v13870_v60  ;;  %10385 = vmatprep.subr.bf16.mxu1 %v13872_v42  ;;  %v17030_v60 = vld [vmem:[#allocation39_spill] sm:$0xff] }
 0x3b8   :  { %v1963_v54 = vpop.f32.mrb[4].mxu0  ;;  %v2034_v27 = vpop.f32.mrb[4].mxu1 }
 0x3b9   :  { %v12244_v15 = vadd.f32 %v1963_v54, %v13682_v38  ;;  %v1965_v12 = vpop.f32.mrb[5].mxu0  ;;  %v2036_v44 = vpop.f32.mrb[5].mxu1  ;;  %v12260_v55 = vadd.f32 %v2034_v27, %v17026_v56 }
 0x3ba   :  { %v12245_v39 = vadd.f32 %v1965_v12, %v17025_v11  ;;  %v12261_v5 = vadd.f32 %v2036_v44, %v17027_v58 }
 0x3bb   :  { %v9656_v43 = vmul.f32 -1.442695, %v12244_v15  ;;  %v9658_v53 = vmul.f32 -1.442695, %v12260_v55  ;;  %v17036_v55 = vld [vmem:[#allocation29_spill] sm:$0xff] }
 0x3bc   :  { %v9657_v30 = vmul.f32 -1.442695, %v12245_v39 }
 0x3bd   :  { %12566 = vpow2.f32 %v9656_v43  ;;  %v17034_v43 = vld [vmem:[#allocation27_spill] sm:$0xff] }
 0x3be   :  { %12568 = vpow2.f32 %v9657_v30  ;;  %v17035_v30 = vld [vmem:[#allocation28_spill] sm:$0xff] }
 0x3bf   :  { %12570 = vtanh.f32 %v12261_v5  ;;  %v17037_v5 = vld [vmem:[#allocation30_spill] sm:$0xff] }
 0x3c0   :  { %12572 = vpow2.f32 %v9658_v53  ;;  %v17040_v53 = vld [vmem:[#allocation33_spill] sm:$0xff] }
 0x3c7   :  { %v12567_v0 = vpop.eup %12566 }
 0x3c8   :  { %v2052_v10 = vadd.f32 1.0, %v12567_v0  ;;  %v12569_v3 = vpop.eup %12568  ;;  %v17041_v0 = vld [vmem:[#allocation43_spill] sm:$0xff] }
 0x3c9   :  { %v2053_v57 = vadd.f32 1.0, %v12569_v3  ;;  %v12571_v29 = vpop.eup %12570 }
 0x3ca   :  { %12574 = vrcp.f32 %v2052_v10  ;;  %v12573_v47 = vpop.eup %12572  ;;  %v17042_v10 = vld [vmem:[#allocation44_spill] sm:$0xff] }
 0x3cb   :  { %12576 = vrcp.f32 %v2053_v57  ;;  %v2054_v22 = vadd.f32 1.0, %v12573_v47  ;;  %v17043_v47 = vld [vmem:[#allocation45_spill] sm:$0xff] }
 0x3cd   :  { %12578 = vrcp.f32 %v2054_v22 }
 0x3d4   :  { %v12575_v36 = vpop.eup %12574 }
 0x3d5   :  { %v2064_v9 = vmul.f32 %v12575_v36, %v12571_v29  ;;  %v12577_v16 = vpop.eup %12576  ;;  %v17044_v36 = vld [vmem:[#allocation46_spill] sm:$0xff] }
 0x3d6   :  { %v2063_v21 = vmul.f32 %v12577_v16, %v17028_v37 }
 0x3d7   :  { %v12579_v46 = vpop.eup %12578 }
 0x3d8   :  { %v2212_v26 = vpop.f32.mrb[26].mxu0  ;;  %v2283_v31 = vpop.f32.mrb[26].mxu1  ;;  %v14033_v2 = vadd.f32 %v2064_v9, %v2063_v21  ;;  %v17045_v21 = vld [vmem:[#allocation47_spill] sm:$0xff] }
 0x3d9   :  { %v12282_v40 = vadd.f32 %v2212_v26, %v17029_v18  ;;  %v2214_v8 = vpop.f32.mrb[27].mxu0  ;;  %v2285_v17 = vpop.f32.mrb[27].mxu1  ;;  %v12298_v23 = vadd.f32 %v2283_v31, %v17031_v25  ;;  %v17046_v26 = vld [vmem:[#allocation48_spill] sm:$0xff] }
 0x3da   :  { %v12283_v42 = vadd.f32 %v2214_v8, %v17030_v60  ;;  %12580 = vtanh.f32 %v14033_v2  ;;  %v12299_v28 = vadd.f32 %v2285_v17, %v17032_v48  ;;  %v2835_v31 = vld [vmem:[#allocation11 + $0x48] sm:$0xff]  ;;  %v2837_v8 = vld [vmem:[#allocation11 + $0x58] sm:$0xff] }
 0x3db   :  { %v9659_v49 = vmul.f32 -1.442695, %v12282_v40  ;;  %v9661_v54 = vmul.f32 -1.442695, %v12298_v23  ;;  %v2839_v40 = vld [vmem:[#allocation11 + $0x68] sm:$0xff] }
 0x3dc   :  { %v9660_v34 = vmul.f32 -1.442695, %v12283_v42  ;;  %v14098_v17 = vpack.c.bf16 %v2839_v40, %v2835_v31  ;;  %v2841_v42 = vld [vmem:[#allocation11 + $0x78] sm:$0xff]  ;;  %v2864_v31 = vld [vmem:[#allocation11 + $0x130] sm:$0xff] }
 0x3dd   :  { %12582 = vpow2.f32 %v9659_v49  ;;  %v2834_v49 = vld [vmem:[#allocation11 + $0x40] sm:$0xff]  ;;  %v14100_v23 = vpack.c.bf16 %v2841_v42, %v2837_v8  ;;  %v2867_v8 = vld [vmem:[#allocation11 + $0x148] sm:$0xff] }
 0x3de   :  { %12584 = vpow2.f32 %v9660_v34  ;;  %v2838_v34 = vld [vmem:[#allocation11 + $0x60] sm:$0xff]  ;;  %v2871_v42 = vld [vmem:[#allocation11 + $0x168] sm:$0xff] }
 0x3df   :  { %12586 = vtanh.f32 %v12299_v28  ;;  %v2836_v28 = vld [vmem:[#allocation11 + $0x50] sm:$0xff] }
 0x3e0   :  { %12588 = vpow2.f32 %v9661_v54 }
 0x3e4   :  { %v12581_v45 = vpop.eup %12580 }
 0x3e5   :  { %v14040_v27 = vmul.f32 %v12581_v45, %v12579_v46  ;;  %v14102_v46 = vpack.c.bf16 %v2838_v34, %v2834_v49  ;;  %v2840_v45 = vld [vmem:[#allocation11 + $0x70] sm:$0xff]  ;;  %v2869_v49 = vld [vmem:[#allocation11 + $0x158] sm:$0xff]  ;;  %v14146_v34 = vpack.c.bf16 %v2871_v42, %v2867_v8  ;;  %v2886_v8 = vld [vmem:[#allocation11 + $0x1e0] sm:$0xff] }
 0x3e6   :  { %v14105_v54 = vpack.c.bf16 %v2840_v45, %v2836_v28  ;;  %v2873_v28 = vld [vmem:[#allocation11 + $0x178] sm:$0xff]  ;;  %v2866_v45 = vld [vmem:[#allocation11 + $0x140] sm:$0xff] }
 0x3e7   :  { %17033 = vst [vmem:[#allocation25_spill] sm:$0xff] %v14040_v27  ;;  %v12583_v15 = vpop.eup %12582  ;;  %2460 = vmatmul.mubr.f32.vlgmr.msra.gmra.mrb[6].mxu0 %v14040_v27  ;;  %2531 = vmatmul.mubr.f32.vlgmr.msra.gmra.mrb[6].mxu1 %v14040_v27 }
 0x3e8   :  { %v2301_v12 = vadd.f32 1.0, %v12583_v15  ;;  %v12585_v44 = vpop.eup %12584  ;;  %10355 = vmatpush1.bf16.msra.mxu0 %v13888_v50  ;;  %10387 = vmatpush1.bf16.msra.mxu1 %v13890_v32  ;;  %v17038_v50 = vld [vmem:[#allocation31_spill] sm:$0xff]  ;;  %v17039_v32 = vld [vmem:[#allocation32_spill] sm:$0xff] }
 0x3e9   :  { %v2302_v39 = vadd.f32 1.0, %v12585_v44  ;;  %10357 = vmatprep.subr.bf16.mxu0 %v13894_v6  ;;  %10389 = vmatprep.subr.bf16.mxu1 %v17034_v43  ;;  %v12587_v6 = vpop.eup %12586  ;;  %v2843_v15 = vld [vmem:[#allocation11 + $0x88] sm:$0xff]  ;;  %v2845_v44 = vld [vmem:[#allocation11 + $0x98] sm:$0xff] }
 0x3ea   :  { %12590 = vrcp.f32 %v2301_v12  ;;  %2708 = vmatprep.mubr.f32.mxu0 %v16988_v19  ;;  %2779 = vmatprep.mubr.f32.mxu1 %v16988_v19  ;;  %v12589_v3 = vpop.eup %12588  ;;  %v2847_v12 = vld [vmem:[#allocation11 + $0xa8] sm:$0xff]  ;;  %v2849_v43 = vld [vmem:[#allocation11 + $0xb8] sm:$0xff] }
 0x3eb   :  { %12592 = vrcp.f32 %v2302_v39  ;;  %v2303_v16 = vadd.f32 1.0, %v12589_v3  ;;  %v14110_v39 = vpack.c.bf16 %v2847_v12, %v2843_v15  ;;  %v2853_v3 = vld [vmem:[#allocation11 + $0xd8] sm:$0xff]  ;;  %v2870_v15 = vld [vmem:[#allocation11 + $0x160] sm:$0xff]  ;;  %v14148_v12 = vpack.c.bf16 %v2873_v28, %v2869_v49  ;;  %v2884_v28 = vld [vmem:[#allocation11 + $0x1d0] sm:$0xff] }
 0x3ec   :  { %10359 = vmatpush1.bf16.msra.mxu0 %v17035_v30  ;;  %10391 = vmatpush1.bf16.msra.mxu1 %v17036_v55  ;;  %v2842_v30 = vld [vmem:[#allocation11 + $0x80] sm:$0xff] }
 0x3ed   :  { %10361 = vmatprep.subr.bf16.mxu0 %v17037_v5  ;;  %10393 = vmatprep.subr.bf16.mxu1 %v17038_v50  ;;  %12594 = vrcp.f32 %v2303_v16  ;;  %v2846_v55 = vld [vmem:[#allocation11 + $0xa0] sm:$0xff]  ;;  %v14112_v5 = vpack.c.bf16 %v2849_v43, %v2845_v44  ;;  %v14150_v44 = vpack.c.bf16 %v2870_v15, %v2866_v45  ;;  %v2868_v43 = vld [vmem:[#allocation11 + $0x150] sm:$0xff] }
 0x3ee   :  { %v14114_v50 = vpack.c.bf16 %v2846_v55, %v2842_v30  ;;  %v2872_v30 = vld [vmem:[#allocation11 + $0x170] sm:$0xff] }
 0x3ef   :  { %v14153_v55 = vpack.c.bf16 %v2872_v30, %v2868_v43  ;;  %v2888_v45 = vld [vmem:[#allocation11 + $0x1f0] sm:$0xff]  ;;  %v3070_v43 = vld [vmem:[#allocation13 + $0x8] sm:$0xff] }
 0x3f0   :  { %10363 = vmatpush1.bf16.msra.mxu0 %v17039_v32  ;;  %10395 = vmatpush1.bf16.msra.mxu1 %v17040_v53  ;;  %v2844_v32 = vld [vmem:[#allocation11 + $0x90] sm:$0xff]  ;;  %v14177_v15 = vpack.c.bf16 %v2888_v45, %v2884_v28  ;;  %v3074_v30 = vld [vmem:[#allocation13 + $0x28] sm:$0xff] }
 0x3f1   :  { %10365 = vmatprep.subr.bf16.mxu0 %v17041_v0  ;;  %10397 = vmatprep.subr.bf16.mxu1 %v17042_v10  ;;  %v2848_v53 = vld [vmem:[#allocation11 + $0xb0] sm:$0xff]  ;;  %v2851_v0 = vld [vmem:[#allocation11 + $0xc8] sm:$0xff] }
 0x3f2   :  { %v2855_v10 = vld [vmem:[#allocation11 + $0xe8] sm:$0xff] }
 0x3f4   :  { %v12591_v57 = vpop.eup %12590  ;;  %10367 = vmatpush1.bf16.msra.mxu0 %v17043_v47  ;;  %10399 = vmatpush1.bf16.msra.mxu1 %v17044_v36  ;;  %v2850_v47 = vld [vmem:[#allocation11 + $0xc0] sm:$0xff] }
 0x3f5   :  { %v2313_v29 = vmul.f32 %v12591_v57, %v12587_v6  ;;  %v12593_v9 = vpop.eup %12592  ;;  %10369 = vmatprep.subr.bf16.mxu0 %v13934_v59  ;;  %10401 = vmatprep.subr.bf16.mxu1 %v13936_v14  ;;  %v2827_v59 = vld [vmem:[#allocation11 + $0x8] sm:$0xff]  ;;  %v14117_v6 = vpack.c.bf16 %v2848_v53, %v2844_v32  ;;  %v14122_v57 = vpack.c.bf16 %v2855_v10, %v2851_v0  ;;  %v2854_v36 = vld [vmem:[#allocation11 + $0xe0] sm:$0xff]  ;;  %v2877_v0 = vld [vmem:[#allocation11 + $0x198] sm:$0xff] }
 0x3f6   :  { %v2312_v22 = vmul.f32 %v12593_v9, %v13951_v1  ;;  %v2831_v14 = vld [vmem:[#allocation11 + $0x28] sm:$0xff]  ;;  %v14126_v16 = vpack.c.bf16 %v2854_v36, %v2850_v47  ;;  %v2878_v47 = vld [vmem:[#allocation11 + $0x1a0] sm:$0xff] }
 0x3f7   :  { %v2875_v32 = vld [vmem:[#allocation11 + $0x188] sm:$0xff] }
 0x3f8   :  { %v14063_v37 = vadd.f32 %v2313_v29, %v2312_v22  ;;  %10371 = vmatpush1.bf16.msra.mxu0 %v13940_v61  ;;  %10403 = vmatpush1.bf16.msra.mxu1 %v13942_v13  ;;  %v12595_v61 = vpop.eup %12594  ;;  %v2857_v29 = vld [vmem:[#allocation11 + $0xf8] sm:$0xff]  ;;  %v2852_v22 = vld [vmem:[#allocation11 + $0xd0] sm:$0xff]  ;;  %v2879_v53 = vld [vmem:[#allocation11 + $0x1a8] sm:$0xff] }
 0x3f9   :  { %10373 = vmatprep.subr.bf16.mxu0 %v17045_v21  ;;  %10405 = vmatprep.subr.bf16.mxu1 %v17046_v26  ;;  %v14124_v9 = vpack.c.bf16 %v2857_v29, %v2853_v3  ;;  %v2856_v21 = vld [vmem:[#allocation11 + $0xf0] sm:$0xff]  ;;  %v14158_v10 = vpack.c.bf16 %v2879_v53, %v2875_v32  ;;  %v2881_v3 = vld [vmem:[#allocation11 + $0x1b8] sm:$0xff]  ;;  %v2874_v29 = vld [vmem:[#allocation11 + $0x180] sm:$0xff]  ;;  %v14182_v53 = vpack.c.bf16 %v3074_v30, %v3070_v43 }
 0x3fa   :  { %12596 = vtanh.f32 %v14063_v37  ;;  %v14129_v26 = vpack.c.bf16 %v2856_v21, %v2852_v22  ;;  %v14160_v36 = vpack.c.bf16 %v2881_v3, %v2877_v0  ;;  %v14162_v22 = vpack.c.bf16 %v2878_v47, %v2874_v29  ;;  %v2876_v21 = vld [vmem:[#allocation11 + $0x190] sm:$0xff]  ;;  %v3072_v32 = vld [vmem:[#allocation13 + $0x18] sm:$0xff] }
 0x3fb   :  { %v3076_v0 = vld [vmem:[#allocation13 + $0x38] sm:$0xff] }
 0x3fc   :  { %10375 = vmatpush1.bf16.msra.mxu0 %v13955_v7  ;;  %10407 = vmatpush1.bf16.msra.mxu1 %v13957_v63  ;;  %v2829_v7 = vld [vmem:[#allocation11 + $0x18] sm:$0xff]  ;;  %v14086_v63 = vpack.c.bf16 %v2831_v14, %v2827_v59  ;;  %v14184_v3 = vpack.c.bf16 %v3076_v0, %v3072_v32 }
 0x3fd   :  { %10377 = vmatprep.subr.bf16.mxu0 %v13961_v62  ;;  %10409 = vmatprep.subr.bf16.mxu1 %v13963_v4  ;;  %v2833_v62 = vld [vmem:[#allocation11 + $0x38] sm:$0xff]  ;;  %v2826_v4 = vld [vmem:[#allocation11] sm:$0xff] }
 0x3fe   :  { %v2861_v59 = vld [vmem:[#allocation11 + $0x118] sm:$0xff] }
 0x400   :  { %10379 = vmatpush1.bf16.msra.mxu0 %v13968_v51  ;;  %10411 = vmatpush1.bf16.msra.mxu1 %v13970_v24  ;;  %v2830_v51 = vld [vmem:[#allocation11 + $0x20] sm:$0xff]  ;;  %v14088_v24 = vpack.c.bf16 %v2833_v62, %v2829_v7  ;;  %v2865_v7 = vld [vmem:[#allocation11 + $0x138] sm:$0xff] }
 0x401   :  { %10381 = vmatprep.subr.bf16.mxu0 %v13974_v52  ;;  %10413 = vmatprep.subr.bf16.mxu1 %v13976_v35  ;;  %v14090_v52 = vpack.c.bf16 %v2830_v51, %v2826_v4  ;;  %v2828_v35 = vld [vmem:[#allocation11 + $0x10] sm:$0xff]  ;;  %v2858_v62 = vld [vmem:[#allocation11 + $0x100] sm:$0xff]  ;;  %v14136_v51 = vpack.c.bf16 %v2865_v7, %v2861_v59  ;;  %v2883_v59 = vld [vmem:[#allocation11 + $0x1c8] sm:$0xff] }
 0x402   :  { %v2862_v4 = vld [vmem:[#allocation11 + $0x120] sm:$0xff]  ;;  %v2887_v7 = vld [vmem:[#allocation11 + $0x1e8] sm:$0xff] }
 0x404   :  { %v12597_v13 = vpop.eup %12596  ;;  %10383 = vmatpush1.bf16.msra.mxu0 %v13980_v41  ;;  %10415 = vmatpush1.bf16.msra.mxu1 %v13982_v20  ;;  %v2832_v41 = vld [vmem:[#allocation11 + $0x30] sm:$0xff] }
 0x405   :  { %v14080_v1 = vmul.f32 %v12597_v13, %v12595_v61  ;;  %10417 = vmatprep.subr.bf16.mxu0 %v14086_v63  ;;  %v14093_v20 = vpack.c.bf16 %v2832_v41, %v2828_v35  ;;  %10449 = vmatprep.subr.bf16.mxu1 %v14088_v24  ;;  %v2859_v61 = vld [vmem:[#allocation11 + $0x108] sm:$0xff]  ;;  %v14138_v35 = vpack.c.bf16 %v2862_v4, %v2858_v62  ;;  %v2860_v41 = vld [vmem:[#allocation11 + $0x110] sm:$0xff]  ;;  %v2885_v62 = vld [vmem:[#allocation11 + $0x1d8] sm:$0xff] }
 0x406   :  { %v2863_v13 = vld [vmem:[#allocation11 + $0x128] sm:$0xff]  ;;  %v14141_v40 = vpack.c.bf16 %v2864_v31, %v2860_v41  ;;  %v14170_v4 = vpack.c.bf16 %v2887_v7, %v2883_v59  ;;  %v2889_v41 = vld [vmem:[#allocation11 + $0x1f8] sm:$0xff]  ;;  %v2882_v31 = vld [vmem:[#allocation11 + $0x1c0] sm:$0xff] }
 0x407   :  { %17047 = vst [vmem:[#allocation27_spill] sm:$0xff] %v14080_v1  ;;  %2709 = vmatmul.mubr.f32.vlgmr.msra.gmra.mrb[24].mxu0 %v14080_v1  ;;  %2780 = vmatmul.mubr.f32.vlgmr.msra.gmra.mrb[24].mxu1 %v14080_v1  ;;  %v14134_v14 = vpack.c.bf16 %v2863_v13, %v2859_v61  ;;  %v2880_v61 = vld [vmem:[#allocation11 + $0x1b0] sm:$0xff]  ;;  %v14172_v42 = vpack.c.bf16 %v2889_v41, %v2885_v62 }
 0x408   :  { %2954 = vmatprep.mubr.f32.mxu0 %v16988_v19  ;;  %3025 = vmatprep.mubr.f32.mxu1 %v16988_v19  ;;  %v14165_v13 = vpack.c.bf16 %v2880_v61, %v2876_v21  ;;  %v14174_v49 = vpack.c.bf16 %v2886_v8, %v2882_v31 }
 0x409   :  { %10419 = vmatpush1.bf16.msra.mxu0 %v14090_v52  ;;  %10451 = vmatpush1.bf16.msra.mxu1 %v14093_v20 }
 0x40a   :  { %10421 = vmatprep.subr.bf16.mxu0 %v14098_v17  ;;  %10453 = vmatprep.subr.bf16.mxu1 %v14100_v23 }
 0x40d   :  { %10423 = vmatpush1.bf16.msra.mxu0 %v14102_v46  ;;  %10455 = vmatpush1.bf16.msra.mxu1 %v14105_v54 }
 0x40e   :  { %10425 = vmatprep.subr.bf16.mxu0 %v14110_v39  ;;  %10457 = vmatprep.subr.bf16.mxu1 %v14112_v5 }
 0x411   :  { %10427 = vmatpush1.bf16.msra.mxu0 %v14114_v50  ;;  %10459 = vmatpush1.bf16.msra.mxu1 %v14117_v6 }
 0x412   :  { %10429 = vmatprep.subr.bf16.mxu0 %v14122_v57  ;;  %10461 = vmatprep.subr.bf16.mxu1 %v14124_v9 }
 0x415   :  { %10431 = vmatpush1.bf16.msra.mxu0 %v14126_v16  ;;  %10463 = vmatpush1.bf16.msra.mxu1 %v14129_v26 }
 0x416   :  { %10433 = vmatprep.subr.bf16.mxu0 %v14134_v14  ;;  %10465 = vmatprep.subr.bf16.mxu1 %v14136_v51 }
 0x419   :  { %10435 = vmatpush1.bf16.msra.mxu0 %v14138_v35  ;;  %10467 = vmatpush1.bf16.msra.mxu1 %v14141_v40 }
 0x41a   :  { %10437 = vmatprep.subr.bf16.mxu0 %v14146_v34  ;;  %10469 = vmatprep.subr.bf16.mxu1 %v14148_v12 }
 0x41d   :  { %10439 = vmatpush1.bf16.msra.mxu0 %v14150_v44  ;;  %10471 = vmatpush1.bf16.msra.mxu1 %v14153_v55 }
 0x41e   :  { %10441 = vmatprep.subr.bf16.mxu0 %v14158_v10  ;;  %10473 = vmatprep.subr.bf16.mxu1 %v14160_v36 }
 0x421   :  { %10443 = vmatpush1.bf16.msra.mxu0 %v14162_v22  ;;  %10475 = vmatpush1.bf16.msra.mxu1 %v14165_v13 }
 0x422   :  { %10445 = vmatprep.subr.bf16.mxu0 %v14170_v4  ;;  %10477 = vmatprep.subr.bf16.mxu1 %v14172_v42 }
 0x425   :  { %10447 = vmatpush1.bf16.msra.mxu0 %v14174_v49  ;;  %10479 = vmatpush1.bf16.msra.mxu1 %v14177_v15 }
 0x426   :  { %10481 = vmatprep.subr.bf16.mxu0 %v14182_v53  ;;  %10513 = vmatprep.subr.bf16.mxu1 %v14184_v3 }
 0x4ba   :  { %v2461_v29 = vpop.f32.mrb[6].mxu0  ;;  %v2532_v47 = vpop.f32.mrb[6].mxu1 }
 0x4bb   :  { %v12246_v21 = vadd.f32 %v2461_v29, %v13682_v38  ;;  %v2463_v61 = vpop.f32.mrb[7].mxu0  ;;  %v2534_v59 = vpop.f32.mrb[7].mxu1  ;;  %v12262_v31 = vadd.f32 %v2532_v47, %v17026_v56 }
 0x4bc   :  { %v12247_v7 = vadd.f32 %v2463_v61, %v17025_v11  ;;  %v12263_v8 = vadd.f32 %v2534_v59, %v17027_v58  ;;  %v3086_v58 = vld [vmem:[#allocation13 + $0x88] sm:$0xff] }
 0x4bd   :  { %v9662_v62 = vmul.f32 -1.442695, %v12246_v21  ;;  %v9664_v28 = vmul.f32 -1.442695, %v12262_v31  ;;  %v3090_v11 = vld [vmem:[#allocation13 + $0xa8] sm:$0xff] }
 0x4be   :  { %v9663_v41 = vmul.f32 -1.442695, %v12247_v7 }
 0x4bf   :  { %12598 = vpow2.f32 %v9662_v62 }
 0x4c0   :  { %12600 = vpow2.f32 %v9663_v41 }
 0x4c1   :  { %12602 = vtanh.f32 %v12263_v8 }
 0x4c2   :  { %12604 = vpow2.f32 %v9664_v28 }
 0x4c9   :  { %v12599_v45 = vpop.eup %12598 }
 0x4ca   :  { %v2550_v43 = vadd.f32 1.0, %v12599_v45  ;;  %v12601_v30 = vpop.eup %12600 }
 0x4cb   :  { %v2551_v32 = vadd.f32 1.0, %v12601_v30  ;;  %v12603_v0 = vpop.eup %12602 }
 0x4cc   :  { %12606 = vrcp.f32 %v2550_v43  ;;  %v12605_v29 = vpop.eup %12604 }
 0x4cd   :  { %12608 = vrcp.f32 %v2551_v32  ;;  %v2552_v62 = vadd.f32 1.0, %v12605_v29  ;;  %v3071_v29 = vld [vmem:[#allocation13 + $0x10] sm:$0xff] }
 0x4cf   :  { %12610 = vrcp.f32 %v2552_v62 }
 0x4d6   :  { %v12607_v61 = vpop.eup %12606 }
 0x4d7   :  { %v2562_v21 = vmul.f32 %v12607_v61, %v12603_v0  ;;  %v12609_v7 = vpop.eup %12608  ;;  %v3073_v0 = vld [vmem:[#allocation13 + $0x20] sm:$0xff]  ;;  %v3075_v61 = vld [vmem:[#allocation13 + $0x30] sm:$0xff] }
 0x4d8   :  { %v2561_v41 = vmul.f32 %v12609_v7, %v14033_v2  ;;  %v3069_v2 = vld [vmem:[#allocation13] sm:$0xff]  ;;  %v3082_v7 = vld [vmem:[#allocation13 + $0x68] sm:$0xff] }
 0x4d9   :  { %v12611_v1 = vpop.eup %12610 }
 0x4da   :  { %v2710_v47 = vpop.f32.mrb[24].mxu0  ;;  %v2781_v33 = vpop.f32.mrb[24].mxu1  ;;  %v14193_v59 = vadd.f32 %v2562_v21, %v2561_v41  ;;  %v3078_v21 = vld [vmem:[#allocation13 + $0x48] sm:$0xff]  ;;  %v3080_v41 = vld [vmem:[#allocation13 + $0x58] sm:$0xff] }
 0x4db   :  { %v12280_v31 = vadd.f32 %v2710_v47, %v17029_v18  ;;  %v2712_v8 = vpop.f32.mrb[25].mxu0  ;;  %v2783_v45 = vpop.f32.mrb[25].mxu1  ;;  %v12296_v32 = vadd.f32 %v2781_v33, %v17031_v25  ;;  %v3084_v47 = vld [vmem:[#allocation13 + $0x78] sm:$0xff]  ;;  %v3079_v18 = vld [vmem:[#allocation13 + $0x50] sm:$0xff] }
 0x4dc   :  { %17048 = vst [vmem:[#allocation28_spill] sm:$0xff] %v14193_v59  ;;  %v12281_v28 = vadd.f32 %v2712_v8, %v17030_v60  ;;  %12612 = vtanh.f32 %v14193_v59  ;;  %v12297_v62 = vadd.f32 %v2783_v45, %v17032_v48  ;;  %v14200_v60 = vpack.c.bf16 %v3073_v0, %v3069_v2  ;;  %v3083_v59 = vld [vmem:[#allocation13 + $0x70] sm:$0xff]  ;;  %v3088_v45 = vld [vmem:[#allocation13 + $0x98] sm:$0xff] }
 0x4dd   :  { %v9665_v43 = vmul.f32 -1.442695, %v12280_v31  ;;  %v9667_v27 = vmul.f32 -1.442695, %v12296_v32  ;;  %v14202_v31 = vpack.c.bf16 %v3075_v61, %v3071_v29  ;;  %v14208_v25 = vpack.c.bf16 %v3084_v47, %v3080_v41  ;;  %v3092_v48 = vld [vmem:[#allocation13 + $0xb8] sm:$0xff]  ;;  %v3085_v29 = vld [vmem:[#allocation13 + $0x80] sm:$0xff] }
 0x4de   :  { %v9666_v30 = vmul.f32 -1.442695, %v12281_v28  ;;  %v3077_v28 = vld [vmem:[#allocation13 + $0x40] sm:$0xff]  ;;  %v14216_v0 = vpack.c.bf16 %v3083_v59, %v3079_v18  ;;  %v3091_v41 = vld [vmem:[#allocation13 + $0xb0] sm:$0xff]  ;;  %v3094_v47 = vld [vmem:[#allocation13 + $0xc8] sm:$0xff] }
 0x4df   :  { %12614 = vpow2.f32 %v9665_v43  ;;  %v3081_v43 = vld [vmem:[#allocation13 + $0x60] sm:$0xff]  ;;  %17050 = vst [vmem:[#allocation30_spill] sm:$0xff] %v14208_v25 }
 0x4e0   :  { %12616 = vpow2.f32 %v9666_v30  ;;  %v14206_v30 = vpack.c.bf16 %v3082_v7, %v3078_v21  ;;  %17052 = vst [vmem:[#allocation32_spill] sm:$0xff] %v14216_v0  ;;  %v3089_v61 = vld [vmem:[#allocation13 + $0xa0] sm:$0xff]  ;;  %v14222_v7 = vpack.c.bf16 %v3092_v48, %v3088_v45  ;;  %v3095_v45 = vld [vmem:[#allocation13 + $0xd0] sm:$0xff] }
 0x4e1   :  { %12618 = vtanh.f32 %v12297_v62  ;;  %v3098_v62 = vld [vmem:[#allocation13 + $0xe8] sm:$0xff]  ;;  %v14228_v18 = vpack.c.bf16 %v3089_v61, %v3085_v29  ;;  %v3097_v48 = vld [vmem:[#allocation13 + $0xe0] sm:$0xff] }
 0x4e2   :  { %12620 = vpow2.f32 %v9667_v27  ;;  %17054 = vst [vmem:[#allocation43_spill] sm:$0xff] %v14222_v7  ;;  %v3087_v27 = vld [vmem:[#allocation13 + $0x90] sm:$0xff]  ;;  %v14234_v59 = vpack.c.bf16 %v3098_v62, %v3094_v47 }
 0x4e3   :  { %17055 = vst [vmem:[#allocation44_spill] sm:$0xff] %v14228_v18 }
 0x4e4   :  { %17057 = vst [vmem:[#allocation46_spill] sm:$0xff] %v14234_v59 }
 0x4e6   :  { %v12613_v8 = vpop.eup %12612 }
 0x4e7   :  { %v14204_v33 = vmul.f32 %v12613_v8, %v12611_v1  ;;  %v14214_v1 = vpack.c.bf16 %v3081_v43, %v3077_v28  ;;  %v3096_v8 = vld [vmem:[#allocation13 + $0xd8] sm:$0xff] }
 0x4e8   :  { %v3100_v28 = vld [vmem:[#allocation13 + $0xf8] sm:$0xff] }
 0x4e9   :  { %17049 = vst [vmem:[#allocation29_spill] sm:$0xff] %v14204_v33  ;;  %v12615_v56 = vpop.eup %12614  ;;  %2955 = vmatmul.mubr.f32.vlgmr.msra.gmra.mrb[8].mxu0 %v14204_v33  ;;  %3026 = vmatmul.mubr.f32.vlgmr.msra.gmra.mrb[8].mxu1 %v14204_v33  ;;  %17051 = vst [vmem:[#allocation31_spill] sm:$0xff] %v14214_v1  ;;  %v14236_v43 = vpack.c.bf16 %v3100_v28, %v3096_v8  ;;  %v3104_v33 = vld [vmem:[#allocation13 + $0x118] sm:$0xff]  ;;  %v3103_v28 = vld [vmem:[#allocation13 + $0x110] sm:$0xff] }
 0x4ea   :  { %v2799_v32 = vadd.f32 1.0, %v12615_v56  ;;  %v12617_v2 = vpop.eup %12616  ;;  %10483 = vmatpush1.bf16.msra.mxu0 %v14200_v60  ;;  %10515 = vmatpush1.bf16.msra.mxu1 %v14202_v31  ;;  %v14220_v56 = vpack.c.bf16 %v3090_v11, %v3086_v58  ;;  %v14230_v11 = vpack.c.bf16 %v3091_v41, %v3087_v27  ;;  %v3093_v58 = vld [vmem:[#allocation13 + $0xc0] sm:$0xff] }
 0x4eb   :  { %v2800_v21 = vadd.f32 1.0, %v12617_v2  ;;  %10485 = vmatprep.subr.bf16.mxu0 %v14206_v30  ;;  %10517 = vmatprep.subr.bf16.mxu1 %v14208_v25  ;;  %17058 = vst [vmem:[#allocation47_spill] sm:$0xff] %v14236_v43  ;;  %v3102_v2 = vld [vmem:[#allocation13 + $0x108] sm:$0xff]  ;;  %v14240_v29 = vpack.c.bf16 %v3097_v48, %v3093_v58  ;;  %v3101_v27 = vld [vmem:[#allocation13 + $0x100] sm:$0xff]  ;;  %v12619_v47 = vpop.eup %12618  ;;  %v3112_v58 = vld [vmem:[#allocation13 + $0x158] sm:$0xff] }
 0x4ec   :  { %12622 = vrcp.f32 %v2799_v32  ;;  %17053 = vst [vmem:[#allocation33_spill] sm:$0xff] %v14220_v56  ;;  %3197 = vmatprep.mubr.f32.mxu0 %v16988_v19  ;;  %3268 = vmatprep.mubr.f32.mxu1 %v16988_v19  ;;  %17056 = vst [vmem:[#allocation45_spill] sm:$0xff] %v14230_v11  ;;  %v3099_v32 = vld [vmem:[#allocation13 + $0xf0] sm:$0xff]  ;;  %v3105_v41 = vld [vmem:[#allocation13 + $0x120] sm:$0xff] }
 0x4ed   :  { %12624 = vrcp.f32 %v2800_v21  ;;  %v3106_v21 = vld [vmem:[#allocation13 + $0x128] sm:$0xff]  ;;  %17059 = vst [vmem:[#allocation48_spill] sm:$0xff] %v14240_v29  ;;  %v14242_v61 = vpack.c.bf16 %v3099_v32, %v3095_v45  ;;  %v3116_v48 = vld [vmem:[#allocation13 + $0x178] sm:$0xff] }
 0x4ee   :  { %10487 = vmatpush1.bf16.msra.mxu0 %v14214_v1  ;;  %10519 = vmatpush1.bf16.msra.mxu1 %v14216_v0  ;;  %v3108_v0 = vld [vmem:[#allocation13 + $0x138] sm:$0xff]  ;;  %v14246_v62 = vpack.c.bf16 %v3106_v21, %v3102_v2  ;;  %v3109_v2 = vld [vmem:[#allocation13 + $0x140] sm:$0xff]  ;;  %v14260_v25 = vpack.c.bf16 %v3116_v48, %v3112_v58 }
 0x4ef   :  { %10489 = vmatprep.subr.bf16.mxu0 %v14220_v56  ;;  %10521 = vmatprep.subr.bf16.mxu1 %v14222_v7  ;;  %17060 = vst [vmem:[#allocation50_spill] sm:$0xff] %v14242_v61  ;;  %v14248_v8 = vpack.c.bf16 %v3108_v0, %v3104_v33  ;;  %v3107_v7 = vld [vmem:[#allocation13 + $0x130] sm:$0xff]  ;;  %v12621_v56 = vpop.eup %12620  ;;  %v3113_v33 = vld [vmem:[#allocation13 + $0x160] sm:$0xff] }
 0x4f0   :  { %v2801_v21 = vadd.f32 1.0, %v12621_v56  ;;  %17062 = vst [vmem:[#allocation52_spill] sm:$0xff] %v14260_v25  ;;  %v14267_v56 = vpack.c.bf16 %v3113_v33, %v3109_v2  ;;  %v3121_v58 = vld [vmem:[#allocation13 + $0x1a0] sm:$0xff]  ;;  %v3130_v2 = vld [vmem:[#allocation13 + $0x1e8] sm:$0xff]  ;;  %v3128_v33 = vld [vmem:[#allocation13 + $0x1d8] sm:$0xff] }
 0x4f2   :  { %10491 = vmatpush1.bf16.msra.mxu0 %v14228_v18  ;;  %10523 = vmatpush1.bf16.msra.mxu1 %v14230_v11  ;;  %v3110_v18 = vld [vmem:[#allocation13 + $0x148] sm:$0xff]  ;;  %12626 = vrcp.f32 %v2801_v21 }
 0x4f3   :  { %10493 = vmatprep.subr.bf16.mxu0 %v14234_v59  ;;  %10525 = vmatprep.subr.bf16.mxu1 %v14236_v43  ;;  %v3114_v11 = vld [vmem:[#allocation13 + $0x168] sm:$0xff]  ;;  %v14252_v59 = vpack.c.bf16 %v3105_v41, %v3101_v27  ;;  %v14254_v43 = vpack.c.bf16 %v3107_v7, %v3103_v28  ;;  %v3120_v7 = vld [vmem:[#allocation13 + $0x198] sm:$0xff] }
 0x4f4   :  { %v14258_v1 = vpack.c.bf16 %v3114_v11, %v3110_v18  ;;  %v3122_v41 = vld [vmem:[#allocation13 + $0x1a8] sm:$0xff]  ;;  %v3124_v28 = vld [vmem:[#allocation13 + $0x1b8] sm:$0xff]  ;;  %v3117_v11 = vld [vmem:[#allocation13 + $0x180] sm:$0xff] }
 0x4f5   :  { %v14275_v48 = vpack.c.bf16 %v3124_v28, %v3120_v7  ;;  %v14280_v21 = vpack.c.bf16 %v3121_v58, %v3117_v11  ;;  %v3129_v28 = vld [vmem:[#allocation13 + $0x1e0] sm:$0xff] }
 0x4f6   :  { %v12623_v45 = vpop.eup %12622  ;;  %10495 = vmatpush1.bf16.msra.mxu0 %v14240_v29  ;;  %10527 = vmatpush1.bf16.msra.mxu1 %v14242_v61  ;;  %17061 = vst [vmem:[#allocation51_spill] sm:$0xff] %v14258_v1  ;;  %v3118_v29 = vld [vmem:[#allocation13 + $0x188] sm:$0xff] }
 0x4f7   :  { %v2811_v32 = vmul.f32 %v12623_v45, %v12619_v47  ;;  %v12625_v0 = vpop.eup %12624  ;;  %10497 = vmatprep.subr.bf16.mxu0 %v14246_v62  ;;  %10529 = vmatprep.subr.bf16.mxu1 %v14248_v8  ;;  %v3111_v47 = vld [vmem:[#allocation13 + $0x150] sm:$0xff] }
 0x4f8   :  { %v3115_v45 = vld [vmem:[#allocation13 + $0x170] sm:$0xff]  ;;  %v2810_v27 = vmul.f32 %v12625_v0, %v14063_v37  ;;  %v14273_v37 = vpack.c.bf16 %v3122_v41, %v3118_v29  ;;  %v3125_v29 = vld [vmem:[#allocation13 + $0x1c0] sm:$0xff] }
 0x4f9   :  { %v14269_v18 = vpack.c.bf16 %v3115_v45, %v3111_v47  ;;  %v3123_v0 = vld [vmem:[#allocation13 + $0x1b0] sm:$0xff]  ;;  %v3132_v47 = vld [vmem:[#allocation13 + $0x1f8] sm:$0xff]  ;;  %v14292_v11 = vpack.c.bf16 %v3129_v28, %v3125_v29 }
 0x4fa   :  { %v14263_v61 = vadd.f32 %v2811_v32, %v2810_v27  ;;  %10499 = vmatpush1.bf16.msra.mxu0 %v14252_v59  ;;  %10531 = vmatpush1.bf16.msra.mxu1 %v14254_v43  ;;  %v3119_v32 = vld [vmem:[#allocation13 + $0x190] sm:$0xff]  ;;  %v3126_v27 = vld [vmem:[#allocation13 + $0x1c8] sm:$0xff]  ;;  %v14288_v7 = vpack.c.bf16 %v3132_v47, %v3128_v33 }
 0x4fb   :  { %10501 = vmatprep.subr.bf16.mxu0 %v14258_v1  ;;  %10533 = vmatprep.subr.bf16.mxu1 %v14260_v25  ;;  %v14282_v45 = vpack.c.bf16 %v3123_v0, %v3119_v32  ;;  %v14286_v41 = vpack.c.bf16 %v3130_v2, %v3126_v27  ;;  %v3127_v25 = vld [vmem:[#allocation13 + $0x1d0] sm:$0xff]  ;;  %v17070_v33 = vld [vmem:[#allocation40_spill] sm:$0xff] }
 0x4fc   :  { %12628 = vtanh.f32 %v14263_v61  ;;  %v3131_v1 = vld [vmem:[#allocation13 + $0x1f0] sm:$0xff]  ;;  %v12627_v32 = vpop.eup %12626 }
 0x4fd   :  { %v14294_v58 = vpack.c.bf16 %v3131_v1, %v3127_v25  ;;  %v17071_v28 = vld [vmem:[#allocation41_spill] sm:$0xff] }
 0x4fe   :  { %10503 = vmatpush1.bf16.msra.mxu0 %v14267_v56  ;;  %10535 = vmatpush1.bf16.msra.mxu1 %v14269_v18 }
 0x4ff   :  { %10505 = vmatprep.subr.bf16.mxu0 %v14273_v37  ;;  %10537 = vmatprep.subr.bf16.mxu1 %v14275_v48 }
 0x502   :  { %10507 = vmatpush1.bf16.msra.mxu0 %v14280_v21  ;;  %10539 = vmatpush1.bf16.msra.mxu1 %v14282_v45 }
 0x503   :  { %10509 = vmatprep.subr.bf16.mxu0 %v14286_v41  ;;  %10541 = vmatprep.subr.bf16.mxu1 %v14288_v7 }
 0x506   :  { %v12629_v0 = vpop.eup %12628  ;;  %10511 = vmatpush1.bf16.msra.mxu0 %v14292_v11  ;;  %10543 = vmatpush1.bf16.msra.mxu1 %v14294_v58 }
 0x507   :  { %v14300_v27 = vmul.f32 %v12629_v0, %v12627_v32  ;;  %10545 = vmatprep.subr.bf16.mxu0 %v14086_v63  ;;  %10577 = vmatprep.subr.bf16.mxu1 %v14088_v24 }
 0x509   :  { %17063 = vst [vmem:[#allocation53_spill] sm:$0xff] %v14300_v27  ;;  %3198 = vmatmul.mubr.f32.vlgmr.msra.gmra.mrb[22].mxu0 %v14300_v27  ;;  %3269 = vmatmul.mubr.f32.vlgmr.msra.gmra.mrb[22].mxu1 %v14300_v27 }
 0x50a   :  { %10547 = vmatpush1.bf16.msra.mxu0 %v14090_v52  ;;  %10579 = vmatpush1.bf16.msra.mxu1 %v14093_v20 }
 0x50b   :  { %10549 = vmatprep.subr.bf16.mxu0 %v14098_v17  ;;  %10581 = vmatprep.subr.bf16.mxu1 %v14100_v23  ;;  %v17064_v17 = vld [vmem:[#allocation35_spill] sm:$0xff] }
 0x50c   :  { %3440 = vmatprep.mubr.f32.mxu0 %v16988_v19  ;;  %3511 = vmatprep.mubr.f32.mxu1 %v16988_v19 }
 0x50e   :  { %10551 = vmatpush1.bf16.msra.mxu0 %v14102_v46  ;;  %10583 = vmatpush1.bf16.msra.mxu1 %v14105_v54 }
 0x50f   :  { %10553 = vmatprep.subr.bf16.mxu0 %v14110_v39  ;;  %10585 = vmatprep.subr.bf16.mxu1 %v14112_v5  ;;  %v17065_v39 = vld [vmem:[#allocation36_spill] sm:$0xff] }
 0x512   :  { %10555 = vmatpush1.bf16.msra.mxu0 %v14114_v50  ;;  %10587 = vmatpush1.bf16.msra.mxu1 %v14117_v6  ;;  %v17066_v50 = vld [vmem:[#allocation37_spill] sm:$0xff] }
 0x513   :  { %10557 = vmatprep.subr.bf16.mxu0 %v14122_v57  ;;  %10589 = vmatprep.subr.bf16.mxu1 %v14124_v9 }
 0x516   :  { %10559 = vmatpush1.bf16.msra.mxu0 %v14126_v16  ;;  %10591 = vmatpush1.bf16.msra.mxu1 %v14129_v26 }
 0x517   :  { %10561 = vmatprep.subr.bf16.mxu0 %v14134_v14  ;;  %10593 = vmatprep.subr.bf16.mxu1 %v14136_v51 }
 0x51a   :  { %10563 = vmatpush1.bf16.msra.mxu0 %v14138_v35  ;;  %10595 = vmatpush1.bf16.msra.mxu1 %v14141_v40 }
 0x51b   :  { %10565 = vmatprep.subr.bf16.mxu0 %v14146_v34  ;;  %10597 = vmatprep.subr.bf16.mxu1 %v14148_v12 }
 0x51e   :  { %10567 = vmatpush1.bf16.msra.mxu0 %v14150_v44  ;;  %10599 = vmatpush1.bf16.msra.mxu1 %v14153_v55  ;;  %v17067_v55 = vld [vmem:[#allocation28_spill] sm:$0xff] }
 0x51f   :  { %10569 = vmatprep.subr.bf16.mxu0 %v14158_v10  ;;  %10601 = vmatprep.subr.bf16.mxu1 %v14160_v36 }
 0x522   :  { %10571 = vmatpush1.bf16.msra.mxu0 %v14162_v22  ;;  %10603 = vmatpush1.bf16.msra.mxu1 %v14165_v13 }
 0x523   :  { %10573 = vmatprep.subr.bf16.mxu0 %v14170_v4  ;;  %10605 = vmatprep.subr.bf16.mxu1 %v14172_v42  ;;  %v17068_v4 = vld [vmem:[#allocation38_spill] sm:$0xff] }
 0x526   :  { %10575 = vmatpush1.bf16.msra.mxu0 %v14174_v49  ;;  %10607 = vmatpush1.bf16.msra.mxu1 %v14177_v15 }
 0x527   :  { %10609 = vmatprep.subr.bf16.mxu0 %v14182_v53  ;;  %10641 = vmatprep.subr.bf16.mxu1 %v14184_v3  ;;  %v17069_v53 = vld [vmem:[#allocation39_spill] sm:$0xff] }
 0x5bc   :  { %v2956_v25 = vpop.f32.mrb[8].mxu0  ;;  %v3027_v63 = vpop.f32.mrb[8].mxu1 }
 0x5bd   :  { %v12248_v24 = vadd.f32 %v2956_v25, %v13682_v38  ;;  %v2958_v52 = vpop.f32.mrb[9].mxu0  ;;  %v3029_v20 = vpop.f32.mrb[9].mxu1  ;;  %v12264_v5 = vadd.f32 %v3027_v63, %v17065_v39 }
 0x5be   :  { %v12249_v23 = vadd.f32 %v2958_v52, %v17064_v17  ;;  %v12265_v6 = vadd.f32 %v3029_v20, %v17066_v50 }
 0x5bf   :  { %v9668_v46 = vmul.f32 -1.442695, %v12248_v24  ;;  %v9670_v57 = vmul.f32 -1.442695, %v12264_v5  ;;  %v17075_v5 = vld [vmem:[#allocation32_spill] sm:$0xff] }
 0x5c0   :  { %v9669_v54 = vmul.f32 -1.442695, %v12249_v23 }
 0x5c1   :  { %12630 = vpow2.f32 %v9668_v46  ;;  %v17073_v46 = vld [vmem:[#allocation30_spill] sm:$0xff] }
 0x5c2   :  { %12632 = vpow2.f32 %v9669_v54  ;;  %v17074_v54 = vld [vmem:[#allocation31_spill] sm:$0xff] }
 0x5c3   :  { %12634 = vtanh.f32 %v12265_v6  ;;  %v17076_v6 = vld [vmem:[#allocation33_spill] sm:$0xff] }
 0x5c4   :  { %12636 = vpow2.f32 %v9670_v57  ;;  %v17079_v57 = vld [vmem:[#allocation45_spill] sm:$0xff] }
 0x5cb   :  { %v12631_v9 = vpop.eup %12630 }
 0x5cc   :  { %v3045_v16 = vadd.f32 1.0, %v12631_v9  ;;  %v12633_v26 = vpop.eup %12632  ;;  %v17080_v9 = vld [vmem:[#allocation46_spill] sm:$0xff] }
 0x5cd   :  { %v3046_v14 = vadd.f32 1.0, %v12633_v26  ;;  %v12635_v51 = vpop.eup %12634 }
 0x5ce   :  { %12638 = vrcp.f32 %v3045_v16  ;;  %v12637_v35 = vpop.eup %12636  ;;  %v17081_v16 = vld [vmem:[#allocation47_spill] sm:$0xff] }
 0x5cf   :  { %12640 = vrcp.f32 %v3046_v14  ;;  %v3047_v44 = vadd.f32 1.0, %v12637_v35  ;;  %v17082_v35 = vld [vmem:[#allocation48_spill] sm:$0xff] }
 0x5d1   :  { %12642 = vrcp.f32 %v3047_v44 }
 0x5d8   :  { %v12639_v40 = vpop.eup %12638 }
 0x5d9   :  { %v3057_v34 = vmul.f32 %v12639_v40, %v12635_v51  ;;  %v12641_v12 = vpop.eup %12640  ;;  %v17083_v40 = vld [vmem:[#allocation50_spill] sm:$0xff] }
 0x5da   :  { %v3056_v10 = vmul.f32 %v12641_v12, %v17067_v55 }
 0x5db   :  { %v12643_v29 = vpop.eup %12642 }
 0x5dc   :  { %v3199_v36 = vpop.f32.mrb[22].mxu0  ;;  %v3270_v22 = vpop.f32.mrb[22].mxu1  ;;  %v14345_v13 = vadd.f32 %v3057_v34, %v3056_v10  ;;  %v17084_v10 = vld [vmem:[#allocation51_spill] sm:$0xff] }
 0x5dd   :  { %v12278_v42 = vadd.f32 %v3199_v36, %v17068_v4  ;;  %v3201_v49 = vpop.f32.mrb[23].mxu0  ;;  %v3272_v15 = vpop.f32.mrb[23].mxu1  ;;  %v12294_v47 = vadd.f32 %v3270_v22, %v17070_v33  ;;  %v17085_v36 = vld [vmem:[#allocation52_spill] sm:$0xff] }
 0x5de   :  { %v12279_v3 = vadd.f32 %v3201_v49, %v17069_v53  ;;  %12644 = vtanh.f32 %v14345_v13  ;;  %v12295_v32 = vadd.f32 %v3272_v15, %v17071_v28  ;;  %v3807_v22 = vld [vmem:[#allocation11 + $0x48] sm:$0xff]  ;;  %v3809_v49 = vld [vmem:[#allocation11 + $0x58] sm:$0xff] }
 0x5df   :  { %v9671_v1 = vmul.f32 -1.442695, %v12278_v42  ;;  %v9673_v25 = vmul.f32 -1.442695, %v12294_v47  ;;  %v3811_v42 = vld [vmem:[#allocation11 + $0x68] sm:$0xff] }
 0x5e0   :  { %v9672_v2 = vmul.f32 -1.442695, %v12279_v3  ;;  %v14410_v15 = vpack.c.bf16 %v3811_v42, %v3807_v22  ;;  %v3813_v3 = vld [vmem:[#allocation11 + $0x78] sm:$0xff]  ;;  %v3836_v22 = vld [vmem:[#allocation11 + $0x130] sm:$0xff] }
 0x5e1   :  { %12646 = vpow2.f32 %v9671_v1  ;;  %v3806_v1 = vld [vmem:[#allocation11 + $0x40] sm:$0xff]  ;;  %v14412_v47 = vpack.c.bf16 %v3813_v3, %v3809_v49  ;;  %v3839_v49 = vld [vmem:[#allocation11 + $0x148] sm:$0xff] }
 0x5e2   :  { %12648 = vpow2.f32 %v9672_v2  ;;  %v3810_v2 = vld [vmem:[#allocation11 + $0x60] sm:$0xff]  ;;  %v3843_v3 = vld [vmem:[#allocation11 + $0x168] sm:$0xff] }
 0x5e3   :  { %12650 = vtanh.f32 %v12295_v32  ;;  %v3808_v32 = vld [vmem:[#allocation11 + $0x50] sm:$0xff] }
 0x5e4   :  { %12652 = vpow2.f32 %v9673_v25 }
 0x5e8   :  { %v12645_v0 = vpop.eup %12644 }
 0x5e9   :  { %v14352_v63 = vmul.f32 %v12645_v0, %v12643_v29  ;;  %v14414_v29 = vpack.c.bf16 %v3810_v2, %v3806_v1  ;;  %v3812_v0 = vld [vmem:[#allocation11 + $0x70] sm:$0xff]  ;;  %v3841_v1 = vld [vmem:[#allocation11 + $0x158] sm:$0xff]  ;;  %v14458_v2 = vpack.c.bf16 %v3843_v3, %v3839_v49  ;;  %v3858_v49 = vld [vmem:[#allocation11 + $0x1e0] sm:$0xff] }
 0x5ea   :  { %v14417_v25 = vpack.c.bf16 %v3812_v0, %v3808_v32  ;;  %v3845_v32 = vld [vmem:[#allocation11 + $0x178] sm:$0xff]  ;;  %v3838_v0 = vld [vmem:[#allocation11 + $0x140] sm:$0xff] }
 0x5eb   :  { %17072 = vst [vmem:[#allocation28_spill] sm:$0xff] %v14352_v63  ;;  %v12647_v24 = vpop.eup %12646  ;;  %3441 = vmatmul.mubr.f32.vlgmr.msra.gmra.mrb[10].mxu0 %v14352_v63  ;;  %3512 = vmatmul.mubr.f32.vlgmr.msra.gmra.mrb[10].mxu1 %v14352_v63 }
 0x5ec   :  { %v3288_v52 = vadd.f32 1.0, %v12647_v24  ;;  %v12649_v20 = vpop.eup %12648  ;;  %10611 = vmatpush1.bf16.msra.mxu0 %v14200_v60  ;;  %10643 = vmatpush1.bf16.msra.mxu1 %v14202_v31  ;;  %v17077_v60 = vld [vmem:[#allocation43_spill] sm:$0xff]  ;;  %v17078_v31 = vld [vmem:[#allocation44_spill] sm:$0xff] }
 0x5ed   :  { %v3289_v23 = vadd.f32 1.0, %v12649_v20  ;;  %10613 = vmatprep.subr.bf16.mxu0 %v14206_v30  ;;  %10645 = vmatprep.subr.bf16.mxu1 %v17073_v46  ;;  %v12651_v30 = vpop.eup %12650  ;;  %v3815_v24 = vld [vmem:[#allocation11 + $0x88] sm:$0xff]  ;;  %v3817_v20 = vld [vmem:[#allocation11 + $0x98] sm:$0xff] }
 0x5ee   :  { %12654 = vrcp.f32 %v3288_v52  ;;  %3683 = vmatprep.mubr.f32.mxu0 %v16988_v19  ;;  %3754 = vmatprep.mubr.f32.mxu1 %v16988_v19  ;;  %v12653_v26 = vpop.eup %12652  ;;  %v3819_v52 = vld [vmem:[#allocation11 + $0xa8] sm:$0xff]  ;;  %v3821_v46 = vld [vmem:[#allocation11 + $0xb8] sm:$0xff] }
 0x5ef   :  { %12656 = vrcp.f32 %v3289_v23  ;;  %v3290_v12 = vadd.f32 1.0, %v12653_v26  ;;  %v14422_v23 = vpack.c.bf16 %v3819_v52, %v3815_v24  ;;  %v3825_v26 = vld [vmem:[#allocation11 + $0xd8] sm:$0xff]  ;;  %v3842_v24 = vld [vmem:[#allocation11 + $0x160] sm:$0xff]  ;;  %v14460_v52 = vpack.c.bf16 %v3845_v32, %v3841_v1  ;;  %v3856_v32 = vld [vmem:[#allocation11 + $0x1d0] sm:$0xff] }
 0x5f0   :  { %10615 = vmatpush1.bf16.msra.mxu0 %v17074_v54  ;;  %10647 = vmatpush1.bf16.msra.mxu1 %v17075_v5  ;;  %v3814_v54 = vld [vmem:[#allocation11 + $0x80] sm:$0xff] }
 0x5f1   :  { %10617 = vmatprep.subr.bf16.mxu0 %v17076_v6  ;;  %10649 = vmatprep.subr.bf16.mxu1 %v17077_v60  ;;  %12658 = vrcp.f32 %v3290_v12  ;;  %v3818_v5 = vld [vmem:[#allocation11 + $0xa0] sm:$0xff]  ;;  %v14424_v6 = vpack.c.bf16 %v3821_v46, %v3817_v20  ;;  %v14462_v20 = vpack.c.bf16 %v3842_v24, %v3838_v0  ;;  %v3840_v46 = vld [vmem:[#allocation11 + $0x150] sm:$0xff] }
 0x5f2   :  { %v14426_v60 = vpack.c.bf16 %v3818_v5, %v3814_v54  ;;  %v3844_v54 = vld [vmem:[#allocation11 + $0x170] sm:$0xff] }
 0x5f3   :  { %v14465_v5 = vpack.c.bf16 %v3844_v54, %v3840_v46  ;;  %v3860_v0 = vld [vmem:[#allocation11 + $0x1f0] sm:$0xff]  ;;  %v4042_v46 = vld [vmem:[#allocation13 + $0x8] sm:$0xff] }
 0x5f4   :  { %10619 = vmatpush1.bf16.msra.mxu0 %v17078_v31  ;;  %10651 = vmatpush1.bf16.msra.mxu1 %v17079_v57  ;;  %v3816_v31 = vld [vmem:[#allocation11 + $0x90] sm:$0xff]  ;;  %v14489_v24 = vpack.c.bf16 %v3860_v0, %v3856_v32  ;;  %v4046_v54 = vld [vmem:[#allocation13 + $0x28] sm:$0xff] }
 0x5f5   :  { %10621 = vmatprep.subr.bf16.mxu0 %v17080_v9  ;;  %10653 = vmatprep.subr.bf16.mxu1 %v17081_v16  ;;  %v3820_v57 = vld [vmem:[#allocation11 + $0xb0] sm:$0xff]  ;;  %v3823_v9 = vld [vmem:[#allocation11 + $0xc8] sm:$0xff] }
 0x5f6   :  { %v3827_v16 = vld [vmem:[#allocation11 + $0xe8] sm:$0xff] }
 0x5f8   :  { %v12655_v14 = vpop.eup %12654  ;;  %10623 = vmatpush1.bf16.msra.mxu0 %v17082_v35  ;;  %10655 = vmatpush1.bf16.msra.mxu1 %v17083_v40  ;;  %v3822_v35 = vld [vmem:[#allocation11 + $0xc0] sm:$0xff] }
 0x5f9   :  { %v3300_v51 = vmul.f32 %v12655_v14, %v12651_v30  ;;  %v12657_v34 = vpop.eup %12656  ;;  %10625 = vmatprep.subr.bf16.mxu0 %v14246_v62  ;;  %10657 = vmatprep.subr.bf16.mxu1 %v14248_v8  ;;  %v3799_v62 = vld [vmem:[#allocation11 + $0x8] sm:$0xff]  ;;  %v14429_v30 = vpack.c.bf16 %v3820_v57, %v3816_v31  ;;  %v14434_v14 = vpack.c.bf16 %v3827_v16, %v3823_v9  ;;  %v3826_v40 = vld [vmem:[#allocation11 + $0xe0] sm:$0xff]  ;;  %v3849_v9 = vld [vmem:[#allocation11 + $0x198] sm:$0xff] }
 0x5fa   :  { %v3299_v44 = vmul.f32 %v12657_v34, %v14263_v61  ;;  %v3803_v8 = vld [vmem:[#allocation11 + $0x28] sm:$0xff]  ;;  %v14438_v12 = vpack.c.bf16 %v3826_v40, %v3822_v35  ;;  %v3850_v35 = vld [vmem:[#allocation11 + $0x1a0] sm:$0xff] }
 0x5fb   :  { %v3847_v31 = vld [vmem:[#allocation11 + $0x188] sm:$0xff] }
 0x5fc   :  { %v14375_v55 = vadd.f32 %v3300_v51, %v3299_v44  ;;  %10627 = vmatpush1.bf16.msra.mxu0 %v14252_v59  ;;  %10659 = vmatpush1.bf16.msra.mxu1 %v14254_v43  ;;  %v12659_v59 = vpop.eup %12658  ;;  %v3829_v51 = vld [vmem:[#allocation11 + $0xf8] sm:$0xff]  ;;  %v3824_v44 = vld [vmem:[#allocation11 + $0xd0] sm:$0xff]  ;;  %v3851_v57 = vld [vmem:[#allocation11 + $0x1a8] sm:$0xff] }
 0x5fd   :  { %10629 = vmatprep.subr.bf16.mxu0 %v17084_v10  ;;  %10661 = vmatprep.subr.bf16.mxu1 %v17085_v36  ;;  %v14436_v34 = vpack.c.bf16 %v3829_v51, %v3825_v26  ;;  %v3828_v10 = vld [vmem:[#allocation11 + $0xf0] sm:$0xff]  ;;  %v14470_v16 = vpack.c.bf16 %v3851_v57, %v3847_v31  ;;  %v3853_v26 = vld [vmem:[#allocation11 + $0x1b8] sm:$0xff]  ;;  %v3846_v51 = vld [vmem:[#allocation11 + $0x180] sm:$0xff]  ;;  %v14494_v57 = vpack.c.bf16 %v4046_v54, %v4042_v46 }
 0x5fe   :  { %12660 = vtanh.f32 %v14375_v55  ;;  %v14441_v36 = vpack.c.bf16 %v3828_v10, %v3824_v44  ;;  %v14472_v40 = vpack.c.bf16 %v3853_v26, %v3849_v9  ;;  %v14474_v44 = vpack.c.bf16 %v3850_v35, %v3846_v51  ;;  %v3848_v10 = vld [vmem:[#allocation11 + $0x190] sm:$0xff]  ;;  %v4044_v31 = vld [vmem:[#allocation13 + $0x18] sm:$0xff] }
 0x5ff   :  { %v4048_v9 = vld [vmem:[#allocation13 + $0x38] sm:$0xff] }
 0x600   :  { %10631 = vmatpush1.bf16.msra.mxu0 %v14267_v56  ;;  %10663 = vmatpush1.bf16.msra.mxu1 %v14269_v18  ;;  %v3801_v56 = vld [vmem:[#allocation11 + $0x18] sm:$0xff]  ;;  %v14398_v18 = vpack.c.bf16 %v3803_v8, %v3799_v62  ;;  %v14496_v26 = vpack.c.bf16 %v4048_v9, %v4044_v31 }
 0x601   :  { %10633 = vmatprep.subr.bf16.mxu0 %v14273_v37  ;;  %10665 = vmatprep.subr.bf16.mxu1 %v14275_v48  ;;  %v3805_v37 = vld [vmem:[#allocation11 + $0x38] sm:$0xff]  ;;  %v3798_v48 = vld [vmem:[#allocation11] sm:$0xff] }
 0x602   :  { %v3833_v62 = vld [vmem:[#allocation11 + $0x118] sm:$0xff] }
 0x604   :  { %10635 = vmatpush1.bf16.msra.mxu0 %v14280_v21  ;;  %10667 = vmatpush1.bf16.msra.mxu1 %v14282_v45  ;;  %v3802_v21 = vld [vmem:[#allocation11 + $0x20] sm:$0xff]  ;;  %v14400_v45 = vpack.c.bf16 %v3805_v37, %v3801_v56  ;;  %v3837_v56 = vld [vmem:[#allocation11 + $0x138] sm:$0xff] }
 0x605   :  { %10637 = vmatprep.subr.bf16.mxu0 %v14286_v41  ;;  %10669 = vmatprep.subr.bf16.mxu1 %v14288_v7  ;;  %v14402_v41 = vpack.c.bf16 %v3802_v21, %v3798_v48  ;;  %v3800_v7 = vld [vmem:[#allocation11 + $0x10] sm:$0xff]  ;;  %v3830_v37 = vld [vmem:[#allocation11 + $0x100] sm:$0xff]  ;;  %v14448_v21 = vpack.c.bf16 %v3837_v56, %v3833_v62  ;;  %v3855_v62 = vld [vmem:[#allocation11 + $0x1c8] sm:$0xff] }
 0x606   :  { %v3834_v48 = vld [vmem:[#allocation11 + $0x120] sm:$0xff]  ;;  %v3859_v56 = vld [vmem:[#allocation11 + $0x1e8] sm:$0xff] }
 0x608   :  { %v12661_v43 = vpop.eup %12660  ;;  %10639 = vmatpush1.bf16.msra.mxu0 %v14292_v11  ;;  %10671 = vmatpush1.bf16.msra.mxu1 %v14294_v58  ;;  %v3804_v11 = vld [vmem:[#allocation11 + $0x30] sm:$0xff] }
 0x609   :  { %v14392_v61 = vmul.f32 %v12661_v43, %v12659_v59  ;;  %10673 = vmatprep.subr.bf16.mxu0 %v14398_v18  ;;  %v14405_v58 = vpack.c.bf16 %v3804_v11, %v3800_v7  ;;  %10705 = vmatprep.subr.bf16.mxu1 %v14400_v45  ;;  %v3831_v59 = vld [vmem:[#allocation11 + $0x108] sm:$0xff]  ;;  %v14450_v7 = vpack.c.bf16 %v3834_v48, %v3830_v37  ;;  %v3832_v11 = vld [vmem:[#allocation11 + $0x110] sm:$0xff]  ;;  %v3857_v37 = vld [vmem:[#allocation11 + $0x1d8] sm:$0xff] }
 0x60a   :  { %v3835_v43 = vld [vmem:[#allocation11 + $0x128] sm:$0xff]  ;;  %v14453_v42 = vpack.c.bf16 %v3836_v22, %v3832_v11  ;;  %v14482_v48 = vpack.c.bf16 %v3859_v56, %v3855_v62  ;;  %v3861_v11 = vld [vmem:[#allocation11 + $0x1f8] sm:$0xff]  ;;  %v3854_v22 = vld [vmem:[#allocation11 + $0x1c0] sm:$0xff] }
 0x60b   :  { %17086 = vst [vmem:[#allocation30_spill] sm:$0xff] %v14392_v61  ;;  %3684 = vmatmul.mubr.f32.vlgmr.msra.gmra.mrb[20].mxu0 %v14392_v61  ;;  %3755 = vmatmul.mubr.f32.vlgmr.msra.gmra.mrb[20].mxu1 %v14392_v61  ;;  %v14446_v8 = vpack.c.bf16 %v3835_v43, %v3831_v59  ;;  %v3852_v59 = vld [vmem:[#allocation11 + $0x1b0] sm:$0xff]  ;;  %v14484_v3 = vpack.c.bf16 %v3861_v11, %v3857_v37 }
 0x60c   :  { %3926 = vmatprep.mubr.f32.mxu0 %v16988_v19  ;;  %3997 = vmatprep.mubr.f32.mxu1 %v16988_v19  ;;  %v14477_v43 = vpack.c.bf16 %v3852_v59, %v3848_v10  ;;  %v14486_v1 = vpack.c.bf16 %v3858_v49, %v3854_v22 }
 0x60d   :  { %10675 = vmatpush1.bf16.msra.mxu0 %v14402_v41  ;;  %10707 = vmatpush1.bf16.msra.mxu1 %v14405_v58 }
 0x60e   :  { %10677 = vmatprep.subr.bf16.mxu0 %v14410_v15  ;;  %10709 = vmatprep.subr.bf16.mxu1 %v14412_v47 }
 0x611   :  { %10679 = vmatpush1.bf16.msra.mxu0 %v14414_v29  ;;  %10711 = vmatpush1.bf16.msra.mxu1 %v14417_v25 }
 0x612   :  { %10681 = vmatprep.subr.bf16.mxu0 %v14422_v23  ;;  %10713 = vmatprep.subr.bf16.mxu1 %v14424_v6 }
 0x615   :  { %10683 = vmatpush1.bf16.msra.mxu0 %v14426_v60  ;;  %10715 = vmatpush1.bf16.msra.mxu1 %v14429_v30 }
 0x616   :  { %10685 = vmatprep.subr.bf16.mxu0 %v14434_v14  ;;  %10717 = vmatprep.subr.bf16.mxu1 %v14436_v34 }
 0x619   :  { %10687 = vmatpush1.bf16.msra.mxu0 %v14438_v12  ;;  %10719 = vmatpush1.bf16.msra.mxu1 %v14441_v36 }
 0x61a   :  { %10689 = vmatprep.subr.bf16.mxu0 %v14446_v8  ;;  %10721 = vmatprep.subr.bf16.mxu1 %v14448_v21 }
 0x61d   :  { %10691 = vmatpush1.bf16.msra.mxu0 %v14450_v7  ;;  %10723 = vmatpush1.bf16.msra.mxu1 %v14453_v42 }
 0x61e   :  { %10693 = vmatprep.subr.bf16.mxu0 %v14458_v2  ;;  %10725 = vmatprep.subr.bf16.mxu1 %v14460_v52 }
 0x621   :  { %10695 = vmatpush1.bf16.msra.mxu0 %v14462_v20  ;;  %10727 = vmatpush1.bf16.msra.mxu1 %v14465_v5 }
 0x622   :  { %10697 = vmatprep.subr.bf16.mxu0 %v14470_v16  ;;  %10729 = vmatprep.subr.bf16.mxu1 %v14472_v40 }
 0x625   :  { %10699 = vmatpush1.bf16.msra.mxu0 %v14474_v44  ;;  %10731 = vmatpush1.bf16.msra.mxu1 %v14477_v43 }
 0x626   :  { %10701 = vmatprep.subr.bf16.mxu0 %v14482_v48  ;;  %10733 = vmatprep.subr.bf16.mxu1 %v14484_v3 }
 0x629   :  { %10703 = vmatpush1.bf16.msra.mxu0 %v14486_v1  ;;  %10735 = vmatpush1.bf16.msra.mxu1 %v14489_v24 }
 0x62a   :  { %10737 = vmatprep.subr.bf16.mxu0 %v14494_v57  ;;  %10769 = vmatprep.subr.bf16.mxu1 %v14496_v26 }
 0x6be   :  { %v3442_v51 = vpop.f32.mrb[10].mxu0  ;;  %v3513_v35 = vpop.f32.mrb[10].mxu1 }
 0x6bf   :  { %v12250_v10 = vadd.f32 %v3442_v51, %v13682_v38  ;;  %v3444_v59 = vpop.f32.mrb[11].mxu0  ;;  %v3515_v62 = vpop.f32.mrb[11].mxu1  ;;  %v12266_v22 = vadd.f32 %v3513_v35, %v17065_v39 }
 0x6c0   :  { %v12251_v56 = vadd.f32 %v3444_v59, %v17064_v17  ;;  %v12267_v49 = vadd.f32 %v3515_v62, %v17066_v50  ;;  %v4058_v50 = vld [vmem:[#allocation13 + $0x88] sm:$0xff] }
 0x6c1   :  { %v9674_v37 = vmul.f32 -1.442695, %v12250_v10  ;;  %v9676_v32 = vmul.f32 -1.442695, %v12266_v22  ;;  %v4062_v17 = vld [vmem:[#allocation13 + $0xa8] sm:$0xff] }
 0x6c2   :  { %v9675_v11 = vmul.f32 -1.442695, %v12251_v56 }
 0x6c3   :  { %12662 = vpow2.f32 %v9674_v37 }
 0x6c4   :  { %12664 = vpow2.f32 %v9675_v11 }
 0x6c5   :  { %12666 = vtanh.f32 %v12267_v49 }
 0x6c6   :  { %12668 = vpow2.f32 %v9676_v32 }
 0x6cd   :  { %v12663_v0 = vpop.eup %12662 }
 0x6ce   :  { %v3531_v46 = vadd.f32 1.0, %v12663_v0  ;;  %v12665_v54 = vpop.eup %12664 }
 0x6cf   :  { %v3532_v31 = vadd.f32 1.0, %v12665_v54  ;;  %v12667_v9 = vpop.eup %12666 }
 0x6d0   :  { %12670 = vrcp.f32 %v3531_v46  ;;  %v12669_v51 = vpop.eup %12668 }
 0x6d1   :  { %12672 = vrcp.f32 %v3532_v31  ;;  %v3533_v37 = vadd.f32 1.0, %v12669_v51  ;;  %v4043_v51 = vld [vmem:[#allocation13 + $0x10] sm:$0xff] }
 0x6d3   :  { %12674 = vrcp.f32 %v3533_v37 }
 0x6da   :  { %v12671_v59 = vpop.eup %12670 }
 0x6db   :  { %v3543_v10 = vmul.f32 %v12671_v59, %v12667_v9  ;;  %v12673_v56 = vpop.eup %12672  ;;  %v4045_v9 = vld [vmem:[#allocation13 + $0x20] sm:$0xff]  ;;  %v4047_v59 = vld [vmem:[#allocation13 + $0x30] sm:$0xff] }
 0x6dc   :  { %v3542_v11 = vmul.f32 %v12673_v56, %v14345_v13  ;;  %v4041_v13 = vld [vmem:[#allocation13] sm:$0xff]  ;;  %v4054_v56 = vld [vmem:[#allocation13 + $0x68] sm:$0xff] }
 0x6dd   :  { %v12675_v27 = vpop.eup %12674 }
 0x6de   :  { %v3685_v35 = vpop.f32.mrb[20].mxu0  ;;  %v3756_v63 = vpop.f32.mrb[20].mxu1  ;;  %v14505_v62 = vadd.f32 %v3543_v10, %v3542_v11  ;;  %v4050_v10 = vld [vmem:[#allocation13 + $0x48] sm:$0xff]  ;;  %v4052_v11 = vld [vmem:[#allocation13 + $0x58] sm:$0xff] }
 0x6df   :  { %v12276_v22 = vadd.f32 %v3685_v35, %v17068_v4  ;;  %v3687_v49 = vpop.f32.mrb[21].mxu0  ;;  %v3758_v0 = vpop.f32.mrb[21].mxu1  ;;  %v12292_v31 = vadd.f32 %v3756_v63, %v17070_v33  ;;  %v4056_v35 = vld [vmem:[#allocation13 + $0x78] sm:$0xff]  ;;  %v4051_v4 = vld [vmem:[#allocation13 + $0x50] sm:$0xff] }
 0x6e0   :  { %17087 = vst [vmem:[#allocation31_spill] sm:$0xff] %v14505_v62  ;;  %v12277_v32 = vadd.f32 %v3687_v49, %v17069_v53  ;;  %12676 = vtanh.f32 %v14505_v62  ;;  %v12293_v37 = vadd.f32 %v3758_v0, %v17071_v28  ;;  %v14512_v53 = vpack.c.bf16 %v4045_v9, %v4041_v13  ;;  %v4055_v62 = vld [vmem:[#allocation13 + $0x70] sm:$0xff]  ;;  %v4060_v0 = vld [vmem:[#allocation13 + $0x98] sm:$0xff] }
 0x6e1   :  { %v9677_v46 = vmul.f32 -1.442695, %v12276_v22  ;;  %v9679_v61 = vmul.f32 -1.442695, %v12292_v31  ;;  %v14514_v22 = vpack.c.bf16 %v4047_v59, %v4043_v51  ;;  %v14520_v33 = vpack.c.bf16 %v4056_v35, %v4052_v11  ;;  %v4064_v28 = vld [vmem:[#allocation13 + $0xb8] sm:$0xff]  ;;  %v4057_v51 = vld [vmem:[#allocation13 + $0x80] sm:$0xff] }
 0x6e2   :  { %v9678_v54 = vmul.f32 -1.442695, %v12277_v32  ;;  %v4049_v32 = vld [vmem:[#allocation13 + $0x40] sm:$0xff]  ;;  %v14528_v9 = vpack.c.bf16 %v4055_v62, %v4051_v4  ;;  %v4063_v11 = vld [vmem:[#allocation13 + $0xb0] sm:$0xff]  ;;  %v4066_v35 = vld [vmem:[#allocation13 + $0xc8] sm:$0xff] }
 0x6e3   :  { %12678 = vpow2.f32 %v9677_v46  ;;  %v4053_v46 = vld [vmem:[#allocation13 + $0x60] sm:$0xff]  ;;  %17089 = vst [vmem:[#allocation33_spill] sm:$0xff] %v14520_v33 }
 0x6e4   :  { %12680 = vpow2.f32 %v9678_v54  ;;  %v14518_v54 = vpack.c.bf16 %v4054_v56, %v4050_v10  ;;  %17091 = vst [vmem:[#allocation44_spill] sm:$0xff] %v14528_v9  ;;  %v4061_v59 = vld [vmem:[#allocation13 + $0xa0] sm:$0xff]  ;;  %v14534_v56 = vpack.c.bf16 %v4064_v28, %v4060_v0  ;;  %v4067_v0 = vld [vmem:[#allocation13 + $0xd0] sm:$0xff] }
 0x6e5   :  { %12682 = vtanh.f32 %v12293_v37  ;;  %v4070_v37 = vld [vmem:[#allocation13 + $0xe8] sm:$0xff]  ;;  %v14540_v4 = vpack.c.bf16 %v4061_v59, %v4057_v51  ;;  %v4069_v28 = vld [vmem:[#allocation13 + $0xe0] sm:$0xff] }
 0x6e6   :  { %12684 = vpow2.f32 %v9679_v61  ;;  %17093 = vst [vmem:[#allocation46_spill] sm:$0xff] %v14534_v56  ;;  %v4059_v61 = vld [vmem:[#allocation13 + $0x90] sm:$0xff]  ;;  %v14546_v62 = vpack.c.bf16 %v4070_v37, %v4066_v35 }
 0x6e7   :  { %17094 = vst [vmem:[#allocation47_spill] sm:$0xff] %v14540_v4 }
 0x6e8   :  { %17096 = vst [vmem:[#allocation50_spill] sm:$0xff] %v14546_v62 }
 0x6ea   :  { %v12677_v49 = vpop.eup %12676 }
 0x6eb   :  { %v14516_v63 = vmul.f32 %v12677_v49, %v12675_v27  ;;  %v14526_v27 = vpack.c.bf16 %v4053_v46, %v4049_v32  ;;  %v4068_v49 = vld [vmem:[#allocation13 + $0xd8] sm:$0xff] }
 0x6ec   :  { %v4072_v32 = vld [vmem:[#allocation13 + $0xf8] sm:$0xff] }
 0x6ed   :  { %17088 = vst [vmem:[#allocation32_spill] sm:$0xff] %v14516_v63  ;;  %v12679_v39 = vpop.eup %12678  ;;  %3927 = vmatmul.mubr.f32.vlgmr.msra.gmra.mrb[12].mxu0 %v14516_v63  ;;  %3998 = vmatmul.mubr.f32.vlgmr.msra.gmra.mrb[12].mxu1 %v14516_v63  ;;  %17090 = vst [vmem:[#allocation43_spill] sm:$0xff] %v14526_v27  ;;  %v14548_v46 = vpack.c.bf16 %v4072_v32, %v4068_v49  ;;  %v4076_v63 = vld [vmem:[#allocation13 + $0x118] sm:$0xff]  ;;  %v4075_v32 = vld [vmem:[#allocation13 + $0x110] sm:$0xff] }
 0x6ee   :  { %v3774_v31 = vadd.f32 1.0, %v12679_v39  ;;  %v12681_v13 = vpop.eup %12680  ;;  %10739 = vmatpush1.bf16.msra.mxu0 %v14512_v53  ;;  %10771 = vmatpush1.bf16.msra.mxu1 %v14514_v22  ;;  %v14532_v39 = vpack.c.bf16 %v4062_v17, %v4058_v50  ;;  %v14542_v17 = vpack.c.bf16 %v4063_v11, %v4059_v61  ;;  %v4065_v50 = vld [vmem:[#allocation13 + $0xc0] sm:$0xff] }
 0x6ef   :  { %v3775_v10 = vadd.f32 1.0, %v12681_v13  ;;  %10741 = vmatprep.subr.bf16.mxu0 %v14518_v54  ;;  %10773 = vmatprep.subr.bf16.mxu1 %v14520_v33  ;;  %17097 = vst [vmem:[#allocation51_spill] sm:$0xff] %v14548_v46  ;;  %v4074_v13 = vld [vmem:[#allocation13 + $0x108] sm:$0xff]  ;;  %v14552_v51 = vpack.c.bf16 %v4069_v28, %v4065_v50  ;;  %v4073_v61 = vld [vmem:[#allocation13 + $0x100] sm:$0xff]  ;;  %v12683_v35 = vpop.eup %12682  ;;  %v4084_v50 = vld [vmem:[#allocation13 + $0x158] sm:$0xff] }
 0x6f0   :  { %12686 = vrcp.f32 %v3774_v31  ;;  %17092 = vst [vmem:[#allocation45_spill] sm:$0xff] %v14532_v39  ;;  %4169 = vmatprep.mubr.f32.mxu0 %v16988_v19  ;;  %4240 = vmatprep.mubr.f32.mxu1 %v16988_v19  ;;  %17095 = vst [vmem:[#allocation48_spill] sm:$0xff] %v14542_v17  ;;  %v4071_v31 = vld [vmem:[#allocation13 + $0xf0] sm:$0xff]  ;;  %v4077_v11 = vld [vmem:[#allocation13 + $0x120] sm:$0xff] }
 0x6f1   :  { %12688 = vrcp.f32 %v3775_v10  ;;  %v4078_v10 = vld [vmem:[#allocation13 + $0x128] sm:$0xff]  ;;  %17098 = vst [vmem:[#allocation52_spill] sm:$0xff] %v14552_v51  ;;  %v14554_v59 = vpack.c.bf16 %v4071_v31, %v4067_v0  ;;  %v4088_v28 = vld [vmem:[#allocation13 + $0x178] sm:$0xff] }
 0x6f2   :  { %10743 = vmatpush1.bf16.msra.mxu0 %v14526_v27  ;;  %10775 = vmatpush1.bf16.msra.mxu1 %v14528_v9  ;;  %v4080_v9 = vld [vmem:[#allocation13 + $0x138] sm:$0xff]  ;;  %v14558_v37 = vpack.c.bf16 %v4078_v10, %v4074_v13  ;;  %v4081_v13 = vld [vmem:[#allocation13 + $0x140] sm:$0xff]  ;;  %v14572_v33 = vpack.c.bf16 %v4088_v28, %v4084_v50 }
 0x6f3   :  { %10745 = vmatprep.subr.bf16.mxu0 %v14532_v39  ;;  %10777 = vmatprep.subr.bf16.mxu1 %v14534_v56  ;;  %17099 = vst [vmem:[#allocation54_spill] sm:$0xff] %v14554_v59  ;;  %v14560_v49 = vpack.c.bf16 %v4080_v9, %v4076_v63  ;;  %v4079_v56 = vld [vmem:[#allocation13 + $0x130] sm:$0xff]  ;;  %v12685_v39 = vpop.eup %12684  ;;  %v4085_v63 = vld [vmem:[#allocation13 + $0x160] sm:$0xff] }
 0x6f4   :  { %v3776_v10 = vadd.f32 1.0, %v12685_v39  ;;  %17101 = vst [vmem:[#allocation56_spill] sm:$0xff] %v14572_v33  ;;  %v14579_v39 = vpack.c.bf16 %v4085_v63, %v4081_v13  ;;  %v4093_v50 = vld [vmem:[#allocation13 + $0x1a0] sm:$0xff]  ;;  %v4102_v13 = vld [vmem:[#allocation13 + $0x1e8] sm:$0xff]  ;;  %v4100_v63 = vld [vmem:[#allocation13 + $0x1d8] sm:$0xff] }
 0x6f6   :  { %10747 = vmatpush1.bf16.msra.mxu0 %v14540_v4  ;;  %10779 = vmatpush1.bf16.msra.mxu1 %v14542_v17  ;;  %v4082_v4 = vld [vmem:[#allocation13 + $0x148] sm:$0xff]  ;;  %12690 = vrcp.f32 %v3776_v10 }
 0x6f7   :  { %10749 = vmatprep.subr.bf16.mxu0 %v14546_v62  ;;  %10781 = vmatprep.subr.bf16.mxu1 %v14548_v46  ;;  %v4086_v17 = vld [vmem:[#allocation13 + $0x168] sm:$0xff]  ;;  %v14564_v62 = vpack.c.bf16 %v4077_v11, %v4073_v61  ;;  %v14566_v46 = vpack.c.bf16 %v4079_v56, %v4075_v32  ;;  %v4092_v56 = vld [vmem:[#allocation13 + $0x198] sm:$0xff] }
 0x6f8   :  { %v14570_v27 = vpack.c.bf16 %v4086_v17, %v4082_v4  ;;  %v4094_v11 = vld [vmem:[#allocation13 + $0x1a8] sm:$0xff]  ;;  %v4096_v32 = vld [vmem:[#allocation13 + $0x1b8] sm:$0xff]  ;;  %v4089_v17 = vld [vmem:[#allocation13 + $0x180] sm:$0xff] }
 0x6f9   :  { %v14587_v28 = vpack.c.bf16 %v4096_v32, %v4092_v56  ;;  %v14592_v10 = vpack.c.bf16 %v4093_v50, %v4089_v17  ;;  %v4101_v32 = vld [vmem:[#allocation13 + $0x1e0] sm:$0xff] }
 0x6fa   :  { %v12687_v0 = vpop.eup %12686  ;;  %10751 = vmatpush1.bf16.msra.mxu0 %v14552_v51  ;;  %10783 = vmatpush1.bf16.msra.mxu1 %v14554_v59  ;;  %17100 = vst [vmem:[#allocation55_spill] sm:$0xff] %v14570_v27  ;;  %v4090_v51 = vld [vmem:[#allocation13 + $0x188] sm:$0xff] }
 0x6fb   :  { %v3786_v31 = vmul.f32 %v12687_v0, %v12683_v35  ;;  %v12689_v9 = vpop.eup %12688  ;;  %10753 = vmatprep.subr.bf16.mxu0 %v14558_v37  ;;  %10785 = vmatprep.subr.bf16.mxu1 %v14560_v49  ;;  %v4083_v35 = vld [vmem:[#allocation13 + $0x150] sm:$0xff] }
 0x6fc   :  { %v4087_v0 = vld [vmem:[#allocation13 + $0x170] sm:$0xff]  ;;  %v3785_v61 = vmul.f32 %v12689_v9, %v14375_v55  ;;  %v14585_v55 = vpack.c.bf16 %v4094_v11, %v4090_v51  ;;  %v4097_v51 = vld [vmem:[#allocation13 + $0x1c0] sm:$0xff] }
 0x6fd   :  { %v14581_v4 = vpack.c.bf16 %v4087_v0, %v4083_v35  ;;  %v4095_v9 = vld [vmem:[#allocation13 + $0x1b0] sm:$0xff]  ;;  %v4104_v35 = vld [vmem:[#allocation13 + $0x1f8] sm:$0xff]  ;;  %v14604_v17 = vpack.c.bf16 %v4101_v32, %v4097_v51 }
 0x6fe   :  { %v14575_v59 = vadd.f32 %v3786_v31, %v3785_v61  ;;  %10755 = vmatpush1.bf16.msra.mxu0 %v14564_v62  ;;  %10787 = vmatpush1.bf16.msra.mxu1 %v14566_v46  ;;  %v4091_v31 = vld [vmem:[#allocation13 + $0x190] sm:$0xff]  ;;  %v4098_v61 = vld [vmem:[#allocation13 + $0x1c8] sm:$0xff]  ;;  %v14600_v56 = vpack.c.bf16 %v4104_v35, %v4100_v63 }
 0x6ff   :  { %10757 = vmatprep.subr.bf16.mxu0 %v14570_v27  ;;  %10789 = vmatprep.subr.bf16.mxu1 %v14572_v33  ;;  %v14594_v0 = vpack.c.bf16 %v4095_v9, %v4091_v31  ;;  %v14598_v11 = vpack.c.bf16 %v4102_v13, %v4098_v61  ;;  %v4099_v33 = vld [vmem:[#allocation13 + $0x1d0] sm:$0xff]  ;;  %v17108_v63 = vld [vmem:[#allocation40_spill] sm:$0xff] }
 0x700   :  { %12692 = vtanh.f32 %v14575_v59  ;;  %v4103_v27 = vld [vmem:[#allocation13 + $0x1f0] sm:$0xff]  ;;  %v12691_v31 = vpop.eup %12690 }
 0x701   :  { %v14606_v50 = vpack.c.bf16 %v4103_v27, %v4099_v33  ;;  %v17109_v32 = vld [vmem:[#allocation41_spill] sm:$0xff] }
 0x702   :  { %10759 = vmatpush1.bf16.msra.mxu0 %v14579_v39  ;;  %10791 = vmatpush1.bf16.msra.mxu1 %v14581_v4 }
 0x703   :  { %10761 = vmatprep.subr.bf16.mxu0 %v14585_v55  ;;  %10793 = vmatprep.subr.bf16.mxu1 %v14587_v28 }
 0x706   :  { %10763 = vmatpush1.bf16.msra.mxu0 %v14592_v10  ;;  %10795 = vmatpush1.bf16.msra.mxu1 %v14594_v0 }
 0x707   :  { %10765 = vmatprep.subr.bf16.mxu0 %v14598_v11  ;;  %10797 = vmatprep.subr.bf16.mxu1 %v14600_v56 }
 0x70a   :  { %v12693_v9 = vpop.eup %12692  ;;  %10767 = vmatpush1.bf16.msra.mxu0 %v14604_v17  ;;  %10799 = vmatpush1.bf16.msra.mxu1 %v14606_v50 }
 0x70b   :  { %v14612_v61 = vmul.f32 %v12693_v9, %v12691_v31  ;;  %10801 = vmatprep.subr.bf16.mxu0 %v14398_v18  ;;  %10833 = vmatprep.subr.bf16.mxu1 %v14400_v45 }
 0x70d   :  { %4170 = vmatmul.mubr.f32.vlgmr.msra.gmra.mrb[18].mxu0 %v14612_v61  ;;  %4241 = vmatmul.mubr.f32.vlgmr.msra.gmra.mrb[18].mxu1 %v14612_v61 }
 0x70e   :  { %10803 = vmatpush1.bf16.msra.mxu0 %v14402_v41  ;;  %10835 = vmatpush1.bf16.msra.mxu1 %v14405_v58 }
 0x70f   :  { %10805 = vmatprep.subr.bf16.mxu0 %v14410_v15  ;;  %10837 = vmatprep.subr.bf16.mxu1 %v14412_v47  ;;  %v17102_v15 = vld [vmem:[#allocation35_spill] sm:$0xff] }
 0x710   :  { %4412 = vmatprep.mubr.f32.mxu0 %v16988_v19  ;;  %4483 = vmatprep.mubr.f32.mxu1 %v16988_v19 }
 0x712   :  { %10807 = vmatpush1.bf16.msra.mxu0 %v14414_v29  ;;  %10839 = vmatpush1.bf16.msra.mxu1 %v14417_v25 }
 0x713   :  { %10809 = vmatprep.subr.bf16.mxu0 %v14422_v23  ;;  %10841 = vmatprep.subr.bf16.mxu1 %v14424_v6  ;;  %v17103_v23 = vld [vmem:[#allocation36_spill] sm:$0xff] }
 0x716   :  { %10811 = vmatpush1.bf16.msra.mxu0 %v14426_v60  ;;  %10843 = vmatpush1.bf16.msra.mxu1 %v14429_v30  ;;  %v17104_v60 = vld [vmem:[#allocation37_spill] sm:$0xff] }
 0x717   :  { %10813 = vmatprep.subr.bf16.mxu0 %v14434_v14  ;;  %10845 = vmatprep.subr.bf16.mxu1 %v14436_v34 }
 0x71a   :  { %10815 = vmatpush1.bf16.msra.mxu0 %v14438_v12  ;;  %10847 = vmatpush1.bf16.msra.mxu1 %v14441_v36 }
 0x71b   :  { %10817 = vmatprep.subr.bf16.mxu0 %v14446_v8  ;;  %10849 = vmatprep.subr.bf16.mxu1 %v14448_v21 }
 0x71e   :  { %10819 = vmatpush1.bf16.msra.mxu0 %v14450_v7  ;;  %10851 = vmatpush1.bf16.msra.mxu1 %v14453_v42 }
 0x71f   :  { %10821 = vmatprep.subr.bf16.mxu0 %v14458_v2  ;;  %10853 = vmatprep.subr.bf16.mxu1 %v14460_v52 }
 0x722   :  { %10823 = vmatpush1.bf16.msra.mxu0 %v14462_v20  ;;  %10855 = vmatpush1.bf16.msra.mxu1 %v14465_v5  ;;  %v17105_v5 = vld [vmem:[#allocation31_spill] sm:$0xff] }
 0x723   :  { %10825 = vmatprep.subr.bf16.mxu0 %v14470_v16  ;;  %10857 = vmatprep.subr.bf16.mxu1 %v14472_v40 }
 0x726   :  { %10827 = vmatpush1.bf16.msra.mxu0 %v14474_v44  ;;  %10859 = vmatpush1.bf16.msra.mxu1 %v14477_v43 }
 0x727   :  { %10829 = vmatprep.subr.bf16.mxu0 %v14482_v48  ;;  %10861 = vmatprep.subr.bf16.mxu1 %v14484_v3  ;;  %v17106_v48 = vld [vmem:[#allocation38_spill] sm:$0xff] }
 0x72a   :  { %10831 = vmatpush1.bf16.msra.mxu0 %v14486_v1  ;;  %10863 = vmatpush1.bf16.msra.mxu1 %v14489_v24 }
 0x72b   :  { %10865 = vmatprep.subr.bf16.mxu0 %v14494_v57  ;;  %10897 = vmatprep.subr.bf16.mxu1 %v14496_v26  ;;  %v17107_v57 = vld [vmem:[#allocation39_spill] sm:$0xff] }
 0x7c0   :  { %v3928_v33 = vpop.f32.mrb[12].mxu0  ;;  %v3999_v18 = vpop.f32.mrb[12].mxu1 }
 0x7c1   :  { %v12252_v45 = vadd.f32 %v3928_v33, %v13682_v38  ;;  %v3930_v41 = vpop.f32.mrb[13].mxu0  ;;  %v4001_v58 = vpop.f32.mrb[13].mxu1  ;;  %v12268_v6 = vadd.f32 %v3999_v18, %v17103_v23 }
 0x7c2   :  { %v12253_v47 = vadd.f32 %v3930_v41, %v17102_v15  ;;  %v12269_v30 = vadd.f32 %v4001_v58, %v17104_v60 }
 0x7c3   :  { %v9680_v29 = vmul.f32 -1.442695, %v12252_v45  ;;  %v9682_v14 = vmul.f32 -1.442695, %v12268_v6  ;;  %v17112_v6 = vld [vmem:[#allocation44_spill] sm:$0xff] }
 0x7c4   :  { %v9681_v25 = vmul.f32 -1.442695, %v12253_v47 }
 0x7c5   :  { %12694 = vpow2.f32 %v9680_v29  ;;  %v17110_v29 = vld [vmem:[#allocation33_spill] sm:$0xff] }
 0x7c6   :  { %12696 = vpow2.f32 %v9681_v25  ;;  %v17111_v25 = vld [vmem:[#allocation43_spill] sm:$0xff] }
 0x7c7   :  { %12698 = vtanh.f32 %v12269_v30  ;;  %v17113_v30 = vld [vmem:[#allocation45_spill] sm:$0xff] }
 0x7c8   :  { %12700 = vpow2.f32 %v9682_v14  ;;  %v17116_v14 = vld [vmem:[#allocation48_spill] sm:$0xff] }
 0x7cf   :  { %v12695_v34 = vpop.eup %12694 }
 0x7d0   :  { %v4017_v12 = vadd.f32 1.0, %v12695_v34  ;;  %v12697_v36 = vpop.eup %12696  ;;  %v17117_v34 = vld [vmem:[#allocation50_spill] sm:$0xff] }
 0x7d1   :  { %v4018_v8 = vadd.f32 1.0, %v12697_v36  ;;  %v12699_v21 = vpop.eup %12698 }
 0x7d2   :  { %12702 = vrcp.f32 %v4017_v12  ;;  %v12701_v7 = vpop.eup %12700  ;;  %v17118_v12 = vld [vmem:[#allocation51_spill] sm:$0xff] }
 0x7d3   :  { %12704 = vrcp.f32 %v4018_v8  ;;  %v4019_v20 = vadd.f32 1.0, %v12701_v7  ;;  %v17119_v7 = vld [vmem:[#allocation52_spill] sm:$0xff] }
 0x7d5   :  { %12706 = vrcp.f32 %v4019_v20 }
 0x7dc   :  { %v12703_v42 = vpop.eup %12702 }
 0x7dd   :  { %v4029_v2 = vmul.f32 %v12703_v42, %v12699_v21  ;;  %v12705_v52 = vpop.eup %12704  ;;  %v17120_v42 = vld [vmem:[#allocation54_spill] sm:$0xff] }
 0x7de   :  { %v4028_v16 = vmul.f32 %v12705_v52, %v17105_v5 }
 0x7df   :  { %v12707_v51 = vpop.eup %12706 }
 0x7e0   :  { %v4171_v40 = vpop.f32.mrb[18].mxu0  ;;  %v4242_v44 = vpop.f32.mrb[18].mxu1  ;;  %v14657_v43 = vadd.f32 %v4029_v2, %v4028_v16  ;;  %v17121_v16 = vld [vmem:[#allocation55_spill] sm:$0xff] }
 0x7e1   :  { %v12274_v3 = vadd.f32 %v4171_v40, %v17106_v48  ;;  %v4173_v1 = vpop.f32.mrb[19].mxu0  ;;  %v4244_v24 = vpop.f32.mrb[19].mxu1  ;;  %v12290_v35 = vadd.f32 %v4242_v44, %v17108_v63  ;;  %v17122_v40 = vld [vmem:[#allocation56_spill] sm:$0xff]  ;;  %v4791_v44 = vld [vmem:[#allocation14 + $0x50] sm:$0xff] }
 0x7e2   :  { %v12275_v26 = vadd.f32 %v4173_v1, %v17107_v57  ;;  %12708 = vtanh.f32 %v14657_v43  ;;  %v12291_v31 = vadd.f32 %v4244_v24, %v17109_v32  ;;  %v4800_v1 = vld [vmem:[#allocation14 + $0x98] sm:$0xff] }
 0x7e3   :  { %v9683_v27 = vmul.f32 -1.442695, %v12274_v3  ;;  %v9685_v33 = vmul.f32 -1.442695, %v12290_v35  ;;  %v4806_v3 = vld [vmem:[#allocation14 + $0xc8] sm:$0xff] }
 0x7e4   :  { %v9684_v13 = vmul.f32 -1.442695, %v12275_v26  ;;  %v4808_v26 = vld [vmem:[#allocation14 + $0xd8] sm:$0xff] }
 0x7e5   :  { %12710 = vpow2.f32 %v9683_v27  ;;  %v4797_v27 = vld [vmem:[#allocation14 + $0x80] sm:$0xff]  ;;  %v10996_v35 = vpack.c.bf16 %v4808_v26, %v4800_v1  ;;  %v4872_v1 = vld [vmem:[#allocation14 + $0x2d8] sm:$0xff] }
 0x7e6   :  { %12712 = vpow2.f32 %v9684_v13  ;;  %v4805_v13 = vld [vmem:[#allocation14 + $0xc0] sm:$0xff] }
 0x7e7   :  { %12714 = vtanh.f32 %v12291_v31  ;;  %v4799_v31 = vld [vmem:[#allocation14 + $0x90] sm:$0xff]  ;;  %v4869_v26 = vld [vmem:[#allocation14 + $0x2c0] sm:$0xff] }
 0x7e8   :  { %12716 = vpow2.f32 %v9685_v33 }
 0x7ec   :  { %v12709_v9 = vpop.eup %12708 }
 0x7ed   :  { %v14664_v18 = vmul.f32 %v12709_v9, %v12707_v51  ;;  %v10934_v51 = vpack.c.bf16 %v4805_v13, %v4797_v27  ;;  %v4807_v9 = vld [vmem:[#allocation14 + $0xd0] sm:$0xff] }
 0x7ee   :  { %v10998_v33 = vpack.c.bf16 %v4807_v9, %v4799_v31  ;;  %v4878_v9 = vld [vmem:[#allocation14 + $0x308] sm:$0xff] }
 0x7ef   :  { %v12711_v45 = vpop.eup %12710  ;;  %4413 = vmatmul.mubr.f32.vlgmr.msra.gmra.mrb[14].mxu0 %v14664_v18  ;;  %4484 = vmatmul.mubr.f32.vlgmr.msra.gmra.mrb[14].mxu1 %v14664_v18 }
 0x7f0   :  { %v4260_v41 = vadd.f32 1.0, %v12711_v45  ;;  %v12713_v58 = vpop.eup %12712  ;;  %10867 = vmatpush1.bf16.msra.mxu0 %v14512_v53  ;;  %10899 = vmatpush1.bf16.msra.mxu1 %v14514_v22  ;;  %v17114_v53 = vld [vmem:[#allocation46_spill] sm:$0xff]  ;;  %v17115_v22 = vld [vmem:[#allocation47_spill] sm:$0xff]  ;;  %v4814_v45 = vld [vmem:[#allocation14 + $0x108] sm:$0xff] }
 0x7f1   :  { %v4261_v47 = vadd.f32 1.0, %v12713_v58  ;;  %10869 = vmatprep.subr.bf16.mxu0 %v14518_v54  ;;  %10901 = vmatprep.subr.bf16.mxu1 %v17110_v29  ;;  %v12715_v54 = vpop.eup %12714  ;;  %v4816_v58 = vld [vmem:[#allocation14 + $0x118] sm:$0xff] }
 0x7f2   :  { %12718 = vrcp.f32 %v4260_v41  ;;  %4655 = vmatprep.mubr.f32.mxu0 %v16988_v19  ;;  %4726 = vmatprep.mubr.f32.mxu1 %v16988_v19  ;;  %v12717_v36 = vpop.eup %12716  ;;  %v4822_v41 = vld [vmem:[#allocation14 + $0x148] sm:$0xff]  ;;  %v4824_v29 = vld [vmem:[#allocation14 + $0x158] sm:$0xff] }
 0x7f3   :  { %12720 = vrcp.f32 %v4261_v47  ;;  %v4262_v52 = vadd.f32 1.0, %v12717_v36  ;;  %v10936_v47 = vpack.c.bf16 %v4822_v41, %v4814_v45  ;;  %v4832_v36 = vld [vmem:[#allocation14 + $0x198] sm:$0xff] }
 0x7f4   :  { %10871 = vmatpush1.bf16.msra.mxu0 %v17111_v25  ;;  %10903 = vmatpush1.bf16.msra.mxu1 %v17112_v6  ;;  %v4813_v25 = vld [vmem:[#allocation14 + $0x100] sm:$0xff]  ;;  %v4880_v45 = vld [vmem:[#allocation14 + $0x318] sm:$0xff] }
 0x7f5   :  { %10873 = vmatprep.subr.bf16.mxu0 %v17113_v30  ;;  %10905 = vmatprep.subr.bf16.mxu1 %v17114_v53  ;;  %12722 = vrcp.f32 %v4262_v52  ;;  %v4821_v6 = vld [vmem:[#allocation14 + $0x140] sm:$0xff]  ;;  %v11000_v30 = vpack.c.bf16 %v4824_v29, %v4816_v58  ;;  %v4888_v58 = vld [vmem:[#allocation14 + $0x358] sm:$0xff] }
 0x7f6   :  { %v10938_v53 = vpack.c.bf16 %v4821_v6, %v4813_v25  ;;  %v4885_v29 = vld [vmem:[#allocation14 + $0x340] sm:$0xff]  ;;  %v11016_v25 = vpack.c.bf16 %v4888_v58, %v4880_v45  ;;  %v4952_v45 = vld [vmem:[#allocation14 + $0x558] sm:$0xff] }
 0x7f7   :  { %v4949_v58 = vld [vmem:[#allocation14 + $0x540] sm:$0xff] }
 0x7f8   :  { %10875 = vmatpush1.bf16.msra.mxu0 %v17115_v22  ;;  %10907 = vmatpush1.bf16.msra.mxu1 %v17116_v14  ;;  %v4815_v22 = vld [vmem:[#allocation14 + $0x110] sm:$0xff] }
 0x7f9   :  { %10877 = vmatprep.subr.bf16.mxu0 %v17117_v34  ;;  %10909 = vmatprep.subr.bf16.mxu1 %v17118_v12  ;;  %v4823_v14 = vld [vmem:[#allocation14 + $0x150] sm:$0xff]  ;;  %v4830_v34 = vld [vmem:[#allocation14 + $0x188] sm:$0xff] }
 0x7fa   :  { %v4838_v12 = vld [vmem:[#allocation14 + $0x1c8] sm:$0xff] }
 0x7fc   :  { %v12719_v8 = vpop.eup %12718  ;;  %10879 = vmatpush1.bf16.msra.mxu0 %v17119_v7  ;;  %10911 = vmatpush1.bf16.msra.mxu1 %v17120_v42  ;;  %v4829_v7 = vld [vmem:[#allocation14 + $0x180] sm:$0xff] }
 0x7fd   :  { %v4272_v21 = vmul.f32 %v12719_v8, %v12715_v54  ;;  %v12721_v2 = vpop.eup %12720  ;;  %10881 = vmatprep.subr.bf16.mxu0 %v14558_v37  ;;  %10913 = vmatprep.subr.bf16.mxu1 %v14560_v49  ;;  %v4782_v37 = vld [vmem:[#allocation14 + $0x8] sm:$0xff]  ;;  %v11002_v54 = vpack.c.bf16 %v4823_v14, %v4815_v22  ;;  %v10940_v8 = vpack.c.bf16 %v4838_v12, %v4830_v34  ;;  %v4837_v42 = vld [vmem:[#allocation14 + $0x1c0] sm:$0xff]  ;;  %v4896_v34 = vld [vmem:[#allocation14 + $0x398] sm:$0xff] }
 0x7fe   :  { %v4271_v20 = vmul.f32 %v12721_v2, %v14575_v59  ;;  %v4790_v49 = vld [vmem:[#allocation14 + $0x48] sm:$0xff]  ;;  %v10942_v52 = vpack.c.bf16 %v4837_v42, %v4829_v7 }
 0x7ff   :  { %v4894_v14 = vld [vmem:[#allocation14 + $0x388] sm:$0xff] }
 0x800   :  { %v14687_v5 = vadd.f32 %v4272_v21, %v4271_v20  ;;  %10883 = vmatpush1.bf16.msra.mxu0 %v14564_v62  ;;  %10915 = vmatpush1.bf16.msra.mxu1 %v14566_v46  ;;  %v12723_v62 = vpop.eup %12722  ;;  %v4840_v21 = vld [vmem:[#allocation14 + $0x1d8] sm:$0xff]  ;;  %v4831_v20 = vld [vmem:[#allocation14 + $0x190] sm:$0xff] }
 0x801   :  { %10885 = vmatprep.subr.bf16.mxu0 %v17121_v16  ;;  %10917 = vmatprep.subr.bf16.mxu1 %v17122_v40  ;;  %v11004_v2 = vpack.c.bf16 %v4840_v21, %v4832_v36  ;;  %v4839_v16 = vld [vmem:[#allocation14 + $0x1d0] sm:$0xff]  ;;  %v4904_v36 = vld [vmem:[#allocation14 + $0x3d8] sm:$0xff]  ;;  %v4901_v21 = vld [vmem:[#allocation14 + $0x3c0] sm:$0xff] }
 0x802   :  { %12724 = vtanh.f32 %v14687_v5  ;;  %v11006_v40 = vpack.c.bf16 %v4839_v16, %v4831_v20  ;;  %v11020_v7 = vpack.c.bf16 %v4904_v36, %v4896_v34  ;;  %v4910_v16 = vld [vmem:[#allocation14 + $0x408] sm:$0xff]  ;;  %v4968_v34 = vld [vmem:[#allocation14 + $0x5d8] sm:$0xff]  ;;  %v4965_v36 = vld [vmem:[#allocation14 + $0x5c0] sm:$0xff] }
 0x804   :  { %10887 = vmatpush1.bf16.msra.mxu0 %v14579_v39  ;;  %10919 = vmatpush1.bf16.msra.mxu1 %v14581_v4  ;;  %v4784_v39 = vld [vmem:[#allocation14 + $0x18] sm:$0xff]  ;;  %v10928_v4 = vpack.c.bf16 %v4790_v49, %v4782_v37 }
 0x805   :  { %10889 = vmatprep.subr.bf16.mxu0 %v14585_v55  ;;  %10921 = vmatprep.subr.bf16.mxu1 %v14587_v28  ;;  %v4792_v55 = vld [vmem:[#allocation14 + $0x58] sm:$0xff]  ;;  %v4781_v28 = vld [vmem:[#allocation14] sm:$0xff] }
 0x806   :  { %v4848_v37 = vld [vmem:[#allocation14 + $0x218] sm:$0xff] }
 0x808   :  { %10891 = vmatpush1.bf16.msra.mxu0 %v14592_v10  ;;  %10923 = vmatpush1.bf16.msra.mxu1 %v14594_v0  ;;  %v4789_v10 = vld [vmem:[#allocation14 + $0x40] sm:$0xff]  ;;  %v10992_v0 = vpack.c.bf16 %v4792_v55, %v4784_v39  ;;  %v4856_v39 = vld [vmem:[#allocation14 + $0x258] sm:$0xff] }
 0x809   :  { %10893 = vmatprep.subr.bf16.mxu0 %v14598_v11  ;;  %10925 = vmatprep.subr.bf16.mxu1 %v14600_v56  ;;  %v10930_v11 = vpack.c.bf16 %v4789_v10, %v4781_v28  ;;  %v4783_v56 = vld [vmem:[#allocation14 + $0x10] sm:$0xff]  ;;  %v4853_v55 = vld [vmem:[#allocation14 + $0x240] sm:$0xff]  ;;  %v11008_v28 = vpack.c.bf16 %v4856_v39, %v4848_v37  ;;  %v4920_v37 = vld [vmem:[#allocation14 + $0x458] sm:$0xff] }
 0x80a   :  { %v4917_v39 = vld [vmem:[#allocation14 + $0x440] sm:$0xff] }
 0x80c   :  { %v12725_v46 = vpop.eup %12724  ;;  %10895 = vmatpush1.bf16.msra.mxu0 %v14604_v17  ;;  %10927 = vmatpush1.bf16.msra.mxu1 %v14606_v50  ;;  %v10994_v17 = vpack.c.bf16 %v4791_v44, %v4783_v56  ;;  %v4798_v50 = vld [vmem:[#allocation14 + $0x88] sm:$0xff] }
 0x80d   :  { %v14704_v59 = vmul.f32 %v12725_v46, %v12723_v62  ;;  %10929 = vmatprep.subr.bf16.mxu0 %v10928_v4  ;;  %10993 = vmatprep.subr.bf16.mxu1 %v10992_v0  ;;  %v10932_v24 = vpack.c.bf16 %v4806_v3, %v4798_v50  ;;  %v4846_v62 = vld [vmem:[#allocation14 + $0x208] sm:$0xff]  ;;  %v4845_v4 = vld [vmem:[#allocation14 + $0x200] sm:$0xff]  ;;  %v4847_v0 = vld [vmem:[#allocation14 + $0x210] sm:$0xff] }
 0x80e   :  { %v4854_v46 = vld [vmem:[#allocation14 + $0x248] sm:$0xff]  ;;  %v10946_v10 = vpack.c.bf16 %v4853_v55, %v4845_v4  ;;  %v4864_v50 = vld [vmem:[#allocation14 + $0x298] sm:$0xff] }
 0x80f   :  { %4656 = vmatmul.mubr.f32.vlgmr.msra.gmra.mrb[16].mxu0 %v14704_v59  ;;  %4727 = vmatmul.mubr.f32.vlgmr.msra.gmra.mrb[16].mxu1 %v14704_v59  ;;  %v10944_v49 = vpack.c.bf16 %v4854_v46, %v4846_v62  ;;  %v4862_v44 = vld [vmem:[#allocation14 + $0x288] sm:$0xff]  ;;  %v11012_v27 = vpack.c.bf16 %v4872_v1, %v4864_v50  ;;  %v4912_v62 = vld [vmem:[#allocation14 + $0x418] sm:$0xff]  ;;  %v4933_v1 = vld [vmem:[#allocation14 + $0x4c0] sm:$0xff] }
 0x810   :  { %10931 = vmatpush1.bf16.msra.mxu0 %v10930_v11  ;;  %10995 = vmatpush1.bf16.msra.mxu1 %v10994_v17  ;;  %v4855_v11 = vld [vmem:[#allocation14 + $0x250] sm:$0xff]  ;;  %v4870_v17 = vld [vmem:[#allocation14 + $0x2c8] sm:$0xff]  ;;  %v11024_v4 = vpack.c.bf16 %v4920_v37, %v4912_v62  ;;  %v4936_v50 = vld [vmem:[#allocation14 + $0x4d8] sm:$0xff] }
 0x811   :  { %10933 = vmatprep.subr.bf16.mxu0 %v10932_v24  ;;  %10997 = vmatprep.subr.bf16.mxu1 %v10996_v35  ;;  %v11010_v56 = vpack.c.bf16 %v4855_v11, %v4847_v0  ;;  %v10948_v3 = vpack.c.bf16 %v4870_v17, %v4862_v44  ;;  %v4861_v24 = vld [vmem:[#allocation14 + $0x280] sm:$0xff]  ;;  %v4863_v35 = vld [vmem:[#allocation14 + $0x290] sm:$0xff]  ;;  %v4926_v11 = vld [vmem:[#allocation14 + $0x488] sm:$0xff] }
 0x812   :  { %v10950_v13 = vpack.c.bf16 %v4869_v26, %v4861_v24  ;;  %v4928_v44 = vld [vmem:[#allocation14 + $0x498] sm:$0xff]  ;;  %v4981_v37 = vld [vmem:[#allocation14 + $0x640] sm:$0xff] }
 0x813   :  { %v11028_v24 = vpack.c.bf16 %v4936_v50, %v4928_v44  ;;  %v4984_v62 = vld [vmem:[#allocation14 + $0x658] sm:$0xff]  ;;  %v4997_v50 = vld [vmem:[#allocation14 + $0x6c0] sm:$0xff] }
 0x814   :  { %10935 = vmatpush1.bf16.msra.mxu0 %v10934_v51  ;;  %10999 = vmatpush1.bf16.msra.mxu1 %v10998_v33  ;;  %v4871_v51 = vld [vmem:[#allocation14 + $0x2d0] sm:$0xff]  ;;  %v4886_v33 = vld [vmem:[#allocation14 + $0x348] sm:$0xff]  ;;  %v5000_v44 = vld [vmem:[#allocation14 + $0x6d8] sm:$0xff] }
 0x815   :  { %10937 = vmatprep.subr.bf16.mxu0 %v10936_v47  ;;  %11001 = vmatprep.subr.bf16.mxu1 %v11000_v30  ;;  %v11014_v31 = vpack.c.bf16 %v4871_v51, %v4863_v35  ;;  %v10952_v41 = vpack.c.bf16 %v4886_v33, %v4878_v9  ;;  %v4877_v47 = vld [vmem:[#allocation14 + $0x300] sm:$0xff]  ;;  %v4879_v30 = vld [vmem:[#allocation14 + $0x310] sm:$0xff]  ;;  %v4942_v51 = vld [vmem:[#allocation14 + $0x508] sm:$0xff] }
 0x816   :  { %v10954_v6 = vpack.c.bf16 %v4885_v29, %v4877_v47  ;;  %v4944_v9 = vld [vmem:[#allocation14 + $0x518] sm:$0xff] }
 0x817   :  { %v11032_v47 = vpack.c.bf16 %v4952_v45, %v4944_v9  ;;  %v5005_v45 = vld [vmem:[#allocation14 + $0x700] sm:$0xff] }
 0x818   :  { %10939 = vmatpush1.bf16.msra.mxu0 %v10938_v53  ;;  %11003 = vmatpush1.bf16.msra.mxu1 %v11002_v54  ;;  %v4887_v53 = vld [vmem:[#allocation14 + $0x350] sm:$0xff]  ;;  %v4902_v54 = vld [vmem:[#allocation14 + $0x3c8] sm:$0xff] }
 0x819   :  { %10941 = vmatprep.subr.bf16.mxu0 %v10940_v8  ;;  %11005 = vmatprep.subr.bf16.mxu1 %v11004_v2  ;;  %v11018_v22 = vpack.c.bf16 %v4887_v53, %v4879_v30  ;;  %v10956_v12 = vpack.c.bf16 %v4902_v54, %v4894_v14  ;;  %v4893_v8 = vld [vmem:[#allocation14 + $0x380] sm:$0xff]  ;;  %v4895_v2 = vld [vmem:[#allocation14 + $0x390] sm:$0xff]  ;;  %v4958_v53 = vld [vmem:[#allocation14 + $0x588] sm:$0xff] }
 0x81a   :  { %v10958_v42 = vpack.c.bf16 %v4901_v21, %v4893_v8  ;;  %v4960_v14 = vld [vmem:[#allocation14 + $0x598] sm:$0xff] }
 0x81b   :  { %v11036_v8 = vpack.c.bf16 %v4968_v34, %v4960_v14  ;;  %v5032_v14 = vld [vmem:[#allocation14 + $0x7d8] sm:$0xff] }
 0x81c   :  { %10943 = vmatpush1.bf16.msra.mxu0 %v10942_v52  ;;  %11007 = vmatpush1.bf16.msra.mxu1 %v11006_v40  ;;  %v4903_v52 = vld [vmem:[#allocation14 + $0x3d0] sm:$0xff]  ;;  %v4918_v40 = vld [vmem:[#allocation14 + $0x448] sm:$0xff] }
 0x81d   :  { %10945 = vmatprep.subr.bf16.mxu0 %v10944_v49  ;;  %11009 = vmatprep.subr.bf16.mxu1 %v11008_v28  ;;  %v11022_v20 = vpack.c.bf16 %v4903_v52, %v4895_v2  ;;  %v10960_v46 = vpack.c.bf16 %v4918_v40, %v4910_v16  ;;  %v4909_v49 = vld [vmem:[#allocation14 + $0x400] sm:$0xff]  ;;  %v4911_v28 = vld [vmem:[#allocation14 + $0x410] sm:$0xff]  ;;  %v4974_v52 = vld [vmem:[#allocation14 + $0x608] sm:$0xff] }
 0x81e   :  { %v10962_v55 = vpack.c.bf16 %v4917_v39, %v4909_v49  ;;  %v4976_v16 = vld [vmem:[#allocation14 + $0x618] sm:$0xff] }
 0x81f   :  { %v11040_v49 = vpack.c.bf16 %v4984_v62, %v4976_v16  ;;  %v4796_v16 = vld [vmem:[#allocation14 + $0x78] sm:$0xff] }
 0x820   :  { %10947 = vmatpush1.bf16.msra.mxu0 %v10946_v10  ;;  %11011 = vmatpush1.bf16.msra.mxu1 %v11010_v56  ;;  %v4919_v10 = vld [vmem:[#allocation14 + $0x450] sm:$0xff]  ;;  %v4934_v56 = vld [vmem:[#allocation14 + $0x4c8] sm:$0xff] }
 0x821   :  { %10949 = vmatprep.subr.bf16.mxu0 %v10948_v3  ;;  %11013 = vmatprep.subr.bf16.mxu1 %v11012_v27  ;;  %v11026_v0 = vpack.c.bf16 %v4919_v10, %v4911_v28  ;;  %v10964_v17 = vpack.c.bf16 %v4934_v56, %v4926_v11  ;;  %v4925_v3 = vld [vmem:[#allocation14 + $0x480] sm:$0xff]  ;;  %v4927_v27 = vld [vmem:[#allocation14 + $0x490] sm:$0xff]  ;;  %v4990_v10 = vld [vmem:[#allocation14 + $0x688] sm:$0xff] }
 0x822   :  { %v10966_v26 = vpack.c.bf16 %v4933_v1, %v4925_v3  ;;  %v4992_v11 = vld [vmem:[#allocation14 + $0x698] sm:$0xff] }
 0x823   :  { %v11044_v3 = vpack.c.bf16 %v5000_v44, %v4992_v11 }
 0x824   :  { %10951 = vmatpush1.bf16.msra.mxu0 %v10950_v13  ;;  %11015 = vmatpush1.bf16.msra.mxu1 %v11014_v31  ;;  %v4935_v13 = vld [vmem:[#allocation14 + $0x4d0] sm:$0xff]  ;;  %v4950_v31 = vld [vmem:[#allocation14 + $0x548] sm:$0xff] }
 0x825   :  { %10953 = vmatprep.subr.bf16.mxu0 %v10952_v41  ;;  %11017 = vmatprep.subr.bf16.mxu1 %v11016_v25  ;;  %v11030_v35 = vpack.c.bf16 %v4935_v13, %v4927_v27  ;;  %v10968_v33 = vpack.c.bf16 %v4950_v31, %v4942_v51  ;;  %v4941_v41 = vld [vmem:[#allocation14 + $0x500] sm:$0xff]  ;;  %v4943_v25 = vld [vmem:[#allocation14 + $0x510] sm:$0xff]  ;;  %v5006_v27 = vld [vmem:[#allocation14 + $0x708] sm:$0xff] }
 0x826   :  { %v10970_v29 = vpack.c.bf16 %v4949_v58, %v4941_v41  ;;  %v5008_v51 = vld [vmem:[#allocation14 + $0x718] sm:$0xff]  ;;  %v5013_v41 = vld [vmem:[#allocation14 + $0x740] sm:$0xff]  ;;  %v5007_v58 = vld [vmem:[#allocation14 + $0x710] sm:$0xff] }
 0x827   :  { %v5016_v31 = vld [vmem:[#allocation14 + $0x758] sm:$0xff] }
 0x828   :  { %10955 = vmatpush1.bf16.msra.mxu0 %v10954_v6  ;;  %11019 = vmatpush1.bf16.msra.mxu1 %v11018_v22  ;;  %v4951_v6 = vld [vmem:[#allocation14 + $0x550] sm:$0xff]  ;;  %v4966_v22 = vld [vmem:[#allocation14 + $0x5c8] sm:$0xff] }
 0x829   :  { %10957 = vmatprep.subr.bf16.mxu0 %v10956_v12  ;;  %11021 = vmatprep.subr.bf16.mxu1 %v11020_v7  ;;  %v11034_v30 = vpack.c.bf16 %v4951_v6, %v4943_v25  ;;  %v10972_v54 = vpack.c.bf16 %v4966_v22, %v4958_v53  ;;  %v4957_v12 = vld [vmem:[#allocation14 + $0x580] sm:$0xff]  ;;  %v4959_v7 = vld [vmem:[#allocation14 + $0x590] sm:$0xff]  ;;  %v5022_v25 = vld [vmem:[#allocation14 + $0x788] sm:$0xff] }
 0x82a   :  { %v10974_v21 = vpack.c.bf16 %v4965_v36, %v4957_v12  ;;  %v5030_v6 = vld [vmem:[#allocation14 + $0x7c8] sm:$0xff]  ;;  %v5024_v22 = vld [vmem:[#allocation14 + $0x798] sm:$0xff]  ;;  %v5029_v12 = vld [vmem:[#allocation14 + $0x7c0] sm:$0xff] }
 0x82b   :  { %v10988_v53 = vpack.c.bf16 %v5030_v6, %v5022_v25  ;;  %v11052_v34 = vpack.c.bf16 %v5032_v14, %v5024_v22  ;;  %v5023_v36 = vld [vmem:[#allocation14 + $0x790] sm:$0xff] }
 0x82c   :  { %10959 = vmatpush1.bf16.msra.mxu0 %v10958_v42  ;;  %11023 = vmatpush1.bf16.msra.mxu1 %v11022_v20  ;;  %v4967_v42 = vld [vmem:[#allocation14 + $0x5d0] sm:$0xff]  ;;  %v4982_v20 = vld [vmem:[#allocation14 + $0x648] sm:$0xff] }
 0x82d   :  { %10961 = vmatprep.subr.bf16.mxu0 %v10960_v46  ;;  %11025 = vmatprep.subr.bf16.mxu1 %v11024_v4  ;;  %v11038_v2 = vpack.c.bf16 %v4967_v42, %v4959_v7  ;;  %v10976_v40 = vpack.c.bf16 %v4982_v20, %v4974_v52  ;;  %v4973_v46 = vld [vmem:[#allocation14 + $0x600] sm:$0xff]  ;;  %v4975_v4 = vld [vmem:[#allocation14 + $0x610] sm:$0xff]  ;;  %v4786_v42 = vld [vmem:[#allocation14 + $0x28] sm:$0xff] }
 0x82e   :  { %v10978_v39 = vpack.c.bf16 %v4981_v37, %v4973_v46  ;;  %v4788_v52 = vld [vmem:[#allocation14 + $0x38] sm:$0xff] }
 0x830   :  { %10963 = vmatpush1.bf16.msra.mxu0 %v10962_v55  ;;  %11027 = vmatpush1.bf16.msra.mxu1 %v11026_v0  ;;  %v4983_v55 = vld [vmem:[#allocation14 + $0x650] sm:$0xff]  ;;  %v4998_v0 = vld [vmem:[#allocation14 + $0x6c8] sm:$0xff] }
 0x831   :  { %10965 = vmatprep.subr.bf16.mxu0 %v10964_v17  ;;  %11029 = vmatprep.subr.bf16.mxu1 %v11028_v24  ;;  %v11042_v28 = vpack.c.bf16 %v4983_v55, %v4975_v4  ;;  %v10980_v56 = vpack.c.bf16 %v4998_v0, %v4990_v10  ;;  %v4989_v17 = vld [vmem:[#allocation14 + $0x680] sm:$0xff]  ;;  %v4991_v24 = vld [vmem:[#allocation14 + $0x690] sm:$0xff] }
 0x832   :  { %v10982_v1 = vpack.c.bf16 %v4997_v50, %v4989_v17 }
 0x834   :  { %10967 = vmatpush1.bf16.msra.mxu0 %v10966_v26  ;;  %11031 = vmatpush1.bf16.msra.mxu1 %v11030_v35  ;;  %v4999_v26 = vld [vmem:[#allocation14 + $0x6d0] sm:$0xff]  ;;  %v5014_v35 = vld [vmem:[#allocation14 + $0x748] sm:$0xff] }
 0x835   :  { %10969 = vmatprep.subr.bf16.mxu0 %v10968_v33  ;;  %11033 = vmatprep.subr.bf16.mxu1 %v11032_v47  ;;  %v11046_v13 = vpack.c.bf16 %v4999_v26, %v4991_v24  ;;  %v10984_v9 = vpack.c.bf16 %v5014_v35, %v5006_v27  ;;  %v11048_v33 = vpack.c.bf16 %v5016_v31, %v5008_v51 }
 0x836   :  { %v10986_v47 = vpack.c.bf16 %v5013_v41, %v5005_v45 }
 0x838   :  { %10971 = vmatpush1.bf16.msra.mxu0 %v10970_v29  ;;  %11035 = vmatpush1.bf16.msra.mxu1 %v11034_v30  ;;  %v5015_v29 = vld [vmem:[#allocation14 + $0x750] sm:$0xff] }
 0x839   :  { %10973 = vmatprep.subr.bf16.mxu0 %v10972_v54  ;;  %11037 = vmatprep.subr.bf16.mxu1 %v11036_v8  ;;  %v11050_v30 = vpack.c.bf16 %v5015_v29, %v5007_v58  ;;  %v5021_v54 = vld [vmem:[#allocation14 + $0x780] sm:$0xff]  ;;  %v5031_v8 = vld [vmem:[#allocation14 + $0x7d0] sm:$0xff] }
 0x83a   :  { %v11054_v7 = vpack.c.bf16 %v5031_v8, %v5023_v36  ;;  %v4785_v36 = vld [vmem:[#allocation14 + $0x20] sm:$0xff] }
 0x83b   :  { %v4793_v8 = vld [vmem:[#allocation14 + $0x60] sm:$0xff] }
 0x83c   :  { %10975 = vmatpush1.bf16.msra.mxu0 %v10974_v21  ;;  %11039 = vmatpush1.bf16.msra.mxu1 %v11038_v2  ;;  %v10990_v21 = vpack.c.bf16 %v5029_v12, %v5021_v54  ;;  %v4794_v2 = vld [vmem:[#allocation14 + $0x68] sm:$0xff] }
 0x83d   :  { %10977 = vmatprep.subr.bf16.mxu0 %v10976_v40  ;;  %11041 = vmatprep.subr.bf16.mxu1 %v11040_v49  ;;  %v11056_v20 = vpack.c.bf16 %v4794_v2, %v4786_v42  ;;  %v11120_v40 = vpack.c.bf16 %v4796_v16, %v4788_v52  ;;  %v4802_v2 = vld [vmem:[#allocation14 + $0xa8] sm:$0xff]  ;;  %v4804_v16 = vld [vmem:[#allocation14 + $0xb8] sm:$0xff] }
 0x840   :  { %10979 = vmatpush1.bf16.msra.mxu0 %v10978_v39  ;;  %11043 = vmatpush1.bf16.msra.mxu1 %v11042_v28 }
 0x841   :  { %10981 = vmatprep.subr.bf16.mxu0 %v10980_v56  ;;  %11045 = vmatprep.subr.bf16.mxu1 %v11044_v3 }
 0x844   :  { %10983 = vmatpush1.bf16.msra.mxu0 %v10982_v1  ;;  %11047 = vmatpush1.bf16.msra.mxu1 %v11046_v13 }
 0x845   :  { %10985 = vmatprep.subr.bf16.mxu0 %v10984_v9  ;;  %11049 = vmatprep.subr.bf16.mxu1 %v11048_v33 }
 0x848   :  { %10987 = vmatpush1.bf16.msra.mxu0 %v10986_v47  ;;  %11051 = vmatpush1.bf16.msra.mxu1 %v11050_v30 }
 0x849   :  { %10989 = vmatprep.subr.bf16.mxu0 %v10988_v53  ;;  %11053 = vmatprep.subr.bf16.mxu1 %v11052_v34 }
 0x84c   :  { %10991 = vmatpush1.bf16.msra.mxu0 %v10990_v21  ;;  %11055 = vmatpush1.bf16.msra.mxu1 %v11054_v7  ;;  %v4787_v21 = vld [vmem:[#allocation14 + $0x30] sm:$0xff] }
 0x84d   :  { %11057 = vmatprep.subr.bf16.mxu0 %v11056_v20  ;;  %11121 = vmatprep.subr.bf16.mxu1 %v11120_v40  ;;  %v4795_v7 = vld [vmem:[#allocation14 + $0x70] sm:$0xff]  ;;  %v4810_v20 = vld [vmem:[#allocation14 + $0xe8] sm:$0xff]  ;;  %v4812_v40 = vld [vmem:[#allocation14 + $0xf8] sm:$0xff] }
 0x8c2   :  { %v4414_v62 = vpop.f32.mrb[14].mxu0  ;;  %v4485_v46 = vpop.f32.mrb[14].mxu1 }
 0x8c3   :  { %v12254_v37 = vadd.f32 %v4414_v62, %v13682_v38  ;;  %v4416_v49 = vpop.f32.mrb[15].mxu0  ;;  %v4487_v39 = vpop.f32.mrb[15].mxu1  ;;  %v12270_v10 = vadd.f32 %v4485_v46, %v17103_v23  ;;  %v11058_v46 = vpack.c.bf16 %v4793_v8, %v4785_v36  ;;  %v4866_v36 = vld [vmem:[#allocation14 + $0x2a8] sm:$0xff]  ;;  %v17127_v8 = vld [vmem:[#allocation29_spill] sm:$0xff] }
 0x8c4   :  { %v12255_v4 = vadd.f32 %v4416_v49, %v17102_v15  ;;  %v12271_v0 = vadd.f32 %v4487_v39, %v17104_v60  ;;  %v4801_v49 = vld [vmem:[#allocation14 + $0xa0] sm:$0xff] }
 0x8c5   :  { %v9686_v55 = vmul.f32 -1.442695, %v12254_v37  ;;  %v9688_v11 = vmul.f32 -1.442695, %v12270_v10  ;;  %v11122_v37 = vpack.c.bf16 %v4795_v7, %v4787_v21  ;;  %v4809_v39 = vld [vmem:[#allocation14 + $0xe0] sm:$0xff]  ;;  %v4818_v10 = vld [vmem:[#allocation14 + $0x128] sm:$0xff] }
 0x8c6   :  { %v9687_v28 = vmul.f32 -1.442695, %v12255_v4  ;;  %v4811_v4 = vld [vmem:[#allocation14 + $0xf0] sm:$0xff]  ;;  %v4874_v21 = vld [vmem:[#allocation14 + $0x2e8] sm:$0xff]  ;;  %v4868_v7 = vld [vmem:[#allocation14 + $0x2b8] sm:$0xff] }
 0x8c7   :  { %12726 = vpow2.f32 %v9686_v55  ;;  %v11060_v55 = vpack.c.bf16 %v4810_v20, %v4802_v2  ;;  %v4865_v20 = vld [vmem:[#allocation14 + $0x2a0] sm:$0xff] }
 0x8c8   :  { %12728 = vpow2.f32 %v9687_v28  ;;  %v11124_v28 = vpack.c.bf16 %v4812_v40, %v4804_v16  ;;  %v17128_v16 = vld [vmem:[#allocation53_spill] sm:$0xff]  ;;  %v4873_v40 = vld [vmem:[#allocation14 + $0x2e0] sm:$0xff] }
 0x8c9   :  { %12730 = vtanh.f32 %v12271_v0  ;;  %v17123_v0 = vld [vmem:[#allocation42_spill] sm:$0xff] }
 0x8ca   :  { %12732 = vpow2.f32 %v9688_v11  ;;  %v4826_v11 = vld [vmem:[#allocation14 + $0x168] sm:$0xff] }
 0x8d1   :  { %v12727_v56 = vpop.eup %12726 }
 0x8d2   :  { %v4503_v44 = vadd.f32 1.0, %v12727_v56  ;;  %v12729_v17 = vpop.eup %12728  ;;  %v4820_v56 = vld [vmem:[#allocation14 + $0x138] sm:$0xff] }
 0x8d3   :  { %v4504_v38 = vadd.f32 1.0, %v12729_v17  ;;  %v12731_v50 = vpop.eup %12730  ;;  %v11062_v17 = vpack.c.bf16 %v4809_v39, %v4801_v49  ;;  %v11076_v49 = vpack.c.bf16 %v4874_v21, %v4866_v36 }
 0x8d4   :  { %12734 = vrcp.f32 %v4503_v44  ;;  %v12733_v3 = vpop.eup %12732  ;;  %v4828_v44 = vld [vmem:[#allocation14 + $0x178] sm:$0xff] }
 0x8d5   :  { %12736 = vrcp.f32 %v4504_v38  ;;  %v4505_v26 = vadd.f32 1.0, %v12733_v3  ;;  %v4825_v3 = vld [vmem:[#allocation14 + $0x160] sm:$0xff] }
 0x8d7   :  { %12738 = vrcp.f32 %v4505_v26  ;;  %v11128_v26 = vpack.c.bf16 %v4828_v44, %v4820_v56  ;;  %v4881_v44 = vld [vmem:[#allocation14 + $0x320] sm:$0xff] }
 0x8de   :  { %v12735_v15 = vpop.eup %12734 }
 0x8df   :  { %v4515_v1 = vmul.f32 %v12735_v15, %v12731_v50  ;;  %v12737_v24 = vpop.eup %12736  ;;  %v4817_v50 = vld [vmem:[#allocation14 + $0x120] sm:$0xff]  ;;  %v4819_v15 = vld [vmem:[#allocation14 + $0x130] sm:$0xff] }
 0x8e0   :  { %v4514_v27 = vmul.f32 %v12737_v24, %v14657_v43  ;;  %v11064_v24 = vpack.c.bf16 %v4826_v11, %v4818_v10  ;;  %v4892_v10 = vld [vmem:[#allocation14 + $0x378] sm:$0xff]  ;;  %v11078_v11 = vpack.c.bf16 %v4873_v40, %v4865_v20  ;;  %v4929_v40 = vld [vmem:[#allocation14 + $0x4a0] sm:$0xff] }
 0x8e1   :  { %v12739_v58 = vpop.eup %12738 }
 0x8e2   :  { %v4657_v23 = vpop.f32.mrb[16].mxu0  ;;  %v4728_v13 = vpop.f32.mrb[16].mxu1  ;;  %v4516_v60 = vadd.f32 %v4515_v1, %v4514_v27  ;;  %v4827_v1 = vld [vmem:[#allocation14 + $0x170] sm:$0xff]  ;;  %v4834_v27 = vld [vmem:[#allocation14 + $0x1a8] sm:$0xff] }
 0x8e3   :  { %v12272_v35 = vadd.f32 %v4657_v23, %v17106_v48  ;;  %v4659_v51 = vpop.f32.mrb[17].mxu0  ;;  %v4730_v31 = vpop.f32.mrb[17].mxu1  ;;  %v12288_v41 = vadd.f32 %v4728_v13, %v17108_v63  ;;  %v17124_v23 = vld [vmem:[#allocation26_spill] sm:$0xff]  ;;  %v4842_v13 = vld [vmem:[#allocation14 + $0x1e8] sm:$0xff] }
 0x8e4   :  { %v12273_v9 = vadd.f32 %v4659_v51, %v17107_v57  ;;  %12740 = vtanh.f32 %v4516_v60  ;;  %v12289_v43 = vadd.f32 %v4730_v31, %v17109_v32  ;;  %v4836_v60 = vld [vmem:[#allocation14 + $0x1b8] sm:$0xff]  ;;  %v11066_v51 = vpack.c.bf16 %v4825_v3, %v4817_v50  ;;  %v4883_v50 = vld [vmem:[#allocation14 + $0x330] sm:$0xff] }
 0x8e5   :  { %v9689_v33 = vmul.f32 -1.442695, %v12272_v35  ;;  %v9691_v29 = vmul.f32 -1.442695, %v12288_v41  ;;  %v4844_v35 = vld [vmem:[#allocation14 + $0x1f8] sm:$0xff]  ;;  %v11130_v31 = vpack.c.bf16 %v4827_v1, %v4819_v15  ;;  %v4843_v41 = vld [vmem:[#allocation14 + $0x1f0] sm:$0xff] }
 0x8e6   :  { %v9690_v45 = vmul.f32 -1.442695, %v12273_v9  ;;  %v4833_v9 = vld [vmem:[#allocation14 + $0x1a0] sm:$0xff]  ;;  %v4891_v3 = vld [vmem:[#allocation14 + $0x370] sm:$0xff] }
 0x8e7   :  { %12742 = vpow2.f32 %v9689_v33  ;;  %v4841_v33 = vld [vmem:[#allocation14 + $0x1e0] sm:$0xff] }
 0x8e8   :  { %12744 = vpow2.f32 %v9690_v45  ;;  %v4835_v45 = vld [vmem:[#allocation14 + $0x1b0] sm:$0xff] }
 0x8e9   :  { %12746 = vtanh.f32 %v12289_v43  ;;  %v11132_v43 = vpack.c.bf16 %v4844_v35, %v4836_v60  ;;  %v4908_v60 = vld [vmem:[#allocation14 + $0x3f8] sm:$0xff] }
 0x8ea   :  { %12748 = vpow2.f32 %v9691_v29  ;;  %v17125_v29 = vld [vmem:[#allocation25_spill] sm:$0xff] }
 0x8ee   :  { %v12741_v47 = vpop.eup %12740 }
 0x8ef   :  { %v14717_v25 = vmul.f32 %v12741_v47, %v12739_v58  ;;  %v11068_v58 = vpack.c.bf16 %v4842_v13, %v4834_v27  ;;  %v4850_v47 = vld [vmem:[#allocation14 + $0x228] sm:$0xff]  ;;  %v4900_v13 = vld [vmem:[#allocation14 + $0x3b8] sm:$0xff] }
 0x8f0   :  { %v4906_v27 = vld [vmem:[#allocation14 + $0x3e8] sm:$0xff] }
 0x8f1   :  { %v12743_v48 = vpop.eup %12742 }
 0x8f2   :  { %v4746_v6 = vadd.f32 1.0, %v12743_v48  ;;  %v12745_v30 = vpop.eup %12744  ;;  %v4858_v48 = vld [vmem:[#allocation14 + $0x268] sm:$0xff] }
 0x8f3   :  { %v4747_v57 = vadd.f32 1.0, %v12745_v30  ;;  %v12747_v53 = vpop.eup %12746  ;;  %v4860_v30 = vld [vmem:[#allocation14 + $0x278] sm:$0xff] }
 0x8f4   :  { %12750 = vrcp.f32 %v4746_v6  ;;  %v12749_v22 = vpop.eup %12748  ;;  %v4852_v6 = vld [vmem:[#allocation14 + $0x238] sm:$0xff] }
 0x8f5   :  { %12752 = vrcp.f32 %v4747_v57  ;;  %v4748_v34 = vadd.f32 1.0, %v12749_v22  ;;  %v11070_v57 = vpack.c.bf16 %v4841_v33, %v4833_v9  ;;  %v4849_v22 = vld [vmem:[#allocation14 + $0x220] sm:$0xff]  ;;  %v17132_v9 = vld [vmem:[#allocation49_spill] sm:$0xff] }
 0x8f6   :  { %v4905_v33 = vld [vmem:[#allocation14 + $0x3e0] sm:$0xff] }
 0x8f7   :  { %12754 = vrcp.f32 %v4748_v34  ;;  %v4859_v34 = vld [vmem:[#allocation14 + $0x270] sm:$0xff] }
 0x8fe   :  { %v12751_v14 = vpop.eup %12750 }
 0x8ff   :  { %v4758_v54 = vmul.f32 %v12751_v14, %v12747_v53  ;;  %v12753_v63 = vpop.eup %12752  ;;  %v11134_v53 = vpack.c.bf16 %v4843_v41, %v4835_v45  ;;  %v17126_v14 = vld [vmem:[#allocation30_spill] sm:$0xff]  ;;  %v4899_v45 = vld [vmem:[#allocation14 + $0x3b0] sm:$0xff] }
 0x900   :  { %v4757_v32 = vmul.f32 %v12753_v63, %v14687_v5  ;;  %v4803_v5 = vld [vmem:[#allocation14 + $0xb0] sm:$0xff] }
 0x901   :  { %v12755_v42 = vpop.eup %12754  ;;  %v11126_v38 = vpack.c.bf16 %v4811_v4, %v4803_v5  ;;  %v4851_v63 = vld [vmem:[#allocation14 + $0x230] sm:$0xff]  ;;  %v4882_v5 = vld [vmem:[#allocation14 + $0x328] sm:$0xff] }
 0x902   :  { %v4759_v12 = vadd.f32 %v4758_v54, %v4757_v32  ;;  %v4857_v54 = vld [vmem:[#allocation14 + $0x260] sm:$0xff]  ;;  %v11072_v32 = vpack.c.bf16 %v4858_v48, %v4850_v47  ;;  %v17129_v4 = vld [vmem:[#allocation28_spill] sm:$0xff]  ;;  %v4907_v41 = vld [vmem:[#allocation14 + $0x3f0] sm:$0xff] }
 0x903   :  { %v11074_v2 = vpack.c.bf16 %v4857_v54, %v4849_v22  ;;  %v4914_v47 = vld [vmem:[#allocation14 + $0x428] sm:$0xff]  ;;  %v4913_v22 = vld [vmem:[#allocation14 + $0x420] sm:$0xff] }
 0x904   :  { %12756 = vtanh.f32 %v4759_v12  ;;  %v11136_v12 = vpack.c.bf16 %v4860_v30, %v4852_v6  ;;  %v4922_v48 = vld [vmem:[#allocation14 + $0x468] sm:$0xff]  ;;  %v4916_v6 = vld [vmem:[#allocation14 + $0x438] sm:$0xff]  ;;  %v4921_v54 = vld [vmem:[#allocation14 + $0x460] sm:$0xff] }
 0x905   :  { %v4924_v30 = vld [vmem:[#allocation14 + $0x478] sm:$0xff]  ;;  %v11088_v36 = vpack.c.bf16 %v4922_v48, %v4914_v47  ;;  %v4978_v47 = vld [vmem:[#allocation14 + $0x628] sm:$0xff] }
 0x906   :  { %v11152_v21 = vpack.c.bf16 %v4924_v30, %v4916_v6  ;;  %v4986_v48 = vld [vmem:[#allocation14 + $0x668] sm:$0xff]  ;;  %v4980_v6 = vld [vmem:[#allocation14 + $0x638] sm:$0xff] }
 0x907   :  { %v4988_v30 = vld [vmem:[#allocation14 + $0x678] sm:$0xff] }
 0x90e   :  { %v12757_v52 = vpop.eup %12756 }
 0x90f   :  { %v14720_v62 = vmul.f32 %v12757_v52, %v12755_v42  ;;  %v4876_v42 = vld [vmem:[#allocation14 + $0x2f8] sm:$0xff]  ;;  %v11138_v52 = vpack.c.bf16 %v4859_v34, %v4851_v63  ;;  %v17133_v63 = vld [vmem:[#allocation24_spill] sm:$0xff]  ;;  %v4915_v34 = vld [vmem:[#allocation14 + $0x430] sm:$0xff] }
 0x910   :  { %v11140_v39 = vpack.c.bf16 %v4876_v42, %v4868_v7  ;;  %v4938_v7 = vld [vmem:[#allocation14 + $0x4e8] sm:$0xff]  ;;  %v4932_v42 = vld [vmem:[#allocation14 + $0x4b8] sm:$0xff] }
 0x911   :  { %5143 = vmatprep.mubr.f32.mxu0 %v14720_v62  ;;  %5256 = vmatprep.mubr.f32.mxu1 %v14720_v62 }
 0x912   :  { %5144 = vmatmul.mubr.f32.vlgmr.msra.gmra.mrb[32].mxu0 %v17123_v0  ;;  %5257 = vmatmul.mubr.f32.vlgmr.msra.gmra.mrb[32].mxu1 %v17123_v0 }
 0x913   :  { %11059 = vmatpush1.bf16.msra.mxu0 %v11058_v46  ;;  %11123 = vmatpush1.bf16.msra.mxu1 %v11122_v37  ;;  %v4867_v46 = vld [vmem:[#allocation14 + $0x2b0] sm:$0xff] }
 0x914   :  { %5149 = vmatprep.mubr.f32.mxu0 %v14704_v59  ;;  %5262 = vmatprep.mubr.f32.mxu1 %v14704_v59  ;;  %v4875_v37 = vld [vmem:[#allocation14 + $0x2f0] sm:$0xff] }
 0x915   :  { %11061 = vmatprep.subr.bf16.mxu0 %v11060_v55  ;;  %11125 = vmatprep.subr.bf16.mxu1 %v11124_v28  ;;  %v4890_v55 = vld [vmem:[#allocation14 + $0x368] sm:$0xff]  ;;  %v4884_v28 = vld [vmem:[#allocation14 + $0x338] sm:$0xff]  ;;  %v11142_v56 = vpack.c.bf16 %v4875_v37, %v4867_v46  ;;  %v4937_v46 = vld [vmem:[#allocation14 + $0x4e0] sm:$0xff] }
 0x916   :  { %5150 = vmatmul.mubr.f32.gmra.mrb[34].mxu0 %v17124_v23  ;;  %5263 = vmatmul.mubr.f32.gmra.mrb[34].mxu1 %v17124_v23  ;;  %v11080_v15 = vpack.c.bf16 %v4890_v55, %v4882_v5  ;;  %v11144_v1 = vpack.c.bf16 %v4892_v10, %v4884_v28  ;;  %v4939_v5 = vld [vmem:[#allocation14 + $0x4f0] sm:$0xff]  ;;  %v4946_v55 = vld [vmem:[#allocation14 + $0x528] sm:$0xff]  ;;  %v4948_v10 = vld [vmem:[#allocation14 + $0x538] sm:$0xff] }
 0x917   :  { %11063 = vmatpush1.bf16.msra.mxu0 %v11062_v17  ;;  %11127 = vmatpush1.bf16.msra.mxu1 %v11126_v38  ;;  %v17130_v17 = vld [vmem:[#allocation27_spill] sm:$0xff]  ;;  %v4954_v28 = vld [vmem:[#allocation14 + $0x568] sm:$0xff] }
 0x918   :  { %5155 = vmatprep.mubr.f32.mxu0 %v14612_v61  ;;  %5268 = vmatprep.mubr.f32.mxu1 %v14612_v61  ;;  %v4889_v38 = vld [vmem:[#allocation14 + $0x360] sm:$0xff] }
 0x919   :  { %11065 = vmatprep.subr.bf16.mxu0 %v11064_v24  ;;  %11129 = vmatprep.subr.bf16.mxu1 %v11128_v26  ;;  %v4898_v24 = vld [vmem:[#allocation14 + $0x3a8] sm:$0xff]  ;;  %v11082_v35 = vpack.c.bf16 %v4889_v38, %v4881_v44  ;;  %v4945_v38 = vld [vmem:[#allocation14 + $0x520] sm:$0xff] }
 0x91a   :  { %5156 = vmatmul.mubr.f32.gmra.mrb[36].mxu0 %v17125_v29  ;;  %5269 = vmatmul.mubr.f32.gmra.mrb[36].mxu1 %v17125_v29  ;;  %v17131_v26 = vld [vmem:[#allocation32_spill] sm:$0xff] }
 0x91b   :  { %11067 = vmatpush1.bf16.msra.mxu0 %v11066_v51  ;;  %11131 = vmatpush1.bf16.msra.mxu1 %v11130_v31  ;;  %v11146_v51 = vpack.c.bf16 %v4891_v3, %v4883_v50  ;;  %v4897_v31 = vld [vmem:[#allocation14 + $0x3a0] sm:$0xff]  ;;  %v11096_v3 = vpack.c.bf16 %v4954_v28, %v4946_v55  ;;  %v5010_v55 = vld [vmem:[#allocation14 + $0x728] sm:$0xff] }
 0x91c   :  { %5161 = vmatprep.mubr.f32.mxu0 %v17126_v14  ;;  %5274 = vmatprep.mubr.f32.mxu1 %v17126_v14  ;;  %v4953_v50 = vld [vmem:[#allocation14 + $0x560] sm:$0xff]  ;;  %v5018_v28 = vld [vmem:[#allocation14 + $0x768] sm:$0xff] }
 0x91d   :  { %11069 = vmatprep.subr.bf16.mxu0 %v11068_v58  ;;  %11133 = vmatprep.subr.bf16.mxu1 %v11132_v43  ;;  %v11084_v58 = vpack.c.bf16 %v4906_v27, %v4898_v24  ;;  %v11148_v43 = vpack.c.bf16 %v4908_v60, %v4900_v13  ;;  %v4962_v24 = vld [vmem:[#allocation14 + $0x5a8] sm:$0xff]  ;;  %v4964_v13 = vld [vmem:[#allocation14 + $0x5b8] sm:$0xff] }
 0x91e   :  { %5162 = vmatmul.mubr.f32.gmra.mrb[38].mxu0 %v17127_v8  ;;  %5275 = vmatmul.mubr.f32.gmra.mrb[38].mxu1 %v17127_v8  ;;  %v4970_v27 = vld [vmem:[#allocation14 + $0x5e8] sm:$0xff]  ;;  %v4972_v60 = vld [vmem:[#allocation14 + $0x5f8] sm:$0xff] }
 0x91f   :  { %11071 = vmatpush1.bf16.msra.mxu0 %v11070_v57  ;;  %11135 = vmatpush1.bf16.msra.mxu1 %v11134_v53  ;;  %v11086_v57 = vpack.c.bf16 %v4905_v33, %v4897_v31  ;;  %v11150_v53 = vpack.c.bf16 %v4907_v41, %v4899_v45  ;;  %v4961_v31 = vld [vmem:[#allocation14 + $0x5a0] sm:$0xff]  ;;  %v11100_v45 = vpack.c.bf16 %v4970_v27, %v4962_v24  ;;  %v5026_v24 = vld [vmem:[#allocation14 + $0x7a8] sm:$0xff] }
 0x920   :  { %5167 = vmatprep.mubr.f32.mxu0 %v17128_v16  ;;  %5280 = vmatprep.mubr.f32.mxu1 %v17128_v16  ;;  %v4969_v33 = vld [vmem:[#allocation14 + $0x5e0] sm:$0xff]  ;;  %v11164_v41 = vpack.c.bf16 %v4972_v60, %v4964_v13  ;;  %v5034_v27 = vld [vmem:[#allocation14 + $0x7e8] sm:$0xff]  ;;  %v5028_v13 = vld [vmem:[#allocation14 + $0x7b8] sm:$0xff] }
 0x921   :  { %11073 = vmatprep.subr.bf16.mxu0 %v11072_v32  ;;  %11137 = vmatprep.subr.bf16.mxu1 %v11136_v12  ;;  %v4923_v32 = vld [vmem:[#allocation14 + $0x470] sm:$0xff]  ;;  %v4930_v12 = vld [vmem:[#allocation14 + $0x4a8] sm:$0xff]  ;;  %v5036_v60 = vld [vmem:[#allocation14 + $0x7f8] sm:$0xff] }
 0x922   :  { %5168 = vmatmul.mubr.f32.gmra.mrb[40].mxu0 %v17129_v4  ;;  %5281 = vmatmul.mubr.f32.gmra.mrb[40].mxu1 %v17129_v4  ;;  %v11154_v20 = vpack.c.bf16 %v4923_v32, %v4915_v34  ;;  %v11092_v37 = vpack.c.bf16 %v4938_v7, %v4930_v12  ;;  %v11104_v34 = vpack.c.bf16 %v4986_v48, %v4978_v47  ;;  %v4979_v12 = vld [vmem:[#allocation14 + $0x630] sm:$0xff]  ;;  %v5002_v7 = vld [vmem:[#allocation14 + $0x6e8] sm:$0xff] }
 0x923   :  { %11075 = vmatpush1.bf16.msra.mxu0 %v11074_v2  ;;  %11139 = vmatpush1.bf16.msra.mxu1 %v11138_v52  ;;  %v4940_v2 = vld [vmem:[#allocation14 + $0x4f8] sm:$0xff]  ;;  %v11090_v52 = vpack.c.bf16 %v4921_v54, %v4913_v22  ;;  %v4977_v22 = vld [vmem:[#allocation14 + $0x620] sm:$0xff]  ;;  %v11168_v32 = vpack.c.bf16 %v4988_v30, %v4980_v6  ;;  %v5605_v47 = vld [vmem:[%s16776_s7 + $0x8] sm:$0xff] }
 0x924   :  { %5173 = vmatprep.mubr.f32.mxu0 %v17130_v17  ;;  %5286 = vmatprep.mubr.f32.mxu1 %v17130_v17  ;;  %v4985_v54 = vld [vmem:[#allocation14 + $0x660] sm:$0xff]  ;;  %v5609_v48 = vld [vmem:[%s16776_s7 + $0x28] sm:$0xff]  ;;  %v5607_v6 = vld [vmem:[%s16776_s7 + $0x18] sm:$0xff] }
 0x925   :  { %11077 = vmatprep.subr.bf16.mxu0 %v11076_v49  ;;  %11141 = vmatprep.subr.bf16.mxu1 %v11140_v39  ;;  %v11156_v49 = vpack.c.bf16 %v4940_v2, %v4932_v42  ;;  %v4931_v39 = vld [vmem:[#allocation14 + $0x4b0] sm:$0xff]  ;;  %v4996_v42 = vld [vmem:[#allocation14 + $0x6b8] sm:$0xff] }
 0x926   :  { %5174 = vmatmul.mubr.f32.gmra.mrb[42].mxu0 %v17131_v26  ;;  %5287 = vmatmul.mubr.f32.gmra.mrb[42].mxu1 %v17131_v26  ;;  %v11158_v44 = vpack.c.bf16 %v4939_v5, %v4931_v39  ;;  %v5004_v2 = vld [vmem:[#allocation14 + $0x6f8] sm:$0xff]  ;;  %v4995_v39 = vld [vmem:[#allocation14 + $0x6b0] sm:$0xff] }
 0x927   :  { %11079 = vmatpush1.bf16.msra.mxu0 %v11078_v11  ;;  %11143 = vmatpush1.bf16.msra.mxu1 %v11142_v56  ;;  %v4956_v11 = vld [vmem:[#allocation14 + $0x578] sm:$0xff]  ;;  %v11094_v56 = vpack.c.bf16 %v4937_v46, %v4929_v40  ;;  %v4993_v40 = vld [vmem:[#allocation14 + $0x6a0] sm:$0xff]  ;;  %v5003_v5 = vld [vmem:[#allocation14 + $0x6f0] sm:$0xff] }
 0x928   :  { %5179 = vmatprep.mubr.f32.mxu0 %v17132_v9  ;;  %5292 = vmatprep.mubr.f32.mxu1 %v17132_v9  ;;  %v5001_v46 = vld [vmem:[#allocation14 + $0x6e0] sm:$0xff]  ;;  %v5611_v30 = vld [vmem:[%s16776_s7 + $0x38] sm:$0xff] }
 0x929   :  { %11081 = vmatprep.subr.bf16.mxu0 %v11080_v15  ;;  %11145 = vmatprep.subr.bf16.mxu1 %v11144_v1  ;;  %v4947_v15 = vld [vmem:[#allocation14 + $0x530] sm:$0xff] }
 0x92a   :  { %5180 = vmatmul.mubr.f32.gmra.mrb[44].mxu0 %v14664_v18  ;;  %5293 = vmatmul.mubr.f32.gmra.mrb[44].mxu1 %v14664_v18  ;;  %v4955_v1 = vld [vmem:[#allocation14 + $0x570] sm:$0xff] }
 0x92b   :  { %11083 = vmatpush1.bf16.msra.mxu0 %v11082_v35  ;;  %11147 = vmatpush1.bf16.msra.mxu1 %v11146_v51  ;;  %v11098_v35 = vpack.c.bf16 %v4953_v50, %v4945_v38  ;;  %v11162_v51 = vpack.c.bf16 %v4955_v1, %v4947_v15  ;;  %v5009_v38 = vld [vmem:[#allocation14 + $0x720] sm:$0xff]  ;;  %v5011_v15 = vld [vmem:[#allocation14 + $0x730] sm:$0xff] }
 0x92c   :  { %5185 = vmatprep.mubr.f32.mxu0 %v17133_v63  ;;  %5298 = vmatprep.mubr.f32.mxu1 %v17133_v63  ;;  %v5017_v50 = vld [vmem:[#allocation14 + $0x760] sm:$0xff]  ;;  %v5019_v1 = vld [vmem:[#allocation14 + $0x770] sm:$0xff] }
 0x92d   :  { %11085 = vmatprep.subr.bf16.mxu0 %v11084_v58  ;;  %11149 = vmatprep.subr.bf16.mxu1 %v11148_v43  ;;  %v4963_v58 = vld [vmem:[#allocation14 + $0x5b0] sm:$0xff] }
 0x92e   :  { %5186 = vmatmul.mubr.f32.gmra.mrb[46].mxu0 %v14717_v25  ;;  %5299 = vmatmul.mubr.f32.gmra.mrb[46].mxu1 %v14717_v25  ;;  %v4971_v43 = vld [vmem:[#allocation14 + $0x5f0] sm:$0xff] }
 0x92f   :  { %11087 = vmatpush1.bf16.msra.mxu0 %v11086_v57  ;;  %11151 = vmatpush1.bf16.msra.mxu1 %v11150_v53  ;;  %v11102_v57 = vpack.c.bf16 %v4969_v33, %v4961_v31  ;;  %v11166_v53 = vpack.c.bf16 %v4971_v43, %v4963_v58  ;;  %v5025_v31 = vld [vmem:[#allocation14 + $0x7a0] sm:$0xff]  ;;  %v5027_v58 = vld [vmem:[#allocation14 + $0x7b0] sm:$0xff] }
 0x930   :  { %5369 = vmatprep.mubr.f32.mxu0 %v14720_v62  ;;  %5482 = vmatprep.mubr.f32.mxu1 %v14720_v62  ;;  %v11160_v62 = vpack.c.bf16 %v4956_v11, %v4948_v10  ;;  %v5012_v10 = vld [vmem:[#allocation14 + $0x738] sm:$0xff]  ;;  %v5033_v33 = vld [vmem:[#allocation14 + $0x7e0] sm:$0xff]  ;;  %v5035_v43 = vld [vmem:[#allocation14 + $0x7f0] sm:$0xff] }
 0x931   :  { %11089 = vmatprep.subr.bf16.mxu0 %v11088_v36  ;;  %11153 = vmatprep.subr.bf16.mxu1 %v11152_v21  ;;  %v4987_v36 = vld [vmem:[#allocation14 + $0x670] sm:$0xff]  ;;  %v4994_v21 = vld [vmem:[#allocation14 + $0x6a8] sm:$0xff]  ;;  %v5020_v11 = vld [vmem:[#allocation14 + $0x778] sm:$0xff] }
 0x933   :  { %11091 = vmatpush1.bf16.msra.mxu0 %v11090_v52  ;;  %11155 = vmatpush1.bf16.msra.mxu1 %v11154_v20  ;;  %v11106_v52 = vpack.c.bf16 %v4985_v54, %v4977_v22  ;;  %v11170_v20 = vpack.c.bf16 %v4987_v36, %v4979_v12  ;;  %v14768_v22 = vpack.c.bf16 %v5609_v48, %v5605_v47  ;;  %v5606_v12 = vld [vmem:[%s16776_s7 + $0x10] sm:$0xff]  ;;  %v5636_v48 = vld [vmem:[%s16776_s7 + $0x100] sm:$0xff] }
 0x934   :  { %11093 = vmatprep.subr.bf16.mxu0 %v11092_v37  ;;  %11157 = vmatprep.subr.bf16.mxu1 %v11156_v49  ;;  %v11108_v37 = vpack.c.bf16 %v5002_v7, %v4994_v21  ;;  %v11172_v49 = vpack.c.bf16 %v5004_v2, %v4996_v42  ;;  %v14770_v54 = vpack.c.bf16 %v5611_v30, %v5607_v6  ;;  %v5610_v36 = vld [vmem:[%s16776_s7 + $0x30] sm:$0xff]  ;;  %v5613_v21 = vld [vmem:[%s16776_s7 + $0x48] sm:$0xff]  ;;  %v5615_v42 = vld [vmem:[%s16776_s7 + $0x58] sm:$0xff] }
 0x935   :  { %v5617_v7 = vld [vmem:[%s16776_s7 + $0x68] sm:$0xff]  ;;  %v5619_v2 = vld [vmem:[%s16776_s7 + $0x78] sm:$0xff]  ;;  %v5640_v6 = vld [vmem:[%s16776_s7 + $0x120] sm:$0xff] }
 0x937   :  { %11095 = vmatpush1.bf16.msra.mxu0 %v11094_v56  ;;  %11159 = vmatpush1.bf16.msra.mxu1 %v11158_v44  ;;  %v11110_v56 = vpack.c.bf16 %v5001_v46, %v4993_v40  ;;  %v11174_v44 = vpack.c.bf16 %v5003_v5, %v4995_v39  ;;  %v5612_v40 = vld [vmem:[%s16776_s7 + $0x40] sm:$0xff]  ;;  %v5614_v39 = vld [vmem:[%s16776_s7 + $0x50] sm:$0xff] }
 0x938   :  { %11097 = vmatprep.subr.bf16.mxu0 %v11096_v3  ;;  %11161 = vmatprep.subr.bf16.mxu1 %v11160_v62  ;;  %v11112_v3 = vpack.c.bf16 %v5018_v28, %v5010_v55  ;;  %v11176_v62 = vpack.c.bf16 %v5020_v11, %v5012_v10  ;;  %v5616_v46 = vld [vmem:[%s16776_s7 + $0x60] sm:$0xff]  ;;  %v5618_v5 = vld [vmem:[%s16776_s7 + $0x70] sm:$0xff]  ;;  %v5621_v55 = vld [vmem:[%s16776_s7 + $0x88] sm:$0xff] }
 0x939   :  { %v5625_v28 = vld [vmem:[%s16776_s7 + $0xa8] sm:$0xff]  ;;  %v5623_v10 = vld [vmem:[%s16776_s7 + $0x98] sm:$0xff] }
 0x93a   :  { %v5627_v11 = vld [vmem:[%s16776_s7 + $0xb8] sm:$0xff] }
 0x93b   :  { %11099 = vmatpush1.bf16.msra.mxu0 %v11098_v35  ;;  %11163 = vmatpush1.bf16.msra.mxu1 %v11162_v51  ;;  %v11114_v35 = vpack.c.bf16 %v5017_v50, %v5009_v38  ;;  %v11178_v51 = vpack.c.bf16 %v5019_v1, %v5011_v15  ;;  %v5624_v38 = vld [vmem:[%s16776_s7 + $0xa0] sm:$0xff]  ;;  %v14850_v50 = vpack.c.bf16 %v5627_v11, %v5623_v10  ;;  %v5629_v15 = vld [vmem:[%s16776_s7 + $0xc8] sm:$0xff] }
 0x93c   :  { %11101 = vmatprep.subr.bf16.mxu0 %v11100_v45  ;;  %11165 = vmatprep.subr.bf16.mxu1 %v11164_v41  ;;  %v11116_v45 = vpack.c.bf16 %v5034_v27, %v5026_v24  ;;  %v11180_v41 = vpack.c.bf16 %v5036_v60, %v5028_v13  ;;  %v5633_v1 = vld [vmem:[%s16776_s7 + $0xe8] sm:$0xff]  ;;  %v5631_v24 = vld [vmem:[%s16776_s7 + $0xd8] sm:$0xff]  ;;  %v5628_v60 = vld [vmem:[%s16776_s7 + $0xc0] sm:$0xff] }
 0x93d   :  { %v5635_v27 = vld [vmem:[%s16776_s7 + $0xf8] sm:$0xff]  ;;  %v5652_v11 = vld [vmem:[%s16776_s7 + $0x180] sm:$0xff] }
 0x93f   :  { %11103 = vmatpush1.bf16.msra.mxu0 %v11102_v57  ;;  %11167 = vmatpush1.bf16.msra.mxu1 %v11166_v53  ;;  %v11118_v57 = vpack.c.bf16 %v5033_v33, %v5025_v31  ;;  %v11182_v53 = vpack.c.bf16 %v5035_v43, %v5027_v58  ;;  %v5630_v31 = vld [vmem:[%s16776_s7 + $0xd0] sm:$0xff]  ;;  %v5639_v58 = vld [vmem:[%s16776_s7 + $0x118] sm:$0xff] }
 0x940   :  { %11105 = vmatprep.subr.bf16.mxu0 %v11104_v34  ;;  %11169 = vmatprep.subr.bf16.mxu1 %v11168_v32  ;;  %v5604_v34 = vld [vmem:[%s16776_s7] sm:$0xff]  ;;  %v5634_v33 = vld [vmem:[%s16776_s7 + $0xf0] sm:$0xff]  ;;  %v5643_v43 = vld [vmem:[%s16776_s7 + $0x138] sm:$0xff] }
 0x941   :  { %v5608_v32 = vld [vmem:[%s16776_s7 + $0x20] sm:$0xff]  ;;  %v14918_v47 = vpack.c.bf16 %v5634_v33, %v5630_v31  ;;  %v14930_v30 = vpack.c.bf16 %v5643_v43, %v5639_v58  ;;  %v5850_v58 = vld [vmem:[#allocation17 + $0x8] sm:$0xff] }
 0x942   :  { %v5664_v31 = vld [vmem:[%s16776_s7 + $0x1e0] sm:$0xff]  ;;  %v5854_v43 = vld [vmem:[#allocation17 + $0x28] sm:$0xff] }
 0x943   :  { %11107 = vmatpush1.bf16.msra.mxu0 %v11106_v52  ;;  %11171 = vmatpush1.bf16.msra.mxu1 %v11170_v20  ;;  %v14798_v52 = vpack.c.bf16 %v5608_v32, %v5604_v34  ;;  %v14800_v20 = vpack.c.bf16 %v5610_v36, %v5606_v12  ;;  %v5645_v34 = vld [vmem:[%s16776_s7 + $0x148] sm:$0xff]  ;;  %v5647_v12 = vld [vmem:[%s16776_s7 + $0x158] sm:$0xff] }
 0x944   :  { %11109 = vmatprep.subr.bf16.mxu0 %v11108_v37  ;;  %11173 = vmatprep.subr.bf16.mxu1 %v11172_v49  ;;  %v14808_v37 = vpack.c.bf16 %v5617_v7, %v5613_v21  ;;  %v14810_v49 = vpack.c.bf16 %v5619_v2, %v5615_v42  ;;  %v5649_v32 = vld [vmem:[%s16776_s7 + $0x168] sm:$0xff]  ;;  %v5651_v36 = vld [vmem:[%s16776_s7 + $0x178] sm:$0xff]  ;;  %v5644_v7 = vld [vmem:[%s16776_s7 + $0x140] sm:$0xff] }
 0x945   :  { %v5648_v42 = vld [vmem:[%s16776_s7 + $0x160] sm:$0xff]  ;;  %v14970_v2 = vpack.c.bf16 %v5651_v36, %v5647_v12  ;;  %v5851_v36 = vld [vmem:[#allocation17 + $0x10] sm:$0xff] }
 0x947   :  { %11111 = vmatpush1.bf16.msra.mxu0 %v11110_v56  ;;  %11175 = vmatpush1.bf16.msra.mxu1 %v11174_v44  ;;  %v14838_v56 = vpack.c.bf16 %v5618_v5, %v5614_v39  ;;  %v5620_v44 = vld [vmem:[%s16776_s7 + $0x80] sm:$0xff]  ;;  %v5653_v39 = vld [vmem:[%s16776_s7 + $0x188] sm:$0xff] }
 0x948   :  { %11113 = vmatprep.subr.bf16.mxu0 %v11112_v3  ;;  %11177 = vmatprep.subr.bf16.mxu1 %v11176_v62  ;;  %v5622_v3 = vld [vmem:[%s16776_s7 + $0x90] sm:$0xff]  ;;  %v5657_v5 = vld [vmem:[%s16776_s7 + $0x1a8] sm:$0xff] }
 0x949   :  { %v5626_v62 = vld [vmem:[%s16776_s7 + $0xb0] sm:$0xff] }
 0x94a   :  { %v14878_v13 = vpack.c.bf16 %v5626_v62, %v5622_v3  ;;  %v5654_v3 = vld [vmem:[%s16776_s7 + $0x190] sm:$0xff] }
 0x94b   :  { %11115 = vmatpush1.bf16.msra.mxu0 %v11114_v35  ;;  %11179 = vmatpush1.bf16.msra.mxu1 %v11178_v51  ;;  %v5632_v35 = vld [vmem:[%s16776_s7 + $0xe0] sm:$0xff]  ;;  %v14890_v51 = vpack.c.bf16 %v5635_v27, %v5631_v24  ;;  %v5658_v62 = vld [vmem:[%s16776_s7 + $0x1b0] sm:$0xff]  ;;  %v5663_v24 = vld [vmem:[%s16776_s7 + $0x1d8] sm:$0xff] }
 0x94c   :  { %11117 = vmatprep.subr.bf16.mxu0 %v11116_v45  ;;  %11181 = vmatprep.subr.bf16.mxu1 %v11180_v41  ;;  %v5637_v45 = vld [vmem:[%s16776_s7 + $0x108] sm:$0xff]  ;;  %v5667_v27 = vld [vmem:[%s16776_s7 + $0x1f8] sm:$0xff] }
 0x94d   :  { %v5641_v41 = vld [vmem:[%s16776_s7 + $0x128] sm:$0xff]  ;;  %v15050_v33 = vpack.c.bf16 %v5667_v27, %v5663_v24  ;;  %v5872_v24 = vld [vmem:[#allocation17 + $0xb8] sm:$0xff] }
 0x94f   :  { %11119 = vmatpush1.bf16.msra.mxu0 %v11118_v57  ;;  %11183 = vmatpush1.bf16.msra.mxu1 %v11182_v53  ;;  %v5638_v57 = vld [vmem:[%s16776_s7 + $0x110] sm:$0xff] }
 0x950   :  { %11185 = vmatprep.subr.bf16.mxu0 %v14768_v22  ;;  %11217 = vmatprep.subr.bf16.mxu1 %v14770_v54  ;;  %v5642_v53 = vld [vmem:[%s16776_s7 + $0x130] sm:$0xff] }
 0x951   :  { %v14958_v21 = vpack.c.bf16 %v5642_v53, %v5638_v57 }
 0x952   :  { %5370 = vmatmul.mubr.f32.vlgmr.msra.gmra.mrb[48].mxu0 %v17123_v0  ;;  %5483 = vmatmul.mubr.f32.vlgmr.msra.gmra.mrb[48].mxu1 %v17123_v0  ;;  %v14836_v0 = vpack.c.bf16 %v5616_v46, %v5612_v40  ;;  %v5646_v40 = vld [vmem:[%s16776_s7 + $0x150] sm:$0xff] }
 0x953   :  { %5375 = vmatprep.mubr.f32.mxu0 %v14704_v59  ;;  %5488 = vmatprep.mubr.f32.mxu1 %v14704_v59  ;;  %v14848_v59 = vpack.c.bf16 %v5625_v28, %v5621_v55  ;;  %v5650_v46 = vld [vmem:[%s16776_s7 + $0x170] sm:$0xff]  ;;  %v5655_v55 = vld [vmem:[%s16776_s7 + $0x198] sm:$0xff] }
 0x954   :  { %11187 = vmatpush1.bf16.msra.mxu0 %v14798_v52  ;;  %11219 = vmatpush1.bf16.msra.mxu1 %v14800_v20  ;;  %v5659_v28 = vld [vmem:[%s16776_s7 + $0x1b8] sm:$0xff]  ;;  %v14998_v10 = vpack.c.bf16 %v5650_v46, %v5646_v40  ;;  %v5860_v40 = vld [vmem:[#allocation17 + $0x58] sm:$0xff] }
 0x955   :  { %11189 = vmatprep.subr.bf16.mxu0 %v14808_v37  ;;  %11221 = vmatprep.subr.bf16.mxu1 %v14810_v49  ;;  %v5864_v46 = vld [vmem:[#allocation17 + $0x78] sm:$0xff] }
 0x956   :  { %5376 = vmatmul.mubr.f32.gmra.mrb[50].mxu0 %v17124_v23  ;;  %5489 = vmatmul.mubr.f32.gmra.mrb[50].mxu1 %v17124_v23  ;;  %v14876_v23 = vpack.c.bf16 %v5624_v38, %v5620_v44  ;;  %v5656_v44 = vld [vmem:[%s16776_s7 + $0x1a0] sm:$0xff]  ;;  %v15010_v38 = vpack.c.bf16 %v5659_v28, %v5655_v55  ;;  %v5857_v55 = vld [vmem:[#allocation17 + $0x40] sm:$0xff] }
 0x957   :  { %5381 = vmatprep.mubr.f32.mxu0 %v14612_v61  ;;  %5494 = vmatprep.mubr.f32.mxu1 %v14612_v61  ;;  %v14888_v61 = vpack.c.bf16 %v5633_v1, %v5629_v15  ;;  %v5661_v15 = vld [vmem:[%s16776_s7 + $0x1c8] sm:$0xff] }
 0x958   :  { %11191 = vmatpush1.bf16.msra.mxu0 %v14836_v0  ;;  %11223 = vmatpush1.bf16.msra.mxu1 %v14838_v56  ;;  %v5665_v1 = vld [vmem:[%s16776_s7 + $0x1e8] sm:$0xff] }
 0x959   :  { %11193 = vmatprep.subr.bf16.mxu0 %v14848_v59  ;;  %11225 = vmatprep.subr.bf16.mxu1 %v14850_v50  ;;  %v5861_v28 = vld [vmem:[#allocation17 + $0x60] sm:$0xff] }
 0x95a   :  { %5382 = vmatmul.mubr.f32.gmra.mrb[52].mxu0 %v17125_v29  ;;  %5495 = vmatmul.mubr.f32.gmra.mrb[52].mxu1 %v17125_v29  ;;  %v14916_v29 = vpack.c.bf16 %v5632_v35, %v5628_v60  ;;  %v15038_v60 = vpack.c.bf16 %v5658_v62, %v5654_v3  ;;  %v5660_v35 = vld [vmem:[%s16776_s7 + $0x1c0] sm:$0xff]  ;;  %v5863_v3 = vld [vmem:[#allocation17 + $0x70] sm:$0xff]  ;;  %v5866_v62 = vld [vmem:[#allocation17 + $0x88] sm:$0xff]  ;;  %v15094_v27 = vpack.c.bf16 %v5861_v28, %v5857_v55 }
 0x95b   :  { %5387 = vmatprep.mubr.f32.mxu0 %v17126_v14  ;;  %5500 = vmatprep.mubr.f32.mxu1 %v17126_v14  ;;  %v14928_v14 = vpack.c.bf16 %v5641_v41, %v5637_v45  ;;  %v5662_v45 = vld [vmem:[%s16776_s7 + $0x1d0] sm:$0xff]  ;;  %v15064_v57 = vpack.c.bf16 %v5664_v31, %v5660_v35  ;;  %v5865_v31 = vld [vmem:[#allocation17 + $0x80] sm:$0xff]  ;;  %v5875_v28 = vld [vmem:[#allocation17 + $0xd0] sm:$0xff] }
 0x95c   :  { %11195 = vmatpush1.bf16.msra.mxu0 %v14876_v23  ;;  %11227 = vmatpush1.bf16.msra.mxu1 %v14878_v13  ;;  %v5666_v41 = vld [vmem:[%s16776_s7 + $0x1f0] sm:$0xff] }
 0x95d   :  { %11197 = vmatprep.subr.bf16.mxu0 %v14888_v61  ;;  %11229 = vmatprep.subr.bf16.mxu1 %v14890_v51  ;;  %v15066_v53 = vpack.c.bf16 %v5666_v41, %v5662_v45  ;;  %v5869_v45 = vld [vmem:[#allocation17 + $0xa0] sm:$0xff] }
 0x95e   :  { %5388 = vmatmul.mubr.f32.gmra.mrb[54].mxu0 %v17127_v8  ;;  %5501 = vmatmul.mubr.f32.gmra.mrb[54].mxu1 %v17127_v8  ;;  %v14956_v8 = vpack.c.bf16 %v5640_v6, %v5636_v48  ;;  %v5852_v48 = vld [vmem:[#allocation17 + $0x18] sm:$0xff] }
 0x95f   :  { %5393 = vmatprep.mubr.f32.mxu0 %v17128_v16  ;;  %5506 = vmatprep.mubr.f32.mxu1 %v17128_v16  ;;  %v14968_v16 = vpack.c.bf16 %v5649_v32, %v5645_v34  ;;  %v5856_v6 = vld [vmem:[#allocation17 + $0x38] sm:$0xff]  ;;  %v5849_v34 = vld [vmem:[#allocation17] sm:$0xff] }
 0x960   :  { %11199 = vmatpush1.bf16.msra.mxu0 %v14916_v29  ;;  %11231 = vmatpush1.bf16.msra.mxu1 %v14918_v47  ;;  %v5853_v32 = vld [vmem:[#allocation17 + $0x20] sm:$0xff]  ;;  %v15072_v12 = vpack.c.bf16 %v5856_v6, %v5852_v48  ;;  %v5871_v48 = vld [vmem:[#allocation17 + $0xb0] sm:$0xff]  ;;  %v5874_v6 = vld [vmem:[#allocation17 + $0xc8] sm:$0xff] }
 0x961   :  { %11201 = vmatprep.subr.bf16.mxu0 %v14928_v14  ;;  %11233 = vmatprep.subr.bf16.mxu1 %v14930_v30 }
 0x962   :  { %5394 = vmatmul.mubr.f32.gmra.mrb[56].mxu0 %v17129_v4  ;;  %5507 = vmatmul.mubr.f32.gmra.mrb[56].mxu1 %v17129_v4  ;;  %v14996_v4 = vpack.c.bf16 %v5648_v42, %v5644_v7  ;;  %v5858_v7 = vld [vmem:[#allocation17 + $0x48] sm:$0xff] }
 0x963   :  { %5399 = vmatprep.mubr.f32.mxu0 %v17130_v17  ;;  %5512 = vmatprep.mubr.f32.mxu1 %v17130_v17  ;;  %v15008_v17 = vpack.c.bf16 %v5657_v5, %v5653_v39  ;;  %v5862_v42 = vld [vmem:[#allocation17 + $0x68] sm:$0xff]  ;;  %v15080_v39 = vpack.c.bf16 %v5853_v32, %v5849_v34  ;;  %v5876_v32 = vld [vmem:[#allocation17 + $0xd8] sm:$0xff] }
 0x964   :  { %11203 = vmatpush1.bf16.msra.mxu0 %v14956_v8  ;;  %11235 = vmatpush1.bf16.msra.mxu1 %v14958_v21  ;;  %v5878_v34 = vld [vmem:[#allocation17 + $0xe8] sm:$0xff] }
 0x965   :  { %11205 = vmatprep.subr.bf16.mxu0 %v14968_v16  ;;  %11237 = vmatprep.subr.bf16.mxu1 %v14970_v2 }
 0x966   :  { %5400 = vmatmul.mubr.f32.gmra.mrb[58].mxu0 %v17131_v26  ;;  %5513 = vmatmul.mubr.f32.gmra.mrb[58].mxu1 %v17131_v26  ;;  %v15036_v26 = vpack.c.bf16 %v5656_v44, %v5652_v11  ;;  %v15088_v11 = vpack.c.bf16 %v5864_v46, %v5860_v40  ;;  %v5859_v44 = vld [vmem:[#allocation17 + $0x50] sm:$0xff]  ;;  %v5877_v40 = vld [vmem:[#allocation17 + $0xe0] sm:$0xff]  ;;  %v15114_v46 = vpack.c.bf16 %v5878_v34, %v5874_v6 }
 0x967   :  { %5405 = vmatprep.mubr.f32.mxu0 %v17132_v9  ;;  %5518 = vmatprep.mubr.f32.mxu1 %v17132_v9  ;;  %v15048_v9 = vpack.c.bf16 %v5665_v1, %v5661_v15  ;;  %v5870_v15 = vld [vmem:[#allocation17 + $0xa8] sm:$0xff]  ;;  %v5868_v1 = vld [vmem:[#allocation17 + $0x98] sm:$0xff]  ;;  %v15096_v35 = vpack.c.bf16 %v5863_v3, %v5859_v44  ;;  %v5879_v44 = vld [vmem:[#allocation17 + $0xf0] sm:$0xff] }
 0x968   :  { %11207 = vmatpush1.bf16.msra.mxu0 %v14996_v4  ;;  %11239 = vmatpush1.bf16.msra.mxu1 %v14998_v10  ;;  %v15100_v41 = vpack.c.bf16 %v5870_v15, %v5866_v62  ;;  %17137 = vst [vmem:[#allocation31_spill] sm:$0xff] %v15114_v46  ;;  %v5882_v3 = vld [vmem:[#allocation17 + $0x108] sm:$0xff]  ;;  %v5884_v15 = vld [vmem:[#allocation17 + $0x118] sm:$0xff]  ;;  %v5883_v34 = vld [vmem:[#allocation17 + $0x110] sm:$0xff] }
 0x969   :  { %11209 = vmatprep.subr.bf16.mxu0 %v15008_v17  ;;  %11241 = vmatprep.subr.bf16.mxu1 %v15010_v38  ;;  %v5886_v62 = vld [vmem:[#allocation17 + $0x128] sm:$0xff] }
 0x96a   :  { %5406 = vmatmul.mubr.f32.gmra.mrb[60].mxu0 %v14664_v18  ;;  %5519 = vmatmul.mubr.f32.gmra.mrb[60].mxu1 %v14664_v18  ;;  %v15070_v18 = vpack.c.bf16 %v5854_v43, %v5850_v58  ;;  %v15102_v58 = vpack.c.bf16 %v5872_v24, %v5868_v1  ;;  %v5867_v43 = vld [vmem:[#allocation17 + $0x90] sm:$0xff]  ;;  %v5888_v1 = vld [vmem:[#allocation17 + $0x138] sm:$0xff] }
 0x96b   :  { %5411 = vmatprep.mubr.f32.mxu0 %v17133_v63  ;;  %5524 = vmatprep.mubr.f32.mxu1 %v17133_v63  ;;  %v5855_v63 = vld [vmem:[#allocation17 + $0x30] sm:$0xff]  ;;  %v15128_v6 = vpack.c.bf16 %v5888_v1, %v5884_v15 }
 0x96c   :  { %11211 = vmatpush1.bf16.msra.mxu0 %v15036_v26  ;;  %11243 = vmatpush1.bf16.msra.mxu1 %v15038_v60  ;;  %v15082_v5 = vpack.c.bf16 %v5855_v63, %v5851_v36  ;;  %17134 = vst [vmem:[#allocation35_spill] sm:$0xff] %v15102_v58  ;;  %v5880_v36 = vld [vmem:[#allocation17 + $0xf8] sm:$0xff]  ;;  %v15108_v63 = vpack.c.bf16 %v5869_v45, %v5865_v31  ;;  %v5881_v45 = vld [vmem:[#allocation17 + $0x100] sm:$0xff]  ;;  %v5891_v15 = vld [vmem:[#allocation17 + $0x150] sm:$0xff] }
 0x96d   :  { %11213 = vmatprep.subr.bf16.mxu0 %v15048_v9  ;;  %11245 = vmatprep.subr.bf16.mxu1 %v15050_v33  ;;  %v15116_v55 = vpack.c.bf16 %v5880_v36, %v5876_v32  ;;  %v15122_v31 = vpack.c.bf16 %v5879_v44, %v5875_v28  ;;  %17142 = vst [vmem:[#allocation33_spill] sm:$0xff] %v15128_v6  ;;  %v5887_v32 = vld [vmem:[#allocation17 + $0x130] sm:$0xff]  ;;  %v5890_v36 = vld [vmem:[#allocation17 + $0x148] sm:$0xff]  ;;  %v5889_v28 = vld [vmem:[#allocation17 + $0x140] sm:$0xff] }
 0x96e   :  { %5412 = vmatmul.mubr.f32.gmra.mrb[62].mxu0 %v14717_v25  ;;  %5525 = vmatmul.mubr.f32.gmra.mrb[62].mxu1 %v14717_v25  ;;  %v15086_v25 = vpack.c.bf16 %v5862_v42, %v5858_v7  ;;  %17135 = vst [vmem:[#allocation36_spill] sm:$0xff] %v15108_v63  ;;  %v15110_v7 = vpack.c.bf16 %v5871_v48, %v5867_v43  ;;  %v5873_v42 = vld [vmem:[#allocation17 + $0xc0] sm:$0xff]  ;;  %v5895_v1 = vld [vmem:[#allocation17 + $0x170] sm:$0xff] }
 0x96f   :  { %5732 = vmatprep.mubr.f32.mxu0 %v16988_v19  ;;  %5803 = vmatprep.mubr.f32.mxu1 %v16988_v19  ;;  %17138 = vst [vmem:[#allocation38_spill] sm:$0xff] %v15116_v55  ;;  %v15120_v24 = vpack.c.bf16 %v5877_v40, %v5873_v42  ;;  %17140 = vst [vmem:[#allocation40_spill] sm:$0xff] %v15122_v31  ;;  %v5885_v43 = vld [vmem:[#allocation17 + $0x120] sm:$0xff]  ;;  %v15126_v48 = vpack.c.bf16 %v5886_v62, %v5882_v3 }
 0x970   :  { %11215 = vmatpush1.bf16.msra.mxu0 %v15064_v57  ;;  %11247 = vmatpush1.bf16.msra.mxu1 %v15066_v53  ;;  %17136 = vst [vmem:[#allocation37_spill] sm:$0xff] %v15110_v7  ;;  %v15132_v42 = vpack.c.bf16 %v5885_v43, %v5881_v45  ;;  %v15134_v40 = vpack.c.bf16 %v5887_v32, %v5883_v34  ;;  %v5893_v44 = vld [vmem:[#allocation17 + $0x160] sm:$0xff] }
 0x971   :  { %11249 = vmatprep.subr.bf16.mxu0 %v15070_v18  ;;  %11281 = vmatprep.subr.bf16.mxu1 %v15072_v12  ;;  %17139 = vst [vmem:[#allocation39_spill] sm:$0xff] %v15120_v24  ;;  %17141 = vst [vmem:[#allocation41_spill] sm:$0xff] %v15126_v48  ;;  %v15144_v45 = vpack.c.bf16 %v5893_v44, %v5889_v28  ;;  %v15146_v43 = vpack.c.bf16 %v5895_v1, %v5891_v15  ;;  %v5897_v34 = vld [vmem:[#allocation17 + $0x180] sm:$0xff]  ;;  %v5911_v1 = vld [vmem:[#allocation17 + $0x1f0] sm:$0xff] }
 0x972   :  { %17143 = vst [vmem:[#allocation43_spill] sm:$0xff] %v15132_v42  ;;  %17144 = vst [vmem:[#allocation44_spill] sm:$0xff] %v15134_v40  ;;  %v5901_v32 = vld [vmem:[#allocation17 + $0x1a0] sm:$0xff] }
 0x973   :  { %5733 = vmatmul.mubr.f32.vlgmr.msra.gmra.mrb[32].mxu0 %v16988_v19  ;;  %5804 = vmatmul.mubr.f32.vlgmr.msra.gmra.mrb[32].mxu1 %v16988_v19  ;;  %v15156_v28 = vpack.c.bf16 %v5901_v32, %v5897_v34  ;;  %v5905_v15 = vld [vmem:[#allocation17 + $0x1c0] sm:$0xff] }
 0x974   :  { %11251 = vmatpush1.bf16.msra.mxu0 %v15080_v39  ;;  %11283 = vmatpush1.bf16.msra.mxu1 %v15082_v5 }
 0x975   :  { %11253 = vmatprep.subr.bf16.mxu0 %v15086_v25  ;;  %11285 = vmatprep.subr.bf16.mxu1 %v15088_v11 }
 0x976   :  { %5977 = vmatprep.mubr.f32.mxu0 %v16988_v19  ;;  %6048 = vmatprep.mubr.f32.mxu1 %v16988_v19 }
 0x978   :  { %11255 = vmatpush1.bf16.msra.mxu0 %v15094_v27  ;;  %11287 = vmatpush1.bf16.msra.mxu1 %v15096_v35 }
 0x979   :  { %11257 = vmatprep.subr.bf16.mxu0 %v15100_v41  ;;  %11289 = vmatprep.subr.bf16.mxu1 %v15102_v58  ;;  %v5892_v58 = vld [vmem:[#allocation17 + $0x158] sm:$0xff] }
 0x97c   :  { %11259 = vmatpush1.bf16.msra.mxu0 %v15108_v63  ;;  %11291 = vmatpush1.bf16.msra.mxu1 %v15110_v7  ;;  %v5894_v63 = vld [vmem:[#allocation17 + $0x168] sm:$0xff]  ;;  %v5896_v7 = vld [vmem:[#allocation17 + $0x178] sm:$0xff] }
 0x97d   :  { %11261 = vmatprep.subr.bf16.mxu0 %v15114_v46  ;;  %11293 = vmatprep.subr.bf16.mxu1 %v15116_v55  ;;  %v15138_v3 = vpack.c.bf16 %v5894_v63, %v5890_v36  ;;  %v15140_v62 = vpack.c.bf16 %v5896_v7, %v5892_v58  ;;  %v5898_v55 = vld [vmem:[#allocation17 + $0x188] sm:$0xff]  ;;  %v5900_v46 = vld [vmem:[#allocation17 + $0x198] sm:$0xff]  ;;  %v5899_v7 = vld [vmem:[#allocation17 + $0x190] sm:$0xff] }
 0x97e   :  { %v5903_v36 = vld [vmem:[#allocation17 + $0x1b0] sm:$0xff] }
 0x97f   :  { %v15158_v44 = vpack.c.bf16 %v5903_v36, %v5899_v7 }
 0x980   :  { %11263 = vmatpush1.bf16.msra.mxu0 %v15120_v24  ;;  %11295 = vmatpush1.bf16.msra.mxu1 %v15122_v31  ;;  %v5902_v24 = vld [vmem:[#allocation17 + $0x1a8] sm:$0xff]  ;;  %v5904_v31 = vld [vmem:[#allocation17 + $0x1b8] sm:$0xff] }
 0x981   :  { %11265 = vmatprep.subr.bf16.mxu0 %v15126_v48  ;;  %11297 = vmatprep.subr.bf16.mxu1 %v15128_v6  ;;  %v15150_v58 = vpack.c.bf16 %v5902_v24, %v5898_v55  ;;  %v15152_v63 = vpack.c.bf16 %v5904_v31, %v5900_v46  ;;  %v5906_v6 = vld [vmem:[#allocation17 + $0x1c8] sm:$0xff]  ;;  %v5908_v48 = vld [vmem:[#allocation17 + $0x1d8] sm:$0xff]  ;;  %v5909_v24 = vld [vmem:[#allocation17 + $0x1e0] sm:$0xff] }
 0x982   :  { %v5907_v31 = vld [vmem:[#allocation17 + $0x1d0] sm:$0xff]  ;;  %v15168_v34 = vpack.c.bf16 %v5909_v24, %v5905_v15 }
 0x983   :  { %v15170_v32 = vpack.c.bf16 %v5911_v1, %v5907_v31 }
 0x984   :  { %11267 = vmatpush1.bf16.msra.mxu0 %v15132_v42  ;;  %11299 = vmatpush1.bf16.msra.mxu1 %v15134_v40  ;;  %v5910_v42 = vld [vmem:[#allocation17 + $0x1e8] sm:$0xff]  ;;  %v5912_v40 = vld [vmem:[#allocation17 + $0x1f8] sm:$0xff] }
 0x985   :  { %11269 = vmatprep.subr.bf16.mxu0 %v15138_v3  ;;  %11301 = vmatprep.subr.bf16.mxu1 %v15140_v62  ;;  %v15162_v46 = vpack.c.bf16 %v5910_v42, %v5906_v6  ;;  %v15164_v55 = vpack.c.bf16 %v5912_v40, %v5908_v48 }
 0x988   :  { %11271 = vmatpush1.bf16.msra.mxu0 %v15144_v45  ;;  %11303 = vmatpush1.bf16.msra.mxu1 %v15146_v43 }
 0x989   :  { %11273 = vmatprep.subr.bf16.mxu0 %v15150_v58  ;;  %11305 = vmatprep.subr.bf16.mxu1 %v15152_v63 }
 0x98c   :  { %11275 = vmatpush1.bf16.msra.mxu0 %v15156_v28  ;;  %11307 = vmatpush1.bf16.msra.mxu1 %v15158_v44 }
 0x98d   :  { %11277 = vmatprep.subr.bf16.mxu0 %v15162_v46  ;;  %11309 = vmatprep.subr.bf16.mxu1 %v15164_v55 }
 0x990   :  { %11279 = vmatpush1.bf16.msra.mxu0 %v15168_v34  ;;  %11311 = vmatpush1.bf16.msra.mxu1 %v15170_v32 }
 0x991   :  { %11313 = vmatprep.subr.bf16.mxu0 %v14768_v22  ;;  %11345 = vmatprep.subr.bf16.mxu1 %v14770_v54 }
 0x993   :  { %5978 = vmatmul.mubr.f32.vlgmr.msra.gmra.mrb[62].mxu0 %v16988_v19  ;;  %6049 = vmatmul.mubr.f32.vlgmr.msra.gmra.mrb[62].mxu1 %v16988_v19 }
 0x994   :  { %11315 = vmatpush1.bf16.msra.mxu0 %v14798_v52  ;;  %11347 = vmatpush1.bf16.msra.mxu1 %v14800_v20 }
 0x995   :  { %11317 = vmatprep.subr.bf16.mxu0 %v14808_v37  ;;  %11349 = vmatprep.subr.bf16.mxu1 %v14810_v49  ;;  %v5037_v37 = vld [vmem:[#allocation16] sm:$0xff]  ;;  %v17145_v49 = vld [vmem:[#allocation34_spill] sm:$0xff] }
 0x996   :  { %6222 = vmatprep.mubr.f32.mxu0 %v16988_v19  ;;  %6293 = vmatprep.mubr.f32.mxu1 %v16988_v19  ;;  %v17156_v40 = vsub.s32 5, %v17145_v49 }
 0x998   :  { %11319 = vmatpush1.bf16.msra.mxu0 %v14836_v0  ;;  %11351 = vmatpush1.bf16.msra.mxu1 %v14838_v56  ;;  %v17146_v0 = vsub.s32 0, %v17145_v49  ;;  %v15240_v7 = vrot.slane %v5037_v37, %v17156_v40  ;;  %v6590_v40 = vld [vmem:[%s16776_s7 + $0x30] sm:$0xff] }
 0x999   :  { %11321 = vmatprep.subr.bf16.mxu0 %v14848_v59  ;;  %11353 = vmatprep.subr.bf16.mxu1 %v14850_v50  ;;  %v17148_v59 = vsub.s32 1, %v17145_v49 }
 0x99a   :  { %v15216_v56 = vrot.slane %v5037_v37, %v17146_v0  ;;  %17157 = vst [vmem:[#allocation51_spill] sm:$0xff] %v15240_v7 }
 0x99b   :  { %v15220_v50 = vrot.slane %v5037_v37, %v17148_v59  ;;  %v17158_v59 = vsub.s32 6, %v17145_v49 }
 0x99c   :  { %11323 = vmatpush1.bf16.msra.mxu0 %v14876_v23  ;;  %11355 = vmatpush1.bf16.msra.mxu1 %v14878_v13  ;;  %17147 = vst [vmem:[#allocation45_spill] sm:$0xff] %v15216_v56 }
 0x99d   :  { %11325 = vmatprep.subr.bf16.mxu0 %v14888_v61  ;;  %11357 = vmatprep.subr.bf16.mxu1 %v14890_v51  ;;  %17149 = vst [vmem:[#allocation46_spill] sm:$0xff] %v15220_v50 }
 0x9a0   :  { %11327 = vmatpush1.bf16.msra.mxu0 %v14916_v29  ;;  %11359 = vmatpush1.bf16.msra.mxu1 %v14918_v47 }
 0x9a1   :  { %11329 = vmatprep.subr.bf16.mxu0 %v14928_v14  ;;  %11361 = vmatprep.subr.bf16.mxu1 %v14930_v30 }
 0x9a4   :  { %11331 = vmatpush1.bf16.msra.mxu0 %v14956_v8  ;;  %11363 = vmatpush1.bf16.msra.mxu1 %v14958_v21  ;;  %v17150_v8 = vsub.s32 2, %v17145_v49 }
 0x9a5   :  { %11333 = vmatprep.subr.bf16.mxu0 %v14968_v16  ;;  %11365 = vmatprep.subr.bf16.mxu1 %v14970_v2  ;;  %v17152_v16 = vsub.s32 3, %v17145_v49 }
 0x9a6   :  { %v15226_v21 = vrot.slane %v5037_v37, %v17150_v8 }
 0x9a7   :  { %v15230_v2 = vrot.slane %v5037_v37, %v17152_v16 }
 0x9a8   :  { %11335 = vmatpush1.bf16.msra.mxu0 %v14996_v4  ;;  %11367 = vmatpush1.bf16.msra.mxu1 %v14998_v10  ;;  %17151 = vst [vmem:[#allocation47_spill] sm:$0xff] %v15226_v21 }
 0x9a9   :  { %11337 = vmatprep.subr.bf16.mxu0 %v15008_v17  ;;  %11369 = vmatprep.subr.bf16.mxu1 %v15010_v38  ;;  %17153 = vst [vmem:[#allocation48_spill] sm:$0xff] %v15230_v2 }
 0x9ac   :  { %11339 = vmatpush1.bf16.msra.mxu0 %v15036_v26  ;;  %11371 = vmatpush1.bf16.msra.mxu1 %v15038_v60 }
 0x9ad   :  { %11341 = vmatprep.subr.bf16.mxu0 %v15048_v9  ;;  %11373 = vmatprep.subr.bf16.mxu1 %v15050_v33 }
 0x9b0   :  { %11343 = vmatpush1.bf16.msra.mxu0 %v15064_v57  ;;  %11375 = vmatpush1.bf16.msra.mxu1 %v15066_v53 }
 0x9b1   :  { %11377 = vmatprep.subr.bf16.mxu0 %v15070_v18  ;;  %11409 = vmatprep.subr.bf16.mxu1 %v15072_v12  ;;  %v17154_v12 = vsub.s32 4, %v17145_v49 }
 0x9b3   :  { %v15236_v48 = vrot.slane %v5037_v37, %v17154_v12  ;;  %v17171_v12 = vld [vmem:[#allocation43_spill] sm:$0xff] }
 0x9b5   :  { %17155 = vst [vmem:[#allocation50_spill] sm:$0xff] %v15236_v48 }
 0xa25   :  { %v5371_v22 = vpop.f32.mrb[48].mxu0  ;;  %v5484_v54 = vpop.f32.mrb[48].mxu1 }
 0xa26   :  { %v5373_v52 = vpop.f32.mrb[49].mxu0  ;;  %v5486_v20 = vpop.f32.mrb[49].mxu1 }
 0xa46   :  { %v5734_v23 = vpop.f32.mrb[32].mxu0  ;;  %v5805_v13 = vpop.f32.mrb[32].mxu1 }
 0xa47   :  { %v12304_v61 = vadd.f32 %v5734_v23, %v15216_v56  ;;  %v5736_v51 = vpop.f32.mrb[33].mxu0  ;;  %v5807_v29 = vpop.f32.mrb[33].mxu1  ;;  %v12320_v4 = vadd.f32 %v5805_v13, %v15226_v21  ;;  %v15249_v23 = vrot.slane %v5037_v37, %v17158_v59  ;;  %v17160_v13 = vsub.s32 7, %v17145_v49  ;;  %v17164_v49 = vld [vmem:[#allocation37_spill] sm:$0xff] }
 0xa48   :  { %v12305_v47 = vadd.f32 %v5736_v51, %v15220_v50  ;;  %v12321_v10 = vadd.f32 %v5807_v29, %v15230_v2 }
 0xa49   :  { %v9692_v14 = vmul.f32 -1.442695, %v12304_v61  ;;  %v9694_v17 = vmul.f32 -1.442695, %v12320_v4  ;;  %17159 = vst [vmem:[#allocation52_spill] sm:$0xff] %v15249_v23  ;;  %v15253_v61 = vrot.slane %v5037_v37, %v17160_v13  ;;  %v6594_v13 = vld [vmem:[%s16776_s7 + $0x50] sm:$0xff] }
 0xa4a   :  { %v9693_v30 = vmul.f32 -1.442695, %v12305_v47 }
 0xa4b   :  { %12758 = vpow2.f32 %v9692_v14  ;;  %17161 = vst [vmem:[#allocation54_spill] sm:$0xff] %v15253_v61 }
 0xa4c   :  { %12760 = vpow2.f32 %v9693_v30 }
 0xa4d   :  { %12762 = vtanh.f32 %v12321_v10 }
 0xa4e   :  { %12764 = vpow2.f32 %v9694_v17  ;;  %v17165_v17 = vld [vmem:[#allocation31_spill] sm:$0xff] }
 0xa55   :  { %v12759_v38 = vpop.eup %12758 }
 0xa56   :  { %v5823_v26 = vadd.f32 1.0, %v12759_v38  ;;  %v12761_v60 = vpop.eup %12760 }
 0xa57   :  { %v5824_v9 = vadd.f32 1.0, %v12761_v60  ;;  %v12763_v33 = vpop.eup %12762 }
 0xa58   :  { %12766 = vrcp.f32 %v5823_v26  ;;  %v12765_v57 = vpop.eup %12764 }
 0xa59   :  { %12768 = vrcp.f32 %v5824_v9  ;;  %v5825_v42 = vadd.f32 1.0, %v12765_v57  ;;  %v17167_v9 = vld [vmem:[#allocation39_spill] sm:$0xff]  ;;  %v17170_v57 = vld [vmem:[#allocation33_spill] sm:$0xff] }
 0xa5b   :  { %12770 = vrcp.f32 %v5825_v42  ;;  %v6586_v42 = vld [vmem:[%s16776_s7 + $0x10] sm:$0xff] }
 0xa62   :  { %v12767_v53 = vpop.eup %12766 }
 0xa63   :  { %v5835_v18 = vmul.f32 %v12767_v53, %v12763_v33  ;;  %v12769_v6 = vpop.eup %12768  ;;  %v17169_v33 = vld [vmem:[#allocation41_spill] sm:$0xff] }
 0xa64   :  { %v5834_v36 = vmul.f32 0.0, %v12769_v6  ;;  %v17172_v6 = vld [vmem:[#allocation44_spill] sm:$0xff] }
 0xa65   :  { %v12771_v29 = vpop.eup %12770 }
 0xa66   :  { %v5979_v15 = vpop.f32.mrb[62].mxu0  ;;  %v6050_v24 = vpop.f32.mrb[62].mxu1  ;;  %v15242_v31 = vadd.f32 %v5835_v18, %v5834_v36  ;;  %v15329_v36 = vpack.c.bf16 %v6590_v40, %v6586_v42  ;;  %v6622_v42 = vld [vmem:[%s16776_s7 + $0x130] sm:$0xff] }
 0xa67   :  { %v12348_v1 = vadd.f32 %v5979_v15, %v15236_v48  ;;  %v5981_v22 = vpop.f32.mrb[63].mxu0  ;;  %v6052_v54 = vpop.f32.mrb[63].mxu1  ;;  %v12362_v51 = vadd.f32 %v6050_v24, %v15249_v23  ;;  %v6593_v15 = vld [vmem:[%s16776_s7 + $0x48] sm:$0xff] }
 0xa68   :  { %v12349_v52 = vadd.f32 %v5981_v22, %v15240_v7  ;;  %12772 = vtanh.f32 %v15242_v31  ;;  %v12363_v47 = vadd.f32 %v6052_v54, %v15253_v61  ;;  %v6597_v24 = vld [vmem:[%s16776_s7 + $0x68] sm:$0xff]  ;;  %v6599_v54 = vld [vmem:[%s16776_s7 + $0x78] sm:$0xff] }
 0xa69   :  { %v9695_v20 = vmul.f32 -1.442695, %v12348_v1  ;;  %v9697_v30 = vmul.f32 -1.442695, %v12362_v51  ;;  %v6595_v1 = vld [vmem:[%s16776_s7 + $0x58] sm:$0xff]  ;;  %v15343_v22 = vpack.c.bf16 %v6597_v24, %v6593_v15  ;;  %v6598_v51 = vld [vmem:[%s16776_s7 + $0x70] sm:$0xff] }
 0xa6a   :  { %v9696_v0 = vmul.f32 -1.442695, %v12349_v52  ;;  %v6592_v52 = vld [vmem:[%s16776_s7 + $0x40] sm:$0xff]  ;;  %v6625_v15 = vld [vmem:[%s16776_s7 + $0x148] sm:$0xff] }
 0xa6b   :  { %12774 = vpow2.f32 %v9695_v20  ;;  %v6596_v20 = vld [vmem:[%s16776_s7 + $0x60] sm:$0xff]  ;;  %v6629_v24 = vld [vmem:[%s16776_s7 + $0x168] sm:$0xff] }
 0xa6c   :  { %12776 = vpow2.f32 %v9696_v0  ;;  %v15354_v0 = vpack.c.bf16 %v6599_v54, %v6595_v1  ;;  %v15356_v59 = vpack.c.bf16 %v6596_v20, %v6592_v52  ;;  %v6627_v1 = vld [vmem:[%s16776_s7 + $0x158] sm:$0xff]  ;;  %v15487_v54 = vpack.c.bf16 %v6629_v24, %v6625_v15  ;;  %v6624_v20 = vld [vmem:[%s16776_s7 + $0x140] sm:$0xff]  ;;  %v6642_v24 = vld [vmem:[%s16776_s7 + $0x1d0] sm:$0xff] }
 0xa6d   :  { %12778 = vtanh.f32 %v12363_v47  ;;  %v6601_v47 = vld [vmem:[%s16776_s7 + $0x88] sm:$0xff]  ;;  %v6631_v52 = vld [vmem:[%s16776_s7 + $0x178] sm:$0xff] }
 0xa6e   :  { %12780 = vpow2.f32 %v9697_v30  ;;  %v6603_v30 = vld [vmem:[%s16776_s7 + $0x98] sm:$0xff] }
 0xa72   :  { %v12773_v14 = vpop.eup %12772 }
 0xa73   :  { %v5838_v8 = vmul.f32 %v12773_v14, %v12771_v29  ;;  %v15365_v29 = vpack.c.bf16 %v6598_v51, %v6594_v13  ;;  %v6605_v14 = vld [vmem:[%s16776_s7 + $0xa8] sm:$0xff]  ;;  %v6628_v13 = vld [vmem:[%s16776_s7 + $0x160] sm:$0xff]  ;;  %v15498_v51 = vpack.c.bf16 %v6631_v52, %v6627_v1  ;;  %v6646_v1 = vld [vmem:[%s16776_s7 + $0x1f0] sm:$0xff] }
 0xa74   :  { %v15581_v52 = vpack.c.bf16 %v6646_v1, %v6642_v24 }
 0xa75   :  { %v12775_v16 = vpop.eup %12774  ;;  %6223 = vmatmul.mubr.f32.vlgmr.msra.gmra.mrb[34].mxu0 %v5838_v8  ;;  %6294 = vmatmul.mubr.f32.vlgmr.msra.gmra.mrb[34].mxu1 %v5838_v8  ;;  %v15379_v8 = vpack.c.bf16 %v6605_v14, %v6601_v47  ;;  %v15500_v47 = vpack.c.bf16 %v6628_v13, %v6624_v20  ;;  %v6626_v14 = vld [vmem:[%s16776_s7 + $0x150] sm:$0xff] }
 0xa76   :  { %v6068_v4 = vadd.f32 1.0, %v12775_v16  ;;  %v12777_v10 = vpop.eup %12776  ;;  %11379 = vmatpush1.bf16.msra.mxu0 %v15080_v39  ;;  %11411 = vmatpush1.bf16.msra.mxu1 %v15082_v5  ;;  %v17162_v39 = vld [vmem:[#allocation35_spill] sm:$0xff]  ;;  %v17163_v5 = vld [vmem:[#allocation36_spill] sm:$0xff]  ;;  %v6607_v16 = vld [vmem:[%s16776_s7 + $0xb8] sm:$0xff] }
 0xa77   :  { %v6069_v37 = vadd.f32 1.0, %v12777_v10  ;;  %11381 = vmatprep.subr.bf16.mxu0 %v15086_v25  ;;  %11413 = vmatprep.subr.bf16.mxu1 %v15088_v11  ;;  %v12779_v25 = vpop.eup %12778  ;;  %v17166_v11 = vld [vmem:[#allocation38_spill] sm:$0xff]  ;;  %v6604_v10 = vld [vmem:[%s16776_s7 + $0xa0] sm:$0xff]  ;;  %v6830_v20 = vld [vmem:[#allocation17 + $0x8] sm:$0xff] }
 0xa78   :  { %12782 = vrcp.f32 %v6068_v4  ;;  %6467 = vmatprep.mubr.f32.mxu0 %v16988_v19  ;;  %6538 = vmatprep.mubr.f32.mxu1 %v16988_v19  ;;  %v12781_v38 = vpop.eup %12780  ;;  %v6600_v4 = vld [vmem:[%s16776_s7 + $0x80] sm:$0xff]  ;;  %v6834_v13 = vld [vmem:[#allocation17 + $0x28] sm:$0xff] }
 0xa79   :  { %12784 = vrcp.f32 %v6069_v37  ;;  %v15390_v37 = vpack.c.bf16 %v6607_v16, %v6603_v30  ;;  %v6630_v30 = vld [vmem:[%s16776_s7 + $0x170] sm:$0xff] }
 0xa7a   :  { %11383 = vmatpush1.bf16.msra.mxu0 %v15094_v27  ;;  %11415 = vmatpush1.bf16.msra.mxu1 %v15096_v35  ;;  %v17168_v27 = vld [vmem:[#allocation40_spill] sm:$0xff]  ;;  %v15509_v16 = vpack.c.bf16 %v6630_v30, %v6626_v14  ;;  %v6832_v14 = vld [vmem:[#allocation17 + $0x18] sm:$0xff]  ;;  %v15586_v30 = vpack.c.bf16 %v6834_v13, %v6830_v20 }
 0xa7b   :  { %11385 = vmatprep.subr.bf16.mxu0 %v15100_v41  ;;  %11417 = vmatprep.subr.bf16.mxu1 %v17162_v39  ;;  %v6070_v41 = vadd.f32 1.0, %v12781_v38  ;;  %v15392_v39 = vpack.c.bf16 %v6604_v10, %v6600_v4  ;;  %v6611_v38 = vld [vmem:[%s16776_s7 + $0xd8] sm:$0xff]  ;;  %v6633_v4 = vld [vmem:[%s16776_s7 + $0x188] sm:$0xff] }
 0xa7c   :  { %v6637_v10 = vld [vmem:[%s16776_s7 + $0x1a8] sm:$0xff] }
 0xa7d   :  { %12786 = vrcp.f32 %v6070_v41 }
 0xa7e   :  { %11387 = vmatpush1.bf16.msra.mxu0 %v17163_v5  ;;  %11419 = vmatpush1.bf16.msra.mxu1 %v17164_v49  ;;  %v6602_v5 = vld [vmem:[%s16776_s7 + $0x90] sm:$0xff] }
 0xa7f   :  { %11389 = vmatprep.subr.bf16.mxu0 %v17165_v17  ;;  %11421 = vmatprep.subr.bf16.mxu1 %v17166_v11  ;;  %v6606_v49 = vld [vmem:[%s16776_s7 + $0xb0] sm:$0xff]  ;;  %v6609_v17 = vld [vmem:[%s16776_s7 + $0xc8] sm:$0xff] }
 0xa80   :  { %v6613_v11 = vld [vmem:[%s16776_s7 + $0xe8] sm:$0xff] }
 0xa82   :  { %v12783_v26 = vpop.eup %12782  ;;  %11391 = vmatpush1.bf16.msra.mxu0 %v17167_v9  ;;  %11423 = vmatpush1.bf16.msra.mxu1 %v17168_v27  ;;  %v6608_v9 = vld [vmem:[%s16776_s7 + $0xc0] sm:$0xff] }
 0xa83   :  { %v6080_v60 = vmul.f32 %v12783_v26, %v12779_v25  ;;  %v12785_v35 = vpop.eup %12784  ;;  %11393 = vmatprep.subr.bf16.mxu0 %v17169_v33  ;;  %11425 = vmatprep.subr.bf16.mxu1 %v17170_v57  ;;  %v15401_v25 = vpack.c.bf16 %v6606_v49, %v6602_v5  ;;  %v15415_v26 = vpack.c.bf16 %v6613_v11, %v6609_v17  ;;  %v6612_v27 = vld [vmem:[%s16776_s7 + $0xe0] sm:$0xff]  ;;  %v6610_v33 = vld [vmem:[%s16776_s7 + $0xd0] sm:$0xff]  ;;  %v6635_v5 = vld [vmem:[%s16776_s7 + $0x198] sm:$0xff] }
 0xa84   :  { %v6079_v53 = vmul.f32 0.0, %v12785_v35  ;;  %v15428_v41 = vpack.c.bf16 %v6612_v27, %v6608_v9  ;;  %v6614_v57 = vld [vmem:[%s16776_s7 + $0xf0] sm:$0xff]  ;;  %v15523_v49 = vpack.c.bf16 %v6637_v10, %v6633_v4  ;;  %v6639_v17 = vld [vmem:[%s16776_s7 + $0x1b8] sm:$0xff]  ;;  %v6632_v11 = vld [vmem:[%s16776_s7 + $0x180] sm:$0xff] }
 0xa85   :  { %v6634_v27 = vld [vmem:[%s16776_s7 + $0x190] sm:$0xff]  ;;  %v6836_v4 = vld [vmem:[#allocation17 + $0x38] sm:$0xff] }
 0xa86   :  { %v15275_v18 = vadd.f32 %v6080_v60, %v6079_v53  ;;  %11395 = vmatpush1.bf16.msra.mxu0 %v17171_v12  ;;  %11427 = vmatpush1.bf16.msra.mxu1 %v17172_v6  ;;  %v6615_v60 = vld [vmem:[%s16776_s7 + $0xf8] sm:$0xff]  ;;  %v15437_v53 = vpack.c.bf16 %v6614_v57, %v6610_v33  ;;  %v6617_v12 = vld [vmem:[%s16776_s7 + $0x108] sm:$0xff]  ;;  %v6638_v33 = vld [vmem:[%s16776_s7 + $0x1b0] sm:$0xff]  ;;  %v15588_v10 = vpack.c.bf16 %v6836_v4, %v6832_v14 }
 0xa87   :  { %11397 = vmatprep.subr.bf16.mxu0 %v15138_v3  ;;  %11429 = vmatprep.subr.bf16.mxu1 %v15140_v62  ;;  %v12787_v3 = vpop.eup %12786  ;;  %v15426_v35 = vpack.c.bf16 %v6615_v60, %v6611_v38  ;;  %v6621_v6 = vld [vmem:[%s16776_s7 + $0x128] sm:$0xff]  ;;  %v6636_v38 = vld [vmem:[%s16776_s7 + $0x1a0] sm:$0xff]  ;;  %v15534_v60 = vpack.c.bf16 %v6639_v17, %v6635_v5  ;;  %v15545_v57 = vpack.c.bf16 %v6638_v33, %v6634_v27 }
 0xa88   :  { %12788 = vtanh.f32 %v15275_v18  ;;  %v15536_v9 = vpack.c.bf16 %v6636_v38, %v6632_v11 }
 0xa8a   :  { %11399 = vmatpush1.bf16.msra.mxu0 %v15144_v45  ;;  %11431 = vmatpush1.bf16.msra.mxu1 %v15146_v43  ;;  %v6585_v43 = vld [vmem:[%s16776_s7 + $0x8] sm:$0xff] }
 0xa8b   :  { %11401 = vmatprep.subr.bf16.mxu0 %v15150_v58  ;;  %11433 = vmatprep.subr.bf16.mxu1 %v15152_v63  ;;  %v6589_v58 = vld [vmem:[%s16776_s7 + $0x28] sm:$0xff]  ;;  %v6587_v63 = vld [vmem:[%s16776_s7 + $0x18] sm:$0xff] }
 0xa8e   :  { %11403 = vmatpush1.bf16.msra.mxu0 %v15156_v28  ;;  %11435 = vmatpush1.bf16.msra.mxu1 %v15158_v44  ;;  %v15307_v28 = vpack.c.bf16 %v6589_v58, %v6585_v43  ;;  %v6591_v44 = vld [vmem:[%s16776_s7 + $0x38] sm:$0xff]  ;;  %v6616_v58 = vld [vmem:[%s16776_s7 + $0x100] sm:$0xff] }
 0xa8f   :  { %11405 = vmatprep.subr.bf16.mxu0 %v15162_v46  ;;  %11437 = vmatprep.subr.bf16.mxu1 %v15164_v55  ;;  %v6584_v46 = vld [vmem:[%s16776_s7] sm:$0xff]  ;;  %v6623_v43 = vld [vmem:[%s16776_s7 + $0x138] sm:$0xff] }
 0xa90   :  { %v6588_v55 = vld [vmem:[%s16776_s7 + $0x20] sm:$0xff] }
 0xa92   :  { %v12789_v62 = vpop.eup %12788  ;;  %11407 = vmatpush1.bf16.msra.mxu0 %v15168_v34  ;;  %11439 = vmatpush1.bf16.msra.mxu1 %v15170_v32  ;;  %v15318_v34 = vpack.c.bf16 %v6591_v44, %v6587_v63  ;;  %v15320_v32 = vpack.c.bf16 %v6588_v55, %v6584_v46  ;;  %v6620_v63 = vld [vmem:[%s16776_s7 + $0x120] sm:$0xff]  ;;  %v6618_v55 = vld [vmem:[%s16776_s7 + $0x110] sm:$0xff] }
 0xa93   :  { %v15292_v45 = vmul.f32 %v12789_v62, %v12787_v3  ;;  %11441 = vmatprep.subr.bf16.mxu0 %v15307_v28  ;;  %v6619_v3 = vld [vmem:[%s16776_s7 + $0x118] sm:$0xff]  ;;  %v15451_v62 = vpack.c.bf16 %v6621_v6, %v6617_v12  ;;  %v15464_v46 = vpack.c.bf16 %v6620_v63, %v6616_v58  ;;  %v15473_v40 = vpack.c.bf16 %v6622_v42, %v6618_v55  ;;  %v6641_v12 = vld [vmem:[%s16776_s7 + $0x1c8] sm:$0xff]  ;;  %v6640_v63 = vld [vmem:[%s16776_s7 + $0x1c0] sm:$0xff] }
 0xa94   :  { %11473 = vmatprep.subr.bf16.mxu1 %v15318_v34  ;;  %v15462_v44 = vpack.c.bf16 %v6623_v43, %v6619_v3  ;;  %v6645_v6 = vld [vmem:[%s16776_s7 + $0x1e8] sm:$0xff]  ;;  %v6643_v3 = vld [vmem:[%s16776_s7 + $0x1d8] sm:$0xff]  ;;  %v6644_v55 = vld [vmem:[%s16776_s7 + $0x1e0] sm:$0xff] }
 0xa95   :  { %17173 = vst [vmem:[#allocation55_spill] sm:$0xff] %v15292_v45  ;;  %6468 = vmatmul.mubr.f32.vlgmr.msra.gmra.mrb[60].mxu0 %v15292_v45  ;;  %6539 = vmatmul.mubr.f32.vlgmr.msra.gmra.mrb[60].mxu1 %v15292_v45  ;;  %v15559_v43 = vpack.c.bf16 %v6645_v6, %v6641_v12  ;;  %v6647_v58 = vld [vmem:[%s16776_s7 + $0x1f8] sm:$0xff]  ;;  %v15572_v15 = vpack.c.bf16 %v6644_v55, %v6640_v63 }
 0xa96   :  { %6712 = vmatprep.mubr.f32.mxu0 %v16988_v19  ;;  %6783 = vmatprep.mubr.f32.mxu1 %v16988_v19  ;;  %v15570_v42 = vpack.c.bf16 %v6647_v58, %v6643_v3 }
 0xa97   :  { %11443 = vmatpush1.bf16.msra.mxu0 %v15320_v32  ;;  %11475 = vmatpush1.bf16.msra.mxu1 %v15329_v36 }
 0xa98   :  { %11445 = vmatprep.subr.bf16.mxu0 %v15343_v22  ;;  %11477 = vmatprep.subr.bf16.mxu1 %v15354_v0 }
 0xa9b   :  { %11447 = vmatpush1.bf16.msra.mxu0 %v15356_v59  ;;  %11479 = vmatpush1.bf16.msra.mxu1 %v15365_v29 }
 0xa9c   :  { %11449 = vmatprep.subr.bf16.mxu0 %v15379_v8  ;;  %11481 = vmatprep.subr.bf16.mxu1 %v15390_v37 }
 0xa9f   :  { %11451 = vmatpush1.bf16.msra.mxu0 %v15392_v39  ;;  %11483 = vmatpush1.bf16.msra.mxu1 %v15401_v25 }
 0xaa0   :  { %11453 = vmatprep.subr.bf16.mxu0 %v15415_v26  ;;  %11485 = vmatprep.subr.bf16.mxu1 %v15426_v35 }
 0xaa3   :  { %11455 = vmatpush1.bf16.msra.mxu0 %v15428_v41  ;;  %11487 = vmatpush1.bf16.msra.mxu1 %v15437_v53 }
 0xaa4   :  { %11457 = vmatprep.subr.bf16.mxu0 %v15451_v62  ;;  %11489 = vmatprep.subr.bf16.mxu1 %v15462_v44 }
 0xaa7   :  { %11459 = vmatpush1.bf16.msra.mxu0 %v15464_v46  ;;  %11491 = vmatpush1.bf16.msra.mxu1 %v15473_v40 }
 0xaa8   :  { %11461 = vmatprep.subr.bf16.mxu0 %v15487_v54  ;;  %11493 = vmatprep.subr.bf16.mxu1 %v15498_v51 }
 0xaab   :  { %11463 = vmatpush1.bf16.msra.mxu0 %v15500_v47  ;;  %11495 = vmatpush1.bf16.msra.mxu1 %v15509_v16 }
 0xaac   :  { %11465 = vmatprep.subr.bf16.mxu0 %v15523_v49  ;;  %11497 = vmatprep.subr.bf16.mxu1 %v15534_v60 }
 0xaaf   :  { %11467 = vmatpush1.bf16.msra.mxu0 %v15536_v9  ;;  %11499 = vmatpush1.bf16.msra.mxu1 %v15545_v57 }
 0xab0   :  { %11469 = vmatprep.subr.bf16.mxu0 %v15559_v43  ;;  %11501 = vmatprep.subr.bf16.mxu1 %v15570_v42 }
 0xab3   :  { %11471 = vmatpush1.bf16.msra.mxu0 %v15572_v15  ;;  %11503 = vmatpush1.bf16.msra.mxu1 %v15581_v52 }
 0xab4   :  { %11505 = vmatprep.subr.bf16.mxu0 %v15586_v30  ;;  %11537 = vmatprep.subr.bf16.mxu1 %v15588_v10 }
 0xb48   :  { %v6224_v5 = vpop.f32.mrb[34].mxu0  ;;  %v6295_v17 = vpop.f32.mrb[34].mxu1 }
 0xb49   :  { %v12306_v11 = vadd.f32 %v6224_v5, %v15216_v56  ;;  %v6226_v38 = vpop.f32.mrb[35].mxu0  ;;  %v6297_v27 = vpop.f32.mrb[35].mxu1  ;;  %v12322_v3 = vadd.f32 %v6295_v17, %v15226_v21  ;;  %v6848_v56 = vld [vmem:[#allocation17 + $0x98] sm:$0xff] }
 0xb4a   :  { %v12307_v33 = vadd.f32 %v6226_v38, %v15220_v50  ;;  %v12323_v58 = vadd.f32 %v6297_v27, %v15230_v2  ;;  %v6846_v2 = vld [vmem:[#allocation17 + $0x88] sm:$0xff] }
 0xb4b   :  { %v9698_v12 = vmul.f32 -1.442695, %v12306_v11  ;;  %v9700_v63 = vmul.f32 -1.442695, %v12322_v3  ;;  %v6850_v50 = vld [vmem:[#allocation17 + $0xa8] sm:$0xff] }
 0xb4c   :  { %v9699_v6 = vmul.f32 -1.442695, %v12307_v33 }
 0xb4d   :  { %12790 = vpow2.f32 %v9698_v12 }
 0xb4e   :  { %12792 = vpow2.f32 %v9699_v6 }
 0xb4f   :  { %12794 = vtanh.f32 %v12323_v58 }
 0xb50   :  { %12796 = vpow2.f32 %v9700_v63 }
 0xb57   :  { %v12791_v55 = vpop.eup %12790 }
 0xb58   :  { %v6313_v24 = vadd.f32 1.0, %v12791_v55  ;;  %v12793_v1 = vpop.eup %12792 }
 0xb59   :  { %v6314_v20 = vadd.f32 1.0, %v12793_v1  ;;  %v12795_v13 = vpop.eup %12794 }
 0xb5a   :  { %12798 = vrcp.f32 %v6313_v24  ;;  %v12797_v14 = vpop.eup %12796 }
 0xb5b   :  { %12800 = vrcp.f32 %v6314_v20  ;;  %v6315_v38 = vadd.f32 1.0, %v12797_v14  ;;  %v6833_v20 = vld [vmem:[#allocation17 + $0x20] sm:$0xff]  ;;  %v6835_v14 = vld [vmem:[#allocation17 + $0x30] sm:$0xff] }
 0xb5d   :  { %12802 = vrcp.f32 %v6315_v38 }
 0xb64   :  { %v12799_v4 = vpop.eup %12798 }
 0xb65   :  { %v6325_v5 = vmul.f32 %v12799_v4, %v12795_v13  ;;  %v12801_v11 = vpop.eup %12800  ;;  %v6831_v13 = vld [vmem:[#allocation17 + $0x10] sm:$0xff]  ;;  %v6838_v4 = vld [vmem:[#allocation17 + $0x48] sm:$0xff] }
 0xb66   :  { %v6324_v33 = vmul.f32 %v12801_v11, %v15242_v31  ;;  %v6829_v31 = vld [vmem:[#allocation17] sm:$0xff]  ;;  %v6840_v11 = vld [vmem:[#allocation17 + $0x58] sm:$0xff] }
 0xb68   :  { %v6469_v17 = vpop.f32.mrb[60].mxu0  ;;  %v6540_v12 = vpop.f32.mrb[60].mxu1  ;;  %v15597_v27 = vadd.f32 %v6325_v5, %v6324_v33  ;;  %v6842_v5 = vld [vmem:[#allocation17 + $0x68] sm:$0xff]  ;;  %v6844_v33 = vld [vmem:[#allocation17 + $0x78] sm:$0xff] }
 0xb69   :  { %v12346_v6 = vadd.f32 %v6469_v17, %v15236_v48  ;;  %v6471_v3 = vpop.f32.mrb[61].mxu0  ;;  %v6542_v58 = vpop.f32.mrb[61].mxu1  ;;  %v12360_v1 = vadd.f32 %v6540_v12, %v15249_v23  ;;  %v15610_v23 = vpack.c.bf16 %v6844_v33, %v6840_v11  ;;  %v6839_v48 = vld [vmem:[#allocation17 + $0x50] sm:$0xff]  ;;  %v6854_v33 = vld [vmem:[#allocation17 + $0xc8] sm:$0xff] }
 0xb6a   :  { %17174 = vst [vmem:[#allocation56_spill] sm:$0xff] %v15597_v27  ;;  %v12347_v63 = vadd.f32 %v6471_v3, %v15240_v7  ;;  %12804 = vtanh.f32 %v15597_v27  ;;  %v12803_v17 = vpop.eup %12802  ;;  %v12361_v38 = vadd.f32 %v6542_v58, %v15253_v61  ;;  %v15604_v7 = vpack.c.bf16 %v6833_v20, %v6829_v31  ;;  %v6843_v27 = vld [vmem:[#allocation17 + $0x70] sm:$0xff]  ;;  %v6852_v58 = vld [vmem:[#allocation17 + $0xb8] sm:$0xff] }
 0xb6b   :  { %v9701_v55 = vmul.f32 -1.442695, %v12346_v6  ;;  %v9703_v45 = vmul.f32 -1.442695, %v12360_v1  ;;  %v15606_v6 = vpack.c.bf16 %v6835_v14, %v6831_v13  ;;  %v15616_v20 = vpack.c.bf16 %v6843_v27, %v6839_v48  ;;  %v6845_v13 = vld [vmem:[#allocation17 + $0x80] sm:$0xff]  ;;  %v6851_v11 = vld [vmem:[#allocation17 + $0xb0] sm:$0xff] }
 0xb6c   :  { %v9702_v24 = vmul.f32 -1.442695, %v12347_v63  ;;  %v6837_v63 = vld [vmem:[#allocation17 + $0x40] sm:$0xff] }
 0xb6d   :  { %12806 = vpow2.f32 %v9701_v55  ;;  %v6841_v55 = vld [vmem:[#allocation17 + $0x60] sm:$0xff]  ;;  %17176 = vst [vmem:[#allocation26_spill] sm:$0xff] %v15616_v20 }
 0xb6e   :  { %12808 = vpow2.f32 %v9702_v24  ;;  %v15608_v24 = vpack.c.bf16 %v6842_v5, %v6838_v4  ;;  %v15614_v31 = vpack.c.bf16 %v6841_v55, %v6837_v63  ;;  %v6849_v14 = vld [vmem:[#allocation17 + $0xa0] sm:$0xff]  ;;  %v15622_v5 = vpack.c.bf16 %v6852_v58, %v6848_v56  ;;  %v6855_v63 = vld [vmem:[#allocation17 + $0xd0] sm:$0xff]  ;;  %v6866_v58 = vld [vmem:[#allocation17 + $0x128] sm:$0xff] }
 0xb6f   :  { %12810 = vtanh.f32 %v12361_v38  ;;  %v6856_v38 = vld [vmem:[#allocation17 + $0xd8] sm:$0xff]  ;;  %v15628_v48 = vpack.c.bf16 %v6849_v14, %v6845_v13  ;;  %v6853_v56 = vld [vmem:[#allocation17 + $0xc0] sm:$0xff]  ;;  %v6859_v55 = vld [vmem:[#allocation17 + $0xf0] sm:$0xff] }
 0xb70   :  { %12812 = vpow2.f32 %v9703_v45  ;;  %17175 = vst [vmem:[#allocation42_spill] sm:$0xff] %v15614_v31  ;;  %17178 = vst [vmem:[#allocation30_spill] sm:$0xff] %v15622_v5  ;;  %v6847_v45 = vld [vmem:[#allocation17 + $0x90] sm:$0xff]  ;;  %v15642_v14 = vpack.c.bf16 %v6859_v55, %v6855_v63 }
 0xb71   :  { %17179 = vst [vmem:[#allocation29_spill] sm:$0xff] %v15628_v48 }
 0xb72   :  { %17184 = vst [vmem:[#allocation49_spill] sm:$0xff] %v15642_v14 }
 0xb74   :  { %v12805_v3 = vpop.eup %12804 }
 0xb75   :  { %v6328_v12 = vmul.f32 %v12805_v3, %v12803_v17  ;;  %v6858_v17 = vld [vmem:[#allocation17 + $0xe8] sm:$0xff]  ;;  %v6860_v3 = vld [vmem:[#allocation17 + $0xf8] sm:$0xff] }
 0xb76   :  { %v15636_v27 = vpack.c.bf16 %v6860_v3, %v6856_v38  ;;  %v6863_v3 = vld [vmem:[#allocation17 + $0x110] sm:$0xff] }
 0xb77   :  { %v12807_v21 = vpop.eup %12806  ;;  %6713 = vmatmul.mubr.f32.vlgmr.msra.gmra.mrb[36].mxu0 %v6328_v12  ;;  %6784 = vmatmul.mubr.f32.vlgmr.msra.gmra.mrb[36].mxu1 %v6328_v12  ;;  %v6862_v12 = vld [vmem:[#allocation17 + $0x108] sm:$0xff] }
 0xb78   :  { %v6558_v61 = vadd.f32 1.0, %v12807_v21  ;;  %v12809_v1 = vpop.eup %12808  ;;  %11507 = vmatpush1.bf16.msra.mxu0 %v15604_v7  ;;  %11539 = vmatpush1.bf16.msra.mxu1 %v15606_v6  ;;  %v15620_v21 = vpack.c.bf16 %v6850_v50, %v6846_v2  ;;  %v15630_v50 = vpack.c.bf16 %v6851_v11, %v6847_v45  ;;  %v6857_v2 = vld [vmem:[#allocation17 + $0xe0] sm:$0xff]  ;;  %17182 = vst [vmem:[#allocation27_spill] sm:$0xff] %v15636_v27 }
 0xb79   :  { %v6559_v4 = vadd.f32 1.0, %v12809_v1  ;;  %11509 = vmatprep.subr.bf16.mxu0 %v15608_v24  ;;  %11541 = vmatprep.subr.bf16.mxu1 %v15610_v23  ;;  %v6864_v1 = vld [vmem:[#allocation17 + $0x118] sm:$0xff]  ;;  %v15640_v13 = vpack.c.bf16 %v6857_v2, %v6853_v56  ;;  %v6861_v45 = vld [vmem:[#allocation17 + $0x100] sm:$0xff] }
 0xb7a   :  { %12814 = vrcp.f32 %v6558_v61  ;;  %17177 = vst [vmem:[#allocation25_spill] sm:$0xff] %v15620_v21  ;;  %6957 = vmatprep.mubr.f32.mxu0 %v16988_v19  ;;  %7028 = vmatprep.mubr.f32.mxu1 %v16988_v19  ;;  %17180 = vst [vmem:[#allocation53_spill] sm:$0xff] %v15630_v50  ;;  %v15634_v61 = vpack.c.bf16 %v6858_v17, %v6854_v33  ;;  %v6865_v11 = vld [vmem:[#allocation17 + $0x120] sm:$0xff]  ;;  %v12811_v33 = vpop.eup %12810  ;;  %v15646_v17 = vpack.c.bf16 %v6866_v58, %v6862_v12  ;;  %v6872_v56 = vld [vmem:[#allocation17 + $0x158] sm:$0xff] }
 0xb7b   :  { %12816 = vrcp.f32 %v6559_v4  ;;  %v6868_v4 = vld [vmem:[#allocation17 + $0x138] sm:$0xff]  ;;  %17183 = vst [vmem:[#allocation32_spill] sm:$0xff] %v15640_v13  ;;  %v6869_v12 = vld [vmem:[#allocation17 + $0x140] sm:$0xff] }
 0xb7c   :  { %11511 = vmatpush1.bf16.msra.mxu0 %v15614_v31  ;;  %11543 = vmatpush1.bf16.msra.mxu1 %v15616_v20  ;;  %17181 = vst [vmem:[#allocation28_spill] sm:$0xff] %v15634_v61  ;;  %v15648_v38 = vpack.c.bf16 %v6868_v4, %v6864_v1  ;;  %v6876_v2 = vld [vmem:[#allocation17 + $0x178] sm:$0xff]  ;;  %v6873_v58 = vld [vmem:[#allocation17 + $0x160] sm:$0xff] }
 0xb7d   :  { %11513 = vmatprep.subr.bf16.mxu0 %v15620_v21  ;;  %11545 = vmatprep.subr.bf16.mxu1 %v15622_v5  ;;  %v6867_v5 = vld [vmem:[#allocation17 + $0x130] sm:$0xff]  ;;  %v12813_v21 = vpop.eup %12812  ;;  %v15660_v31 = vpack.c.bf16 %v6876_v2, %v6872_v56  ;;  %v6881_v56 = vld [vmem:[#allocation17 + $0x1a0] sm:$0xff] }
 0xb7e   :  { %v6560_v4 = vadd.f32 1.0, %v12813_v21  ;;  %v15667_v21 = vpack.c.bf16 %v6873_v58, %v6869_v12  ;;  %v6890_v12 = vld [vmem:[#allocation17 + $0x1e8] sm:$0xff]  ;;  %v6888_v58 = vld [vmem:[#allocation17 + $0x1d8] sm:$0xff] }
 0xb7f   :  { %17186 = vst [vmem:[#allocation34_spill] sm:$0xff] %v15660_v31 }
 0xb80   :  { %11515 = vmatpush1.bf16.msra.mxu0 %v15628_v48  ;;  %11547 = vmatpush1.bf16.msra.mxu1 %v15630_v50  ;;  %v6870_v48 = vld [vmem:[#allocation17 + $0x148] sm:$0xff]  ;;  %12818 = vrcp.f32 %v6560_v4 }
 0xb81   :  { %11517 = vmatprep.subr.bf16.mxu0 %v15634_v61  ;;  %11549 = vmatprep.subr.bf16.mxu1 %v15636_v27  ;;  %v6874_v50 = vld [vmem:[#allocation17 + $0x168] sm:$0xff]  ;;  %v15652_v61 = vpack.c.bf16 %v6865_v11, %v6861_v45  ;;  %v15654_v27 = vpack.c.bf16 %v6867_v5, %v6863_v3  ;;  %v6880_v5 = vld [vmem:[#allocation17 + $0x198] sm:$0xff] }
 0xb82   :  { %v15658_v20 = vpack.c.bf16 %v6874_v50, %v6870_v48  ;;  %v6882_v11 = vld [vmem:[#allocation17 + $0x1a8] sm:$0xff]  ;;  %v6884_v3 = vld [vmem:[#allocation17 + $0x1b8] sm:$0xff]  ;;  %v6877_v50 = vld [vmem:[#allocation17 + $0x180] sm:$0xff] }
 0xb83   :  { %v15675_v2 = vpack.c.bf16 %v6884_v3, %v6880_v5  ;;  %v15680_v4 = vpack.c.bf16 %v6881_v56, %v6877_v50  ;;  %v6889_v3 = vld [vmem:[#allocation17 + $0x1e0] sm:$0xff] }
 0xb84   :  { %v12815_v63 = vpop.eup %12814  ;;  %11519 = vmatpush1.bf16.msra.mxu0 %v15640_v13  ;;  %11551 = vmatpush1.bf16.msra.mxu1 %v15642_v14  ;;  %17185 = vst [vmem:[#allocation24_spill] sm:$0xff] %v15658_v20  ;;  %v6878_v13 = vld [vmem:[#allocation17 + $0x188] sm:$0xff] }
 0xb85   :  { %v6570_v55 = vmul.f32 %v12815_v63, %v12811_v33  ;;  %v12817_v1 = vpop.eup %12816  ;;  %11521 = vmatprep.subr.bf16.mxu0 %v15646_v17  ;;  %11553 = vmatprep.subr.bf16.mxu1 %v15648_v38  ;;  %v6871_v33 = vld [vmem:[#allocation17 + $0x150] sm:$0xff] }
 0xb86   :  { %v6875_v63 = vld [vmem:[#allocation17 + $0x170] sm:$0xff]  ;;  %v6569_v45 = vmul.f32 %v12817_v1, %v15275_v18  ;;  %v15673_v18 = vpack.c.bf16 %v6882_v11, %v6878_v13  ;;  %v6885_v13 = vld [vmem:[#allocation17 + $0x1c0] sm:$0xff] }
 0xb87   :  { %v15669_v48 = vpack.c.bf16 %v6875_v63, %v6871_v33  ;;  %v6883_v1 = vld [vmem:[#allocation17 + $0x1b0] sm:$0xff]  ;;  %v6892_v33 = vld [vmem:[#allocation17 + $0x1f8] sm:$0xff]  ;;  %v15692_v50 = vpack.c.bf16 %v6889_v3, %v6885_v13 }
 0xb88   :  { %v15663_v14 = vadd.f32 %v6570_v55, %v6569_v45  ;;  %11523 = vmatpush1.bf16.msra.mxu0 %v15652_v61  ;;  %11555 = vmatpush1.bf16.msra.mxu1 %v15654_v27  ;;  %v6879_v55 = vld [vmem:[#allocation17 + $0x190] sm:$0xff]  ;;  %v6886_v45 = vld [vmem:[#allocation17 + $0x1c8] sm:$0xff]  ;;  %v15688_v5 = vpack.c.bf16 %v6892_v33, %v6888_v58  ;;  %v17194_v33 = vld [vmem:[#allocation52_spill] sm:$0xff] }
 0xb89   :  { %11525 = vmatprep.subr.bf16.mxu0 %v15658_v20  ;;  %11557 = vmatprep.subr.bf16.mxu1 %v15660_v31  ;;  %v15682_v63 = vpack.c.bf16 %v6883_v1, %v6879_v55  ;;  %v15686_v11 = vpack.c.bf16 %v6890_v12, %v6886_v45  ;;  %v6887_v31 = vld [vmem:[#allocation17 + $0x1d0] sm:$0xff] }
 0xb8a   :  { %12820 = vtanh.f32 %v15663_v14  ;;  %v6891_v20 = vld [vmem:[#allocation17 + $0x1f0] sm:$0xff]  ;;  %v12819_v55 = vpop.eup %12818 }
 0xb8b   :  { %v15694_v56 = vpack.c.bf16 %v6891_v20, %v6887_v31  ;;  %v17193_v31 = vld [vmem:[#allocation51_spill] sm:$0xff] }
 0xb8c   :  { %11527 = vmatpush1.bf16.msra.mxu0 %v15667_v21  ;;  %11559 = vmatpush1.bf16.msra.mxu1 %v15669_v48 }
 0xb8d   :  { %11529 = vmatprep.subr.bf16.mxu0 %v15673_v18  ;;  %11561 = vmatprep.subr.bf16.mxu1 %v15675_v2 }
 0xb90   :  { %11531 = vmatpush1.bf16.msra.mxu0 %v15680_v4  ;;  %11563 = vmatpush1.bf16.msra.mxu1 %v15682_v63 }
 0xb91   :  { %11533 = vmatprep.subr.bf16.mxu0 %v15686_v11  ;;  %11565 = vmatprep.subr.bf16.mxu1 %v15688_v5 }
 0xb94   :  { %v12821_v1 = vpop.eup %12820  ;;  %11535 = vmatpush1.bf16.msra.mxu0 %v15692_v50  ;;  %11567 = vmatpush1.bf16.msra.mxu1 %v15694_v56 }
 0xb95   :  { %v6573_v45 = vmul.f32 %v12821_v1, %v12819_v55  ;;  %11569 = vmatprep.subr.bf16.mxu0 %v15307_v28  ;;  %11601 = vmatprep.subr.bf16.mxu1 %v15318_v34  ;;  %v17195_v55 = vld [vmem:[#allocation54_spill] sm:$0xff] }
 0xb97   :  { %6958 = vmatmul.mubr.f32.vlgmr.msra.gmra.mrb[58].mxu0 %v6573_v45  ;;  %7029 = vmatmul.mubr.f32.vlgmr.msra.gmra.mrb[58].mxu1 %v6573_v45 }
 0xb98   :  { %11571 = vmatpush1.bf16.msra.mxu0 %v15320_v32  ;;  %11603 = vmatpush1.bf16.msra.mxu1 %v15329_v36  ;;  %v17187_v32 = vld [vmem:[#allocation45_spill] sm:$0xff] }
 0xb99   :  { %11573 = vmatprep.subr.bf16.mxu0 %v15343_v22  ;;  %11605 = vmatprep.subr.bf16.mxu1 %v15354_v0 }
 0xb9a   :  { %7202 = vmatprep.mubr.f32.mxu0 %v16988_v19  ;;  %7273 = vmatprep.mubr.f32.mxu1 %v16988_v19 }
 0xb9c   :  { %11575 = vmatpush1.bf16.msra.mxu0 %v15356_v59  ;;  %11607 = vmatpush1.bf16.msra.mxu1 %v15365_v29  ;;  %v17188_v59 = vld [vmem:[#allocation46_spill] sm:$0xff] }
 0xb9d   :  { %11577 = vmatprep.subr.bf16.mxu0 %v15379_v8  ;;  %11609 = vmatprep.subr.bf16.mxu1 %v15390_v37 }
 0xba0   :  { %11579 = vmatpush1.bf16.msra.mxu0 %v15392_v39  ;;  %11611 = vmatpush1.bf16.msra.mxu1 %v15401_v25  ;;  %v17189_v39 = vld [vmem:[#allocation47_spill] sm:$0xff] }
 0xba1   :  { %11581 = vmatprep.subr.bf16.mxu0 %v15415_v26  ;;  %11613 = vmatprep.subr.bf16.mxu1 %v15426_v35  ;;  %v17190_v26 = vld [vmem:[#allocation48_spill] sm:$0xff] }
 0xba4   :  { %11583 = vmatpush1.bf16.msra.mxu0 %v15428_v41  ;;  %11615 = vmatpush1.bf16.msra.mxu1 %v15437_v53 }
 0xba5   :  { %11585 = vmatprep.subr.bf16.mxu0 %v15451_v62  ;;  %11617 = vmatprep.subr.bf16.mxu1 %v15462_v44 }
 0xba8   :  { %11587 = vmatpush1.bf16.msra.mxu0 %v15464_v46  ;;  %11619 = vmatpush1.bf16.msra.mxu1 %v15473_v40 }
 0xba9   :  { %11589 = vmatprep.subr.bf16.mxu0 %v15487_v54  ;;  %11621 = vmatprep.subr.bf16.mxu1 %v15498_v51 }
 0xbac   :  { %11591 = vmatpush1.bf16.msra.mxu0 %v15500_v47  ;;  %11623 = vmatpush1.bf16.msra.mxu1 %v15509_v16 }
 0xbad   :  { %11593 = vmatprep.subr.bf16.mxu0 %v15523_v49  ;;  %11625 = vmatprep.subr.bf16.mxu1 %v15534_v60  ;;  %v17191_v60 = vld [vmem:[#allocation56_spill] sm:$0xff] }
 0xbb0   :  { %11595 = vmatpush1.bf16.msra.mxu0 %v15536_v9  ;;  %11627 = vmatpush1.bf16.msra.mxu1 %v15545_v57 }
 0xbb1   :  { %11597 = vmatprep.subr.bf16.mxu0 %v15559_v43  ;;  %11629 = vmatprep.subr.bf16.mxu1 %v15570_v42 }
 0xbb4   :  { %11599 = vmatpush1.bf16.msra.mxu0 %v15572_v15  ;;  %11631 = vmatpush1.bf16.msra.mxu1 %v15581_v52  ;;  %v17192_v15 = vld [vmem:[#allocation50_spill] sm:$0xff] }
 0xbb5   :  { %11633 = vmatprep.subr.bf16.mxu0 %v15586_v30  ;;  %11665 = vmatprep.subr.bf16.mxu1 %v15588_v10 }
 0xc4a   :  { %v6714_v28 = vpop.f32.mrb[36].mxu0  ;;  %v6785_v34 = vpop.f32.mrb[36].mxu1 }
 0xc4b   :  { %v12308_v36 = vadd.f32 %v6714_v28, %v17187_v32  ;;  %v6716_v22 = vpop.f32.mrb[37].mxu0  ;;  %v6787_v0 = vpop.f32.mrb[37].mxu1  ;;  %v12324_v25 = vadd.f32 %v6785_v34, %v17189_v39 }
 0xc4c   :  { %v12309_v29 = vadd.f32 %v6716_v22, %v17188_v59  ;;  %v12325_v35 = vadd.f32 %v6787_v0, %v17190_v26 }
 0xc4d   :  { %v9704_v8 = vmul.f32 -1.442695, %v12308_v36  ;;  %v9706_v41 = vmul.f32 -1.442695, %v12324_v25  ;;  %v17198_v25 = vld [vmem:[#allocation25_spill] sm:$0xff] }
 0xc4e   :  { %v9705_v37 = vmul.f32 -1.442695, %v12309_v29 }
 0xc4f   :  { %12822 = vpow2.f32 %v9704_v8  ;;  %v17196_v8 = vld [vmem:[#allocation42_spill] sm:$0xff] }
 0xc50   :  { %12824 = vpow2.f32 %v9705_v37  ;;  %v17197_v37 = vld [vmem:[#allocation26_spill] sm:$0xff] }
 0xc51   :  { %12826 = vtanh.f32 %v12325_v35  ;;  %v17201_v35 = vld [vmem:[#allocation53_spill] sm:$0xff] }
 0xc52   :  { %12828 = vpow2.f32 %v9706_v41  ;;  %v17202_v41 = vld [vmem:[#allocation28_spill] sm:$0xff] }
 0xc59   :  { %v12823_v53 = vpop.eup %12822 }
 0xc5a   :  { %v6803_v62 = vadd.f32 1.0, %v12823_v53  ;;  %v12825_v44 = vpop.eup %12824 }
 0xc5b   :  { %v6804_v46 = vadd.f32 1.0, %v12825_v44  ;;  %v12827_v40 = vpop.eup %12826 }
 0xc5c   :  { %12830 = vrcp.f32 %v6803_v62  ;;  %v12829_v54 = vpop.eup %12828 }
 0xc5d   :  { %12832 = vrcp.f32 %v6804_v46  ;;  %v6805_v49 = vadd.f32 1.0, %v12829_v54  ;;  %v17204_v46 = vld [vmem:[#allocation32_spill] sm:$0xff] }
 0xc5f   :  { %12834 = vrcp.f32 %v6805_v49  ;;  %v17206_v49 = vld [vmem:[#allocation24_spill] sm:$0xff] }
 0xc66   :  { %v12831_v51 = vpop.eup %12830 }
 0xc67   :  { %v6815_v47 = vmul.f32 %v12831_v51, %v12827_v40  ;;  %v12833_v16 = vpop.eup %12832  ;;  %v17205_v40 = vld [vmem:[#allocation49_spill] sm:$0xff] }
 0xc68   :  { %v6814_v9 = vmul.f32 %v12833_v16, %v17191_v60  ;;  %v17207_v60 = vld [vmem:[#allocation34_spill] sm:$0xff] }
 0xc69   :  { %v12835_v3 = vpop.eup %12834 }
 0xc6a   :  { %v6959_v57 = vpop.f32.mrb[58].mxu0  ;;  %v7030_v43 = vpop.f32.mrb[58].mxu1  ;;  %v15741_v42 = vadd.f32 %v6815_v47, %v6814_v9  ;;  %v7573_v9 = vld [vmem:[%s16776_s7 + $0x48] sm:$0xff] }
 0xc6b   :  { %v12344_v52 = vadd.f32 %v6959_v57, %v17192_v15  ;;  %v6961_v30 = vpop.f32.mrb[59].mxu0  ;;  %v7032_v10 = vpop.f32.mrb[59].mxu1  ;;  %v12358_v13 = vadd.f32 %v7030_v43, %v17194_v33  ;;  %v7577_v57 = vld [vmem:[%s16776_s7 + $0x68] sm:$0xff]  ;;  %v7575_v43 = vld [vmem:[%s16776_s7 + $0x58] sm:$0xff] }
 0xc6c   :  { %v12345_v20 = vadd.f32 %v6961_v30, %v17193_v31  ;;  %12836 = vtanh.f32 %v15741_v42  ;;  %v12359_v1 = vadd.f32 %v7032_v10, %v17195_v55  ;;  %v7579_v30 = vld [vmem:[%s16776_s7 + $0x78] sm:$0xff]  ;;  %v7572_v10 = vld [vmem:[%s16776_s7 + $0x40] sm:$0xff] }
 0xc6d   :  { %v9707_v12 = vmul.f32 -1.442695, %v12344_v52  ;;  %v9709_v28 = vmul.f32 -1.442695, %v12358_v13  ;;  %v15831_v52 = vpack.c.bf16 %v7577_v57, %v7573_v9  ;;  %v7574_v13 = vld [vmem:[%s16776_s7 + $0x50] sm:$0xff]  ;;  %v7609_v9 = vld [vmem:[%s16776_s7 + $0x168] sm:$0xff] }
 0xc6e   :  { %v9708_v58 = vmul.f32 -1.442695, %v12345_v20  ;;  %v7576_v20 = vld [vmem:[%s16776_s7 + $0x60] sm:$0xff]  ;;  %v7607_v57 = vld [vmem:[%s16776_s7 + $0x158] sm:$0xff] }
 0xc6f   :  { %12838 = vpow2.f32 %v9707_v12  ;;  %v15842_v12 = vpack.c.bf16 %v7579_v30, %v7575_v43  ;;  %v7611_v30 = vld [vmem:[%s16776_s7 + $0x178] sm:$0xff] }
 0xc70   :  { %12840 = vpow2.f32 %v9708_v58  ;;  %v15844_v58 = vpack.c.bf16 %v7576_v20, %v7572_v10  ;;  %v7604_v10 = vld [vmem:[%s16776_s7 + $0x140] sm:$0xff] }
 0xc71   :  { %12842 = vtanh.f32 %v12359_v1  ;;  %v7608_v20 = vld [vmem:[%s16776_s7 + $0x160] sm:$0xff] }
 0xc72   :  { %12844 = vpow2.f32 %v9709_v28  ;;  %v7585_v28 = vld [vmem:[%s16776_s7 + $0xa8] sm:$0xff] }
 0xc76   :  { %v12837_v45 = vpop.eup %12836 }
 0xc77   :  { %v6818_v34 = vmul.f32 %v12837_v45, %v12835_v3  ;;  %v7578_v3 = vld [vmem:[%s16776_s7 + $0x70] sm:$0xff]  ;;  %v7581_v45 = vld [vmem:[%s16776_s7 + $0x88] sm:$0xff] }
 0xc78   :  { %v15853_v1 = vpack.c.bf16 %v7578_v3, %v7574_v13  ;;  %v15986_v13 = vpack.c.bf16 %v7611_v30, %v7607_v57  ;;  %v15988_v3 = vpack.c.bf16 %v7608_v20, %v7604_v10  ;;  %v7808_v30 = vld [vmem:[#allocation17 + $0x8] sm:$0xff]  ;;  %v7810_v20 = vld [vmem:[#allocation17 + $0x18] sm:$0xff] }
 0xc79   :  { %v12839_v36 = vpop.eup %12838  ;;  %7203 = vmatmul.mubr.f32.vlgmr.msra.gmra.mrb[38].mxu0 %v6818_v34  ;;  %7274 = vmatmul.mubr.f32.vlgmr.msra.gmra.mrb[38].mxu1 %v6818_v34  ;;  %v7583_v34 = vld [vmem:[%s16776_s7 + $0x98] sm:$0xff]  ;;  %v7812_v10 = vld [vmem:[#allocation17 + $0x28] sm:$0xff] }
 0xc7a   :  { %v7048_v22 = vadd.f32 1.0, %v12839_v36  ;;  %v12841_v0 = vpop.eup %12840  ;;  %11635 = vmatpush1.bf16.msra.mxu0 %v15604_v7  ;;  %11667 = vmatpush1.bf16.msra.mxu1 %v15606_v6  ;;  %v17199_v7 = vld [vmem:[#allocation30_spill] sm:$0xff]  ;;  %v17200_v6 = vld [vmem:[#allocation29_spill] sm:$0xff]  ;;  %v15867_v36 = vpack.c.bf16 %v7585_v28, %v7581_v45 }
 0xc7b   :  { %v7049_v29 = vadd.f32 1.0, %v12841_v0  ;;  %11637 = vmatprep.subr.bf16.mxu0 %v15608_v24  ;;  %11669 = vmatprep.subr.bf16.mxu1 %v15610_v23  ;;  %v12843_v24 = vpop.eup %12842  ;;  %v17203_v23 = vld [vmem:[#allocation27_spill] sm:$0xff]  ;;  %v7606_v45 = vld [vmem:[%s16776_s7 + $0x150] sm:$0xff] }
 0xc7c   :  { %12846 = vrcp.f32 %v7048_v22  ;;  %7447 = vmatprep.mubr.f32.mxu0 %v16988_v19  ;;  %7518 = vmatprep.mubr.f32.mxu1 %v16988_v19  ;;  %v12845_v53 = vpop.eup %12844  ;;  %v7587_v22 = vld [vmem:[%s16776_s7 + $0xb8] sm:$0xff]  ;;  %v7580_v0 = vld [vmem:[%s16776_s7 + $0x80] sm:$0xff]  ;;  %v7610_v28 = vld [vmem:[%s16776_s7 + $0x170] sm:$0xff] }
 0xc7d   :  { %12848 = vrcp.f32 %v7049_v29  ;;  %v7050_v51 = vadd.f32 1.0, %v12845_v53  ;;  %v7584_v29 = vld [vmem:[%s16776_s7 + $0xa0] sm:$0xff]  ;;  %v7595_v53 = vld [vmem:[%s16776_s7 + $0xf8] sm:$0xff] }
 0xc7e   :  { %11639 = vmatpush1.bf16.msra.mxu0 %v17196_v8  ;;  %11671 = vmatpush1.bf16.msra.mxu1 %v17197_v37  ;;  %v15878_v8 = vpack.c.bf16 %v7587_v22, %v7583_v34  ;;  %v15880_v37 = vpack.c.bf16 %v7584_v29, %v7580_v0  ;;  %v15997_v34 = vpack.c.bf16 %v7610_v28, %v7606_v45  ;;  %v7613_v22 = vld [vmem:[%s16776_s7 + $0x188] sm:$0xff]  ;;  %v7615_v29 = vld [vmem:[%s16776_s7 + $0x198] sm:$0xff]  ;;  %v7814_v28 = vld [vmem:[#allocation17 + $0x38] sm:$0xff] }
 0xc7f   :  { %11641 = vmatprep.subr.bf16.mxu0 %v17198_v25  ;;  %11673 = vmatprep.subr.bf16.mxu1 %v17199_v7  ;;  %12850 = vrcp.f32 %v7050_v51  ;;  %v7582_v25 = vld [vmem:[%s16776_s7 + $0x90] sm:$0xff]  ;;  %v7617_v0 = vld [vmem:[%s16776_s7 + $0x1a8] sm:$0xff]  ;;  %v16074_v45 = vpack.c.bf16 %v7812_v10, %v7808_v30 }
 0xc80   :  { %v7586_v7 = vld [vmem:[%s16776_s7 + $0xb0] sm:$0xff] }
 0xc81   :  { %v7594_v51 = vld [vmem:[%s16776_s7 + $0xf0] sm:$0xff] }
 0xc82   :  { %11643 = vmatpush1.bf16.msra.mxu0 %v17200_v6  ;;  %11675 = vmatpush1.bf16.msra.mxu1 %v17201_v35  ;;  %v15889_v6 = vpack.c.bf16 %v7586_v7, %v7582_v25  ;;  %v7589_v35 = vld [vmem:[%s16776_s7 + $0xc8] sm:$0xff]  ;;  %v16011_v25 = vpack.c.bf16 %v7617_v0, %v7613_v22  ;;  %v7619_v7 = vld [vmem:[%s16776_s7 + $0x1b8] sm:$0xff]  ;;  %v16076_v22 = vpack.c.bf16 %v7814_v28, %v7810_v20 }
 0xc83   :  { %11645 = vmatprep.subr.bf16.mxu0 %v17202_v41  ;;  %11677 = vmatprep.subr.bf16.mxu1 %v17203_v23  ;;  %v7591_v41 = vld [vmem:[%s16776_s7 + $0xd8] sm:$0xff] }
 0xc86   :  { %v12847_v62 = vpop.eup %12846  ;;  %11647 = vmatpush1.bf16.msra.mxu0 %v17204_v46  ;;  %11679 = vmatpush1.bf16.msra.mxu1 %v17205_v40  ;;  %v15914_v46 = vpack.c.bf16 %v7595_v53, %v7591_v41  ;;  %v16022_v41 = vpack.c.bf16 %v7619_v7, %v7615_v29 }
 0xc87   :  { %v7060_v44 = vmul.f32 %v12847_v62, %v12843_v24  ;;  %v12849_v54 = vpop.eup %12848  ;;  %11649 = vmatprep.subr.bf16.mxu0 %v15646_v17  ;;  %11681 = vmatprep.subr.bf16.mxu1 %v15648_v38  ;;  %v7565_v17 = vld [vmem:[%s16776_s7 + $0x8] sm:$0xff]  ;;  %v7588_v62 = vld [vmem:[%s16776_s7 + $0xc0] sm:$0xff] }
 0xc88   :  { %v7059_v47 = vmul.f32 %v12849_v54, %v15663_v14  ;;  %v7569_v38 = vld [vmem:[%s16776_s7 + $0x28] sm:$0xff]  ;;  %v7590_v54 = vld [vmem:[%s16776_s7 + $0xd0] sm:$0xff] }
 0xc89   :  { %v7593_v24 = vld [vmem:[%s16776_s7 + $0xe8] sm:$0xff] }
 0xc8a   :  { %v15767_v16 = vadd.f32 %v7060_v44, %v7059_v47  ;;  %11651 = vmatpush1.bf16.msra.mxu0 %v15652_v61  ;;  %11683 = vmatpush1.bf16.msra.mxu1 %v15654_v27  ;;  %v12851_v61 = vpop.eup %12850  ;;  %v15903_v23 = vpack.c.bf16 %v7593_v24, %v7589_v35  ;;  %v7592_v44 = vld [vmem:[%s16776_s7 + $0xe0] sm:$0xff]  ;;  %v15925_v47 = vpack.c.bf16 %v7594_v51, %v7590_v54  ;;  %v7621_v51 = vld [vmem:[%s16776_s7 + $0x1c8] sm:$0xff] }
 0xc8b   :  { %11653 = vmatprep.subr.bf16.mxu0 %v17206_v49  ;;  %11685 = vmatprep.subr.bf16.mxu1 %v17207_v60  ;;  %v15916_v40 = vpack.c.bf16 %v7592_v44, %v7588_v62  ;;  %v7597_v49 = vld [vmem:[%s16776_s7 + $0x108] sm:$0xff]  ;;  %v7612_v35 = vld [vmem:[%s16776_s7 + $0x180] sm:$0xff]  ;;  %v7614_v62 = vld [vmem:[%s16776_s7 + $0x190] sm:$0xff] }
 0xc8c   :  { %12852 = vtanh.f32 %v15767_v16  ;;  %v7601_v60 = vld [vmem:[%s16776_s7 + $0x128] sm:$0xff]  ;;  %v7616_v24 = vld [vmem:[%s16776_s7 + $0x1a0] sm:$0xff]  ;;  %v7618_v44 = vld [vmem:[%s16776_s7 + $0x1b0] sm:$0xff] }
 0xc8d   :  { %v16024_v53 = vpack.c.bf16 %v7616_v24, %v7612_v35  ;;  %v16033_v54 = vpack.c.bf16 %v7618_v44, %v7614_v62 }
 0xc8e   :  { %11655 = vmatpush1.bf16.msra.mxu0 %v15667_v21  ;;  %11687 = vmatpush1.bf16.msra.mxu1 %v15669_v48  ;;  %v7567_v21 = vld [vmem:[%s16776_s7 + $0x18] sm:$0xff]  ;;  %v15795_v48 = vpack.c.bf16 %v7569_v38, %v7565_v17  ;;  %v7596_v17 = vld [vmem:[%s16776_s7 + $0x100] sm:$0xff] }
 0xc8f   :  { %11657 = vmatprep.subr.bf16.mxu0 %v15673_v18  ;;  %11689 = vmatprep.subr.bf16.mxu1 %v15675_v2  ;;  %v7571_v18 = vld [vmem:[%s16776_s7 + $0x38] sm:$0xff]  ;;  %v7564_v2 = vld [vmem:[%s16776_s7] sm:$0xff] }
 0xc90   :  { %v7600_v38 = vld [vmem:[%s16776_s7 + $0x120] sm:$0xff] }
 0xc92   :  { %11659 = vmatpush1.bf16.msra.mxu0 %v15680_v4  ;;  %11691 = vmatpush1.bf16.msra.mxu1 %v15682_v63  ;;  %v7568_v4 = vld [vmem:[%s16776_s7 + $0x20] sm:$0xff]  ;;  %v15806_v63 = vpack.c.bf16 %v7571_v18, %v7567_v21  ;;  %v15952_v18 = vpack.c.bf16 %v7600_v38, %v7596_v17 }
 0xc93   :  { %11661 = vmatprep.subr.bf16.mxu0 %v15686_v11  ;;  %11693 = vmatprep.subr.bf16.mxu1 %v15688_v5  ;;  %v15808_v11 = vpack.c.bf16 %v7568_v4, %v7564_v2  ;;  %v7566_v5 = vld [vmem:[%s16776_s7 + $0x10] sm:$0xff]  ;;  %v7620_v17 = vld [vmem:[%s16776_s7 + $0x1c0] sm:$0xff] }
 0xc94   :  { %v7598_v2 = vld [vmem:[%s16776_s7 + $0x110] sm:$0xff]  ;;  %v7624_v38 = vld [vmem:[%s16776_s7 + $0x1e0] sm:$0xff] }
 0xc95   :  { %v7602_v4 = vld [vmem:[%s16776_s7 + $0x130] sm:$0xff] }
 0xc96   :  { %v12853_v27 = vpop.eup %12852  ;;  %11663 = vmatpush1.bf16.msra.mxu0 %v15692_v50  ;;  %11695 = vmatpush1.bf16.msra.mxu1 %v15694_v56  ;;  %v7570_v50 = vld [vmem:[%s16776_s7 + $0x30] sm:$0xff] }
 0xc97   :  { %v7063_v14 = vmul.f32 %v12853_v27, %v12851_v61  ;;  %11697 = vmatprep.subr.bf16.mxu0 %v15795_v48  ;;  %v15817_v56 = vpack.c.bf16 %v7570_v50, %v7566_v5  ;;  %11729 = vmatprep.subr.bf16.mxu1 %v15806_v63  ;;  %v7599_v61 = vld [vmem:[%s16776_s7 + $0x118] sm:$0xff]  ;;  %v15939_v27 = vpack.c.bf16 %v7601_v60, %v7597_v49  ;;  %v7605_v50 = vld [vmem:[%s16776_s7 + $0x148] sm:$0xff] }
 0xc98   :  { %v15961_v5 = vpack.c.bf16 %v7602_v4, %v7598_v2  ;;  %v15975_v43 = vpack.c.bf16 %v7609_v9, %v7605_v50  ;;  %v7625_v49 = vld [vmem:[%s16776_s7 + $0x1e8] sm:$0xff]  ;;  %v7623_v60 = vld [vmem:[%s16776_s7 + $0x1d8] sm:$0xff]  ;;  %v16060_v4 = vpack.c.bf16 %v7624_v38, %v7620_v17  ;;  %v7622_v50 = vld [vmem:[%s16776_s7 + $0x1d0] sm:$0xff] }
 0xc99   :  { %7448 = vmatmul.mubr.f32.vlgmr.msra.gmra.mrb[56].mxu0 %v7063_v14  ;;  %7519 = vmatmul.mubr.f32.vlgmr.msra.gmra.mrb[56].mxu1 %v7063_v14  ;;  %v7603_v14 = vld [vmem:[%s16776_s7 + $0x138] sm:$0xff]  ;;  %v7626_v9 = vld [vmem:[%s16776_s7 + $0x1f0] sm:$0xff] }
 0xc9a   :  { %7692 = vmatprep.mubr.f32.mxu0 %v16988_v19  ;;  %7763 = vmatprep.mubr.f32.mxu1 %v16988_v19  ;;  %v15950_v21 = vpack.c.bf16 %v7603_v14, %v7599_v61  ;;  %v16047_v61 = vpack.c.bf16 %v7625_v49, %v7621_v51  ;;  %v7627_v14 = vld [vmem:[%s16776_s7 + $0x1f8] sm:$0xff]  ;;  %v16069_v57 = vpack.c.bf16 %v7626_v9, %v7622_v50 }
 0xc9b   :  { %11699 = vmatpush1.bf16.msra.mxu0 %v15808_v11  ;;  %11731 = vmatpush1.bf16.msra.mxu1 %v15817_v56  ;;  %v16058_v2 = vpack.c.bf16 %v7627_v14, %v7623_v60 }
 0xc9c   :  { %11701 = vmatprep.subr.bf16.mxu0 %v15831_v52  ;;  %11733 = vmatprep.subr.bf16.mxu1 %v15842_v12 }
 0xc9f   :  { %11703 = vmatpush1.bf16.msra.mxu0 %v15844_v58  ;;  %11735 = vmatpush1.bf16.msra.mxu1 %v15853_v1 }
 0xca0   :  { %11705 = vmatprep.subr.bf16.mxu0 %v15867_v36  ;;  %11737 = vmatprep.subr.bf16.mxu1 %v15878_v8 }
 0xca3   :  { %11707 = vmatpush1.bf16.msra.mxu0 %v15880_v37  ;;  %11739 = vmatpush1.bf16.msra.mxu1 %v15889_v6 }
 0xca4   :  { %11709 = vmatprep.subr.bf16.mxu0 %v15903_v23  ;;  %11741 = vmatprep.subr.bf16.mxu1 %v15914_v46 }
 0xca7   :  { %11711 = vmatpush1.bf16.msra.mxu0 %v15916_v40  ;;  %11743 = vmatpush1.bf16.msra.mxu1 %v15925_v47 }
 0xca8   :  { %11713 = vmatprep.subr.bf16.mxu0 %v15939_v27  ;;  %11745 = vmatprep.subr.bf16.mxu1 %v15950_v21 }
 0xcab   :  { %11715 = vmatpush1.bf16.msra.mxu0 %v15952_v18  ;;  %11747 = vmatpush1.bf16.msra.mxu1 %v15961_v5 }
 0xcac   :  { %11717 = vmatprep.subr.bf16.mxu0 %v15975_v43  ;;  %11749 = vmatprep.subr.bf16.mxu1 %v15986_v13 }
 0xcaf   :  { %11719 = vmatpush1.bf16.msra.mxu0 %v15988_v3  ;;  %11751 = vmatpush1.bf16.msra.mxu1 %v15997_v34 }
 0xcb0   :  { %11721 = vmatprep.subr.bf16.mxu0 %v16011_v25  ;;  %11753 = vmatprep.subr.bf16.mxu1 %v16022_v41 }
 0xcb3   :  { %11723 = vmatpush1.bf16.msra.mxu0 %v16024_v53  ;;  %11755 = vmatpush1.bf16.msra.mxu1 %v16033_v54 }
 0xcb4   :  { %11725 = vmatprep.subr.bf16.mxu0 %v16047_v61  ;;  %11757 = vmatprep.subr.bf16.mxu1 %v16058_v2 }
 0xcb7   :  { %11727 = vmatpush1.bf16.msra.mxu0 %v16060_v4  ;;  %11759 = vmatpush1.bf16.msra.mxu1 %v16069_v57 }
 0xcb8   :  { %11761 = vmatprep.subr.bf16.mxu0 %v16074_v45  ;;  %11793 = vmatprep.subr.bf16.mxu1 %v16076_v22 }
 0xd4c   :  { %v7204_v0 = vpop.f32.mrb[38].mxu0  ;;  %v7275_v29 = vpop.f32.mrb[38].mxu1 }
 0xd4d   :  { %v12310_v7 = vadd.f32 %v7204_v0, %v17187_v32  ;;  %v7206_v35 = vpop.f32.mrb[39].mxu0  ;;  %v7277_v24 = vpop.f32.mrb[39].mxu1  ;;  %v12326_v49 = vadd.f32 %v7275_v29, %v17189_v39  ;;  %v7826_v32 = vld [vmem:[#allocation17 + $0x98] sm:$0xff] }
 0xd4e   :  { %v12311_v62 = vadd.f32 %v7206_v35, %v17188_v59  ;;  %v12327_v60 = vadd.f32 %v7277_v24, %v17190_v26  ;;  %v7824_v26 = vld [vmem:[#allocation17 + $0x88] sm:$0xff] }
 0xd4f   :  { %v9710_v44 = vmul.f32 -1.442695, %v12310_v7  ;;  %v9712_v14 = vmul.f32 -1.442695, %v12326_v49  ;;  %v7828_v59 = vld [vmem:[#allocation17 + $0xa8] sm:$0xff] }
 0xd50   :  { %v9711_v51 = vmul.f32 -1.442695, %v12311_v62 }
 0xd51   :  { %12854 = vpow2.f32 %v9710_v44 }
 0xd52   :  { %12856 = vpow2.f32 %v9711_v51 }
 0xd53   :  { %12858 = vtanh.f32 %v12327_v60 }
 0xd54   :  { %12860 = vpow2.f32 %v9712_v14 }
 0xd5b   :  { %v12855_v17 = vpop.eup %12854 }
 0xd5c   :  { %v7293_v38 = vadd.f32 1.0, %v12855_v17  ;;  %v12857_v50 = vpop.eup %12856 }
 0xd5d   :  { %v7294_v9 = vadd.f32 1.0, %v12857_v50  ;;  %v12859_v30 = vpop.eup %12858  ;;  %v7811_v50 = vld [vmem:[#allocation17 + $0x20] sm:$0xff] }
 0xd5e   :  { %12862 = vrcp.f32 %v7293_v38  ;;  %v12861_v10 = vpop.eup %12860 }
 0xd5f   :  { %12864 = vrcp.f32 %v7294_v9  ;;  %v7295_v7 = vadd.f32 1.0, %v12861_v10  ;;  %v7809_v9 = vld [vmem:[#allocation17 + $0x10] sm:$0xff]  ;;  %v7816_v10 = vld [vmem:[#allocation17 + $0x48] sm:$0xff] }
 0xd61   :  { %12866 = vrcp.f32 %v7295_v7 }
 0xd68   :  { %v12863_v20 = vpop.eup %12862 }
 0xd69   :  { %v7305_v28 = vmul.f32 %v12863_v20, %v12859_v30  ;;  %v12865_v0 = vpop.eup %12864  ;;  %v7813_v30 = vld [vmem:[#allocation17 + $0x30] sm:$0xff]  ;;  %v7820_v20 = vld [vmem:[#allocation17 + $0x68] sm:$0xff] }
 0xd6a   :  { %v7304_v35 = vmul.f32 %v12865_v0, %v15741_v42  ;;  %v7807_v42 = vld [vmem:[#allocation17] sm:$0xff]  ;;  %v7822_v0 = vld [vmem:[#allocation17 + $0x78] sm:$0xff] }
 0xd6c   :  { %v7449_v29 = vpop.f32.mrb[56].mxu0  ;;  %v7520_v62 = vpop.f32.mrb[56].mxu1  ;;  %v16085_v24 = vadd.f32 %v7305_v28, %v7304_v35  ;;  %v7818_v28 = vld [vmem:[#allocation17 + $0x58] sm:$0xff] }
 0xd6d   :  { %v12342_v44 = vadd.f32 %v7449_v29, %v17192_v15  ;;  %v7451_v51 = vpop.f32.mrb[57].mxu0  ;;  %v7522_v49 = vpop.f32.mrb[57].mxu1  ;;  %v12356_v38 = vadd.f32 %v7520_v62, %v17194_v33  ;;  %v16098_v33 = vpack.c.bf16 %v7822_v0, %v7818_v28  ;;  %v7817_v15 = vld [vmem:[#allocation17 + $0x50] sm:$0xff] }
 0xd6e   :  { %17208 = vst [vmem:[#allocation35_spill] sm:$0xff] %v16085_v24  ;;  %v12343_v60 = vadd.f32 %v7451_v51, %v17193_v31  ;;  %12868 = vtanh.f32 %v16085_v24  ;;  %v12867_v35 = vpop.eup %12866  ;;  %v12357_v7 = vadd.f32 %v7522_v49, %v17195_v55  ;;  %v16092_v31 = vpack.c.bf16 %v7811_v50, %v7807_v42  ;;  %v7821_v24 = vld [vmem:[#allocation17 + $0x70] sm:$0xff]  ;;  %v7830_v49 = vld [vmem:[#allocation17 + $0xb8] sm:$0xff] }
 0xd6f   :  { %v9713_v14 = vmul.f32 -1.442695, %v12342_v44  ;;  %v9715_v51 = vmul.f32 -1.442695, %v12356_v38  ;;  %v16094_v44 = vpack.c.bf16 %v7813_v30, %v7809_v9  ;;  %v16104_v50 = vpack.c.bf16 %v7821_v24, %v7817_v15  ;;  %v7823_v9 = vld [vmem:[#allocation17 + $0x80] sm:$0xff]  ;;  %v7825_v28 = vld [vmem:[#allocation17 + $0x90] sm:$0xff] }
 0xd70   :  { %v9714_v17 = vmul.f32 -1.442695, %v12343_v60  ;;  %v7815_v60 = vld [vmem:[#allocation17 + $0x40] sm:$0xff]  ;;  %v7829_v0 = vld [vmem:[#allocation17 + $0xb0] sm:$0xff] }
 0xd71   :  { %12870 = vpow2.f32 %v9713_v14  ;;  %v7819_v14 = vld [vmem:[#allocation17 + $0x60] sm:$0xff]  ;;  %17210 = vst [vmem:[#allocation37_spill] sm:$0xff] %v16104_v50 }
 0xd72   :  { %12872 = vpow2.f32 %v9714_v17  ;;  %v16096_v17 = vpack.c.bf16 %v7820_v20, %v7816_v10  ;;  %v16102_v42 = vpack.c.bf16 %v7819_v14, %v7815_v60  ;;  %v7827_v30 = vld [vmem:[#allocation17 + $0xa0] sm:$0xff]  ;;  %v16110_v20 = vpack.c.bf16 %v7830_v49, %v7826_v32  ;;  %v7833_v60 = vld [vmem:[#allocation17 + $0xd0] sm:$0xff]  ;;  %v7844_v49 = vld [vmem:[#allocation17 + $0x128] sm:$0xff] }
 0xd73   :  { %12874 = vtanh.f32 %v12357_v7  ;;  %v7836_v7 = vld [vmem:[#allocation17 + $0xe8] sm:$0xff]  ;;  %v16116_v15 = vpack.c.bf16 %v7827_v30, %v7823_v9  ;;  %v7831_v32 = vld [vmem:[#allocation17 + $0xc0] sm:$0xff]  ;;  %v7837_v14 = vld [vmem:[#allocation17 + $0xf0] sm:$0xff] }
 0xd74   :  { %12876 = vpow2.f32 %v9715_v51  ;;  %17209 = vst [vmem:[#allocation36_spill] sm:$0xff] %v16102_v42  ;;  %17212 = vst [vmem:[#allocation38_spill] sm:$0xff] %v16110_v20  ;;  %v7838_v51 = vld [vmem:[#allocation17 + $0xf8] sm:$0xff]  ;;  %v16130_v30 = vpack.c.bf16 %v7837_v14, %v7833_v60 }
 0xd75   :  { %17213 = vst [vmem:[#allocation39_spill] sm:$0xff] %v16116_v15 }
 0xd76   :  { %17218 = vst [vmem:[#allocation44_spill] sm:$0xff] %v16130_v30 }
 0xd78   :  { %v12869_v29 = vpop.eup %12868 }
 0xd79   :  { %v7308_v62 = vmul.f32 %v12869_v29, %v12867_v35  ;;  %v7832_v35 = vld [vmem:[#allocation17 + $0xc8] sm:$0xff]  ;;  %v7834_v29 = vld [vmem:[#allocation17 + $0xd8] sm:$0xff] }
 0xd7a   :  { %v16124_v24 = vpack.c.bf16 %v7838_v51, %v7834_v29  ;;  %v7841_v51 = vld [vmem:[#allocation17 + $0x110] sm:$0xff] }
 0xd7b   :  { %v12871_v39 = vpop.eup %12870  ;;  %7693 = vmatmul.mubr.f32.vlgmr.msra.gmra.mrb[40].mxu0 %v7308_v62  ;;  %7764 = vmatmul.mubr.f32.vlgmr.msra.gmra.mrb[40].mxu1 %v7308_v62  ;;  %v7840_v62 = vld [vmem:[#allocation17 + $0x108] sm:$0xff] }
 0xd7c   :  { %v7538_v55 = vadd.f32 1.0, %v12871_v39  ;;  %v12873_v38 = vpop.eup %12872  ;;  %11763 = vmatpush1.bf16.msra.mxu0 %v16092_v31  ;;  %11795 = vmatpush1.bf16.msra.mxu1 %v16094_v44  ;;  %v16108_v39 = vpack.c.bf16 %v7828_v59, %v7824_v26  ;;  %v16118_v59 = vpack.c.bf16 %v7829_v0, %v7825_v28  ;;  %v7835_v26 = vld [vmem:[#allocation17 + $0xe0] sm:$0xff]  ;;  %17216 = vst [vmem:[#allocation33_spill] sm:$0xff] %v16124_v24 }
 0xd7d   :  { %v7539_v10 = vadd.f32 1.0, %v12873_v38  ;;  %11765 = vmatprep.subr.bf16.mxu0 %v16096_v17  ;;  %11797 = vmatprep.subr.bf16.mxu1 %v16098_v33  ;;  %v7842_v38 = vld [vmem:[#allocation17 + $0x118] sm:$0xff]  ;;  %v16128_v9 = vpack.c.bf16 %v7835_v26, %v7831_v32  ;;  %v7839_v28 = vld [vmem:[#allocation17 + $0x100] sm:$0xff] }
 0xd7e   :  { %12878 = vrcp.f32 %v7538_v55  ;;  %17211 = vst [vmem:[#allocation31_spill] sm:$0xff] %v16108_v39  ;;  %7935 = vmatprep.mubr.f32.mxu0 %v16988_v19  ;;  %8006 = vmatprep.mubr.f32.mxu1 %v16988_v19  ;;  %17214 = vst [vmem:[#allocation40_spill] sm:$0xff] %v16118_v59  ;;  %v16122_v55 = vpack.c.bf16 %v7836_v7, %v7832_v35  ;;  %v7843_v0 = vld [vmem:[#allocation17 + $0x120] sm:$0xff]  ;;  %v12875_v35 = vpop.eup %12874  ;;  %v16134_v7 = vpack.c.bf16 %v7844_v49, %v7840_v62  ;;  %v7850_v32 = vld [vmem:[#allocation17 + $0x158] sm:$0xff] }
 0xd7f   :  { %12880 = vrcp.f32 %v7539_v10  ;;  %v7846_v10 = vld [vmem:[#allocation17 + $0x138] sm:$0xff]  ;;  %17217 = vst [vmem:[#allocation43_spill] sm:$0xff] %v16128_v9  ;;  %v7847_v62 = vld [vmem:[#allocation17 + $0x140] sm:$0xff] }
 0xd80   :  { %11767 = vmatpush1.bf16.msra.mxu0 %v16102_v42  ;;  %11799 = vmatpush1.bf16.msra.mxu1 %v16104_v50  ;;  %17215 = vst [vmem:[#allocation41_spill] sm:$0xff] %v16122_v55  ;;  %v16136_v29 = vpack.c.bf16 %v7846_v10, %v7842_v38  ;;  %v7854_v26 = vld [vmem:[#allocation17 + $0x178] sm:$0xff]  ;;  %v7851_v49 = vld [vmem:[#allocation17 + $0x160] sm:$0xff] }
 0xd81   :  { %11769 = vmatprep.subr.bf16.mxu0 %v16108_v39  ;;  %11801 = vmatprep.subr.bf16.mxu1 %v16110_v20  ;;  %v7845_v20 = vld [vmem:[#allocation17 + $0x130] sm:$0xff]  ;;  %v12877_v39 = vpop.eup %12876  ;;  %v16148_v42 = vpack.c.bf16 %v7854_v26, %v7850_v32  ;;  %v7859_v32 = vld [vmem:[#allocation17 + $0x1a0] sm:$0xff] }
 0xd82   :  { %v7540_v10 = vadd.f32 1.0, %v12877_v39  ;;  %v16155_v39 = vpack.c.bf16 %v7851_v49, %v7847_v62  ;;  %v7868_v62 = vld [vmem:[#allocation17 + $0x1e8] sm:$0xff]  ;;  %v7866_v49 = vld [vmem:[#allocation17 + $0x1d8] sm:$0xff] }
 0xd83   :  { %17220 = vst [vmem:[#allocation42_spill] sm:$0xff] %v16148_v42 }
 0xd84   :  { %11771 = vmatpush1.bf16.msra.mxu0 %v16116_v15  ;;  %11803 = vmatpush1.bf16.msra.mxu1 %v16118_v59  ;;  %v7848_v15 = vld [vmem:[#allocation17 + $0x148] sm:$0xff]  ;;  %12882 = vrcp.f32 %v7540_v10 }
 0xd85   :  { %11773 = vmatprep.subr.bf16.mxu0 %v16122_v55  ;;  %11805 = vmatprep.subr.bf16.mxu1 %v16124_v24  ;;  %v7852_v59 = vld [vmem:[#allocation17 + $0x168] sm:$0xff]  ;;  %v16140_v55 = vpack.c.bf16 %v7843_v0, %v7839_v28  ;;  %v16142_v24 = vpack.c.bf16 %v7845_v20, %v7841_v51  ;;  %v7858_v20 = vld [vmem:[#allocation17 + $0x198] sm:$0xff] }
 0xd86   :  { %v16146_v50 = vpack.c.bf16 %v7852_v59, %v7848_v15  ;;  %v7860_v0 = vld [vmem:[#allocation17 + $0x1a8] sm:$0xff]  ;;  %v7862_v51 = vld [vmem:[#allocation17 + $0x1b8] sm:$0xff]  ;;  %v7855_v59 = vld [vmem:[#allocation17 + $0x180] sm:$0xff] }
 0xd87   :  { %v16163_v26 = vpack.c.bf16 %v7862_v51, %v7858_v20  ;;  %v16168_v10 = vpack.c.bf16 %v7859_v32, %v7855_v59  ;;  %v7867_v51 = vld [vmem:[#allocation17 + $0x1e0] sm:$0xff] }
 0xd88   :  { %v12879_v60 = vpop.eup %12878  ;;  %11775 = vmatpush1.bf16.msra.mxu0 %v16128_v9  ;;  %11807 = vmatpush1.bf16.msra.mxu1 %v16130_v30  ;;  %17219 = vst [vmem:[#allocation56_spill] sm:$0xff] %v16146_v50  ;;  %v7856_v9 = vld [vmem:[#allocation17 + $0x188] sm:$0xff] }
 0xd89   :  { %v7550_v14 = vmul.f32 %v12879_v60, %v12875_v35  ;;  %v12881_v38 = vpop.eup %12880  ;;  %11777 = vmatprep.subr.bf16.mxu0 %v16134_v7  ;;  %11809 = vmatprep.subr.bf16.mxu1 %v16136_v29  ;;  %v7849_v35 = vld [vmem:[#allocation17 + $0x150] sm:$0xff] }
 0xd8a   :  { %v7853_v60 = vld [vmem:[#allocation17 + $0x170] sm:$0xff]  ;;  %v7549_v28 = vmul.f32 %v12881_v38, %v15767_v16  ;;  %v16161_v16 = vpack.c.bf16 %v7860_v0, %v7856_v9  ;;  %v7863_v9 = vld [vmem:[#allocation17 + $0x1c0] sm:$0xff] }
 0xd8b   :  { %v16157_v15 = vpack.c.bf16 %v7853_v60, %v7849_v35  ;;  %v7861_v38 = vld [vmem:[#allocation17 + $0x1b0] sm:$0xff]  ;;  %v7870_v35 = vld [vmem:[#allocation17 + $0x1f8] sm:$0xff]  ;;  %v16180_v59 = vpack.c.bf16 %v7867_v51, %v7863_v9 }
 0xd8c   :  { %v16151_v30 = vadd.f32 %v7550_v14, %v7549_v28  ;;  %11779 = vmatpush1.bf16.msra.mxu0 %v16140_v55  ;;  %11811 = vmatpush1.bf16.msra.mxu1 %v16142_v24  ;;  %v7857_v14 = vld [vmem:[#allocation17 + $0x190] sm:$0xff]  ;;  %v7864_v28 = vld [vmem:[#allocation17 + $0x1c8] sm:$0xff]  ;;  %v16176_v20 = vpack.c.bf16 %v7870_v35, %v7866_v49  ;;  %v17228_v35 = vld [vmem:[#allocation52_spill] sm:$0xff] }
 0xd8d   :  { %11781 = vmatprep.subr.bf16.mxu0 %v16146_v50  ;;  %11813 = vmatprep.subr.bf16.mxu1 %v16148_v42  ;;  %v16170_v60 = vpack.c.bf16 %v7861_v38, %v7857_v14  ;;  %v16174_v0 = vpack.c.bf16 %v7868_v62, %v7864_v28  ;;  %v7865_v42 = vld [vmem:[#allocation17 + $0x1d0] sm:$0xff] }
 0xd8e   :  { %12884 = vtanh.f32 %v16151_v30  ;;  %v7869_v50 = vld [vmem:[#allocation17 + $0x1f0] sm:$0xff]  ;;  %v12883_v14 = vpop.eup %12882 }
 0xd8f   :  { %v16182_v32 = vpack.c.bf16 %v7869_v50, %v7865_v42  ;;  %v17227_v42 = vld [vmem:[#allocation51_spill] sm:$0xff] }
 0xd90   :  { %11783 = vmatpush1.bf16.msra.mxu0 %v16155_v39  ;;  %11815 = vmatpush1.bf16.msra.mxu1 %v16157_v15 }
 0xd91   :  { %11785 = vmatprep.subr.bf16.mxu0 %v16161_v16  ;;  %11817 = vmatprep.subr.bf16.mxu1 %v16163_v26 }
 0xd94   :  { %11787 = vmatpush1.bf16.msra.mxu0 %v16168_v10  ;;  %11819 = vmatpush1.bf16.msra.mxu1 %v16170_v60 }
 0xd95   :  { %11789 = vmatprep.subr.bf16.mxu0 %v16174_v0  ;;  %11821 = vmatprep.subr.bf16.mxu1 %v16176_v20 }
 0xd98   :  { %v12885_v38 = vpop.eup %12884  ;;  %11791 = vmatpush1.bf16.msra.mxu0 %v16180_v59  ;;  %11823 = vmatpush1.bf16.msra.mxu1 %v16182_v32 }
 0xd99   :  { %v7553_v28 = vmul.f32 %v12885_v38, %v12883_v14  ;;  %11825 = vmatprep.subr.bf16.mxu0 %v15795_v48  ;;  %11857 = vmatprep.subr.bf16.mxu1 %v15806_v63  ;;  %v17229_v14 = vld [vmem:[#allocation54_spill] sm:$0xff] }
 0xd9b   :  { %7936 = vmatmul.mubr.f32.vlgmr.msra.gmra.mrb[54].mxu0 %v7553_v28  ;;  %8007 = vmatmul.mubr.f32.vlgmr.msra.gmra.mrb[54].mxu1 %v7553_v28 }
 0xd9c   :  { %11827 = vmatpush1.bf16.msra.mxu0 %v15808_v11  ;;  %11859 = vmatpush1.bf16.msra.mxu1 %v15817_v56  ;;  %v17221_v11 = vld [vmem:[#allocation45_spill] sm:$0xff] }
 0xd9d   :  { %11829 = vmatprep.subr.bf16.mxu0 %v15831_v52  ;;  %11861 = vmatprep.subr.bf16.mxu1 %v15842_v12 }
 0xd9e   :  { %8178 = vmatprep.mubr.f32.mxu0 %v16988_v19  ;;  %8249 = vmatprep.mubr.f32.mxu1 %v16988_v19 }
 0xda0   :  { %11831 = vmatpush1.bf16.msra.mxu0 %v15844_v58  ;;  %11863 = vmatpush1.bf16.msra.mxu1 %v15853_v1  ;;  %v17222_v58 = vld [vmem:[#allocation46_spill] sm:$0xff] }
 0xda1   :  { %11833 = vmatprep.subr.bf16.mxu0 %v15867_v36  ;;  %11865 = vmatprep.subr.bf16.mxu1 %v15878_v8 }
 0xda4   :  { %11835 = vmatpush1.bf16.msra.mxu0 %v15880_v37  ;;  %11867 = vmatpush1.bf16.msra.mxu1 %v15889_v6  ;;  %v17223_v37 = vld [vmem:[#allocation47_spill] sm:$0xff] }
 0xda5   :  { %11837 = vmatprep.subr.bf16.mxu0 %v15903_v23  ;;  %11869 = vmatprep.subr.bf16.mxu1 %v15914_v46  ;;  %v17224_v23 = vld [vmem:[#allocation48_spill] sm:$0xff] }
 0xda8   :  { %11839 = vmatpush1.bf16.msra.mxu0 %v15916_v40  ;;  %11871 = vmatpush1.bf16.msra.mxu1 %v15925_v47 }
 0xda9   :  { %11841 = vmatprep.subr.bf16.mxu0 %v15939_v27  ;;  %11873 = vmatprep.subr.bf16.mxu1 %v15950_v21 }
 0xdac   :  { %11843 = vmatpush1.bf16.msra.mxu0 %v15952_v18  ;;  %11875 = vmatpush1.bf16.msra.mxu1 %v15961_v5 }
 0xdad   :  { %11845 = vmatprep.subr.bf16.mxu0 %v15975_v43  ;;  %11877 = vmatprep.subr.bf16.mxu1 %v15986_v13 }
 0xdb0   :  { %11847 = vmatpush1.bf16.msra.mxu0 %v15988_v3  ;;  %11879 = vmatpush1.bf16.msra.mxu1 %v15997_v34 }
 0xdb1   :  { %11849 = vmatprep.subr.bf16.mxu0 %v16011_v25  ;;  %11881 = vmatprep.subr.bf16.mxu1 %v16022_v41  ;;  %v17225_v41 = vld [vmem:[#allocation35_spill] sm:$0xff] }
 0xdb4   :  { %11851 = vmatpush1.bf16.msra.mxu0 %v16024_v53  ;;  %11883 = vmatpush1.bf16.msra.mxu1 %v16033_v54 }
 0xdb5   :  { %11853 = vmatprep.subr.bf16.mxu0 %v16047_v61  ;;  %11885 = vmatprep.subr.bf16.mxu1 %v16058_v2 }
 0xdb8   :  { %11855 = vmatpush1.bf16.msra.mxu0 %v16060_v4  ;;  %11887 = vmatpush1.bf16.msra.mxu1 %v16069_v57  ;;  %v17226_v4 = vld [vmem:[#allocation50_spill] sm:$0xff] }
 0xdb9   :  { %11889 = vmatprep.subr.bf16.mxu0 %v16074_v45  ;;  %11921 = vmatprep.subr.bf16.mxu1 %v16076_v22 }
 0xe4e   :  { %v7694_v48 = vpop.f32.mrb[40].mxu0  ;;  %v7765_v63 = vpop.f32.mrb[40].mxu1 }
 0xe4f   :  { %v12312_v56 = vadd.f32 %v7694_v48, %v17221_v11  ;;  %v7696_v52 = vpop.f32.mrb[41].mxu0  ;;  %v7767_v12 = vpop.f32.mrb[41].mxu1  ;;  %v12328_v6 = vadd.f32 %v7765_v63, %v17223_v37 }
 0xe50   :  { %v12313_v1 = vadd.f32 %v7696_v52, %v17222_v58  ;;  %v12329_v46 = vadd.f32 %v7767_v12, %v17224_v23 }
 0xe51   :  { %v9716_v36 = vmul.f32 -1.442695, %v12312_v56  ;;  %v9718_v40 = vmul.f32 -1.442695, %v12328_v6  ;;  %v17232_v6 = vld [vmem:[#allocation31_spill] sm:$0xff] }
 0xe52   :  { %v9717_v8 = vmul.f32 -1.442695, %v12313_v1 }
 0xe53   :  { %12886 = vpow2.f32 %v9716_v36  ;;  %v17230_v36 = vld [vmem:[#allocation36_spill] sm:$0xff] }
 0xe54   :  { %12888 = vpow2.f32 %v9717_v8  ;;  %v17231_v8 = vld [vmem:[#allocation37_spill] sm:$0xff] }
 0xe55   :  { %12890 = vtanh.f32 %v12329_v46  ;;  %v17235_v46 = vld [vmem:[#allocation40_spill] sm:$0xff] }
 0xe56   :  { %12892 = vpow2.f32 %v9718_v40  ;;  %v17236_v40 = vld [vmem:[#allocation41_spill] sm:$0xff] }
 0xe5d   :  { %v12887_v47 = vpop.eup %12886 }
 0xe5e   :  { %v7783_v27 = vadd.f32 1.0, %v12887_v47  ;;  %v12889_v21 = vpop.eup %12888 }
 0xe5f   :  { %v7784_v18 = vadd.f32 1.0, %v12889_v21  ;;  %v12891_v5 = vpop.eup %12890 }
 0xe60   :  { %12894 = vrcp.f32 %v7783_v27  ;;  %v12893_v43 = vpop.eup %12892 }
 0xe61   :  { %12896 = vrcp.f32 %v7784_v18  ;;  %v7785_v25 = vadd.f32 1.0, %v12893_v43  ;;  %v17238_v18 = vld [vmem:[#allocation43_spill] sm:$0xff] }
 0xe63   :  { %12898 = vrcp.f32 %v7785_v25  ;;  %v17240_v25 = vld [vmem:[#allocation56_spill] sm:$0xff] }
 0xe6a   :  { %v12895_v13 = vpop.eup %12894 }
 0xe6b   :  { %v7795_v3 = vmul.f32 %v12895_v13, %v12891_v5  ;;  %v12897_v34 = vpop.eup %12896  ;;  %v17239_v5 = vld [vmem:[#allocation44_spill] sm:$0xff] }
 0xe6c   :  { %v7794_v53 = vmul.f32 %v12897_v34, %v17225_v41  ;;  %v17241_v41 = vld [vmem:[#allocation42_spill] sm:$0xff] }
 0xe6d   :  { %v12899_v51 = vpop.eup %12898 }
 0xe6e   :  { %v7937_v54 = vpop.f32.mrb[54].mxu0  ;;  %v8008_v61 = vpop.f32.mrb[54].mxu1  ;;  %v16229_v2 = vadd.f32 %v7795_v3, %v7794_v53  ;;  %v8545_v53 = vld [vmem:[%s16776_s7 + $0x48] sm:$0xff] }
 0xe6f   :  { %v12340_v57 = vadd.f32 %v7937_v54, %v17226_v4  ;;  %v7939_v45 = vpop.f32.mrb[55].mxu0  ;;  %v8010_v22 = vpop.f32.mrb[55].mxu1  ;;  %v12354_v9 = vadd.f32 %v8008_v61, %v17228_v35  ;;  %v8549_v54 = vld [vmem:[%s16776_s7 + $0x68] sm:$0xff]  ;;  %v8547_v61 = vld [vmem:[%s16776_s7 + $0x58] sm:$0xff] }
 0xe70   :  { %v12341_v50 = vadd.f32 %v7939_v45, %v17227_v42  ;;  %12900 = vtanh.f32 %v16229_v2  ;;  %v12355_v38 = vadd.f32 %v8010_v22, %v17229_v14  ;;  %v8551_v45 = vld [vmem:[%s16776_s7 + $0x78] sm:$0xff]  ;;  %v8544_v22 = vld [vmem:[%s16776_s7 + $0x40] sm:$0xff] }
 0xe71   :  { %v9719_v62 = vmul.f32 -1.442695, %v12340_v57  ;;  %v9721_v48 = vmul.f32 -1.442695, %v12354_v9  ;;  %v16319_v57 = vpack.c.bf16 %v8549_v54, %v8545_v53  ;;  %v8546_v9 = vld [vmem:[%s16776_s7 + $0x50] sm:$0xff]  ;;  %v8581_v53 = vld [vmem:[%s16776_s7 + $0x168] sm:$0xff] }
 0xe72   :  { %v9720_v49 = vmul.f32 -1.442695, %v12341_v50  ;;  %v8548_v50 = vld [vmem:[%s16776_s7 + $0x60] sm:$0xff]  ;;  %v8579_v54 = vld [vmem:[%s16776_s7 + $0x158] sm:$0xff] }
 0xe73   :  { %12902 = vpow2.f32 %v9719_v62  ;;  %v16330_v62 = vpack.c.bf16 %v8551_v45, %v8547_v61  ;;  %v8583_v45 = vld [vmem:[%s16776_s7 + $0x178] sm:$0xff] }
 0xe74   :  { %12904 = vpow2.f32 %v9720_v49  ;;  %v16332_v49 = vpack.c.bf16 %v8548_v50, %v8544_v22  ;;  %v8576_v22 = vld [vmem:[%s16776_s7 + $0x140] sm:$0xff] }
 0xe75   :  { %12906 = vtanh.f32 %v12355_v38  ;;  %v8580_v50 = vld [vmem:[%s16776_s7 + $0x160] sm:$0xff] }
 0xe76   :  { %12908 = vpow2.f32 %v9721_v48  ;;  %v8557_v48 = vld [vmem:[%s16776_s7 + $0xa8] sm:$0xff] }
 0xe7a   :  { %v12901_v28 = vpop.eup %12900 }
 0xe7b   :  { %v7798_v63 = vmul.f32 %v12901_v28, %v12899_v51  ;;  %v8550_v51 = vld [vmem:[%s16776_s7 + $0x70] sm:$0xff]  ;;  %v8553_v28 = vld [vmem:[%s16776_s7 + $0x88] sm:$0xff] }
 0xe7c   :  { %v16341_v38 = vpack.c.bf16 %v8550_v51, %v8546_v9  ;;  %v16474_v9 = vpack.c.bf16 %v8583_v45, %v8579_v54  ;;  %v16476_v51 = vpack.c.bf16 %v8580_v50, %v8576_v22  ;;  %v8780_v45 = vld [vmem:[#allocation17 + $0x8] sm:$0xff]  ;;  %v8782_v50 = vld [vmem:[#allocation17 + $0x18] sm:$0xff] }
 0xe7d   :  { %v12903_v56 = vpop.eup %12902  ;;  %8179 = vmatmul.mubr.f32.vlgmr.msra.gmra.mrb[42].mxu0 %v7798_v63  ;;  %8250 = vmatmul.mubr.f32.vlgmr.msra.gmra.mrb[42].mxu1 %v7798_v63  ;;  %v8555_v63 = vld [vmem:[%s16776_s7 + $0x98] sm:$0xff]  ;;  %v8784_v22 = vld [vmem:[#allocation17 + $0x28] sm:$0xff] }
 0xe7e   :  { %v8026_v52 = vadd.f32 1.0, %v12903_v56  ;;  %v12905_v12 = vpop.eup %12904  ;;  %11891 = vmatpush1.bf16.msra.mxu0 %v16092_v31  ;;  %11923 = vmatpush1.bf16.msra.mxu1 %v16094_v44  ;;  %v17233_v31 = vld [vmem:[#allocation38_spill] sm:$0xff]  ;;  %v17234_v44 = vld [vmem:[#allocation39_spill] sm:$0xff]  ;;  %v16355_v56 = vpack.c.bf16 %v8557_v48, %v8553_v28  ;;  %v8578_v28 = vld [vmem:[%s16776_s7 + $0x150] sm:$0xff] }
 0xe7f   :  { %v8027_v1 = vadd.f32 1.0, %v12905_v12  ;;  %11893 = vmatprep.subr.bf16.mxu0 %v16096_v17  ;;  %11925 = vmatprep.subr.bf16.mxu1 %v16098_v33  ;;  %v12907_v17 = vpop.eup %12906  ;;  %v17237_v33 = vld [vmem:[#allocation33_spill] sm:$0xff]  ;;  %v8552_v12 = vld [vmem:[%s16776_s7 + $0x80] sm:$0xff] }
 0xe80   :  { %12910 = vrcp.f32 %v8026_v52  ;;  %8421 = vmatprep.mubr.f32.mxu0 %v16988_v19  ;;  %8492 = vmatprep.mubr.f32.mxu1 %v16988_v19  ;;  %v12909_v47 = vpop.eup %12908  ;;  %v8559_v52 = vld [vmem:[%s16776_s7 + $0xb8] sm:$0xff]  ;;  %v8582_v48 = vld [vmem:[%s16776_s7 + $0x170] sm:$0xff] }
 0xe81   :  { %12912 = vrcp.f32 %v8027_v1  ;;  %v8028_v13 = vadd.f32 1.0, %v12909_v47  ;;  %v8556_v1 = vld [vmem:[%s16776_s7 + $0xa0] sm:$0xff]  ;;  %v8567_v47 = vld [vmem:[%s16776_s7 + $0xf8] sm:$0xff] }
 0xe82   :  { %11895 = vmatpush1.bf16.msra.mxu0 %v17230_v36  ;;  %11927 = vmatpush1.bf16.msra.mxu1 %v17231_v8  ;;  %v16366_v36 = vpack.c.bf16 %v8559_v52, %v8555_v63  ;;  %v16368_v8 = vpack.c.bf16 %v8556_v1, %v8552_v12  ;;  %v16485_v63 = vpack.c.bf16 %v8582_v48, %v8578_v28  ;;  %v8585_v52 = vld [vmem:[%s16776_s7 + $0x188] sm:$0xff]  ;;  %v8587_v1 = vld [vmem:[%s16776_s7 + $0x198] sm:$0xff]  ;;  %v8786_v48 = vld [vmem:[#allocation17 + $0x38] sm:$0xff] }
 0xe83   :  { %11897 = vmatprep.subr.bf16.mxu0 %v17232_v6  ;;  %11929 = vmatprep.subr.bf16.mxu1 %v17233_v31  ;;  %12914 = vrcp.f32 %v8028_v13  ;;  %v8554_v6 = vld [vmem:[%s16776_s7 + $0x90] sm:$0xff]  ;;  %v8589_v12 = vld [vmem:[%s16776_s7 + $0x1a8] sm:$0xff]  ;;  %v16562_v28 = vpack.c.bf16 %v8784_v22, %v8780_v45 }
 0xe84   :  { %v8558_v31 = vld [vmem:[%s16776_s7 + $0xb0] sm:$0xff] }
 0xe85   :  { %v8566_v13 = vld [vmem:[%s16776_s7 + $0xf0] sm:$0xff] }
 0xe86   :  { %11899 = vmatpush1.bf16.msra.mxu0 %v17234_v44  ;;  %11931 = vmatpush1.bf16.msra.mxu1 %v17235_v46  ;;  %v16377_v44 = vpack.c.bf16 %v8558_v31, %v8554_v6  ;;  %v8561_v46 = vld [vmem:[%s16776_s7 + $0xc8] sm:$0xff]  ;;  %v16499_v6 = vpack.c.bf16 %v8589_v12, %v8585_v52  ;;  %v8591_v31 = vld [vmem:[%s16776_s7 + $0x1b8] sm:$0xff]  ;;  %v16564_v52 = vpack.c.bf16 %v8786_v48, %v8782_v50 }
 0xe87   :  { %11901 = vmatprep.subr.bf16.mxu0 %v17236_v40  ;;  %11933 = vmatprep.subr.bf16.mxu1 %v17237_v33  ;;  %v8563_v40 = vld [vmem:[%s16776_s7 + $0xd8] sm:$0xff] }
 0xe8a   :  { %v12911_v27 = vpop.eup %12910  ;;  %11903 = vmatpush1.bf16.msra.mxu0 %v17238_v18  ;;  %11935 = vmatpush1.bf16.msra.mxu1 %v17239_v5  ;;  %v16402_v18 = vpack.c.bf16 %v8567_v47, %v8563_v40  ;;  %v16510_v40 = vpack.c.bf16 %v8591_v31, %v8587_v1 }
 0xe8b   :  { %v8038_v21 = vmul.f32 %v12911_v27, %v12907_v17  ;;  %v12913_v43 = vpop.eup %12912  ;;  %11905 = vmatprep.subr.bf16.mxu0 %v16134_v7  ;;  %11937 = vmatprep.subr.bf16.mxu1 %v16136_v29  ;;  %v8537_v7 = vld [vmem:[%s16776_s7 + $0x8] sm:$0xff]  ;;  %v8560_v27 = vld [vmem:[%s16776_s7 + $0xc0] sm:$0xff] }
 0xe8c   :  { %v8037_v3 = vmul.f32 %v12913_v43, %v16151_v30  ;;  %v8541_v29 = vld [vmem:[%s16776_s7 + $0x28] sm:$0xff]  ;;  %v8562_v43 = vld [vmem:[%s16776_s7 + $0xd0] sm:$0xff] }
 0xe8d   :  { %v8565_v17 = vld [vmem:[%s16776_s7 + $0xe8] sm:$0xff] }
 0xe8e   :  { %v16255_v34 = vadd.f32 %v8038_v21, %v8037_v3  ;;  %11907 = vmatpush1.bf16.msra.mxu0 %v16140_v55  ;;  %11939 = vmatpush1.bf16.msra.mxu1 %v16142_v24  ;;  %v12915_v55 = vpop.eup %12914  ;;  %v16391_v33 = vpack.c.bf16 %v8565_v17, %v8561_v46  ;;  %v8564_v21 = vld [vmem:[%s16776_s7 + $0xe0] sm:$0xff]  ;;  %v16413_v3 = vpack.c.bf16 %v8566_v13, %v8562_v43  ;;  %v8593_v13 = vld [vmem:[%s16776_s7 + $0x1c8] sm:$0xff] }
 0xe8f   :  { %11909 = vmatprep.subr.bf16.mxu0 %v17240_v25  ;;  %11941 = vmatprep.subr.bf16.mxu1 %v17241_v41  ;;  %v16404_v5 = vpack.c.bf16 %v8564_v21, %v8560_v27  ;;  %v8569_v25 = vld [vmem:[%s16776_s7 + $0x108] sm:$0xff]  ;;  %v8584_v46 = vld [vmem:[%s16776_s7 + $0x180] sm:$0xff]  ;;  %v8586_v27 = vld [vmem:[%s16776_s7 + $0x190] sm:$0xff] }
 0xe90   :  { %12916 = vtanh.f32 %v16255_v34  ;;  %v8573_v41 = vld [vmem:[%s16776_s7 + $0x128] sm:$0xff]  ;;  %v8588_v17 = vld [vmem:[%s16776_s7 + $0x1a0] sm:$0xff]  ;;  %v8590_v21 = vld [vmem:[%s16776_s7 + $0x1b0] sm:$0xff] }
 0xe91   :  { %v16512_v47 = vpack.c.bf16 %v8588_v17, %v8584_v46  ;;  %v16521_v43 = vpack.c.bf16 %v8590_v21, %v8586_v27 }
 0xe92   :  { %11911 = vmatpush1.bf16.msra.mxu0 %v16155_v39  ;;  %11943 = vmatpush1.bf16.msra.mxu1 %v16157_v15  ;;  %v8539_v39 = vld [vmem:[%s16776_s7 + $0x18] sm:$0xff]  ;;  %v16283_v15 = vpack.c.bf16 %v8541_v29, %v8537_v7  ;;  %v8568_v7 = vld [vmem:[%s16776_s7 + $0x100] sm:$0xff] }
 0xe93   :  { %11913 = vmatprep.subr.bf16.mxu0 %v16161_v16  ;;  %11945 = vmatprep.subr.bf16.mxu1 %v16163_v26  ;;  %v8543_v16 = vld [vmem:[%s16776_s7 + $0x38] sm:$0xff]  ;;  %v8536_v26 = vld [vmem:[%s16776_s7] sm:$0xff] }
 0xe94   :  { %v8572_v29 = vld [vmem:[%s16776_s7 + $0x120] sm:$0xff] }
 0xe96   :  { %11915 = vmatpush1.bf16.msra.mxu0 %v16168_v10  ;;  %11947 = vmatpush1.bf16.msra.mxu1 %v16170_v60  ;;  %v8540_v10 = vld [vmem:[%s16776_s7 + $0x20] sm:$0xff]  ;;  %v16294_v60 = vpack.c.bf16 %v8543_v16, %v8539_v39  ;;  %v16440_v16 = vpack.c.bf16 %v8572_v29, %v8568_v7 }
 0xe97   :  { %11917 = vmatprep.subr.bf16.mxu0 %v16174_v0  ;;  %11949 = vmatprep.subr.bf16.mxu1 %v16176_v20  ;;  %v16296_v0 = vpack.c.bf16 %v8540_v10, %v8536_v26  ;;  %v8538_v20 = vld [vmem:[%s16776_s7 + $0x10] sm:$0xff]  ;;  %v8592_v7 = vld [vmem:[%s16776_s7 + $0x1c0] sm:$0xff] }
 0xe98   :  { %v8570_v26 = vld [vmem:[%s16776_s7 + $0x110] sm:$0xff]  ;;  %v8596_v29 = vld [vmem:[%s16776_s7 + $0x1e0] sm:$0xff] }
 0xe99   :  { %v8574_v10 = vld [vmem:[%s16776_s7 + $0x130] sm:$0xff] }
 0xe9a   :  { %v12917_v24 = vpop.eup %12916  ;;  %11919 = vmatpush1.bf16.msra.mxu0 %v16180_v59  ;;  %11951 = vmatpush1.bf16.msra.mxu1 %v16182_v32  ;;  %v8542_v59 = vld [vmem:[%s16776_s7 + $0x30] sm:$0xff] }
 0xe9b   :  { %v8041_v30 = vmul.f32 %v12917_v24, %v12915_v55  ;;  %11953 = vmatprep.subr.bf16.mxu0 %v16283_v15  ;;  %v16305_v32 = vpack.c.bf16 %v8542_v59, %v8538_v20  ;;  %11985 = vmatprep.subr.bf16.mxu1 %v16294_v60  ;;  %v8571_v55 = vld [vmem:[%s16776_s7 + $0x118] sm:$0xff]  ;;  %v16427_v24 = vpack.c.bf16 %v8573_v41, %v8569_v25  ;;  %v8577_v59 = vld [vmem:[%s16776_s7 + $0x148] sm:$0xff] }
 0xe9c   :  { %v16449_v20 = vpack.c.bf16 %v8574_v10, %v8570_v26  ;;  %v16463_v61 = vpack.c.bf16 %v8581_v53, %v8577_v59  ;;  %v8597_v25 = vld [vmem:[%s16776_s7 + $0x1e8] sm:$0xff]  ;;  %v8595_v41 = vld [vmem:[%s16776_s7 + $0x1d8] sm:$0xff]  ;;  %v16548_v10 = vpack.c.bf16 %v8596_v29, %v8592_v7  ;;  %v8594_v59 = vld [vmem:[%s16776_s7 + $0x1d0] sm:$0xff] }
 0xe9d   :  { %8422 = vmatmul.mubr.f32.vlgmr.msra.gmra.mrb[52].mxu0 %v8041_v30  ;;  %8493 = vmatmul.mubr.f32.vlgmr.msra.gmra.mrb[52].mxu1 %v8041_v30  ;;  %v8575_v30 = vld [vmem:[%s16776_s7 + $0x138] sm:$0xff]  ;;  %v8598_v53 = vld [vmem:[%s16776_s7 + $0x1f0] sm:$0xff] }
 0xe9e   :  { %8664 = vmatprep.mubr.f32.mxu0 %v16988_v19  ;;  %8735 = vmatprep.mubr.f32.mxu1 %v16988_v19  ;;  %v16438_v39 = vpack.c.bf16 %v8575_v30, %v8571_v55  ;;  %v16535_v55 = vpack.c.bf16 %v8597_v25, %v8593_v13  ;;  %v8599_v30 = vld [vmem:[%s16776_s7 + $0x1f8] sm:$0xff]  ;;  %v16557_v54 = vpack.c.bf16 %v8598_v53, %v8594_v59 }
 0xe9f   :  { %11955 = vmatpush1.bf16.msra.mxu0 %v16296_v0  ;;  %11987 = vmatpush1.bf16.msra.mxu1 %v16305_v32  ;;  %v16546_v26 = vpack.c.bf16 %v8599_v30, %v8595_v41 }
 0xea0   :  { %11957 = vmatprep.subr.bf16.mxu0 %v16319_v57  ;;  %11989 = vmatprep.subr.bf16.mxu1 %v16330_v62 }
 0xea3   :  { %11959 = vmatpush1.bf16.msra.mxu0 %v16332_v49  ;;  %11991 = vmatpush1.bf16.msra.mxu1 %v16341_v38 }
 0xea4   :  { %11961 = vmatprep.subr.bf16.mxu0 %v16355_v56  ;;  %11993 = vmatprep.subr.bf16.mxu1 %v16366_v36 }
 0xea7   :  { %11963 = vmatpush1.bf16.msra.mxu0 %v16368_v8  ;;  %11995 = vmatpush1.bf16.msra.mxu1 %v16377_v44 }
 0xea8   :  { %11965 = vmatprep.subr.bf16.mxu0 %v16391_v33  ;;  %11997 = vmatprep.subr.bf16.mxu1 %v16402_v18 }
 0xeab   :  { %11967 = vmatpush1.bf16.msra.mxu0 %v16404_v5  ;;  %11999 = vmatpush1.bf16.msra.mxu1 %v16413_v3 }
 0xeac   :  { %11969 = vmatprep.subr.bf16.mxu0 %v16427_v24  ;;  %12001 = vmatprep.subr.bf16.mxu1 %v16438_v39 }
 0xeaf   :  { %11971 = vmatpush1.bf16.msra.mxu0 %v16440_v16  ;;  %12003 = vmatpush1.bf16.msra.mxu1 %v16449_v20 }
 0xeb0   :  { %11973 = vmatprep.subr.bf16.mxu0 %v16463_v61  ;;  %12005 = vmatprep.subr.bf16.mxu1 %v16474_v9 }
 0xeb3   :  { %11975 = vmatpush1.bf16.msra.mxu0 %v16476_v51  ;;  %12007 = vmatpush1.bf16.msra.mxu1 %v16485_v63 }
 0xeb4   :  { %11977 = vmatprep.subr.bf16.mxu0 %v16499_v6  ;;  %12009 = vmatprep.subr.bf16.mxu1 %v16510_v40 }
 0xeb7   :  { %11979 = vmatpush1.bf16.msra.mxu0 %v16512_v47  ;;  %12011 = vmatpush1.bf16.msra.mxu1 %v16521_v43 }
 0xeb8   :  { %11981 = vmatprep.subr.bf16.mxu0 %v16535_v55  ;;  %12013 = vmatprep.subr.bf16.mxu1 %v16546_v26 }
 0xebb   :  { %11983 = vmatpush1.bf16.msra.mxu0 %v16548_v10  ;;  %12015 = vmatpush1.bf16.msra.mxu1 %v16557_v54 }
 0xebc   :  { %12017 = vmatprep.subr.bf16.mxu0 %v16562_v28  ;;  %12049 = vmatprep.subr.bf16.mxu1 %v16564_v52 }
 0xf50   :  { %v8180_v12 = vpop.f32.mrb[42].mxu0  ;;  %v8251_v1 = vpop.f32.mrb[42].mxu1 }
 0xf51   :  { %v12314_v31 = vadd.f32 %v8180_v12, %v17221_v11  ;;  %v8182_v46 = vpop.f32.mrb[43].mxu0  ;;  %v8253_v17 = vpop.f32.mrb[43].mxu1  ;;  %v12330_v25 = vadd.f32 %v8251_v1, %v17223_v37  ;;  %v8798_v11 = vld [vmem:[#allocation17 + $0x98] sm:$0xff] }
 0xf52   :  { %v12315_v27 = vadd.f32 %v8182_v46, %v17222_v58  ;;  %v12331_v41 = vadd.f32 %v8253_v17, %v17224_v23  ;;  %v8796_v23 = vld [vmem:[#allocation17 + $0x88] sm:$0xff] }
 0xf53   :  { %v9722_v21 = vmul.f32 -1.442695, %v12314_v31  ;;  %v9724_v30 = vmul.f32 -1.442695, %v12330_v25  ;;  %v8800_v58 = vld [vmem:[#allocation17 + $0xa8] sm:$0xff] }
 0xf54   :  { %v9723_v13 = vmul.f32 -1.442695, %v12315_v27 }
 0xf55   :  { %12918 = vpow2.f32 %v9722_v21 }
 0xf56   :  { %12920 = vpow2.f32 %v9723_v13 }
 0xf57   :  { %12922 = vtanh.f32 %v12331_v41 }
 0xf58   :  { %12924 = vpow2.f32 %v9724_v30 }
 0xf5f   :  { %v12919_v7 = vpop.eup %12918 }
 0xf60   :  { %v8269_v29 = vadd.f32 1.0, %v12919_v7  ;;  %v12921_v59 = vpop.eup %12920 }
 0xf61   :  { %v8270_v53 = vadd.f32 1.0, %v12921_v59  ;;  %v12923_v45 = vpop.eup %12922  ;;  %v8783_v59 = vld [vmem:[#allocation17 + $0x20] sm:$0xff] }
 0xf62   :  { %12926 = vrcp.f32 %v8269_v29  ;;  %v12925_v22 = vpop.eup %12924 }
 0xf63   :  { %12928 = vrcp.f32 %v8270_v53  ;;  %v8271_v31 = vadd.f32 1.0, %v12925_v22  ;;  %v8781_v53 = vld [vmem:[#allocation17 + $0x10] sm:$0xff]  ;;  %v8788_v22 = vld [vmem:[#allocation17 + $0x48] sm:$0xff] }
 0xf65   :  { %12930 = vrcp.f32 %v8271_v31 }
 0xf6c   :  { %v12927_v50 = vpop.eup %12926 }
 0xf6d   :  { %v8281_v48 = vmul.f32 %v12927_v50, %v12923_v45  ;;  %v12929_v12 = vpop.eup %12928  ;;  %v8785_v45 = vld [vmem:[#allocation17 + $0x30] sm:$0xff]  ;;  %v8792_v50 = vld [vmem:[#allocation17 + $0x68] sm:$0xff] }
 0xf6e   :  { %v8280_v46 = vmul.f32 %v12929_v12, %v16229_v2  ;;  %v8779_v2 = vld [vmem:[#allocation17] sm:$0xff]  ;;  %v8794_v12 = vld [vmem:[#allocation17 + $0x78] sm:$0xff] }
 0xf70   :  { %v8423_v1 = vpop.f32.mrb[52].mxu0  ;;  %v8494_v27 = vpop.f32.mrb[52].mxu1  ;;  %v16573_v17 = vadd.f32 %v8281_v48, %v8280_v46  ;;  %v8790_v48 = vld [vmem:[#allocation17 + $0x58] sm:$0xff] }
 0xf71   :  { %v12338_v21 = vadd.f32 %v8423_v1, %v17226_v4  ;;  %v8425_v13 = vpop.f32.mrb[53].mxu0  ;;  %v8496_v25 = vpop.f32.mrb[53].mxu1  ;;  %v12352_v29 = vadd.f32 %v8494_v27, %v17228_v35  ;;  %v16586_v35 = vpack.c.bf16 %v8794_v12, %v8790_v48  ;;  %v8789_v4 = vld [vmem:[#allocation17 + $0x50] sm:$0xff] }
 0xf72   :  { %17242 = vst [vmem:[#allocation26_spill] sm:$0xff] %v16573_v17  ;;  %v12339_v41 = vadd.f32 %v8425_v13, %v17227_v42  ;;  %12932 = vtanh.f32 %v16573_v17  ;;  %v12931_v46 = vpop.eup %12930  ;;  %v12353_v31 = vadd.f32 %v8496_v25, %v17229_v14  ;;  %v16580_v42 = vpack.c.bf16 %v8783_v59, %v8779_v2  ;;  %v8793_v17 = vld [vmem:[#allocation17 + $0x70] sm:$0xff]  ;;  %v8802_v25 = vld [vmem:[#allocation17 + $0xb8] sm:$0xff] }
 0xf73   :  { %v9725_v30 = vmul.f32 -1.442695, %v12338_v21  ;;  %v9727_v13 = vmul.f32 -1.442695, %v12352_v29  ;;  %v16582_v21 = vpack.c.bf16 %v8785_v45, %v8781_v53  ;;  %v16592_v59 = vpack.c.bf16 %v8793_v17, %v8789_v4  ;;  %v8795_v53 = vld [vmem:[#allocation17 + $0x80] sm:$0xff]  ;;  %v8797_v48 = vld [vmem:[#allocation17 + $0x90] sm:$0xff] }
 0xf74   :  { %v9726_v7 = vmul.f32 -1.442695, %v12339_v41  ;;  %v8787_v41 = vld [vmem:[#allocation17 + $0x40] sm:$0xff]  ;;  %v8801_v12 = vld [vmem:[#allocation17 + $0xb0] sm:$0xff] }
 0xf75   :  { %12934 = vpow2.f32 %v9725_v30  ;;  %v8791_v30 = vld [vmem:[#allocation17 + $0x60] sm:$0xff]  ;;  %17244 = vst [vmem:[#allocation30_spill] sm:$0xff] %v16592_v59 }
 0xf76   :  { %12936 = vpow2.f32 %v9726_v7  ;;  %v16584_v7 = vpack.c.bf16 %v8792_v50, %v8788_v22  ;;  %v16590_v2 = vpack.c.bf16 %v8791_v30, %v8787_v41  ;;  %v8799_v45 = vld [vmem:[#allocation17 + $0xa0] sm:$0xff]  ;;  %v16598_v50 = vpack.c.bf16 %v8802_v25, %v8798_v11  ;;  %v8805_v41 = vld [vmem:[#allocation17 + $0xd0] sm:$0xff]  ;;  %v8816_v25 = vld [vmem:[#allocation17 + $0x128] sm:$0xff] }
 0xf77   :  { %12938 = vtanh.f32 %v12353_v31  ;;  %v8808_v31 = vld [vmem:[#allocation17 + $0xe8] sm:$0xff]  ;;  %v16604_v4 = vpack.c.bf16 %v8799_v45, %v8795_v53  ;;  %v8803_v11 = vld [vmem:[#allocation17 + $0xc0] sm:$0xff]  ;;  %v8809_v30 = vld [vmem:[#allocation17 + $0xf0] sm:$0xff] }
 0xf78   :  { %12940 = vpow2.f32 %v9727_v13  ;;  %17243 = vst [vmem:[#allocation25_spill] sm:$0xff] %v16590_v2  ;;  %17246 = vst [vmem:[#allocation53_spill] sm:$0xff] %v16598_v50  ;;  %v8810_v13 = vld [vmem:[#allocation17 + $0xf8] sm:$0xff]  ;;  %v16618_v45 = vpack.c.bf16 %v8809_v30, %v8805_v41 }
 0xf79   :  { %17247 = vst [vmem:[#allocation28_spill] sm:$0xff] %v16604_v4 }
 0xf7a   :  { %17252 = vst [vmem:[#allocation34_spill] sm:$0xff] %v16618_v45 }
 0xf7c   :  { %v12933_v1 = vpop.eup %12932 }
 0xf7d   :  { %v8284_v27 = vmul.f32 %v12933_v1, %v12931_v46  ;;  %v8804_v46 = vld [vmem:[#allocation17 + $0xc8] sm:$0xff]  ;;  %v8806_v1 = vld [vmem:[#allocation17 + $0xd8] sm:$0xff] }
 0xf7e   :  { %v16612_v17 = vpack.c.bf16 %v8810_v13, %v8806_v1  ;;  %v8813_v13 = vld [vmem:[#allocation17 + $0x110] sm:$0xff] }
 0xf7f   :  { %v12935_v37 = vpop.eup %12934  ;;  %8665 = vmatmul.mubr.f32.vlgmr.msra.gmra.mrb[44].mxu0 %v8284_v27  ;;  %8736 = vmatmul.mubr.f32.vlgmr.msra.gmra.mrb[44].mxu1 %v8284_v27  ;;  %v8812_v27 = vld [vmem:[#allocation17 + $0x108] sm:$0xff] }
 0xf80   :  { %v8512_v14 = vadd.f32 1.0, %v12935_v37  ;;  %v12937_v29 = vpop.eup %12936  ;;  %12019 = vmatpush1.bf16.msra.mxu0 %v16580_v42  ;;  %12051 = vmatpush1.bf16.msra.mxu1 %v16582_v21  ;;  %v16596_v37 = vpack.c.bf16 %v8800_v58, %v8796_v23  ;;  %v16606_v58 = vpack.c.bf16 %v8801_v12, %v8797_v48  ;;  %v8807_v23 = vld [vmem:[#allocation17 + $0xe0] sm:$0xff]  ;;  %17250 = vst [vmem:[#allocation49_spill] sm:$0xff] %v16612_v17 }
 0xf81   :  { %v8513_v22 = vadd.f32 1.0, %v12937_v29  ;;  %12021 = vmatprep.subr.bf16.mxu0 %v16584_v7  ;;  %12053 = vmatprep.subr.bf16.mxu1 %v16586_v35  ;;  %v8814_v29 = vld [vmem:[#allocation17 + $0x118] sm:$0xff]  ;;  %v16616_v53 = vpack.c.bf16 %v8807_v23, %v8803_v11  ;;  %v8811_v48 = vld [vmem:[#allocation17 + $0x100] sm:$0xff] }
 0xf82   :  { %12942 = vrcp.f32 %v8512_v14  ;;  %17245 = vst [vmem:[#allocation29_spill] sm:$0xff] %v16596_v37  ;;  %8907 = vmatprep.mubr.f32.mxu0 %v16988_v19  ;;  %8978 = vmatprep.mubr.f32.mxu1 %v16988_v19  ;;  %17248 = vst [vmem:[#allocation27_spill] sm:$0xff] %v16606_v58  ;;  %v16610_v14 = vpack.c.bf16 %v8808_v31, %v8804_v46  ;;  %v8815_v12 = vld [vmem:[#allocation17 + $0x120] sm:$0xff]  ;;  %v12939_v46 = vpop.eup %12938  ;;  %v16622_v31 = vpack.c.bf16 %v8816_v25, %v8812_v27  ;;  %v8822_v11 = vld [vmem:[#allocation17 + $0x158] sm:$0xff] }
 0xf83   :  { %12944 = vrcp.f32 %v8513_v22  ;;  %v8818_v22 = vld [vmem:[#allocation17 + $0x138] sm:$0xff]  ;;  %17251 = vst [vmem:[#allocation24_spill] sm:$0xff] %v16616_v53  ;;  %v8819_v27 = vld [vmem:[#allocation17 + $0x140] sm:$0xff] }
 0xf84   :  { %12023 = vmatpush1.bf16.msra.mxu0 %v16590_v2  ;;  %12055 = vmatpush1.bf16.msra.mxu1 %v16592_v59  ;;  %17249 = vst [vmem:[#allocation32_spill] sm:$0xff] %v16610_v14  ;;  %v16624_v1 = vpack.c.bf16 %v8818_v22, %v8814_v29  ;;  %v8826_v23 = vld [vmem:[#allocation17 + $0x178] sm:$0xff]  ;;  %v8823_v25 = vld [vmem:[#allocation17 + $0x160] sm:$0xff] }
 0xf85   :  { %12025 = vmatprep.subr.bf16.mxu0 %v16596_v37  ;;  %12057 = vmatprep.subr.bf16.mxu1 %v16598_v50  ;;  %v8817_v50 = vld [vmem:[#allocation17 + $0x130] sm:$0xff]  ;;  %v12941_v37 = vpop.eup %12940  ;;  %v16636_v2 = vpack.c.bf16 %v8826_v23, %v8822_v11  ;;  %v8831_v11 = vld [vmem:[#allocation17 + $0x1a0] sm:$0xff] }
 0xf86   :  { %v8514_v22 = vadd.f32 1.0, %v12941_v37  ;;  %v16643_v37 = vpack.c.bf16 %v8823_v25, %v8819_v27  ;;  %v8840_v27 = vld [vmem:[#allocation17 + $0x1e8] sm:$0xff]  ;;  %v8838_v25 = vld [vmem:[#allocation17 + $0x1d8] sm:$0xff] }
 0xf87   :  { %17254 = vst [vmem:[#allocation36_spill] sm:$0xff] %v16636_v2 }
 0xf88   :  { %12027 = vmatpush1.bf16.msra.mxu0 %v16604_v4  ;;  %12059 = vmatpush1.bf16.msra.mxu1 %v16606_v58  ;;  %v8820_v4 = vld [vmem:[#allocation17 + $0x148] sm:$0xff]  ;;  %12946 = vrcp.f32 %v8514_v22 }
 0xf89   :  { %12029 = vmatprep.subr.bf16.mxu0 %v16610_v14  ;;  %12061 = vmatprep.subr.bf16.mxu1 %v16612_v17  ;;  %v8824_v58 = vld [vmem:[#allocation17 + $0x168] sm:$0xff]  ;;  %v16628_v14 = vpack.c.bf16 %v8815_v12, %v8811_v48  ;;  %v16630_v17 = vpack.c.bf16 %v8817_v50, %v8813_v13  ;;  %v8830_v50 = vld [vmem:[#allocation17 + $0x198] sm:$0xff] }
 0xf8a   :  { %v16634_v59 = vpack.c.bf16 %v8824_v58, %v8820_v4  ;;  %v8832_v12 = vld [vmem:[#allocation17 + $0x1a8] sm:$0xff]  ;;  %v8834_v13 = vld [vmem:[#allocation17 + $0x1b8] sm:$0xff]  ;;  %v8827_v58 = vld [vmem:[#allocation17 + $0x180] sm:$0xff] }
 0xf8b   :  { %v16651_v23 = vpack.c.bf16 %v8834_v13, %v8830_v50  ;;  %v16656_v22 = vpack.c.bf16 %v8831_v11, %v8827_v58  ;;  %v8839_v13 = vld [vmem:[#allocation17 + $0x1e0] sm:$0xff] }
 0xf8c   :  { %v12943_v41 = vpop.eup %12942  ;;  %12031 = vmatpush1.bf16.msra.mxu0 %v16616_v53  ;;  %12063 = vmatpush1.bf16.msra.mxu1 %v16618_v45  ;;  %17253 = vst [vmem:[#allocation35_spill] sm:$0xff] %v16634_v59  ;;  %v8828_v53 = vld [vmem:[#allocation17 + $0x188] sm:$0xff] }
 0xf8d   :  { %v8524_v30 = vmul.f32 %v12943_v41, %v12939_v46  ;;  %v12945_v29 = vpop.eup %12944  ;;  %12033 = vmatprep.subr.bf16.mxu0 %v16622_v31  ;;  %12065 = vmatprep.subr.bf16.mxu1 %v16624_v1  ;;  %v8821_v46 = vld [vmem:[#allocation17 + $0x150] sm:$0xff] }
 0xf8e   :  { %v8825_v41 = vld [vmem:[#allocation17 + $0x170] sm:$0xff]  ;;  %v8523_v48 = vmul.f32 %v12945_v29, %v16255_v34  ;;  %v16649_v34 = vpack.c.bf16 %v8832_v12, %v8828_v53  ;;  %v8835_v53 = vld [vmem:[#allocation17 + $0x1c0] sm:$0xff] }
 0xf8f   :  { %v16645_v4 = vpack.c.bf16 %v8825_v41, %v8821_v46  ;;  %v8833_v29 = vld [vmem:[#allocation17 + $0x1b0] sm:$0xff]  ;;  %v8842_v46 = vld [vmem:[#allocation17 + $0x1f8] sm:$0xff]  ;;  %v16668_v58 = vpack.c.bf16 %v8839_v13, %v8835_v53 }
 0xf90   :  { %v16639_v45 = vadd.f32 %v8524_v30, %v8523_v48  ;;  %12035 = vmatpush1.bf16.msra.mxu0 %v16628_v14  ;;  %12067 = vmatpush1.bf16.msra.mxu1 %v16630_v17  ;;  %v8829_v30 = vld [vmem:[#allocation17 + $0x190] sm:$0xff]  ;;  %v8836_v48 = vld [vmem:[#allocation17 + $0x1c8] sm:$0xff]  ;;  %v16664_v50 = vpack.c.bf16 %v8842_v46, %v8838_v25  ;;  %v17262_v46 = vld [vmem:[#allocation52_spill] sm:$0xff] }
 0xf91   :  { %12037 = vmatprep.subr.bf16.mxu0 %v16634_v59  ;;  %12069 = vmatprep.subr.bf16.mxu1 %v16636_v2  ;;  %v16658_v41 = vpack.c.bf16 %v8833_v29, %v8829_v30  ;;  %v16662_v12 = vpack.c.bf16 %v8840_v27, %v8836_v48  ;;  %v8837_v2 = vld [vmem:[#allocation17 + $0x1d0] sm:$0xff] }
 0xf92   :  { %12948 = vtanh.f32 %v16639_v45  ;;  %v8841_v59 = vld [vmem:[#allocation17 + $0x1f0] sm:$0xff]  ;;  %v12947_v30 = vpop.eup %12946 }
 0xf93   :  { %v16670_v11 = vpack.c.bf16 %v8841_v59, %v8837_v2  ;;  %v17261_v2 = vld [vmem:[#allocation51_spill] sm:$0xff] }
 0xf94   :  { %12039 = vmatpush1.bf16.msra.mxu0 %v16643_v37  ;;  %12071 = vmatpush1.bf16.msra.mxu1 %v16645_v4 }
 0xf95   :  { %12041 = vmatprep.subr.bf16.mxu0 %v16649_v34  ;;  %12073 = vmatprep.subr.bf16.mxu1 %v16651_v23 }
 0xf98   :  { %12043 = vmatpush1.bf16.msra.mxu0 %v16656_v22  ;;  %12075 = vmatpush1.bf16.msra.mxu1 %v16658_v41 }
 0xf99   :  { %12045 = vmatprep.subr.bf16.mxu0 %v16662_v12  ;;  %12077 = vmatprep.subr.bf16.mxu1 %v16664_v50 }
 0xf9c   :  { %v12949_v29 = vpop.eup %12948  ;;  %12047 = vmatpush1.bf16.msra.mxu0 %v16668_v58  ;;  %12079 = vmatpush1.bf16.msra.mxu1 %v16670_v11 }
 0xf9d   :  { %v8527_v48 = vmul.f32 %v12949_v29, %v12947_v30  ;;  %12081 = vmatprep.subr.bf16.mxu0 %v16283_v15  ;;  %12113 = vmatprep.subr.bf16.mxu1 %v16294_v60  ;;  %v17263_v30 = vld [vmem:[#allocation54_spill] sm:$0xff] }
 0xf9f   :  { %8908 = vmatmul.mubr.f32.vlgmr.msra.gmra.mrb[50].mxu0 %v8527_v48  ;;  %8979 = vmatmul.mubr.f32.vlgmr.msra.gmra.mrb[50].mxu1 %v8527_v48 }
 0xfa0   :  { %12083 = vmatpush1.bf16.msra.mxu0 %v16296_v0  ;;  %12115 = vmatpush1.bf16.msra.mxu1 %v16305_v32  ;;  %v17255_v0 = vld [vmem:[#allocation45_spill] sm:$0xff] }
 0xfa1   :  { %12085 = vmatprep.subr.bf16.mxu0 %v16319_v57  ;;  %12117 = vmatprep.subr.bf16.mxu1 %v16330_v62 }
 0xfa2   :  { %9150 = vmatprep.mubr.f32.mxu0 %v16988_v19  ;;  %9221 = vmatprep.mubr.f32.mxu1 %v16988_v19 }
 0xfa4   :  { %12087 = vmatpush1.bf16.msra.mxu0 %v16332_v49  ;;  %12119 = vmatpush1.bf16.msra.mxu1 %v16341_v38  ;;  %v17256_v49 = vld [vmem:[#allocation46_spill] sm:$0xff] }
 0xfa5   :  { %12089 = vmatprep.subr.bf16.mxu0 %v16355_v56  ;;  %12121 = vmatprep.subr.bf16.mxu1 %v16366_v36 }
 0xfa8   :  { %12091 = vmatpush1.bf16.msra.mxu0 %v16368_v8  ;;  %12123 = vmatpush1.bf16.msra.mxu1 %v16377_v44  ;;  %v17257_v8 = vld [vmem:[#allocation47_spill] sm:$0xff] }
 0xfa9   :  { %12093 = vmatprep.subr.bf16.mxu0 %v16391_v33  ;;  %12125 = vmatprep.subr.bf16.mxu1 %v16402_v18  ;;  %v17258_v33 = vld [vmem:[#allocation48_spill] sm:$0xff] }
 0xfac   :  { %12095 = vmatpush1.bf16.msra.mxu0 %v16404_v5  ;;  %12127 = vmatpush1.bf16.msra.mxu1 %v16413_v3 }
 0xfad   :  { %12097 = vmatprep.subr.bf16.mxu0 %v16427_v24  ;;  %12129 = vmatprep.subr.bf16.mxu1 %v16438_v39 }
 0xfb0   :  { %12099 = vmatpush1.bf16.msra.mxu0 %v16440_v16  ;;  %12131 = vmatpush1.bf16.msra.mxu1 %v16449_v20 }
 0xfb1   :  { %12101 = vmatprep.subr.bf16.mxu0 %v16463_v61  ;;  %12133 = vmatprep.subr.bf16.mxu1 %v16474_v9 }
 0xfb4   :  { %12103 = vmatpush1.bf16.msra.mxu0 %v16476_v51  ;;  %12135 = vmatpush1.bf16.msra.mxu1 %v16485_v63 }
 0xfb5   :  { %12105 = vmatprep.subr.bf16.mxu0 %v16499_v6  ;;  %12137 = vmatprep.subr.bf16.mxu1 %v16510_v40  ;;  %v17259_v40 = vld [vmem:[#allocation26_spill] sm:$0xff] }
 0xfb8   :  { %12107 = vmatpush1.bf16.msra.mxu0 %v16512_v47  ;;  %12139 = vmatpush1.bf16.msra.mxu1 %v16521_v43 }
 0xfb9   :  { %12109 = vmatprep.subr.bf16.mxu0 %v16535_v55  ;;  %12141 = vmatprep.subr.bf16.mxu1 %v16546_v26 }
 0xfbc   :  { %12111 = vmatpush1.bf16.msra.mxu0 %v16548_v10  ;;  %12143 = vmatpush1.bf16.msra.mxu1 %v16557_v54  ;;  %v17260_v10 = vld [vmem:[#allocation50_spill] sm:$0xff] }
 0xfbd   :  { %12145 = vmatprep.subr.bf16.mxu0 %v16562_v28  ;;  %12177 = vmatprep.subr.bf16.mxu1 %v16564_v52 }
0x1052   :  { %v8666_v15 = vpop.f32.mrb[44].mxu0  ;;  %v8737_v60 = vpop.f32.mrb[44].mxu1 }
0x1053   :  { %v12316_v32 = vadd.f32 %v8666_v15, %v17255_v0  ;;  %v8668_v57 = vpop.f32.mrb[45].mxu0  ;;  %v8739_v62 = vpop.f32.mrb[45].mxu1  ;;  %v12332_v44 = vadd.f32 %v8737_v60, %v17257_v8 }
0x1054   :  { %v12317_v38 = vadd.f32 %v8668_v57, %v17256_v49  ;;  %v12333_v18 = vadd.f32 %v8739_v62, %v17258_v33 }
0x1055   :  { %v9728_v56 = vmul.f32 -1.442695, %v12316_v32  ;;  %v9730_v5 = vmul.f32 -1.442695, %v12332_v44  ;;  %v17266_v44 = vld [vmem:[#allocation29_spill] sm:$0xff] }
0x1056   :  { %v9729_v36 = vmul.f32 -1.442695, %v12317_v38 }
0x1057   :  { %12950 = vpow2.f32 %v9728_v56  ;;  %v17264_v56 = vld [vmem:[#allocation25_spill] sm:$0xff] }
0x1058   :  { %12952 = vpow2.f32 %v9729_v36  ;;  %v17265_v36 = vld [vmem:[#allocation30_spill] sm:$0xff] }
0x1059   :  { %12954 = vtanh.f32 %v12333_v18  ;;  %v17269_v18 = vld [vmem:[#allocation27_spill] sm:$0xff] }
0x105a   :  { %12956 = vpow2.f32 %v9730_v5  ;;  %v17270_v5 = vld [vmem:[#allocation32_spill] sm:$0xff] }
0x1061   :  { %v12951_v3 = vpop.eup %12950 }
0x1062   :  { %v8755_v24 = vadd.f32 1.0, %v12951_v3  ;;  %v12953_v39 = vpop.eup %12952 }
0x1063   :  { %v8756_v16 = vadd.f32 1.0, %v12953_v39  ;;  %v12955_v20 = vpop.eup %12954  ;;  %v17272_v39 = vld [vmem:[#allocation24_spill] sm:$0xff] }
0x1064   :  { %12958 = vrcp.f32 %v8755_v24  ;;  %v12957_v61 = vpop.eup %12956 }
0x1065   :  { %12960 = vrcp.f32 %v8756_v16  ;;  %v8757_v6 = vadd.f32 1.0, %v12957_v61  ;;  %v17273_v16 = vld [vmem:[#allocation34_spill] sm:$0xff] }
0x1067   :  { %12962 = vrcp.f32 %v8757_v6  ;;  %v17275_v6 = vld [vmem:[#allocation36_spill] sm:$0xff] }
0x106e   :  { %v12959_v9 = vpop.eup %12958 }
0x106f   :  { %v8767_v51 = vmul.f32 %v12959_v9, %v12955_v20  ;;  %v12961_v63 = vpop.eup %12960 }
0x1070   :  { %v8766_v47 = vmul.f32 %v12961_v63, %v17259_v40  ;;  %v17274_v63 = vld [vmem:[#allocation35_spill] sm:$0xff]  ;;  %v9507_v40 = vld [vmem:[#allocation19 + $0x10] sm:$0xff] }
0x1071   :  { %v12963_v13 = vpop.eup %12962 }
0x1072   :  { %v8909_v43 = vpop.f32.mrb[50].mxu0  ;;  %v8980_v55 = vpop.f32.mrb[50].mxu1  ;;  %v16717_v26 = vadd.f32 %v8767_v51, %v8766_v47 }
0x1073   :  { %v12336_v54 = vadd.f32 %v8909_v43, %v17260_v10  ;;  %v8911_v28 = vpop.f32.mrb[51].mxu0  ;;  %v8982_v52 = vpop.f32.mrb[51].mxu1  ;;  %v12350_v53 = vadd.f32 %v8980_v55, %v17262_v46  ;;  %v9526_v43 = vld [vmem:[#allocation19 + $0xa8] sm:$0xff]  ;;  %v9509_v10 = vld [vmem:[#allocation19 + $0x20] sm:$0xff] }
0x1074   :  { %v12337_v59 = vadd.f32 %v8911_v28, %v17261_v2  ;;  %12964 = vtanh.f32 %v16717_v26  ;;  %v12351_v29 = vadd.f32 %v8982_v52, %v17263_v30  ;;  %v9527_v52 = vld [vmem:[#allocation19 + $0xb0] sm:$0xff]  ;;  %v9528_v2 = vld [vmem:[#allocation19 + $0xb8] sm:$0xff] }
0x1075   :  { %v9731_v27 = vmul.f32 -1.442695, %v12336_v54  ;;  %v9733_v15 = vmul.f32 -1.442695, %v12350_v53  ;;  %v9510_v54 = vld [vmem:[#allocation19 + $0x28] sm:$0xff]  ;;  %v9529_v53 = vld [vmem:[#allocation19 + $0xc0] sm:$0xff] }
0x1076   :  { %v9732_v25 = vmul.f32 -1.442695, %v12337_v59  ;;  %v12218_v28 = vpack.c.bf16 %v9510_v54, %v9509_v10  ;;  %v12220_v59 = vpack.c.bf16 %v9528_v2, %v9527_v52  ;;  %v9740_v54 = vld [vmem:[%s16779_s10] ss:$0 sm:$0xff] }
0x1077   :  { %12966 = vpow2.f32 %v9731_v27  ;;  %v9511_v27 = vld [vmem:[#allocation19 + $0x30] sm:$0xff] }
0x1078   :  { %12968 = vpow2.f32 %v9732_v25  ;;  %v9512_v25 = vld [vmem:[#allocation19 + $0x38] sm:$0xff] }
0x1079   :  { %12970 = vtanh.f32 %v12351_v29  ;;  %v12222_v46 = vpack.c.bf16 %v9512_v25, %v9511_v27  ;;  %v9513_v29 = vld [vmem:[#allocation19 + $0x40] sm:$0xff] }
0x107a   :  { %12972 = vpow2.f32 %v9733_v15 }
0x107e   :  { %v12965_v48 = vpop.eup %12964 }
0x107f   :  { %v8770_v60 = vmul.f32 %v12965_v48, %v12963_v13  ;;  %v9530_v13 = vld [vmem:[#allocation19 + $0xc8] sm:$0xff] }
0x1080   :  { %v12224_v30 = vpack.c.bf16 %v9530_v13, %v9529_v53  ;;  %v9514_v48 = vld [vmem:[#allocation19 + $0x48] sm:$0xff] }
0x1081   :  { %v12967_v32 = vpop.eup %12966  ;;  %9151 = vmatmul.mubr.f32.vlgmr.msra.gmra.mrb[46].mxu0 %v8770_v60  ;;  %9222 = vmatmul.mubr.f32.vlgmr.msra.gmra.mrb[46].mxu1 %v8770_v60  ;;  %v12226_v15 = vpack.c.bf16 %v9514_v48, %v9513_v29  ;;  %v9531_v60 = vld [vmem:[#allocation19 + $0xd0] sm:$0xff] }
0x1082   :  { %v8998_v57 = vadd.f32 1.0, %v12967_v32  ;;  %v12969_v62 = vpop.eup %12968  ;;  %12147 = vmatpush1.bf16.msra.mxu0 %v16580_v42  ;;  %12179 = vmatpush1.bf16.msra.mxu1 %v16582_v21  ;;  %v17267_v42 = vld [vmem:[#allocation53_spill] sm:$0xff]  ;;  %v17268_v21 = vld [vmem:[#allocation28_spill] sm:$0xff]  ;;  %v9532_v32 = vld [vmem:[#allocation19 + $0xd8] sm:$0xff] }
0x1083   :  { %v8999_v38 = vadd.f32 1.0, %v12969_v62  ;;  %12149 = vmatprep.subr.bf16.mxu0 %v16584_v7  ;;  %12181 = vmatprep.subr.bf16.mxu1 %v16586_v35  ;;  %v12971_v7 = vpop.eup %12970  ;;  %v17271_v35 = vld [vmem:[#allocation49_spill] sm:$0xff]  ;;  %v9515_v62 = vld [vmem:[#allocation19 + $0x50] sm:$0xff] }
0x1084   :  { %12974 = vrcp.f32 %v8998_v57  ;;  %9393 = vmatprep.mubr.f32.mxu0 %v16988_v19  ;;  %9464 = vmatprep.mubr.f32.mxu1 %v16988_v19  ;;  %v12973_v3 = vpop.eup %12972  ;;  %v12228_v57 = vpack.c.bf16 %v9532_v32, %v9531_v60 }
0x1085   :  { %12976 = vrcp.f32 %v8999_v38  ;;  %v9000_v61 = vadd.f32 1.0, %v12973_v3  ;;  %v9516_v38 = vld [vmem:[#allocation19 + $0x58] sm:$0xff] }
0x1086   :  { %12151 = vmatpush1.bf16.msra.mxu0 %v17264_v56  ;;  %12183 = vmatpush1.bf16.msra.mxu1 %v17265_v36  ;;  %v12230_v56 = vpack.c.bf16 %v9516_v38, %v9515_v62  ;;  %v9533_v36 = vld [vmem:[#allocation19 + $0xe0] sm:$0xff] }
0x1087   :  { %12153 = vmatprep.subr.bf16.mxu0 %v17266_v44  ;;  %12185 = vmatprep.subr.bf16.mxu1 %v17267_v42  ;;  %12978 = vrcp.f32 %v9000_v61  ;;  %v9534_v44 = vld [vmem:[#allocation19 + $0xe8] sm:$0xff]  ;;  %v9517_v42 = vld [vmem:[#allocation19 + $0x60] sm:$0xff] }
0x108a   :  { %12155 = vmatpush1.bf16.msra.mxu0 %v17268_v21  ;;  %12187 = vmatpush1.bf16.msra.mxu1 %v17269_v18  ;;  %v12232_v21 = vpack.c.bf16 %v9534_v44, %v9533_v36  ;;  %v9518_v18 = vld [vmem:[#allocation19 + $0x68] sm:$0xff] }
0x108b   :  { %12157 = vmatprep.subr.bf16.mxu0 %v17270_v5  ;;  %12189 = vmatprep.subr.bf16.mxu1 %v17271_v35  ;;  %v9536_v5 = vld [vmem:[#allocation19 + $0xf8] sm:$0xff]  ;;  %v12234_v35 = vpack.c.bf16 %v9518_v18, %v9517_v42 }
0x108e   :  { %v12975_v19 = vpop.eup %12974  ;;  %12159 = vmatpush1.bf16.msra.mxu0 %v17272_v39  ;;  %12191 = vmatpush1.bf16.msra.mxu1 %v17273_v16 }
0x108f   :  { %v9010_v24 = vmul.f32 %v12975_v19, %v12971_v7  ;;  %v12977_v20 = vpop.eup %12976  ;;  %12161 = vmatprep.subr.bf16.mxu0 %v16622_v31  ;;  %12193 = vmatprep.subr.bf16.mxu1 %v16624_v1  ;;  %v17276_v31 = vld [vmem:[#allocation55_spill] sm:$0xff]  ;;  %v9521_v1 = vld [vmem:[#allocation19 + $0x80] sm:$0xff]  ;;  %v9535_v7 = vld [vmem:[#allocation19 + $0xf0] sm:$0xff] }
0x1090   :  { %v9009_v9 = vmul.f32 %v12977_v20, %v16639_v45  ;;  %v12236_v3 = vpack.c.bf16 %v9536_v5, %v9535_v7  ;;  %v9519_v19 = vld [vmem:[#allocation19 + $0x70] sm:$0xff] }
0x1092   :  { %v9011_v51 = vadd.f32 %v9010_v24, %v9009_v9  ;;  %12163 = vmatpush1.bf16.msra.mxu0 %v16628_v14  ;;  %12195 = vmatpush1.bf16.msra.mxu1 %v16630_v17  ;;  %v12979_v14 = vpop.eup %12978  ;;  %v9520_v24 = vld [vmem:[#allocation19 + $0x78] sm:$0xff] }
0x1093   :  { %12165 = vmatprep.subr.bf16.mxu0 %v17274_v63  ;;  %12197 = vmatprep.subr.bf16.mxu1 %v17275_v6  ;;  %v12238_v39 = vpack.c.bf16 %v9520_v24, %v9519_v19 }
0x1094   :  { %12980 = vtanh.f32 %v9011_v51 }
0x1096   :  { %12167 = vmatpush1.bf16.msra.mxu0 %v16643_v37  ;;  %12199 = vmatpush1.bf16.msra.mxu1 %v16645_v4  ;;  %v9522_v37 = vld [vmem:[#allocation19 + $0x88] sm:$0xff] }
0x1097   :  { %12169 = vmatprep.subr.bf16.mxu0 %v16649_v34  ;;  %12201 = vmatprep.subr.bf16.mxu1 %v16651_v23  ;;  %v12208_v4 = vpack.c.bf16 %v9522_v37, %v9521_v1  ;;  %v9505_v34 = vld [vmem:[#allocation19] sm:$0xff]  ;;  %v9506_v23 = vld [vmem:[#allocation19 + $0x8] sm:$0xff] }
0x109a   :  { %12171 = vmatpush1.bf16.msra.mxu0 %v16656_v22  ;;  %12203 = vmatpush1.bf16.msra.mxu1 %v16658_v41  ;;  %v12210_v22 = vpack.c.bf16 %v9506_v23, %v9505_v34  ;;  %v9523_v41 = vld [vmem:[#allocation19 + $0x90] sm:$0xff] }
0x109b   :  { %12173 = vmatprep.subr.bf16.mxu0 %v16662_v12  ;;  %12205 = vmatprep.subr.bf16.mxu1 %v16664_v50  ;;  %v9524_v12 = vld [vmem:[#allocation19 + $0x98] sm:$0xff] }
0x109c   :  { %v12212_v50 = vpack.c.bf16 %v9524_v12, %v9523_v41 }
0x109e   :  { %v12981_v17 = vpop.eup %12980  ;;  %12175 = vmatpush1.bf16.msra.mxu0 %v16668_v58  ;;  %12207 = vmatpush1.bf16.msra.mxu1 %v16670_v11  ;;  %v9508_v58 = vld [vmem:[#allocation19 + $0x18] sm:$0xff]  ;;  %v9525_v11 = vld [vmem:[#allocation19 + $0xa0] sm:$0xff] }
0x109f   :  { %v9013_v45 = vmul.f32 %v12981_v17, %v12979_v14  ;;  %12209 = vmatprep.subr.bf16.mxu0 %v12208_v4  ;;  %v12214_v47 = vpack.c.bf16 %v9508_v58, %v9507_v40  ;;  %v12216_v55 = vpack.c.bf16 %v9526_v43, %v9525_v11 }
0x10a1   :  { %9394 = vmatmul.mubr.f32.vlgmr.msra.gmra.mrb[64].mxu0 %v9013_v45  ;;  %9465 = vmatmul.mubr.f32.vlgmr.msra.gmra.mrb[64].mxu1 %v9013_v45 }
0x10a2   :  { %9608 = vmatprep.mubr.f32.mxu0 %v17276_v31  ;;  %12211 = vmatpush3.bf16.msra.mxu0 %v12210_v22 }
0x10a3   :  { %12213 = vmatprep.subr.bf16.mxu0 %v12212_v50 }
0x10a6   :  { %12215 = vmatpush3.bf16.msra.mxu0 %v12214_v47 }
0x10a7   :  { %12217 = vmatprep.subr.bf16.mxu0 %v12216_v55 }
0x10aa   :  { %12219 = vmatpush3.bf16.msra.mxu0 %v12218_v28 }
0x10ab   :  { %12221 = vmatprep.subr.bf16.mxu0 %v12220_v59 }
0x10ae   :  { %12223 = vmatpush3.bf16.msra.mxu0 %v12222_v46 }
0x10af   :  { %12225 = vmatprep.subr.bf16.mxu0 %v12224_v30 }
0x10b2   :  { %12227 = vmatpush3.bf16.msra.mxu0 %v12226_v15 }
0x10b3   :  { %12229 = vmatprep.subr.bf16.mxu0 %v12228_v57 }
0x10b6   :  { %12231 = vmatpush3.bf16.msra.mxu0 %v12230_v56 }
0x10b7   :  { %12233 = vmatprep.subr.bf16.mxu0 %v12232_v21 }
0x10ba   :  { %12235 = vmatpush3.bf16.msra.mxu0 %v12234_v35 }
0x10bb   :  { %12237 = vmatprep.subr.bf16.mxu0 %v12236_v3 }
0x10be   :  { %12239 = vmatpush3.bf16.msra.mxu0 %v12238_v39 }
0x1154   :  { %v9152_v16 = vpop.f32.mrb[46].mxu0  ;;  %v9223_v20 = vpop.f32.mrb[46].mxu1 }
0x1155   :  { %v12318_v61 = vadd.f32 %v9152_v16, %v17255_v0  ;;  %v9154_v9 = vpop.f32.mrb[47].mxu0  ;;  %v9225_v51 = vpop.f32.mrb[47].mxu1  ;;  %v12334_v17 = vadd.f32 %v9223_v20, %v17257_v8 }
0x1156   :  { %v12319_v63 = vadd.f32 %v9154_v9, %v17256_v49  ;;  %v12335_v45 = vadd.f32 %v9225_v51, %v17258_v33 }
0x1157   :  { %v9734_v6 = vmul.f32 -1.442695, %v12318_v61  ;;  %v9736_v31 = vmul.f32 -1.442695, %v12334_v17 }
0x1158   :  { %v9735_v14 = vmul.f32 -1.442695, %v12319_v63 }
0x1159   :  { %12982 = vpow2.f32 %v9734_v6 }
0x115a   :  { %12984 = vpow2.f32 %v9735_v14 }
0x115b   :  { %12986 = vtanh.f32 %v12335_v45 }
0x115c   :  { %12988 = vpow2.f32 %v9736_v31 }
0x1163   :  { %v12983_v1 = vpop.eup %12982 }
0x1164   :  { %v9241_v37 = vadd.f32 1.0, %v12983_v1  ;;  %v12985_v4 = vpop.eup %12984 }
0x1165   :  { %v9242_v0 = vadd.f32 1.0, %v12985_v4  ;;  %v12987_v34 = vpop.eup %12986 }
0x1166   :  { %12990 = vrcp.f32 %v9241_v37  ;;  %v12989_v23 = vpop.eup %12988 }
0x1167   :  { %12992 = vrcp.f32 %v9242_v0  ;;  %v9243_v12 = vadd.f32 1.0, %v12989_v23 }
0x1169   :  { %12994 = vrcp.f32 %v9243_v12 }
0x1170   :  { %v12991_v49 = vpop.eup %12990 }
0x1171   :  { %v9253_v22 = vmul.f32 %v12991_v49, %v12987_v34  ;;  %v12993_v41 = vpop.eup %12992 }
0x1172   :  { %v9252_v50 = vmul.f32 %v12993_v41, %v16717_v26 }
0x1173   :  { %v12995_v11 = vpop.eup %12994 }
0x1174   :  { %v9395_v8 = vpop.f32.mrb[64].mxu0  ;;  %v9466_v40 = vpop.f32.mrb[64].mxu1  ;;  %v9254_v33 = vadd.f32 %v9253_v22, %v9252_v50 }
0x1175   :  { %v9397_v58 = vpop.f32.mrb[65].mxu0  ;;  %v9468_v47 = vpop.f32.mrb[65].mxu1 }
0x1176   :  { %12996 = vtanh.f32 %v9254_v33 }
0x1180   :  { %v12997_v43 = vpop.eup %12996 }
0x1181   :  { %v9256_v55 = vmul.f32 %v12997_v43, %v12995_v11 }
0x1183   :  { %9609 = vmatmul.mubr.f32.vlgmr.msra.gmra.mrb[66].mxu0 %v9256_v55 }
0x1256   :  { %v9773_v10 = vpop.f32.mrb[66].mxu0 }
0x1257   :  { %v9774_v28 = vpop.f32.mrb[67].mxu0 }
0x1258   :  { %v9775_v52 = vadd.f32 %v9774_v28, %v9773_v10 }
0x125a   :  { %v9611_v2 = vadd.f32 %v9775_v52, %v9740_v54 }
0x125c   :  { %9614 = vst [vmem:[%s16780_s11] sm:$0xff] %v9611_v2 }
0x125d   :  { %9619 = vsyncpa [#allocation10], 1 }
0x125e   :  { %9620 = vsyncpa [#allocation12], 1 }
0x125f   :  { %9621 = vsyncpa [#allocation15], 1 }
0x1260   :  { %9622 = vsyncpa [#allocation18], 1 }

</bundles_post_ra>
